<compile_context>
chip_gen: v7x
topology: tpu7x:2x2x1
jax: 0.10.0
libtpu: 0.0.40
codegen_flags: <defaults>
</compile_context>

<pallas_src>
import functools
import math

import jax
import jax.numpy as jnp
from jax import lax
from jax.experimental import pallas as pl
from jax.experimental.pallas import tpu as pltpu

# ----------------------- small config (consistent with FDM) -----------------
FEATURE_DIM = 128       # lane-dense stand-in for feature_dim=512
N_HEAD = 4              # module default -> head_dim = 32
NUM_LAYERS = 2          # stands in for num_layers=8 (kept small for the demo)
AUDIO_IN = 768          # wav2vec feature dim, hard-coded in the module
NUM_STYLES = 10         # len('F2 F3 F4 M3 M4 M5 F1 F5 F6 M1'.split())
FFN_DIM = 2 * FEATURE_DIM
MAX_LEN = 5000
EPS = 1e-5              # torch LayerNorm default
NUM_OUT_TOKENS = 8      # feat_out[-8:]
VMEM_LIMIT = 32 * 1024 * 1024


# ----------------------------- in-kernel helpers ------------------------------
def _mm(a, w_ref):
    """bf16 MXU matmul with f32 accumulation. a: f32 value, w_ref: bf16 weight ref."""
    return jnp.dot(a.astype(jnp.bfloat16), w_ref[...],
                   preferred_element_type=jnp.float32)


def _mish(y):
    # mish(y) = y * tanh(softplus(y)).  Single-exp form:
    #   tanh(log(1+w)) = ((1+w)^2 - 1) / ((1+w)^2 + 1),  w = e^y (clamped).
    w = jnp.exp(jnp.minimum(y, 20.0))
    t = (1.0 + w) * (1.0 + w)
    return y * (t - 1.0) * pl.reciprocal(t + 1.0, approx=True)


def _layer_norm(y, g, b):
    mu = jnp.mean(y, axis=-1, keepdims=True)
    yc = y - mu
    var = jnp.mean(yc * yc, axis=-1, keepdims=True)
    return yc * lax.rsqrt(var + EPS) * g + b


# ----------------------------- Pallas kernels --------------------------------
def _embed_kernel(audio_ref, pe_t_ref,
                  aw1_ref, ab1_ref, aw2_ref, ab2_ref,
                  tw1_ref, tb1_ref, tw2_ref, tb2_ref,
                  af_ref, time_ref):
    # audio_extract: Linear(768, D) -> Mish -> Linear(D, D)
    a = _mish(_mm(audio_ref[...], aw1_ref) + ab1_ref[...])
    af_ref[...] = (_mm(a, aw2_ref) + ab2_ref[...]).astype(af_ref.dtype)

    # time_embedd: pe[t] -> Linear -> Mish -> Linear
    t = _mish(_mm(pe_t_ref[...], tw1_ref) + tb1_ref[...])
    time_ref[...] = (_mm(t, tw2_ref) + tb2_ref[...]).astype(time_ref.dtype)


def _encoder_stack_kernel(x_ref, wqkv_ref, wo_ref, ffw1_ref, ffw2_ref,
                          vecs_ref, ffb1_ref, dw1_ref, db1_ref, dw2_ref,
                          o_ref, act_ref, *, n_head, n_batch):
    """One grid step == one post-norm nn.TransformerEncoderLayer.

    act_ref (VMEM scratch) holds the (S*B, D) activation slab across all layers.
    At the last layer the motion_decoder is applied to the last 8 positions and
    written to o_ref (the only HBM output of the whole stack).
    """
    l = pl.program_id(0)

    @pl.when(l == 0)
    def _():
        act_ref[...] = x_ref[...]

    x = act_ref[...]                    # (SB, D) f32
    SB, D = x.shape
    S = SB // n_batch
    hd = D // n_head
    scale = 1.0 / math.sqrt(hd)

    # Packed tiny per-layer vectors (one DMA instead of 10+):
    vecs = vecs_ref[...]                # (16, D) f32
    bq, bk, bv = vecs[0:1], vecs[1:2], vecs[2:3]
    bo = vecs[3:4]
    ffb2 = vecs[4:5]
    ln1_g, ln1_b = vecs[5:6], vecs[6:7]
    ln2_g, ln2_b = vecs[7:8], vecs[8:9]

    # ---- packed QKV projection: (SB, D) @ (D, 3D) ----
    qkv = _mm(x, wqkv_ref)
    q = qkv[:, :D] + bq
    k = qkv[:, D:2 * D] + bk
    v = qkv[:, 2 * D:] + bv

    # Per-position multi-head attention.  The torch encoder (batch_first=True)
    # is fed (S, B, D), so attention mixes only over the original batch axis B
    # within each position s: compute just the (B, B) diagonal blocks (batched
    # over S), no mask needed.  Out-projection folded into the head loop
    # (lane-dense accumulation, no masked 32-lane stores).
    q3 = q.reshape(S, n_batch, D)
    k3 = k.reshape(S, n_batch, D)
    v3 = v.reshape(S, n_batch, D)
    acc = jnp.zeros((SB, D), jnp.float32)
    for h in range(n_head):
        sl = slice(h * hd, (h + 1) * hd)
        qh = (q3[:, :, sl] * scale).astype(jnp.bfloat16)        # (S, B, hd)
        kh = k3[:, :, sl].astype(jnp.bfloat16)
        vh = v3[:, :, sl].astype(jnp.bfloat16)
        s_blk = jnp.einsum('sbh,sch->sbc', qh, kh,
                           preferred_element_type=jnp.float32)  # (S, B, B)
        m = jnp.max(s_blk, axis=-1, keepdims=True)
        p = jnp.exp(s_blk - m)
        p = p * pl.reciprocal(jnp.sum(p, axis=-1, keepdims=True), approx=True)
        pv = jnp.einsum('sbc,sch->sbh', p.astype(jnp.bfloat16), vh,
                        preferred_element_type=jnp.float32)     # (S, B, hd)
        acc = acc + jnp.dot(pv.reshape(SB, hd).astype(jnp.bfloat16),
                            wo_ref[sl, :], preferred_element_type=jnp.float32)
    attn = acc + bo

    # add + LayerNorm 1 (post-norm layer, dropout = identity)
    x1 = _layer_norm(attn + x, ln1_g, ln1_b)

    # FFN (ReLU) + add + LayerNorm 2
    ff = jnp.maximum(_mm(x1, ffw1_ref) + ffb1_ref[...], 0.0)
    ff = _mm(ff, ffw2_ref) + ffb2
    y = _layer_norm(ff + x1, ln2_g, ln2_b)
    act_ref[...] = y

    # ---- fused motion_decoder on the last 8 positions (last layer only) ----
    @pl.when(l == pl.num_programs(0) - 1)
    def _():
        feat = y[SB - NUM_OUT_TOKENS * n_batch:, :]             # (8*B, D)
        h1 = _mish(_mm(feat, dw1_ref) + db1_ref[...])
        o_ref[...] = _mm(h1, dw2_ref).astype(o_ref.dtype)       # Linear(bias=False)


# ------------------------------ kernel wrappers --------------------------------
def run_embed(params, audio_flat, pe_t):
    bn = audio_flat.shape[0]
    b = pe_t.shape[0]
    out_shapes = (
        jax.ShapeDtypeStruct((bn, FEATURE_DIM), jnp.float32),
        jax.ShapeDtypeStruct((b, FEATURE_DIM), jnp.float32),
    )
    return pl.pallas_call(
        _embed_kernel, out_shape=out_shapes,
        compiler_params=pltpu.CompilerParams(vmem_limit_bytes=VMEM_LIMIT),
    )(audio_flat, pe_t,
      params["audio_w1"], params["audio_b1"], params["audio_w2"], params["audio_b2"],
      params["time_w1"], params["time_b1"], params["time_w2"], params["time_b2"])


def run_encoder_stack_and_decode(params, xf, n_batch):
    sb, d = xf.shape
    num_layers = params["enc_wqkv"].shape[0]
    out_rows = NUM_OUT_TOKENS * n_batch

    grid_spec = pltpu.PrefetchScalarGridSpec(
        num_scalar_prefetch=0,
        grid=(num_layers,),
        in_specs=[
            pl.BlockSpec((sb, d), lambda l: (0, 0)),                    # x (read @ l==0)
            pl.BlockSpec((None, d, 3 * d), lambda l: (l, 0, 0)),        # Wqkv[l]
            pl.BlockSpec((None, d, d), lambda l: (l, 0, 0)),            # Wo[l]
            pl.BlockSpec((None, d, FFN_DIM), lambda l: (l, 0, 0)),      # Wff1[l]
            pl.BlockSpec((None, FFN_DIM, d), lambda l: (l, 0, 0)),      # Wff2[l]
            pl.BlockSpec((None, 16, d), lambda l: (l, 0, 0)),           # packed vecs[l]
            pl.BlockSpec((None, 1, FFN_DIM), lambda l: (l, 0, 0)),      # ff bias1[l]
            pl.BlockSpec((d, d), lambda l: (0, 0)),                     # dec_w1
            pl.BlockSpec((1, d), lambda l: (0, 0)),                     # dec_b1
            pl.BlockSpec((d, d), lambda l: (0, 0)),                     # dec_w2
        ],
        out_specs=pl.BlockSpec((out_rows, d), lambda l: (0, 0)),
        scratch_shapes=[pltpu.VMEM((sb, d), jnp.float32)],
    )
    return pl.pallas_call(
        functools.partial(_encoder_stack_kernel, n_head=N_HEAD, n_batch=n_batch),
        out_shape=jax.ShapeDtypeStruct((out_rows, d), jnp.float32),
        grid_spec=grid_spec,
        compiler_params=pltpu.CompilerParams(
            dimension_semantics=("arbitrary",),   # sequential layer dependence
            vmem_limit_bytes=VMEM_LIMIT,
        ),
    )(xf, params["enc_wqkv"], params["enc_wo"], params["enc_ffw1"],
      params["enc_ffw2"], params["enc_vecs"], params["enc_ffb1"],
      params["dec_w1"], params["dec_b1"], params["dec_w2"])


# ----------------------------- parameters ------------------------------------
def make_positional_encoding(d_model, max_len=MAX_LEN):
    position = jnp.arange(max_len, dtype=jnp.float32)[:, None]
    div_term = jnp.exp(
        jnp.arange(0, d_model, 2, dtype=jnp.float32) * (-math.log(10000.0) / d_model)
    )
    pe = jnp.zeros((max_len, d_model), jnp.float32)
    pe = pe.at[:, 0::2].set(jnp.sin(position * div_term))
    pe = pe.at[:, 1::2].set(jnp.cos(position * div_term))
    return pe  # (max_len, d_model); torch buffer is (max_len, 1, d_model)


def init_params(key):
    keys = iter(jax.random.split(key, 256))

    def lin(in_d, out_d, bias=True):
        # MXU weights stored in bf16 (halves weight DMA); biases / LN params in f32.
        w = (jax.random.normal(next(keys), (in_d, out_d), jnp.float32) * 0.05
             ).astype(jnp.bfloat16)
        if bias:
            b = jax.random.normal(next(keys), (1, out_d), jnp.float32) * 0.05
        else:
            b = jnp.zeros((1, out_d), jnp.float32)
        return w, b

    p = {}
    p["audio_w1"], p["audio_b1"] = lin(AUDIO_IN, FEATURE_DIM)
    p["audio_w2"], p["audio_b2"] = lin(FEATURE_DIM, FEATURE_DIM)
    p["time_w1"], p["time_b1"] = lin(FEATURE_DIM, FEATURE_DIM)
    p["time_w2"], p["time_b2"] = lin(FEATURE_DIM, FEATURE_DIM)
    # style embedding handled in the wrapper (degenerate K=10 one-hot matmul)
    p["style_w"] = jax.random.normal(next(keys), (NUM_STYLES, FEATURE_DIM), jnp.float32) * 0.05
    p["style_b"] = jax.random.normal(next(keys), (1, FEATURE_DIM), jnp.float32) * 0.05
    p["dec_w1"], p["dec_b1"] = lin(FEATURE_DIM, FEATURE_DIM)
    p["dec_w2"], _ = lin(FEATURE_DIM, FEATURE_DIM, bias=False)

    wqkv_s, wo_s, ffw1_s, ffw2_s, vecs_s, ffb1_s = [], [], [], [], [], []
    for _ in range(NUM_LAYERS):
        # packed in_proj (Q|K|V) exactly like torch's nn.MultiheadAttention
        wqkv, bqkv = lin(FEATURE_DIM, 3 * FEATURE_DIM)
        wo, bo = lin(FEATURE_DIM, FEATURE_DIM)
        ffw1, ffb1 = lin(FEATURE_DIM, FFN_DIM)
        ffw2, ffb2 = lin(FFN_DIM, FEATURE_DIM)
        ln1_g = jnp.ones((1, FEATURE_DIM), jnp.float32)
        ln1_b = jnp.zeros((1, FEATURE_DIM), jnp.float32)
        ln2_g = jnp.ones((1, FEATURE_DIM), jnp.float32)
        ln2_b = jnp.zeros((1, FEATURE_DIM), jnp.float32)
        # pack all (1, D)-sized per-layer vectors into one (16, D) slab
        vecs = jnp.concatenate(
            [bqkv.reshape(3, FEATURE_DIM),        # rows 0..2: bq, bk, bv
             bo, ffb2,                            # rows 3, 4
             ln1_g, ln1_b, ln2_g, ln2_b,          # rows 5..8
             jnp.zeros((7, FEATURE_DIM), jnp.float32)],  # pad to 16 rows
            axis=0)
        wqkv_s.append(wqkv); wo_s.append(wo)
        ffw1_s.append(ffw1); ffw2_s.append(ffw2)
        vecs_s.append(vecs); ffb1_s.append(ffb1)

    p["enc_wqkv"] = jnp.stack(wqkv_s)             # (L, D, 3D) bf16
    p["enc_wo"] = jnp.stack(wo_s)                 # (L, D, D)  bf16
    p["enc_ffw1"] = jnp.stack(ffw1_s)             # (L, D, FFN) bf16
    p["enc_ffw2"] = jnp.stack(ffw2_s)             # (L, FFN, D) bf16
    p["enc_vecs"] = jnp.stack(vecs_s)             # (L, 16, D) f32
    p["enc_ffb1"] = jnp.stack(ffb1_s)             # (L, 1, FFN) f32
    p["pe"] = make_positional_encoding(FEATURE_DIM)
    return p


# ------------------------------ forward pass ----------------------------------
def fdm_forward(params, audio, t, vertice, past_motion, one_hot):
    B, N, A = audio.shape
    D = FEATURE_DIM
    pe = params["pe"]  # (max_len, D)

    # Fused embedding kernel: audio_extract + time_embedd.
    af, time_emb = run_embed(params, audio.reshape(B * N, A), pe[t])
    af = af.reshape(B, N, D)
    time_tok = time_emb[:, None, :]                               # (B, 1, D)

    # learnable_style_emb: tiny (1,10)@(10,D) — plain XLA glue, fused with the
    # concat/transpose below (removed from the kernel per review).
    style = jnp.dot(one_hot, params["style_w"]) + params["style_b"]   # (1, D)
    style_tok = jnp.broadcast_to(style[None, :, :], (B, 1, D))        # (B, 1, D)

    # motion = cat((past_motion, vertice), dim=2).transpose(1,2) -> (B, Lp+Lv, D)
    motion = jnp.concatenate([past_motion, vertice], axis=2).transpose(0, 2, 1)

    # tens_input: cat along token axis, then permute(1,0,2) -> (S, B, D)
    tens = jnp.concatenate([time_tok, af, style_tok, motion], axis=1)
    x = jnp.transpose(tens, (1, 0, 2))
    S = x.shape[0]

    # self.PE: add positional encoding along dim 0 (dropout = identity, eval mode)
    x = x + pe[:S][:, None, :]
    xf = x.reshape(S * B, D)            # flat token slab, row index = s*B + b

    # Fused transformer-encoder stack + motion_decoder (one gridded pallas_call).
    dec = run_encoder_stack_and_decode(params, xf, n_batch=B)     # (8*B, D)

    # rows are (position, batch)-major for the last 8 positions:
    # reshape -> (8, B, D); torch does [-8:].transpose(0,1) then .transpose(1,2).
    return dec.reshape(NUM_OUT_TOKENS, B, D).transpose(1, 2, 0)   # (B, D, 8)


# ----------------------------------- main --------------------------------------
if __name__ == "__main__":
    key = jax.random.PRNGKey(0)
    k_par, k_a, k_v, k_p, k_t = jax.random.split(key, 5)
    params = init_params(k_par)

    B, N = 2, 8
    Lv, Lp = 8, 4
    audio = jax.random.normal(k_a, (B, N, AUDIO_IN), jnp.float32)
    t = jax.random.randint(k_t, (B,), 0, 100)                      # diffusion steps
    vertice = jax.random.normal(k_v, (B, FEATURE_DIM, Lv), jnp.float32)
    past_motion = jax.random.normal(k_p, (B, FEATURE_DIM, Lp), jnp.float32)
    one_hot = jax.nn.one_hot(jnp.array([3]), NUM_STYLES, dtype=jnp.float32)  # (1, 10)

    out = jax.jit(fdm_forward)(params, audio, t, vertice, past_motion, one_hot)
    out = jax.block_until_ready(out)
    assert out.shape == (B, FEATURE_DIM, 8), out.shape
    assert bool(jnp.all(jnp.isfinite(out)))
    print("KERNEL_OK")
</pallas_src>

<mosaic_0001>
module attributes {stable_mosaic.version = 11 : i64} {
  func.func @_embed_kernel(%arg0: memref<16x768xf32, #tpu.memory_space<vmem>>, %arg1: memref<2x128xf32, #tpu.memory_space<vmem>>, %arg2: memref<768x128xbf16, #tpu.memory_space<vmem>>, %arg3: memref<1x128xf32, #tpu.memory_space<vmem>>, %arg4: memref<128x128xbf16, #tpu.memory_space<vmem>>, %arg5: memref<1x128xf32, #tpu.memory_space<vmem>>, %arg6: memref<128x128xbf16, #tpu.memory_space<vmem>>, %arg7: memref<1x128xf32, #tpu.memory_space<vmem>>, %arg8: memref<128x128xbf16, #tpu.memory_space<vmem>>, %arg9: memref<1x128xf32, #tpu.memory_space<vmem>>, %arg10: memref<16x128xf32, #tpu.memory_space<vmem>>, %arg11: memref<2x128xf32, #tpu.memory_space<vmem>>) attributes {dimension_semantics = [], scalar_prefetch = 0 : i64, scratch_operands = 0 : i64, tpu.core_type = #tpu.core_type<tc>} {
    %c0 = arith.constant 0 : index
    %c0_0 = arith.constant 0 : index
    %0 = vector.load %arg0[%c0, %c0_0] : memref<16x768xf32, #tpu.memory_space<vmem>>, vector<16x768xf32>
    %1 = arith.truncf %0 : vector<16x768xf32> to vector<16x768xbf16>
    %c0_1 = arith.constant 0 : index
    %c0_2 = arith.constant 0 : index
    %2 = vector.load %arg2[%c0_1, %c0_2] : memref<768x128xbf16, #tpu.memory_space<vmem>>, vector<768x128xbf16>
    %cst = arith.constant dense<0.000000e+00> : vector<16x128xf32>
    %3 = tpu.matmul %1, %2, %cst {dimension_numbers = #tpu.dot_dimension_numbers<[1], [0], [0], [1], [0, 0, 1, 1], [], []>} : vector<16x768xbf16>, vector<768x128xbf16>, vector<16x128xf32> -> vector<16x128xf32>
    %c0_3 = arith.constant 0 : index
    %c0_4 = arith.constant 0 : index
    %4 = vector.load %arg3[%c0_3, %c0_4] : memref<1x128xf32, #tpu.memory_space<vmem>>, vector<1x128xf32>
    %5 = vector.broadcast %4 : vector<1x128xf32> to vector<16x128xf32>
    %6 = arith.addf %3, %5 : vector<16x128xf32>
    %cst_5 = arith.constant 2.000000e+01 : f32
    %7 = vector.broadcast %cst_5 : f32 to vector<16x128xf32>
    %8 = arith.minimumf %6, %7 : vector<16x128xf32>
    %9 = math.exp %8 : vector<16x128xf32>
    %cst_6 = arith.constant 1.000000e+00 : f32
    %10 = vector.broadcast %cst_6 : f32 to vector<16x128xf32>
    %11 = arith.addf %10, %9 : vector<16x128xf32>
    %cst_7 = arith.constant 1.000000e+00 : f32
    %12 = vector.broadcast %cst_7 : f32 to vector<16x128xf32>
    %13 = arith.addf %12, %9 : vector<16x128xf32>
    %14 = arith.mulf %11, %13 : vector<16x128xf32>
    %cst_8 = arith.constant 1.000000e+00 : f32
    %15 = vector.broadcast %cst_8 : f32 to vector<16x128xf32>
    %16 = arith.subf %14, %15 : vector<16x128xf32>
    %17 = arith.mulf %6, %16 : vector<16x128xf32>
    %cst_9 = arith.constant 1.000000e+00 : f32
    %18 = vector.broadcast %cst_9 : f32 to vector<16x128xf32>
    %19 = arith.addf %14, %18 : vector<16x128xf32>
    %20 = tpu.reciprocal %19 {approx = true} : vector<16x128xf32> -> vector<16x128xf32>
    %21 = arith.mulf %17, %20 : vector<16x128xf32>
    %22 = arith.truncf %21 : vector<16x128xf32> to vector<16x128xbf16>
    %c0_10 = arith.constant 0 : index
    %c0_11 = arith.constant 0 : index
    %23 = vector.load %arg4[%c0_10, %c0_11] : memref<128x128xbf16, #tpu.memory_space<vmem>>, vector<128x128xbf16>
    %cst_12 = arith.constant dense<0.000000e+00> : vector<16x128xf32>
    %24 = tpu.matmul %22, %23, %cst_12 {dimension_numbers = #tpu.dot_dimension_numbers<[1], [0], [0], [1], [0, 0, 1, 1], [], []>} : vector<16x128xbf16>, vector<128x128xbf16>, vector<16x128xf32> -> vector<16x128xf32>
    %c0_13 = arith.constant 0 : index
    %c0_14 = arith.constant 0 : index
    %25 = vector.load %arg5[%c0_13, %c0_14] : memref<1x128xf32, #tpu.memory_space<vmem>>, vector<1x128xf32>
    %26 = vector.broadcast %25 : vector<1x128xf32> to vector<16x128xf32>
    %27 = arith.addf %24, %26 : vector<16x128xf32>
    %c0_15 = arith.constant 0 : index
    %c0_16 = arith.constant 0 : index
    %28 = vector.load %arg10[%c0_15, %c0_16] : memref<16x128xf32, #tpu.memory_space<vmem>>, vector<16x128xf32>
    tpu.vector_store %arg10[%c0_15, %c0_16], %27 {strides = array<i32>} : memref<16x128xf32, #tpu.memory_space<vmem>>, vector<16x128xf32>,
    %c0_17 = arith.constant 0 : index
    %c0_18 = arith.constant 0 : index
    %29 = vector.load %arg1[%c0_17, %c0_18] : memref<2x128xf32, #tpu.memory_space<vmem>>, vector<2x128xf32>
    %30 = arith.truncf %29 : vector<2x128xf32> to vector<2x128xbf16>
    %c0_19 = arith.constant 0 : index
    %c0_20 = arith.constant 0 : index
    %31 = vector.load %arg6[%c0_19, %c0_20] : memref<128x128xbf16, #tpu.memory_space<vmem>>, vector<128x128xbf16>
    %cst_21 = arith.constant dense<0.000000e+00> : vector<2x128xf32>
    %32 = tpu.matmul %30, %31, %cst_21 {dimension_numbers = #tpu.dot_dimension_numbers<[1], [0], [0], [1], [0, 0, 1, 1], [], []>} : vector<2x128xbf16>, vector<128x128xbf16>, vector<2x128xf32> -> vector<2x128xf32>
    %c0_22 = arith.constant 0 : index
    %c0_23 = arith.constant 0 : index
    %33 = vector.load %arg7[%c0_22, %c0_23] : memref<1x128xf32, #tpu.memory_space<vmem>>, vector<1x128xf32>
    %34 = vector.broadcast %33 : vector<1x128xf32> to vector<2x128xf32>
    %35 = arith.addf %32, %34 : vector<2x128xf32>
    %cst_24 = arith.constant 2.000000e+01 : f32
    %36 = vector.broadcast %cst_24 : f32 to vector<2x128xf32>
    %37 = arith.minimumf %35, %36 : vector<2x128xf32>
    %38 = math.exp %37 : vector<2x128xf32>
    %cst_25 = arith.constant 1.000000e+00 : f32
    %39 = vector.broadcast %cst_25 : f32 to vector<2x128xf32>
    %40 = arith.addf %39, %38 : vector<2x128xf32>
    %cst_26 = arith.constant 1.000000e+00 : f32
    %41 = vector.broadcast %cst_26 : f32 to vector<2x128xf32>
    %42 = arith.addf %41, %38 : vector<2x128xf32>
    %43 = arith.mulf %40, %42 : vector<2x128xf32>
    %cst_27 = arith.constant 1.000000e+00 : f32
    %44 = vector.broadcast %cst_27 : f32 to vector<2x128xf32>
    %45 = arith.subf %43, %44 : vector<2x128xf32>
    %46 = arith.mulf %35, %45 : vector<2x128xf32>
    %cst_28 = arith.constant 1.000000e+00 : f32
    %47 = vector.broadcast %cst_28 : f32 to vector<2x128xf32>
    %48 = arith.addf %43, %47 : vector<2x128xf32>
    %49 = tpu.reciprocal %48 {approx = true} : vector<2x128xf32> -> vector<2x128xf32>
    %50 = arith.mulf %46, %49 : vector<2x128xf32>
    %51 = arith.truncf %50 : vector<2x128xf32> to vector<2x128xbf16>
    %c0_29 = arith.constant 0 : index
    %c0_30 = arith.constant 0 : index
    %52 = vector.load %arg8[%c0_29, %c0_30] : memref<128x128xbf16, #tpu.memory_space<vmem>>, vector<128x128xbf16>
    %cst_31 = arith.constant dense<0.000000e+00> : vector<2x128xf32>
    %53 = tpu.matmul %51, %52, %cst_31 {dimension_numbers = #tpu.dot_dimension_numbers<[1], [0], [0], [1], [0, 0, 1, 1], [], []>} : vector<2x128xbf16>, vector<128x128xbf16>, vector<2x128xf32> -> vector<2x128xf32>
    %c0_32 = arith.constant 0 : index
    %c0_33 = arith.constant 0 : index
    %54 = vector.load %arg9[%c0_32, %c0_33] : memref<1x128xf32, #tpu.memory_space<vmem>>, vector<1x128xf32>
    %55 = vector.broadcast %54 : vector<1x128xf32> to vector<2x128xf32>
    %56 = arith.addf %53, %55 : vector<2x128xf32>
    %c0_34 = arith.constant 0 : index
    %c0_35 = arith.constant 0 : index
    %57 = vector.load %arg11[%c0_34, %c0_35] : memref<2x128xf32, #tpu.memory_space<vmem>>, vector<2x128xf32>
    tpu.vector_store %arg11[%c0_34, %c0_35], %56 {strides = array<i32>} : memref<2x128xf32, #tpu.memory_space<vmem>>, vector<2x128xf32>,
    return
  }
}

module attributes {stable_mosaic.version = 11 : i64} {
  func.func @_encoder_stack_kernel(%arg0: i32, %arg1: memref<44x128xf32, #tpu.memory_space<vmem>>, %arg2: memref<1x128x384xbf16, #tpu.memory_space<vmem>>, %arg3: memref<1x128x128xbf16, #tpu.memory_space<vmem>>, %arg4: memref<1x128x256xbf16, #tpu.memory_space<vmem>>, %arg5: memref<1x256x128xbf16, #tpu.memory_space<vmem>>, %arg6: memref<1x16x128xf32, #tpu.memory_space<vmem>>, %arg7: memref<1x1x256xf32, #tpu.memory_space<vmem>>, %arg8: memref<128x128xbf16, #tpu.memory_space<vmem>>, %arg9: memref<1x128xf32, #tpu.memory_space<vmem>>, %arg10: memref<128x128xbf16, #tpu.memory_space<vmem>>, %arg11: memref<16x128xf32, #tpu.memory_space<vmem>>, %arg12: memref<44x128xf32, #tpu.memory_space<vmem>>) attributes {dimension_semantics = [#tpu.dimension_semantics<arbitrary>], iteration_bounds = array<i64: 2>, scalar_prefetch = 0 : i64, scratch_operands = 1 : i64, tpu.core_type = #tpu.core_type<tc>, window_params = [{pipeline_mode = #tpu.pipeline_mode<synchronous>, transform_indices = @transform_0, window_bounds = array<i64: 44, 128>}, {transform_indices = @transform_1, window_bounds = array<i64: 1, 128, 384>}, {transform_indices = @transform_2, window_bounds = array<i64: 1, 128, 128>}, {transform_indices = @transform_3, window_bounds = array<i64: 1, 128, 256>}, {transform_indices = @transform_4, window_bounds = array<i64: 1, 256, 128>}, {transform_indices = @transform_5, window_bounds = array<i64: 1, 16, 128>}, {transform_indices = @transform_6, window_bounds = array<i64: 1, 1, 256>}, {pipeline_mode = #tpu.pipeline_mode<synchronous>, transform_indices = @transform_7, window_bounds = array<i64: 128, 128>}, {pipeline_mode = #tpu.pipeline_mode<synchronous>, transform_indices = @transform_8, window_bounds = array<i64: 1, 128>}, {pipeline_mode = #tpu.pipeline_mode<synchronous>, transform_indices = @transform_9, window_bounds = array<i64: 128, 128>}, {pipeline_mode = #tpu.pipeline_mode<synchronous>, transform_indices = @transform_10, window_bounds = array<i64: 16, 128>}]} {
    %c0_i32 = arith.constant 0 : i32
    %0 = arith.cmpi eq, %arg0, %c0_i32 : i32
    %1 = arith.extui %0 : i1 to i32
    %c0_i32_0 = arith.constant 0 : i32
    %2 = arith.cmpi ne, %1, %c0_i32_0 : i32
    scf.if %2 {
      %c0_67 = arith.constant 0 : index
      %c0_68 = arith.constant 0 : index
      %204 = vector.load %arg1[%c0_67, %c0_68] : memref<44x128xf32, #tpu.memory_space<vmem>>, vector<44x128xf32>
      %c0_69 = arith.constant 0 : index
      %c0_70 = arith.constant 0 : index
      %205 = vector.load %arg12[%c0_69, %c0_70] : memref<44x128xf32, #tpu.memory_space<vmem>>, vector<44x128xf32>
      tpu.vector_store %arg12[%c0_69, %c0_70], %204 {strides = array<i32>} : memref<44x128xf32, #tpu.memory_space<vmem>>, vector<44x128xf32>,
    } else {
    }
    %c0 = arith.constant 0 : index
    %c0_1 = arith.constant 0 : index
    %3 = vector.load %arg12[%c0, %c0_1] : memref<44x128xf32, #tpu.memory_space<vmem>>, vector<44x128xf32>
    %c0_2 = arith.constant 0 : index
    %c0_3 = arith.constant 0 : index
    %c0_4 = arith.constant 0 : index
    %4 = vector.load %arg6[%c0_2, %c0_3, %c0_4] : memref<1x16x128xf32, #tpu.memory_space<vmem>>, vector<1x16x128xf32>
    %5 = vector.shape_cast %4 : vector<1x16x128xf32> to vector<16x128xf32>
    %6 = vector.extract_strided_slice %5 {offsets = [0, 0], sizes = [1, 128], strides = [1, 1]} : vector<16x128xf32> to vector<1x128xf32>
    %7 = vector.extract_strided_slice %5 {offsets = [1, 0], sizes = [1, 128], strides = [1, 1]} : vector<16x128xf32> to vector<1x128xf32>
    %8 = vector.extract_strided_slice %5 {offsets = [2, 0], sizes = [1, 128], strides = [1, 1]} : vector<16x128xf32> to vector<1x128xf32>
    %9 = vector.extract_strided_slice %5 {offsets = [3, 0], sizes = [1, 128], strides = [1, 1]} : vector<16x128xf32> to vector<1x128xf32>
    %10 = vector.extract_strided_slice %5 {offsets = [4, 0], sizes = [1, 128], strides = [1, 1]} : vector<16x128xf32> to vector<1x128xf32>
    %11 = vector.extract_strided_slice %5 {offsets = [5, 0], sizes = [1, 128], strides = [1, 1]} : vector<16x128xf32> to vector<1x128xf32>
    %12 = vector.extract_strided_slice %5 {offsets = [6, 0], sizes = [1, 128], strides = [1, 1]} : vector<16x128xf32> to vector<1x128xf32>
    %13 = vector.extract_strided_slice %5 {offsets = [7, 0], sizes = [1, 128], strides = [1, 1]} : vector<16x128xf32> to vector<1x128xf32>
    %14 = vector.extract_strided_slice %5 {offsets = [8, 0], sizes = [1, 128], strides = [1, 1]} : vector<16x128xf32> to vector<1x128xf32>
    %15 = arith.truncf %3 : vector<44x128xf32> to vector<44x128xbf16>
    %c0_5 = arith.constant 0 : index
    %c0_6 = arith.constant 0 : index
    %c0_7 = arith.constant 0 : index
    %16 = vector.load %arg2[%c0_5, %c0_6, %c0_7] : memref<1x128x384xbf16, #tpu.memory_space<vmem>>, vector<1x128x384xbf16>
    %17 = vector.shape_cast %16 : vector<1x128x384xbf16> to vector<128x384xbf16>
    %cst = arith.constant dense<0.000000e+00> : vector<44x384xf32>
    %18 = tpu.matmul %15, %17, %cst {dimension_numbers = #tpu.dot_dimension_numbers<[1], [0], [0], [1], [0, 0, 1, 1], [], []>} : vector<44x128xbf16>, vector<128x384xbf16>, vector<44x384xf32> -> vector<44x384xf32>
    %19 = vector.extract_strided_slice %18 {offsets = [0, 0], sizes = [44, 128], strides = [1, 1]} : vector<44x384xf32> to vector<44x128xf32>
    %20 = vector.broadcast %6 : vector<1x128xf32> to vector<44x128xf32>
    %21 = arith.addf %19, %20 : vector<44x128xf32>
    %22 = vector.extract_strided_slice %18 {offsets = [0, 128], sizes = [44, 128], strides = [1, 1]} : vector<44x384xf32> to vector<44x128xf32>
    %23 = vector.broadcast %7 : vector<1x128xf32> to vector<44x128xf32>
    %24 = arith.addf %22, %23 : vector<44x128xf32>
    %25 = vector.extract_strided_slice %18 {offsets = [0, 256], sizes = [44, 128], strides = [1, 1]} : vector<44x384xf32> to vector<44x128xf32>
    %26 = vector.broadcast %8 : vector<1x128xf32> to vector<44x128xf32>
    %27 = arith.addf %25, %26 : vector<44x128xf32>
    %28 = vector.shape_cast %21 : vector<44x128xf32> to vector<22x2x128xf32>
    %29 = vector.shape_cast %24 : vector<44x128xf32> to vector<22x2x128xf32>
    %30 = vector.shape_cast %27 : vector<44x128xf32> to vector<22x2x128xf32>
    %cst_8 = arith.constant 0.000000e+00 : f32
    %31 = vector.broadcast %cst_8 : f32 to vector<44x128xf32>
    %32 = vector.extract_strided_slice %28 {offsets = [0, 0, 0], sizes = [22, 2, 32], strides = [1, 1, 1]} : vector<22x2x128xf32> to vector<22x2x32xf32>
    %cst_9 = arith.constant 0.176776692 : f32
    %33 = vector.broadcast %cst_9 : f32 to vector<22x2x32xf32>
    %34 = arith.mulf %32, %33 : vector<22x2x32xf32>
    %35 = arith.truncf %34 : vector<22x2x32xf32> to vector<22x2x32xbf16>
    %36 = vector.extract_strided_slice %29 {offsets = [0, 0, 0], sizes = [22, 2, 32], strides = [1, 1, 1]} : vector<22x2x128xf32> to vector<22x2x32xf32>
    %37 = arith.truncf %36 : vector<22x2x32xf32> to vector<22x2x32xbf16>
    %38 = vector.extract_strided_slice %30 {offsets = [0, 0, 0], sizes = [22, 2, 32], strides = [1, 1, 1]} : vector<22x2x128xf32> to vector<22x2x32xf32>
    %39 = arith.truncf %38 : vector<22x2x32xf32> to vector<22x2x32xbf16>
    "tpu.trace_start"() <{level = 10 : i32, message = "sbh,sch->sbc"}> : () -> ()
    %cst_10 = arith.constant dense<0.000000e+00> : vector<22x2x2xf32>
    %40 = tpu.matmul %35, %37, %cst_10 {dimension_numbers = #tpu.dot_dimension_numbers<[2], [2], [1], [1], [0, 0, 0, 1, 1, 1], [0], [0]>} : vector<22x2x32xbf16>, vector<22x2x32xbf16>, vector<22x2x2xf32> -> vector<22x2x2xf32>
    "tpu.trace_stop"() : () -> ()
    %cst_11 = arith.constant dense<0xFF800000> : vector<22x2xf32>
    %41 = vector.multi_reduction <maximumf>, %40, %cst_11 [2] : vector<22x2x2xf32> to vector<22x2xf32>
    %42 = vector.shape_cast %41 : vector<22x2xf32> to vector<22x2x1xf32>
    %43 = vector.broadcast %42 : vector<22x2x1xf32> to vector<22x2x2xf32>
    %44 = arith.subf %40, %43 : vector<22x2x2xf32>
    %45 = math.exp %44 : vector<22x2x2xf32>
    %cst_12 = arith.constant dense<0.000000e+00> : vector<22x2xf32>
    %46 = vector.multi_reduction <add>, %45, %cst_12 [2] : vector<22x2x2xf32> to vector<22x2xf32>
    %47 = vector.shape_cast %46 : vector<22x2xf32> to vector<22x2x1xf32>
    %48 = tpu.reciprocal %47 {approx = true} : vector<22x2x1xf32> -> vector<22x2x1xf32>
    %49 = vector.broadcast %48 : vector<22x2x1xf32> to vector<22x2x2xf32>
    %50 = arith.mulf %45, %49 : vector<22x2x2xf32>
    %51 = arith.truncf %50 : vector<22x2x2xf32> to vector<22x2x2xbf16>
    "tpu.trace_start"() <{level = 10 : i32, message = "sbc,sch->sbh"}> : () -> ()
    %cst_13 = arith.constant dense<0.000000e+00> : vector<22x2x32xf32>
    %52 = tpu.matmul %51, %39, %cst_13 {dimension_numbers = #tpu.dot_dimension_numbers<[2], [1], [1], [2], [0, 0, 0, 1, 1, 2], [0], [0]>} : vector<22x2x2xbf16>, vector<22x2x32xbf16>, vector<22x2x32xf32> -> vector<22x2x32xf32>
    "tpu.trace_stop"() : () -> ()
    %53 = vector.shape_cast %52 : vector<22x2x32xf32> to vector<44x32xf32>
    %54 = arith.truncf %53 : vector<44x32xf32> to vector<44x32xbf16>
    %c0_14 = arith.constant 0 : index
    %c0_15 = arith.constant 0 : index
    %c0_16 = arith.constant 0 : index
    %55 = vector.load %arg3[%c0_14, %c0_15, %c0_16] : memref<1x128x128xbf16, #tpu.memory_space<vmem>>, vector<1x32x128xbf16>
    %56 = vector.shape_cast %55 : vector<1x32x128xbf16> to vector<32x128xbf16>
    %cst_17 = arith.constant dense<0.000000e+00> : vector<44x128xf32>
    %57 = tpu.matmul %54, %56, %cst_17 {dimension_numbers = #tpu.dot_dimension_numbers<[1], [0], [0], [1], [0, 0, 1, 1], [], []>} : vector<44x32xbf16>, vector<32x128xbf16>, vector<44x128xf32> -> vector<44x128xf32>
    %58 = arith.addf %31, %57 : vector<44x128xf32>
    %59 = vector.extract_strided_slice %28 {offsets = [0, 0, 32], sizes = [22, 2, 32], strides = [1, 1, 1]} : vector<22x2x128xf32> to vector<22x2x32xf32>
    %cst_18 = arith.constant 0.176776692 : f32
    %60 = vector.broadcast %cst_18 : f32 to vector<22x2x32xf32>
    %61 = arith.mulf %59, %60 : vector<22x2x32xf32>
    %62 = arith.truncf %61 : vector<22x2x32xf32> to vector<22x2x32xbf16>
    %63 = vector.extract_strided_slice %29 {offsets = [0, 0, 32], sizes = [22, 2, 32], strides = [1, 1, 1]} : vector<22x2x128xf32> to vector<22x2x32xf32>
    %64 = arith.truncf %63 : vector<22x2x32xf32> to vector<22x2x32xbf16>
    %65 = vector.extract_strided_slice %30 {offsets = [0, 0, 32], sizes = [22, 2, 32], strides = [1, 1, 1]} : vector<22x2x128xf32> to vector<22x2x32xf32>
    %66 = arith.truncf %65 : vector<22x2x32xf32> to vector<22x2x32xbf16>
    "tpu.trace_start"() <{level = 10 : i32, message = "sbh,sch->sbc"}> : () -> ()
    %cst_19 = arith.constant dense<0.000000e+00> : vector<22x2x2xf32>
    %67 = tpu.matmul %62, %64, %cst_19 {dimension_numbers = #tpu.dot_dimension_numbers<[2], [2], [1], [1], [0, 0, 0, 1, 1, 1], [0], [0]>} : vector<22x2x32xbf16>, vector<22x2x32xbf16>, vector<22x2x2xf32> -> vector<22x2x2xf32>
    "tpu.trace_stop"() : () -> ()
    %cst_20 = arith.constant dense<0xFF800000> : vector<22x2xf32>
    %68 = vector.multi_reduction <maximumf>, %67, %cst_20 [2] : vector<22x2x2xf32> to vector<22x2xf32>
    %69 = vector.shape_cast %68 : vector<22x2xf32> to vector<22x2x1xf32>
    %70 = vector.broadcast %69 : vector<22x2x1xf32> to vector<22x2x2xf32>
    %71 = arith.subf %67, %70 : vector<22x2x2xf32>
    %72 = math.exp %71 : vector<22x2x2xf32>
    %cst_21 = arith.constant dense<0.000000e+00> : vector<22x2xf32>
    %73 = vector.multi_reduction <add>, %72, %cst_21 [2] : vector<22x2x2xf32> to vector<22x2xf32>
    %74 = vector.shape_cast %73 : vector<22x2xf32> to vector<22x2x1xf32>
    %75 = tpu.reciprocal %74 {approx = true} : vector<22x2x1xf32> -> vector<22x2x1xf32>
    %76 = vector.broadcast %75 : vector<22x2x1xf32> to vector<22x2x2xf32>
    %77 = arith.mulf %72, %76 : vector<22x2x2xf32>
    %78 = arith.truncf %77 : vector<22x2x2xf32> to vector<22x2x2xbf16>
    "tpu.trace_start"() <{level = 10 : i32, message = "sbc,sch->sbh"}> : () -> ()
    %cst_22 = arith.constant dense<0.000000e+00> : vector<22x2x32xf32>
    %79 = tpu.matmul %78, %66, %cst_22 {dimension_numbers = #tpu.dot_dimension_numbers<[2], [1], [1], [2], [0, 0, 0, 1, 1, 2], [0], [0]>} : vector<22x2x2xbf16>, vector<22x2x32xbf16>, vector<22x2x32xf32> -> vector<22x2x32xf32>
    "tpu.trace_stop"() : () -> ()
    %80 = vector.shape_cast %79 : vector<22x2x32xf32> to vector<44x32xf32>
    %81 = arith.truncf %80 : vector<44x32xf32> to vector<44x32xbf16>
    %c0_23 = arith.constant 0 : index
    %c32 = arith.constant 32 : index
    %c0_24 = arith.constant 0 : index
    %82 = vector.load %arg3[%c0_23, %c32, %c0_24] : memref<1x128x128xbf16, #tpu.memory_space<vmem>>, vector<1x32x128xbf16>
    %83 = vector.shape_cast %82 : vector<1x32x128xbf16> to vector<32x128xbf16>
    %cst_25 = arith.constant dense<0.000000e+00> : vector<44x128xf32>
    %84 = tpu.matmul %81, %83, %cst_25 {dimension_numbers = #tpu.dot_dimension_numbers<[1], [0], [0], [1], [0, 0, 1, 1], [], []>} : vector<44x32xbf16>, vector<32x128xbf16>, vector<44x128xf32> -> vector<44x128xf32>
    %85 = arith.addf %58, %84 : vector<44x128xf32>
    %86 = vector.extract_strided_slice %28 {offsets = [0, 0, 64], sizes = [22, 2, 32], strides = [1, 1, 1]} : vector<22x2x128xf32> to vector<22x2x32xf32>
    %cst_26 = arith.constant 0.176776692 : f32
    %87 = vector.broadcast %cst_26 : f32 to vector<22x2x32xf32>
    %88 = arith.mulf %86, %87 : vector<22x2x32xf32>
    %89 = arith.truncf %88 : vector<22x2x32xf32> to vector<22x2x32xbf16>
    %90 = vector.extract_strided_slice %29 {offsets = [0, 0, 64], sizes = [22, 2, 32], strides = [1, 1, 1]} : vector<22x2x128xf32> to vector<22x2x32xf32>
    %91 = arith.truncf %90 : vector<22x2x32xf32> to vector<22x2x32xbf16>
    %92 = vector.extract_strided_slice %30 {offsets = [0, 0, 64], sizes = [22, 2, 32], strides = [1, 1, 1]} : vector<22x2x128xf32> to vector<22x2x32xf32>
    %93 = arith.truncf %92 : vector<22x2x32xf32> to vector<22x2x32xbf16>
    "tpu.trace_start"() <{level = 10 : i32, message = "sbh,sch->sbc"}> : () -> ()
    %cst_27 = arith.constant dense<0.000000e+00> : vector<22x2x2xf32>
    %94 = tpu.matmul %89, %91, %cst_27 {dimension_numbers = #tpu.dot_dimension_numbers<[2], [2], [1], [1], [0, 0, 0, 1, 1, 1], [0], [0]>} : vector<22x2x32xbf16>, vector<22x2x32xbf16>, vector<22x2x2xf32> -> vector<22x2x2xf32>
    "tpu.trace_stop"() : () -> ()
    %cst_28 = arith.constant dense<0xFF800000> : vector<22x2xf32>
    %95 = vector.multi_reduction <maximumf>, %94, %cst_28 [2] : vector<22x2x2xf32> to vector<22x2xf32>
    %96 = vector.shape_cast %95 : vector<22x2xf32> to vector<22x2x1xf32>
    %97 = vector.broadcast %96 : vector<22x2x1xf32> to vector<22x2x2xf32>
    %98 = arith.subf %94, %97 : vector<22x2x2xf32>
    %99 = math.exp %98 : vector<22x2x2xf32>
    %cst_29 = arith.constant dense<0.000000e+00> : vector<22x2xf32>
    %100 = vector.multi_reduction <add>, %99, %cst_29 [2] : vector<22x2x2xf32> to vector<22x2xf32>
    %101 = vector.shape_cast %100 : vector<22x2xf32> to vector<22x2x1xf32>
    %102 = tpu.reciprocal %101 {approx = true} : vector<22x2x1xf32> -> vector<22x2x1xf32>
    %103 = vector.broadcast %102 : vector<22x2x1xf32> to vector<22x2x2xf32>
    %104 = arith.mulf %99, %103 : vector<22x2x2xf32>
    %105 = arith.truncf %104 : vector<22x2x2xf32> to vector<22x2x2xbf16>
    "tpu.trace_start"() <{level = 10 : i32, message = "sbc,sch->sbh"}> : () -> ()
    %cst_30 = arith.constant dense<0.000000e+00> : vector<22x2x32xf32>
    %106 = tpu.matmul %105, %93, %cst_30 {dimension_numbers = #tpu.dot_dimension_numbers<[2], [1], [1], [2], [0, 0, 0, 1, 1, 2], [0], [0]>} : vector<22x2x2xbf16>, vector<22x2x32xbf16>, vector<22x2x32xf32> -> vector<22x2x32xf32>
    "tpu.trace_stop"() : () -> ()
    %107 = vector.shape_cast %106 : vector<22x2x32xf32> to vector<44x32xf32>
    %108 = arith.truncf %107 : vector<44x32xf32> to vector<44x32xbf16>
    %c0_31 = arith.constant 0 : index
    %c64 = arith.constant 64 : index
    %c0_32 = arith.constant 0 : index
    %109 = vector.load %arg3[%c0_31, %c64, %c0_32] : memref<1x128x128xbf16, #tpu.memory_space<vmem>>, vector<1x32x128xbf16>
    %110 = vector.shape_cast %109 : vector<1x32x128xbf16> to vector<32x128xbf16>
    %cst_33 = arith.constant dense<0.000000e+00> : vector<44x128xf32>
    %111 = tpu.matmul %108, %110, %cst_33 {dimension_numbers = #tpu.dot_dimension_numbers<[1], [0], [0], [1], [0, 0, 1, 1], [], []>} : vector<44x32xbf16>, vector<32x128xbf16>, vector<44x128xf32> -> vector<44x128xf32>
    %112 = arith.addf %85, %111 : vector<44x128xf32>
    %113 = vector.extract_strided_slice %28 {offsets = [0, 0, 96], sizes = [22, 2, 32], strides = [1, 1, 1]} : vector<22x2x128xf32> to vector<22x2x32xf32>
    %cst_34 = arith.constant 0.176776692 : f32
    %114 = vector.broadcast %cst_34 : f32 to vector<22x2x32xf32>
    %115 = arith.mulf %113, %114 : vector<22x2x32xf32>
    %116 = arith.truncf %115 : vector<22x2x32xf32> to vector<22x2x32xbf16>
    %117 = vector.extract_strided_slice %29 {offsets = [0, 0, 96], sizes = [22, 2, 32], strides = [1, 1, 1]} : vector<22x2x128xf32> to vector<22x2x32xf32>
    %118 = arith.truncf %117 : vector<22x2x32xf32> to vector<22x2x32xbf16>
    %119 = vector.extract_strided_slice %30 {offsets = [0, 0, 96], sizes = [22, 2, 32], strides = [1, 1, 1]} : vector<22x2x128xf32> to vector<22x2x32xf32>
    %120 = arith.truncf %119 : vector<22x2x32xf32> to vector<22x2x32xbf16>
    "tpu.trace_start"() <{level = 10 : i32, message = "sbh,sch->sbc"}> : () -> ()
    %cst_35 = arith.constant dense<0.000000e+00> : vector<22x2x2xf32>
    %121 = tpu.matmul %116, %118, %cst_35 {dimension_numbers = #tpu.dot_dimension_numbers<[2], [2], [1], [1], [0, 0, 0, 1, 1, 1], [0], [0]>} : vector<22x2x32xbf16>, vector<22x2x32xbf16>, vector<22x2x2xf32> -> vector<22x2x2xf32>
    "tpu.trace_stop"() : () -> ()
    %cst_36 = arith.constant dense<0xFF800000> : vector<22x2xf32>
    %122 = vector.multi_reduction <maximumf>, %121, %cst_36 [2] : vector<22x2x2xf32> to vector<22x2xf32>
    %123 = vector.shape_cast %122 : vector<22x2xf32> to vector<22x2x1xf32>
    %124 = vector.broadcast %123 : vector<22x2x1xf32> to vector<22x2x2xf32>
    %125 = arith.subf %121, %124 : vector<22x2x2xf32>
    %126 = math.exp %125 : vector<22x2x2xf32>
    %cst_37 = arith.constant dense<0.000000e+00> : vector<22x2xf32>
    %127 = vector.multi_reduction <add>, %126, %cst_37 [2] : vector<22x2x2xf32> to vector<22x2xf32>
    %128 = vector.shape_cast %127 : vector<22x2xf32> to vector<22x2x1xf32>
    %129 = tpu.reciprocal %128 {approx = true} : vector<22x2x1xf32> -> vector<22x2x1xf32>
    %130 = vector.broadcast %129 : vector<22x2x1xf32> to vector<22x2x2xf32>
    %131 = arith.mulf %126, %130 : vector<22x2x2xf32>
    %132 = arith.truncf %131 : vector<22x2x2xf32> to vector<22x2x2xbf16>
    "tpu.trace_start"() <{level = 10 : i32, message = "sbc,sch->sbh"}> : () -> ()
    %cst_38 = arith.constant dense<0.000000e+00> : vector<22x2x32xf32>
    %133 = tpu.matmul %132, %120, %cst_38 {dimension_numbers = #tpu.dot_dimension_numbers<[2], [1], [1], [2], [0, 0, 0, 1, 1, 2], [0], [0]>} : vector<22x2x2xbf16>, vector<22x2x32xbf16>, vector<22x2x32xf32> -> vector<22x2x32xf32>
    "tpu.trace_stop"() : () -> ()
    %134 = vector.shape_cast %133 : vector<22x2x32xf32> to vector<44x32xf32>
    %135 = arith.truncf %134 : vector<44x32xf32> to vector<44x32xbf16>
    %c0_39 = arith.constant 0 : index
    %c96 = arith.constant 96 : index
    %c0_40 = arith.constant 0 : index
    %136 = vector.load %arg3[%c0_39, %c96, %c0_40] : memref<1x128x128xbf16, #tpu.memory_space<vmem>>, vector<1x32x128xbf16>
    %137 = vector.shape_cast %136 : vector<1x32x128xbf16> to vector<32x128xbf16>
    %cst_41 = arith.constant dense<0.000000e+00> : vector<44x128xf32>
    %138 = tpu.matmul %135, %137, %cst_41 {dimension_numbers = #tpu.dot_dimension_numbers<[1], [0], [0], [1], [0, 0, 1, 1], [], []>} : vector<44x32xbf16>, vector<32x128xbf16>, vector<44x128xf32> -> vector<44x128xf32>
    %139 = arith.addf %112, %138 : vector<44x128xf32>
    %140 = vector.broadcast %9 : vector<1x128xf32> to vector<44x128xf32>
    %141 = arith.addf %139, %140 : vector<44x128xf32>
    %142 = arith.addf %141, %3 : vector<44x128xf32>
    %cst_42 = arith.constant dense<0.000000e+00> : vector<44xf32>
    %143 = vector.multi_reduction <add>, %142, %cst_42 [1] : vector<44x128xf32> to vector<44xf32>
    %144 = vector.shape_cast %143 : vector<44xf32> to vector<44x1xf32>
    %cst_43 = arith.constant 1.280000e+02 : f32
    %145 = vector.broadcast %cst_43 : f32 to vector<44x1xf32>
    %146 = arith.divf %144, %145 : vector<44x1xf32>
    %147 = vector.broadcast %146 : vector<44x1xf32> to vector<44x128xf32>
    %148 = arith.subf %142, %147 : vector<44x128xf32>
    %149 = arith.mulf %148, %148 : vector<44x128xf32>
    %cst_44 = arith.constant dense<0.000000e+00> : vector<44xf32>
    %150 = vector.multi_reduction <add>, %149, %cst_44 [1] : vector<44x128xf32> to vector<44xf32>
    %151 = vector.shape_cast %150 : vector<44xf32> to vector<44x1xf32>
    %cst_45 = arith.constant 1.280000e+02 : f32
    %152 = vector.broadcast %cst_45 : f32 to vector<44x1xf32>
    %153 = arith.divf %151, %152 : vector<44x1xf32>
    %cst_46 = arith.constant 9.99999974E-6 : f32
    %154 = vector.broadcast %cst_46 : f32 to vector<44x1xf32>
    %155 = arith.addf %153, %154 : vector<44x1xf32>
    %156 = math.rsqrt %155 : vector<44x1xf32>
    %157 = vector.broadcast %156 : vector<44x1xf32> to vector<44x128xf32>
    %158 = arith.mulf %148, %157 : vector<44x128xf32>
    %159 = vector.broadcast %11 : vector<1x128xf32> to vector<44x128xf32>
    %160 = arith.mulf %158, %159 : vector<44x128xf32>
    %161 = vector.broadcast %12 : vector<1x128xf32> to vector<44x128xf32>
    %162 = arith.addf %160, %161 : vector<44x128xf32>
    %163 = arith.truncf %162 : vector<44x128xf32> to vector<44x128xbf16>
    %c0_47 = arith.constant 0 : index
    %c0_48 = arith.constant 0 : index
    %c0_49 = arith.constant 0 : index
    %164 = vector.load %arg4[%c0_47, %c0_48, %c0_49] : memref<1x128x256xbf16, #tpu.memory_space<vmem>>, vector<1x128x256xbf16>
    %165 = vector.shape_cast %164 : vector<1x128x256xbf16> to vector<128x256xbf16>
    %cst_50 = arith.constant dense<0.000000e+00> : vector<44x256xf32>
    %166 = tpu.matmul %163, %165, %cst_50 {dimension_numbers = #tpu.dot_dimension_numbers<[1], [0], [0], [1], [0, 0, 1, 1], [], []>} : vector<44x128xbf16>, vector<128x256xbf16>, vector<44x256xf32> -> vector<44x256xf32>
    %c0_51 = arith.constant 0 : index
    %c0_52 = arith.constant 0 : index
    %c0_53 = arith.constant 0 : index
    %167 = vector.load %arg7[%c0_51, %c0_52, %c0_53] : memref<1x1x256xf32, #tpu.memory_space<vmem>>, vector<1x1x256xf32>
    %168 = vector.shape_cast %167 : vector<1x1x256xf32> to vector<1x256xf32>
    %169 = vector.broadcast %168 : vector<1x256xf32> to vector<44x256xf32>
    %170 = arith.addf %166, %169 : vector<44x256xf32>
    %cst_54 = arith.constant 0.000000e+00 : f32
    %171 = vector.broadcast %cst_54 : f32 to vector<44x256xf32>
    %172 = arith.maximumf %170, %171 : vector<44x256xf32>
    %173 = arith.truncf %172 : vector<44x256xf32> to vector<44x256xbf16>
    %c0_55 = arith.constant 0 : index
    %c0_56 = arith.constant 0 : index
    %c0_57 = arith.constant 0 : index
    %174 = vector.load %arg5[%c0_55, %c0_56, %c0_57] : memref<1x256x128xbf16, #tpu.memory_space<vmem>>, vector<1x256x128xbf16>
    %175 = vector.shape_cast %174 : vector<1x256x128xbf16> to vector<256x128xbf16>
    %cst_58 = arith.constant dense<0.000000e+00> : vector<44x128xf32>
    %176 = tpu.matmul %173, %175, %cst_58 {dimension_numbers = #tpu.dot_dimension_numbers<[1], [0], [0], [1], [0, 0, 1, 1], [], []>} : vector<44x256xbf16>, vector<256x128xbf16>, vector<44x128xf32> -> vector<44x128xf32>
    %177 = vector.broadcast %10 : vector<1x128xf32> to vector<44x128xf32>
    %178 = arith.addf %176, %177 : vector<44x128xf32>
    %179 = arith.addf %178, %162 : vector<44x128xf32>
    %cst_59 = arith.constant dense<0.000000e+00> : vector<44xf32>
    %180 = vector.multi_reduction <add>, %179, %cst_59 [1] : vector<44x128xf32> to vector<44xf32>
    %181 = vector.shape_cast %180 : vector<44xf32> to vector<44x1xf32>
    %cst_60 = arith.constant 1.280000e+02 : f32
    %182 = vector.broadcast %cst_60 : f32 to vector<44x1xf32>
    %183 = arith.divf %181, %182 : vector<44x1xf32>
    %184 = vector.broadcast %183 : vector<44x1xf32> to vector<44x128xf32>
    %185 = arith.subf %179, %184 : vector<44x128xf32>
    %186 = arith.mulf %185, %185 : vector<44x128xf32>
    %cst_61 = arith.constant dense<0.000000e+00> : vector<44xf32>
    %187 = vector.multi_reduction <add>, %186, %cst_61 [1] : vector<44x128xf32> to vector<44xf32>
    %188 = vector.shape_cast %187 : vector<44xf32> to vector<44x1xf32>
    %cst_62 = arith.constant 1.280000e+02 : f32
    %189 = vector.broadcast %cst_62 : f32 to vector<44x1xf32>
    %190 = arith.divf %188, %189 : vector<44x1xf32>
    %cst_63 = arith.constant 9.99999974E-6 : f32
    %191 = vector.broadcast %cst_63 : f32 to vector<44x1xf32>
    %192 = arith.addf %190, %191 : vector<44x1xf32>
    %193 = math.rsqrt %192 : vector<44x1xf32>
    %194 = vector.broadcast %193 : vector<44x1xf32> to vector<44x128xf32>
    %195 = arith.mulf %185, %194 : vector<44x128xf32>
    %196 = vector.broadcast %13 : vector<1x128xf32> to vector<44x128xf32>
    %197 = arith.mulf %195, %196 : vector<44x128xf32>
    %198 = vector.broadcast %14 : vector<1x128xf32> to vector<44x128xf32>
    %199 = arith.addf %197, %198 : vector<44x128xf32>
    %c0_64 = arith.constant 0 : index
    %c0_65 = arith.constant 0 : index
    %200 = vector.load %arg12[%c0_64, %c0_65] : memref<44x128xf32, #tpu.memory_space<vmem>>, vector<44x128xf32>
    tpu.vector_store %arg12[%c0_64, %c0_65], %199 {strides = array<i32>} : memref<44x128xf32, #tpu.memory_space<vmem>>, vector<44x128xf32>,
    %c1_i32 = arith.constant 1 : i32
    %201 = arith.cmpi eq, %arg0, %c1_i32 : i32
    %202 = arith.extui %201 : i1 to i32
    %c0_i32_66 = arith.constant 0 : i32
    %203 = arith.cmpi ne, %202, %c0_i32_66 : i32
    scf.if %203 {
      %204 = vector.extract_strided_slice %199 {offsets = [28, 0], sizes = [16, 128], strides = [1, 1]} : vector<44x128xf32> to vector<16x128xf32>
      %205 = arith.truncf %204 : vector<16x128xf32> to vector<16x128xbf16>
      %c0_67 = arith.constant 0 : index
      %c0_68 = arith.constant 0 : index
      %206 = vector.load %arg8[%c0_67, %c0_68] : memref<128x128xbf16, #tpu.memory_space<vmem>>, vector<128x128xbf16>
      %cst_69 = arith.constant dense<0.000000e+00> : vector<16x128xf32>
      %207 = tpu.matmul %205, %206, %cst_69 {dimension_numbers = #tpu.dot_dimension_numbers<[1], [0], [0], [1], [0, 0, 1, 1], [], []>} : vector<16x128xbf16>, vector<128x128xbf16>, vector<16x128xf32> -> vector<16x128xf32>
      %c0_70 = arith.constant 0 : index
      %c0_71 = arith.constant 0 : index
      %208 = vector.load %arg9[%c0_70, %c0_71] : memref<1x128xf32, #tpu.memory_space<vmem>>, vector<1x128xf32>
      %209 = vector.broadcast %208 : vector<1x128xf32> to vector<16x128xf32>
      %210 = arith.addf %207, %209 : vector<16x128xf32>
      %cst_72 = arith.constant 2.000000e+01 : f32
      %211 = vector.broadcast %cst_72 : f32 to vector<16x128xf32>
      %212 = arith.minimumf %210, %211 : vector<16x128xf32>
      %213 = math.exp %212 : vector<16x128xf32>
      %cst_73 = arith.constant 1.000000e+00 : f32
      %214 = vector.broadcast %cst_73 : f32 to vector<16x128xf32>
      %215 = arith.addf %214, %213 : vector<16x128xf32>
      %cst_74 = arith.constant 1.000000e+00 : f32
      %216 = vector.broadcast %cst_74 : f32 to vector<16x128xf32>
      %217 = arith.addf %216, %213 : vector<16x128xf32>
      %218 = arith.mulf %215, %217 : vector<16x128xf32>
      %cst_75 = arith.constant 1.000000e+00 : f32
      %219 = vector.broadcast %cst_75 : f32 to vector<16x128xf32>
      %220 = arith.subf %218, %219 : vector<16x128xf32>
      %221 = arith.mulf %210, %220 : vector<16x128xf32>
      %cst_76 = arith.constant 1.000000e+00 : f32
      %222 = vector.broadcast %cst_76 : f32 to vector<16x128xf32>
      %223 = arith.addf %218, %222 : vector<16x128xf32>
      %224 = tpu.reciprocal %223 {approx = true} : vector<16x128xf32> -> vector<16x128xf32>
      %225 = arith.mulf %221, %224 : vector<16x128xf32>
      %226 = arith.truncf %225 : vector<16x128xf32> to vector<16x128xbf16>
      %c0_77 = arith.constant 0 : index
      %c0_78 = arith.constant 0 : index
      %227 = vector.load %arg10[%c0_77, %c0_78] : memref<128x128xbf16, #tpu.memory_space<vmem>>, vector<128x128xbf16>
      %cst_79 = arith.constant dense<0.000000e+00> : vector<16x128xf32>
      %228 = tpu.matmul %226, %227, %cst_79 {dimension_numbers = #tpu.dot_dimension_numbers<[1], [0], [0], [1], [0, 0, 1, 1], [], []>} : vector<16x128xbf16>, vector<128x128xbf16>, vector<16x128xf32> -> vector<16x128xf32>
      %c0_80 = arith.constant 0 : index
      %c0_81 = arith.constant 0 : index
      %229 = vector.load %arg11[%c0_80, %c0_81] : memref<16x128xf32, #tpu.memory_space<vmem>>, vector<16x128xf32>
      tpu.vector_store %arg11[%c0_80, %c0_81], %228 {strides = array<i32>} : memref<16x128xf32, #tpu.memory_space<vmem>>, vector<16x128xf32>,
    } else {
    }
    return
  }
  func.func @transform_0(%arg0: i32) -> (i32, i32) {
    %c0_i32 = arith.constant 0 : i32
    %c0_i32_0 = arith.constant 0 : i32
    %c0_i32_1 = arith.constant 0 : i32
    return %c0_i32, %c0_i32_0 : i32, i32
  }
  func.func @transform_1(%arg0: i32) -> (i32, i32, i32) {
    %c0_i32 = arith.constant 0 : i32
    %c0_i32_0 = arith.constant 0 : i32
    %c0_i32_1 = arith.constant 0 : i32
    return %arg0, %c0_i32, %c0_i32_0 : i32, i32, i32
  }
  func.func @transform_2(%arg0: i32) -> (i32, i32, i32) {
    %c0_i32 = arith.constant 0 : i32
    %c0_i32_0 = arith.constant 0 : i32
    %c0_i32_1 = arith.constant 0 : i32
    return %arg0, %c0_i32, %c0_i32_0 : i32, i32, i32
  }
  func.func @transform_3(%arg0: i32) -> (i32, i32, i32) {
    %c0_i32 = arith.constant 0 : i32
    %c0_i32_0 = arith.constant 0 : i32
    %c0_i32_1 = arith.constant 0 : i32
    return %arg0, %c0_i32, %c0_i32_0 : i32, i32, i32
  }
  func.func @transform_4(%arg0: i32) -> (i32, i32, i32) {
    %c0_i32 = arith.constant 0 : i32
    %c0_i32_0 = arith.constant 0 : i32
    %c0_i32_1 = arith.constant 0 : i32
    return %arg0, %c0_i32, %c0_i32_0 : i32, i32, i32
  }
  func.func @transform_5(%arg0: i32) -> (i32, i32, i32) {
    %c0_i32 = arith.constant 0 : i32
    %c0_i32_0 = arith.constant 0 : i32
    %c0_i32_1 = arith.constant 0 : i32
    return %arg0, %c0_i32, %c0_i32_0 : i32, i32, i32
  }
  func.func @transform_6(%arg0: i32) -> (i32, i32, i32) {
    %c0_i32 = arith.constant 0 : i32
    %c0_i32_0 = arith.constant 0 : i32
    %c0_i32_1 = arith.constant 0 : i32
    return %arg0, %c0_i32, %c0_i32_0 : i32, i32, i32
  }
  func.func @transform_7(%arg0: i32) -> (i32, i32) {
    %c0_i32 = arith.constant 0 : i32
    %c0_i32_0 = arith.constant 0 : i32
    %c0_i32_1 = arith.constant 0 : i32
    return %c0_i32, %c0_i32_0 : i32, i32
  }
  func.func @transform_8(%arg0: i32) -> (i32, i32) {
    %c0_i32 = arith.constant 0 : i32
    %c0_i32_0 = arith.constant 0 : i32
    %c0_i32_1 = arith.constant 0 : i32
    return %c0_i32, %c0_i32_0 : i32, i32
  }
  func.func @transform_9(%arg0: i32) -> (i32, i32) {
    %c0_i32 = arith.constant 0 : i32
    %c0_i32_0 = arith.constant 0 : i32
    %c0_i32_1 = arith.constant 0 : i32
    return %c0_i32, %c0_i32_0 : i32, i32
  }
  func.func @transform_10(%arg0: i32) -> (i32, i32) {
    %c0_i32 = arith.constant 0 : i32
    %c0_i32_0 = arith.constant 0 : i32
    %c0_i32_1 = arith.constant 0 : i32
    return %c0_i32, %c0_i32_0 : i32, i32
  }
}

</mosaic_0001>

<bundles_post_ra>
// kernel: fdm_forward.2
= control target key start
LH: loop header
LB: loop body
LE: loop exit
PB: predicated region body
PF: predicated region fallthrough
CT: control target
= control target key end

     0   :  { %17 = vsyncpa [#allocation3], 0  ;;  %s1844_s0 = inlined_call_operand.hbm [shape: f32[16,768], index: 0, kind: input, shape index: {}]   ;;  %s1845_s1 = inlined_call_operand.vmem [shape: f32[2,128], index: 1, kind: input, shape index: {}]   ;;  %s1846_s2 = inlined_call_operand.hbm [shape: bf16[768,128], index: 2, kind: input, shape index: {}]   ;;  %s1847_s3 = inlined_call_operand.hbm [shape: f32[1,128], index: 3, kind: input, shape index: {}]   ;;  %s1848_s4 = inlined_call_operand.hbm [shape: bf16[128,128], index: 4, kind: input, shape index: {}]   ;;  %s1849_s5 = inlined_call_operand.hbm [shape: f32[1,128], index: 5, kind: input, shape index: {}]   ;;  %s1850_s6 = inlined_call_operand.hbm [shape: bf16[128,128], index: 6, kind: input, shape index: {}]   ;;  %s1851_s7 = inlined_call_operand.hbm [shape: f32[1,128], index: 7, kind: input, shape index: {}]   ;;  %s1852_s8 = inlined_call_operand.hbm [shape: bf16[128,128], index: 8, kind: input, shape index: {}]   ;;  %s1853_s9 = inlined_call_operand.hbm [shape: f32[1,128], index: 9, kind: input, shape index: {}]   ;;  %s1854_s10 = inlined_call_operand.vmem [shape: f32[16,128], index: 10, kind: output, shape index: {0}]   ;;  %s1855_s11 = inlined_call_operand.vmem [shape: f32[2,128], index: 11, kind: output, shape index: {1}]  }
   0x1   :  { %18 = vsyncpa [#allocation5], 0 }
   0x2   :  { %19 = vsyncpa [#allocation8], 0 }
   0x3   :  { %20 = vsyncpa [#allocation11], 0 }
   0x4   :  { %21 = vsyncpa [#allocation14], 0  ;;  %s1607_s17 = smov [#allocation4]   ;;  %s1399_s21 = scalar_lea.hbm %s1846_s2, 6144 }
   0x5   :  { %s41_s18 = sshll.u32 %s1607_s17, 4  ;;  %p1400_p0 = scmp.ne.s32.totalorder %s1846_s2, %s1399_s21  ;;  %s42_s18 = int_to_ptr.vmem [resolvable:$true] %s41_s18 }
   0x6   :  { %p1403_p1 = scmp.lt.u32.totalorder %s1399_s21, %s1846_s2 }
   0x8   :  { %p1405_p2 = pnand %p1403_p1, %p1400_p0 }
   0xa   :  { %1408 = shalt.err (!%p1405_p2)
}
   0xb   :  { %s1409_s26 = scalar_lea.vmem %s42_s18, 6144  ;;  %p1414_p4 = scmp.lt.s32.totalorder %s42_s18, %s42_s18 }
   0xc   :  { %p1410_p3 = scmp.ne.s32.totalorder %s42_s18, %s1409_s26  ;;  %p1415_p5 = scmp.lt.s32.totalorder %s1409_s26, %s1409_s26 }
   0xe   :  { %p1416_p6 = por %p1415_p5, %p1414_p4 }
  0x10   :  { %p1417_p7 = pnand %p1416_p6, %p1410_p3 }
  0x12   :  { %1420 = shalt.err (!%p1417_p7)
}
  0x13   :  { %s1608_s27 = smov 64   ;;  %s1609_s28 = smov 4  }
  0x14   :  { %47 = dma.hbm_to_vmem [thread:$0]  %s1846_s2, 6144, %s42_s18, [#allocation5], %s1608_s27, %s1608_s27, %s1609_s28  }
  0x15   :  { %s1610_s12 = smov [#allocation7]   ;;  %s1611_s14 = smov [#allocation10]  }
  0x16   :  { %s63_s13 = sshll.u32 %s1610_s12, 4  ;;  %s85_s15 = sshll.u32 %s1611_s14, 4  ;;  %s64_s13 = int_to_ptr.vmem [resolvable:$true] %s63_s13  ;;  %s86_s15 = int_to_ptr.vmem [resolvable:$true] %s85_s15 }
  0x17   :  { %s1421_s19 = scalar_lea.hbm %s1848_s4, 1024 }
  0x18   :  { %p1422_p8 = scmp.ne.s32.totalorder %s1848_s4, %s1421_s19  ;;  %p1425_p9 = scmp.lt.u32.totalorder %s1421_s19, %s1848_s4 }
  0x1a   :  { %p1427_p10 = pnand %p1425_p9, %p1422_p8 }
  0x1c   :  { %1430 = shalt.err (!%p1427_p10)
}
  0x1d   :  { %s1431_s2 = scalar_lea.vmem %s64_s13, 1024  ;;  %p1436_p12 = scmp.lt.s32.totalorder %s64_s13, %s64_s13 }
  0x1e   :  { %p1432_p11 = scmp.ne.s32.totalorder %s64_s13, %s1431_s2  ;;  %p1437_p13 = scmp.lt.s32.totalorder %s1431_s2, %s1431_s2 }
  0x20   :  { %p1438_p0 = por %p1437_p13, %p1436_p12 }
  0x22   :  { %p1439_p1 = pnand %p1438_p0, %p1432_p11 }
  0x24   :  { %1442 = shalt.err (!%p1439_p1)
}
  0x25   :  { %69 = dma.hbm_to_vmem [thread:$0]  %s1848_s4, 1024, %s64_s13, [#allocation8], %s1608_s27, %s1608_s27, %s1609_s28  }
  0x26   :  { %s1443_s29 = scalar_lea.hbm %s1850_s6, 1024 }
  0x27   :  { %p1444_p2 = scmp.ne.s32.totalorder %s1850_s6, %s1443_s29  ;;  %p1447_p3 = scmp.lt.u32.totalorder %s1443_s29, %s1850_s6 }
  0x29   :  { %p1449_p4 = pnand %p1447_p3, %p1444_p2 }
  0x2b   :  { %1452 = shalt.err (!%p1449_p4)
}
  0x2c   :  { %s1453_s17 = scalar_lea.vmem %s86_s15, 1024  ;;  %p1458_p6 = scmp.lt.s32.totalorder %s86_s15, %s86_s15 }
  0x2d   :  { %p1454_p5 = scmp.ne.s32.totalorder %s86_s15, %s1453_s17  ;;  %p1459_p7 = scmp.lt.s32.totalorder %s1453_s17, %s1453_s17 }
  0x2f   :  { %p1460_p8 = por %p1459_p7, %p1458_p6 }
  0x31   :  { %p1461_p9 = pnand %p1460_p8, %p1454_p5 }
  0x33   :  { %1464 = shalt.err (!%p1461_p9)
}
  0x34   :  { %91 = dma.hbm_to_vmem [thread:$0]  %s1850_s6, 1024, %s86_s15, [#allocation11], %s1608_s27, %s1608_s27, %s1609_s28  }
  0x35   :  { %s1612_s19 = smov [#allocation13]   ;;  %s1613_s21 = smov [#allocation2]  }
  0x36   :  { %s107_s20 = sshll.u32 %s1612_s19, 4  ;;  %s27_s22 = sshll.u32 %s1613_s21, 4  ;;  %s108_s20 = int_to_ptr.vmem [resolvable:$true] %s107_s20  ;;  %s28_s22 = int_to_ptr.vmem [resolvable:$true] %s27_s22 }
  0x37   :  { %s1465_s18 = scalar_lea.hbm %s1852_s8, 1024 }
  0x38   :  { %p1466_p10 = scmp.ne.s32.totalorder %s1852_s8, %s1465_s18  ;;  %p1469_p11 = scmp.lt.u32.totalorder %s1465_s18, %s1852_s8 }
  0x3a   :  { %p1471_p12 = pnand %p1469_p11, %p1466_p10 }
  0x3c   :  { %1474 = shalt.err (!%p1471_p12)
}
  0x3d   :  { %s1475_s6 = scalar_lea.vmem %s108_s20, 1024  ;;  %p1480_p0 = scmp.lt.s32.totalorder %s108_s20, %s108_s20 }
  0x3e   :  { %p1476_p13 = scmp.ne.s32.totalorder %s108_s20, %s1475_s6  ;;  %p1481_p1 = scmp.lt.s32.totalorder %s1475_s6, %s1475_s6 }
  0x40   :  { %p1482_p2 = por %p1481_p1, %p1480_p0 }
  0x42   :  { %p1483_p3 = pnand %p1482_p2, %p1476_p13 }
  0x44   :  { %1486 = shalt.err (!%p1483_p3)
}
  0x45   :  { %113 = dma.hbm_to_vmem [thread:$0]  %s1852_s8, 1024, %s108_s20, [#allocation14], %s1608_s27, %s1608_s27, %s1609_s28  }
  0x46   :  { %s1487_s16 = scalar_lea.hbm %s1844_s0, 1536 }
  0x47   :  { %p1488_p4 = scmp.ne.s32.totalorder %s1844_s0, %s1487_s16  ;;  %p1491_p5 = scmp.lt.u32.totalorder %s1487_s16, %s1844_s0 }
  0x49   :  { %p1493_p6 = pnand %p1491_p5, %p1488_p4 }
  0x4b   :  { %1496 = shalt.err (!%p1493_p6)
}
  0x4c   :  { %s1497_s21 = scalar_lea.vmem %s28_s22, 1536  ;;  %p1502_p8 = scmp.lt.s32.totalorder %s28_s22, %s28_s22 }
  0x4d   :  { %p1498_p7 = scmp.ne.s32.totalorder %s28_s22, %s1497_s21  ;;  %p1503_p9 = scmp.lt.s32.totalorder %s1497_s21, %s1497_s21 }
  0x4f   :  { %p1504_p10 = por %p1503_p9, %p1502_p8 }
  0x51   :  { %p1505_p11 = pnand %p1504_p10, %p1498_p7 }
  0x53   :  { %1508 = shalt.err (!%p1505_p11)
}
  0x54   :  { %s1614_s8 = smov 768   ;;  %s1615_s27 = smov 48  }
  0x55   :  { %33 = dma.hbm_to_vmem [thread:$0]  %s1844_s0, 1536, %s28_s22, [#allocation3], %s1614_s8, %s1614_s8, %s1615_s27  }
  0x56   :  { %s1616_s23 = smov [#allocation6]   ;;  %s1617_s18 = smov [#allocation9]  }
  0x57   :  { %s54_s2 = sshll.u32 %s1616_s23, 4  ;;  %s76_s24 = sshll.u32 %s1617_s18, 4  ;;  %s55_s2 = int_to_ptr.vmem [resolvable:$true] %s54_s2  ;;  %s77_s24 = int_to_ptr.vmem [resolvable:$true] %s76_s24 }
  0x58   :  { %s1509_s29 = scalar_lea.hbm %s1847_s3, 16 }
  0x59   :  { %p1510_p12 = scmp.ne.s32.totalorder %s1847_s3, %s1509_s29  ;;  %p1513_p13 = scmp.lt.u32.totalorder %s1509_s29, %s1847_s3 }
  0x5b   :  { %p1515_p0 = pnand %p1513_p13, %p1510_p12 }
  0x5d   :  { %1518 = shalt.err (!%p1515_p0)
}
  0x5e   :  { %s1519_s0 = scalar_lea.vmem %s55_s2, 16  ;;  %s1523_s22 = scalar_lea.vmem %s55_s2, 32 }
  0x5f   :  { %p1520_p1 = scmp.ne.s32.totalorder %s55_s2, %s1519_s0  ;;  %p1524_p2 = scmp.lt.s32.totalorder %s55_s2, %s55_s2 }
  0x60   :  { %p1525_p3 = scmp.lt.s32.totalorder %s1523_s22, %s1519_s0 }
  0x62   :  { %p1526_p4 = por %p1525_p3, %p1524_p2 }
  0x64   :  { %p1527_p5 = pnand %p1526_p4, %p1520_p1 }
  0x66   :  { %1530 = shalt.err (!%p1527_p5)
}
  0x67   :  { %57 = dma.hbm_to_vmem [thread:$0]  %s1847_s3, 16, %s55_s2, [#allocation5]  }
  0x68   :  { %s1531_s13 = scalar_lea.hbm %s1849_s5, 16 }
  0x69   :  { %p1532_p6 = scmp.ne.s32.totalorder %s1849_s5, %s1531_s13  ;;  %p1535_p7 = scmp.lt.u32.totalorder %s1531_s13, %s1849_s5 }
  0x6b   :  { %p1537_p8 = pnand %p1535_p7, %p1532_p6 }
  0x6d   :  { %1540 = shalt.err (!%p1537_p8)
}
  0x6e   :  { %s1541_s28 = scalar_lea.vmem %s77_s24, 16  ;;  %s1545_s20 = scalar_lea.vmem %s77_s24, 32 }
  0x6f   :  { %p1542_p9 = scmp.ne.s32.totalorder %s77_s24, %s1541_s28  ;;  %p1546_p10 = scmp.lt.s32.totalorder %s77_s24, %s77_s24 }
  0x70   :  { %p1547_p11 = scmp.lt.s32.totalorder %s1545_s20, %s1541_s28 }
  0x72   :  { %p1548_p12 = por %p1547_p11, %p1546_p10 }
  0x74   :  { %p1549_p13 = pnand %p1548_p12, %p1542_p9 }
  0x76   :  { %1552 = shalt.err (!%p1549_p13)
}
  0x77   :  { %79 = dma.hbm_to_vmem [thread:$0]  %s1849_s5, 16, %s77_s24, [#allocation8]  }
  0x78   :  { %s1618_s2 = smov [#allocation12]   ;;  %s1619_s25 = smov [#allocation15]  }
  0x79   :  { %s98_s18 = sshll.u32 %s1618_s2, 4  ;;  %s120_s26 = sshll.u32 %s1619_s25, 4  ;;  %s99_s18 = int_to_ptr.vmem [resolvable:$true] %s98_s18  ;;  %s121_s26 = int_to_ptr.vmem [resolvable:$true] %s120_s26 }
  0x7a   :  { %s1553_s15 = scalar_lea.hbm %s1851_s7, 16 }
  0x7b   :  { %p1554_p0 = scmp.ne.s32.totalorder %s1851_s7, %s1553_s15  ;;  %p1557_p1 = scmp.lt.u32.totalorder %s1553_s15, %s1851_s7 }
  0x7d   :  { %p1559_p2 = pnand %p1557_p1, %p1554_p0 }
  0x7f   :  { %1562 = shalt.err (!%p1559_p2)
}
  0x80   :  { %s1563_s5 = scalar_lea.vmem %s99_s18, 16  ;;  %s1567_s24 = scalar_lea.vmem %s99_s18, 32 }
  0x81   :  { %p1564_p3 = scmp.ne.s32.totalorder %s99_s18, %s1563_s5  ;;  %p1568_p4 = scmp.lt.s32.totalorder %s99_s18, %s99_s18 }
  0x82   :  { %p1569_p5 = scmp.lt.s32.totalorder %s1567_s24, %s1563_s5 }
  0x84   :  { %p1570_p6 = por %p1569_p5, %p1568_p4 }
  0x86   :  { %p1571_p7 = pnand %p1570_p6, %p1564_p3 }
  0x88   :  { %1574 = shalt.err (!%p1571_p7)
}
  0x89   :  { %101 = dma.hbm_to_vmem [thread:$0]  %s1851_s7, 16, %s99_s18, [#allocation11]  }
  0x8a   :  { %s1575_s13 = scalar_lea.hbm %s1853_s9, 16 }
  0x8b   :  { %p1576_p8 = scmp.ne.s32.totalorder %s1853_s9, %s1575_s13  ;;  %p1579_p9 = scmp.lt.u32.totalorder %s1575_s13, %s1853_s9 }
  0x8d   :  { %p1581_p10 = pnand %p1579_p9, %p1576_p8 }
  0x8f   :  { %1584 = shalt.err (!%p1581_p10)
}
  0x90   :  { %s1585_s28 = scalar_lea.vmem %s121_s26, 16  ;;  %s1589_s20 = scalar_lea.vmem %s121_s26, 32 }
  0x91   :  { %p1586_p11 = scmp.ne.s32.totalorder %s121_s26, %s1585_s28  ;;  %p1590_p12 = scmp.lt.s32.totalorder %s121_s26, %s121_s26 }
  0x92   :  { %p1591_p13 = scmp.lt.s32.totalorder %s1589_s20, %s1585_s28 }
  0x94   :  { %p1592_p0 = por %p1591_p13, %p1590_p12 }
  0x96   :  { %p1593_p1 = pnand %p1592_p0, %p1586_p11 }
  0x98   :  { %1596 = shalt.err (!%p1593_p1)
}
  0x99   :  { %123 = dma.hbm_to_vmem [thread:$0]  %s1853_s9, 16, %s121_s26, [#allocation14]  }
  0x9a   :  { %1597 = dma.done.wait [#allocation3], 1536  }
  0x9b   :  { %1598 = vsyncadd [#allocation3], 4294965760 }
  0x9c   :  { %1599 = dma.done.wait [#allocation5], 6160  }
  0x9d   :  { %1600 = vsyncadd [#allocation5], 4294961136 }
  0x9e   :  { %1601 = dma.done.wait [#allocation8], 1040  }
  0x9f   :  { %1602 = vsyncadd [#allocation8], 4294966256 }
  0xa0   :  { %1603 = dma.done.wait [#allocation11], 1040  }
  0xa1   :  { %1604 = vsyncadd [#allocation11], 4294966256 }
  0xa2   :  { %1605 = dma.done.wait [#allocation14], 1040  }
  0xa3   :  { %1606 = vsyncadd [#allocation14], 4294966256  ;;  %v1315_v0 = vld [vmem:[#allocation4 + $0x40] sm:$0xff]   ;;  %v1319_v4 = vld [vmem:[#allocation4 + $0x48] sm:$0xff]   ;;  %v1620_v43 = vmov 0.0   ;;  %vm1621_vm0 = vmmov 0  }
  0xa4   :  { %v1316_v1 = vld [vmem:[#allocation4] sm:$0xff]   ;;  %1147 = vmatprep.subr.bf16.mxu0 %v1315_v0  ;;  %v1320_v5 = vld [vmem:[#allocation4 + $0x8] sm:$0xff]   ;;  %v1323_v8 = vld [vmem:[#allocation4 + $0x50] sm:$0xff]  }
  0xa5   :  { %v1317_v2 = vld [vmem:[#allocation4 + $0xc0] sm:$0xff]   ;;  %1148 = vmatpush3.bf16.msra.mxu0 %v1316_v1  ;;  %v1321_v6 = vld [vmem:[#allocation4 + $0xc8] sm:$0xff]   ;;  %v1324_v9 = vld [vmem:[#allocation4 + $0x10] sm:$0xff]  }
  0xa6   :  { %v1318_v3 = vld [vmem:[#allocation4 + $0x80] sm:$0xff]   ;;  %1169 = vmatprep.subr.bf16.mxu1 %v1317_v2  ;;  %1149 = vmatprep.subr.bf16.mxu0 %v1319_v4  ;;  %v1322_v7 = vld [vmem:[#allocation4 + $0x88] sm:$0xff]   ;;  %v1325_v10 = vld [vmem:[#allocation4 + $0xd0] sm:$0xff]  }
  0xa7   :  { %1170 = vmatpush3.bf16.msra.mxu1 %v1318_v3  ;;  %v1326_v11 = vld [vmem:[#allocation4 + $0x90] sm:$0xff]   ;;  %v1327_v12 = vld [vmem:[#allocation4 + $0x58] sm:$0xff]   ;;  %v1331_v16 = vld [vmem:[#allocation4 + $0x60] sm:$0xff]  }
  0xa8   :  { %1171 = vmatprep.subr.bf16.mxu1 %v1321_v6  ;;  %v1328_v13 = vld [vmem:[#allocation4 + $0x18] sm:$0xff]   ;;  %v1332_v17 = vld [vmem:[#allocation4 + $0x20] sm:$0xff]   ;;  %v1335_v20 = vld [vmem:[#allocation4 + $0x68] sm:$0xff]  }
  0xa9   :  { %1150 = vmatpush3.bf16.msra.mxu0 %v1320_v5  ;;  %v1329_v14 = vld [vmem:[#allocation4 + $0xd8] sm:$0xff]   ;;  %v1333_v18 = vld [vmem:[#allocation4 + $0xe0] sm:$0xff]   ;;  %v1336_v21 = vld [vmem:[#allocation4 + $0x28] sm:$0xff]  }
  0xaa   :  { %1151 = vmatprep.subr.bf16.mxu0 %v1323_v8  ;;  %v1330_v15 = vld [vmem:[#allocation4 + $0x98] sm:$0xff]   ;;  %v1334_v19 = vld [vmem:[#allocation4 + $0xa0] sm:$0xff]   ;;  %v1337_v22 = vld [vmem:[#allocation4 + $0xe8] sm:$0xff]  }
  0xab   :  { %1172 = vmatpush3.bf16.msra.mxu1 %v1322_v7  ;;  %v1338_v23 = vld [vmem:[#allocation4 + $0xa8] sm:$0xff]   ;;  %v1339_v24 = vld [vmem:[#allocation4 + $0x70] sm:$0xff]   ;;  %v1343_v28 = vld [vmem:[#allocation4 + $0x78] sm:$0xff]  }
  0xac   :  { %1173 = vmatprep.subr.bf16.mxu1 %v1325_v10  ;;  %v1340_v25 = vld [vmem:[#allocation4 + $0x30] sm:$0xff]   ;;  %v1344_v29 = vld [vmem:[#allocation4 + $0x38] sm:$0xff]   ;;  %v153_v31 = vld [vmem:[#allocation2 + $0x8] sm:$0xff] }
  0xad   :  { %1152 = vmatpush3.bf16.msra.mxu0 %v1324_v9  ;;  %v1341_v26 = vld [vmem:[#allocation4 + $0xf0] sm:$0xff]   ;;  %v1345_v30 = vld [vmem:[#allocation4 + $0xf8] sm:$0xff]   ;;  %v152_v35 = vld [vmem:[#allocation2] sm:$0xff] }
  0xae   :  { %1153 = vmatprep.subr.bf16.mxu0 %v1327_v12  ;;  %v1342_v27 = vld [vmem:[#allocation4 + $0xb0] sm:$0xff]   ;;  %v159_v32 = vld [vmem:[#allocation2 + $0x38] sm:$0xff]  ;;  %v1347_v38 = vld [vmem:[#allocation4 + $0x140] sm:$0xff]  }
  0xaf   :  { %1174 = vmatpush3.bf16.msra.mxu1 %v1326_v11  ;;  %v165_v33 = vpack.c.bf16 %v159_v32, %v153_v31  ;;  %v1346_v34 = vld [vmem:[#allocation4 + $0xb8] sm:$0xff]   ;;  %v158_v36 = vld [vmem:[#allocation2 + $0x30] sm:$0xff]  ;;  %v161_v40 = vld [vmem:[#allocation2 + $0x48] sm:$0xff] }
  0xb0   :  { %1175 = vmatprep.subr.bf16.mxu1 %v1329_v14  ;;  %v164_v37 = vpack.c.bf16 %v158_v36, %v152_v35  ;;  %v155_v39 = vld [vmem:[#allocation2 + $0x18] sm:$0xff]  ;;  %v1348_v42 = vld [vmem:[#allocation4 + $0x100] sm:$0xff]   ;;  %v154_v44 = vld [vmem:[#allocation2 + $0x10] sm:$0xff] }
  0xb1   :  { %1154 = vmatpush3.bf16.msra.mxu0 %v1328_v13  ;;  %593 = vmatprep.mubr.bf16.mxu0 %v165_v33  ;;  %v167_v41 = vpack.c.bf16 %v161_v40, %v155_v39  ;;  %v160_v45 = vld [vmem:[#allocation2 + $0x40] sm:$0xff]  ;;  %v1349_v47 = vld [vmem:[#allocation4 + $0x148] sm:$0xff]   ;;  %v1351_v49 = vld [vmem:[#allocation4 + $0x150] sm:$0xff]  }
  0xb2   :  { %1155 = vmatprep.subr.bf16.mxu0 %v1331_v16  ;;  %v166_v46 = vpack.c.bf16 %v160_v45, %v154_v44  ;;  %v1350_v48 = vld [vmem:[#allocation4 + $0x108] sm:$0xff]   ;;  %v1352_v50 = vld [vmem:[#allocation4 + $0x110] sm:$0xff]   ;;  %v1353_v51 = vld [vmem:[#allocation4 + $0x158] sm:$0xff]  }
  0xb3   :  { %1176 = vmatpush3.bf16.msra.mxu1 %v1330_v15  ;;  %634 = vmatprep.mubr.bf16.mxu1 %v167_v41  ;;  %v1354_v52 = vld [vmem:[#allocation4 + $0x118] sm:$0xff]   ;;  %v1355_v53 = vld [vmem:[#allocation4 + $0x160] sm:$0xff]   ;;  %v1357_v55 = vld [vmem:[#allocation4 + $0x168] sm:$0xff]  }
  0xb4   :  { %1177 = vmatprep.subr.bf16.mxu1 %v1333_v18  ;;  %v1356_v54 = vld [vmem:[#allocation4 + $0x120] sm:$0xff]   ;;  %v157_v56 = vld [vmem:[#allocation2 + $0x28] sm:$0xff]  ;;  %v163_v57 = vld [vmem:[#allocation2 + $0x58] sm:$0xff] }
  0xb5   :  { %1156 = vmatpush3.bf16.msra.mxu0 %v1332_v17  ;;  %v169_v58 = vpack.c.bf16 %v163_v57, %v157_v56  ;;  %v1358_v59 = vld [vmem:[#allocation4 + $0x128] sm:$0xff]   ;;  %v1359_v60 = vld [vmem:[#allocation4 + $0x170] sm:$0xff]   ;;  %v1361_v62 = vld [vmem:[#allocation4 + $0x178] sm:$0xff]  }
  0xb6   :  { %1157 = vmatprep.subr.bf16.mxu0 %v1335_v20  ;;  %v1360_v61 = vld [vmem:[#allocation4 + $0x130] sm:$0xff]   ;;  %v1362_v63 = vld [vmem:[#allocation4 + $0x138] sm:$0xff]   ;;  %v156_v0 = vld [vmem:[#allocation2 + $0x20] sm:$0xff] }
  0xb7   :  { %1178 = vmatpush3.bf16.msra.mxu1 %v1334_v19  ;;  %v162_v1 = vld [vmem:[#allocation2 + $0x50] sm:$0xff]  ;;  %v1363_v2 = vld [vmem:[#allocation10] sm:$0xff]   ;;  %v1366_v6 = vld [vmem:[#allocation10 + $0x18] sm:$0xff]  }
  0xb8   :  { %1179 = vmatprep.subr.bf16.mxu1 %v1337_v22  ;;  %v168_v3 = vpack.c.bf16 %v162_v1, %v156_v0  ;;  %v1364_v4 = vld [vmem:[#allocation10 + $0x8] sm:$0xff]   ;;  %v1365_v5 = vld [vmem:[#allocation10 + $0x10] sm:$0xff]   ;;  %v1367_v7 = vld [vmem:[#allocation10 + $0x20] sm:$0xff]  }
  0xb9   :  { %1158 = vmatpush3.bf16.msra.mxu0 %v1336_v21  ;;  %v1368_v8 = vld [vmem:[#allocation10 + $0x28] sm:$0xff]   ;;  %v1369_v9 = vld [vmem:[#allocation10 + $0x30] sm:$0xff]   ;;  %v1370_v10 = vld [vmem:[#allocation10 + $0x38] sm:$0xff]  }
  0xba   :  { %1159 = vmatprep.subr.bf16.mxu0 %v1339_v24  ;;  %v819_v11 = vld [vmem:[%s1845_s1] sm:$0x3]  ;;  %v1371_v13 = vld [vmem:[#allocation7] sm:$0xff]   ;;  %v1372_v14 = vld [vmem:[#allocation7 + $0x8] sm:$0xff]  }
  0xbb   :  { %1180 = vmatpush3.bf16.msra.mxu1 %v1338_v23  ;;  %v820_v12 = vpack.c.bf16 %v819_v11, %v819_v11  ;;  %v1373_v15 = vld [vmem:[#allocation7 + $0x10] sm:$0xff]   ;;  %v1374_v16 = vld [vmem:[#allocation7 + $0x18] sm:$0xff]   ;;  %v1375_v17 = vld [vmem:[#allocation7 + $0x20] sm:$0xff]  }
  0xbc   :  { %1181 = vmatprep.subr.bf16.mxu1 %v1341_v26  ;;  %v1376_v18 = vld [vmem:[#allocation7 + $0x28] sm:$0xff]   ;;  %v1377_v19 = vld [vmem:[#allocation7 + $0x30] sm:$0xff]   ;;  %v1378_v20 = vld [vmem:[#allocation7 + $0x38] sm:$0xff]  }
  0xbd   :  { %1160 = vmatpush3.bf16.msra.mxu0 %v1340_v25  ;;  %v1068_v22 = vld [vmem:[#allocation6] ss:$0 sm:$0xff]  ;;  %v1379_v11 = vld [vmem:[#allocation13] sm:$0xff]  }
  0xbe   :  { %1161 = vmatprep.subr.bf16.mxu0 %v1343_v28 }
  0xbf   :  { %1182 = vmatpush3.bf16.msra.mxu1 %v1342_v27 }
  0xc0   :  { %1183 = vmatprep.subr.bf16.mxu1 %v1345_v30 }
  0xc1   :  { %1162 = vmatpush3.bf16.msra.mxu0 %v1344_v29 }
  0xc2   :  { %1191 = vmatprep.subr.bf16.mxu0 %v1347_v38 }
  0xc3   :  { %1184 = vmatpush3.bf16.msra.mxu1 %v1346_v34 }
  0xc4   :  { %1240 = vmatprep.subr.bf16.mxu1 %v1620_v43  ;;  %594 = vmatmul.mubr.bf16.vlgmr.msra.gmra.mrb[0].mxu0 %v164_v37 }
  0xc5   :  { %1192 = vmatpush3.bf16.msra.mxu0 %v1348_v42  ;;  %675 = vmatprep.mubr.bf16.mxu0 %v169_v58 }
  0xc6   :  { %635 = vmatmul.mubr.bf16.vlgmr.msra.gmra.mrb[0].mxu1 %v166_v46  ;;  %1193 = vmatprep.subr.bf16.mxu0 %v1349_v47 }
  0xc7   :  { %1256 = vmatprep.mubr.msk.bf16.mxu1 %vm1621_vm0, %v1620_v43  ;;  %1241 = vmatpush3.bf16.msra.mxu1 %v1371_v13  ;;  %v1380_v13 = vld [vmem:[#allocation13 + $0x8] sm:$0xff]  }
  0xc8   :  { %1242 = vmatprep.subr.bf16.mxu1 %v1620_v43 }
  0xc9   :  { %1194 = vmatpush3.bf16.msra.mxu0 %v1350_v48 }
  0xca   :  { %1195 = vmatprep.subr.bf16.mxu0 %v1351_v49 }
  0xcb   :  { %1243 = vmatpush3.bf16.msra.mxu1 %v1372_v14 }
  0xcc   :  { %1244 = vmatprep.subr.bf16.mxu1 %v1620_v43 }
  0xcd   :  { %1196 = vmatpush3.bf16.msra.mxu0 %v1352_v50 }
  0xce   :  { %1197 = vmatprep.subr.bf16.mxu0 %v1353_v51 }
  0xcf   :  { %1245 = vmatpush3.bf16.msra.mxu1 %v1373_v15  ;;  %v1381_v15 = vld [vmem:[#allocation13 + $0x10] sm:$0xff]  }
  0xd0   :  { %1246 = vmatprep.subr.bf16.mxu1 %v1620_v43 }
  0xd1   :  { %1198 = vmatpush3.bf16.msra.mxu0 %v1354_v52 }
  0xd2   :  { %1199 = vmatprep.subr.bf16.mxu0 %v1355_v53 }
  0xd3   :  { %1247 = vmatpush3.bf16.msra.mxu1 %v1374_v16 }
  0xd4   :  { %1248 = vmatprep.subr.bf16.mxu1 %v1620_v43 }
  0xd5   :  { %1200 = vmatpush3.bf16.msra.mxu0 %v1356_v54 }
  0xd6   :  { %1201 = vmatprep.subr.bf16.mxu0 %v1357_v55 }
  0xd7   :  { %1249 = vmatpush3.bf16.msra.mxu1 %v1375_v17 }
  0xd8   :  { %1250 = vmatprep.subr.bf16.mxu1 %v1620_v43 }
  0xd9   :  { %1202 = vmatpush3.bf16.msra.mxu0 %v1358_v59  ;;  %v1128_v59 = vld [vmem:[#allocation12] ss:$0 sm:$0xff] }
  0xda   :  { %1203 = vmatprep.subr.bf16.mxu0 %v1359_v60 }
  0xdb   :  { %1251 = vmatpush3.bf16.msra.mxu1 %v1376_v18  ;;  %v1382_v18 = vld [vmem:[#allocation13 + $0x18] sm:$0xff]  }
  0xdc   :  { %1252 = vmatprep.subr.bf16.mxu1 %v1620_v43 }
  0xdd   :  { %1204 = vmatpush3.bf16.msra.mxu0 %v1360_v61 }
  0xde   :  { %1205 = vmatprep.subr.bf16.mxu0 %v1361_v62 }
  0xdf   :  { %1253 = vmatpush3.bf16.msra.mxu1 %v1377_v19 }
  0xe0   :  { %1254 = vmatprep.subr.bf16.mxu1 %v1620_v43 }
  0xe1   :  { %1206 = vmatpush3.bf16.msra.mxu0 %v1362_v63 }
  0xe2   :  { %1260 = vmatprep.subr.bf16.mxu0 %v1620_v43 }
  0xe3   :  { %1255 = vmatpush3.bf16.msra.mxu1 %v1378_v20  ;;  %v1383_v20 = vld [vmem:[#allocation13 + $0x20] sm:$0xff]  }
  0xe4   :  { %676 = vmatmul.mubr.bf16.vlgmr.msra.gmra.mrb[4].mxu0 %v168_v3  ;;  %1280 = vmatprep.subr.bf16.mxu1 %v1620_v43 }
  0xe5   :  { %1261 = vmatpush3.bf16.msra.mxu0 %v1363_v2  ;;  %1276 = vmatprep.mubr.msk.bf16.mxu0 %vm1621_vm0, %v1620_v43 }
  0xe6   :  { %1262 = vmatprep.subr.bf16.mxu0 %v1620_v43 }
  0xe9   :  { %1263 = vmatpush3.bf16.msra.mxu0 %v1364_v4 }
  0xea   :  { %1264 = vmatprep.subr.bf16.mxu0 %v1620_v43 }
  0xed   :  { %1265 = vmatpush3.bf16.msra.mxu0 %v1365_v5 }
  0xee   :  { %1266 = vmatprep.subr.bf16.mxu0 %v1620_v43 }
  0xf1   :  { %1267 = vmatpush3.bf16.msra.mxu0 %v1366_v6 }
  0xf2   :  { %1268 = vmatprep.subr.bf16.mxu0 %v1620_v43 }
  0xf5   :  { %1269 = vmatpush3.bf16.msra.mxu0 %v1367_v7 }
  0xf6   :  { %1270 = vmatprep.subr.bf16.mxu0 %v1620_v43 }
  0xf9   :  { %1271 = vmatpush3.bf16.msra.mxu0 %v1368_v8 }
  0xfa   :  { %1272 = vmatprep.subr.bf16.mxu0 %v1620_v43 }
  0xfd   :  { %1273 = vmatpush3.bf16.msra.mxu0 %v1369_v9 }
  0xfe   :  { %1274 = vmatprep.subr.bf16.mxu0 %v1620_v43 }
 0x101   :  { %1275 = vmatpush3.bf16.msra.mxu0 %v1370_v10 }
 0x104   :  { %1277 = vmatmul.mubr.bf16.vlgmr.msra.gmra.mrb[8].mxu0 %v820_v12 }
 0x197   :  { %v1163_v21 = vpop.f32.mrb[0].mxu0 }
 0x198   :  { %v1164_v23 = vpop.f32.mrb[1].mxu0 }
 0x199   :  { %v1165_v24 = vadd.f32 %v1164_v23, %v1163_v21  ;;  %v1166_v25 = vpop.f32.mrb[2].mxu0  ;;  %v1185_v26 = vpop.f32.mrb[0].mxu1  ;;  %v1384_v21 = vld [vmem:[#allocation13 + $0x28] sm:$0xff]   ;;  %v1385_v23 = vld [vmem:[#allocation13 + $0x30] sm:$0xff]  }
 0x19a   :  { %v1167_v27 = vpop.f32.mrb[3].mxu0  ;;  %v1186_v30 = vpop.f32.mrb[1].mxu1 }
 0x19b   :  { %v596_v28 = vadd.f32 %v1165_v24, %v1068_v22  ;;  %v1168_v29 = vadd.f32 %v1167_v27, %v1166_v25  ;;  %v1187_v31 = vadd.f32 %v1186_v30, %v1185_v26  ;;  %v1188_v32 = vpop.f32.mrb[2].mxu1  ;;  %v1386_v26 = vld [vmem:[#allocation13 + $0x38] sm:$0xff]  }
 0x19c   :  { %v1189_v34 = vpop.f32.mrb[3].mxu1 }
 0x19d   :  { %v599_v33 = vadd.f32 %v1168_v29, %v1068_v22  ;;  %v637_v35 = vadd.f32 %v1187_v31, %v596_v28  ;;  %v1190_v36 = vadd.f32 %v1189_v34, %v1188_v32  ;;  %v1119_v29 = vld [vmem:[#allocation9] ss:$0 sm:$0xff] }
 0x19f   :  { %v640_v37 = vadd.f32 %v1190_v36, %v599_v33  ;;  %v1138_v36 = vld [vmem:[#allocation15] ss:$0 sm:$0xff] }
 0x1b7   :  { %v1207_v38 = vpop.f32.mrb[4].mxu0 }
 0x1b8   :  { %v1208_v39 = vpop.f32.mrb[5].mxu0 }
 0x1b9   :  { %v1209_v40 = vadd.f32 %v1208_v39, %v1207_v38  ;;  %v1210_v41 = vpop.f32.mrb[6].mxu0 }
 0x1ba   :  { %v1211_v42 = vpop.f32.mrb[7].mxu0 }
 0x1bb   :  { %v678_v44 = vadd.f32 %v1209_v40, %v637_v35  ;;  %v1212_v45 = vadd.f32 %v1211_v42, %v1210_v41 }
 0x1bd   :  { %v684_v46 = vmin.f32 %v678_v44, 20.0  ;;  %v681_v47 = vadd.f32 %v1212_v45, %v640_v37 }
 0x1bf   :  { %v686_v48 = vmul.f32 1.442695, %v684_v46  ;;  %v685_v49 = vmin.f32 %v681_v47, 20.0 }
 0x1c1   :  { %1387 = vpow2.f32 %v686_v48  ;;  %v688_v50 = vmul.f32 1.442695, %v685_v49 }
 0x1c3   :  { %1389 = vpow2.f32 %v688_v50 }
 0x1cb   :  { %v1388_v51 = vpop.eup %1387 }
 0x1cc   :  { %v690_v52 = vadd.f32 1.0, %v1388_v51 }
 0x1cd   :  { %v1390_v53 = vpop.eup %1389 }
 0x1ce   :  { %v692_v54 = vmul.f32 %v690_v52, %v690_v52  ;;  %v691_v55 = vadd.f32 1.0, %v1390_v53 }
 0x1d0   :  { %v698_v56 = vadd.f32 1.0, %v692_v54  ;;  %v693_v57 = vmul.f32 %v691_v55, %v691_v55  ;;  %v1117_v63 = vadd.f32 -1.0, %v692_v54 }
 0x1d2   :  { %1391 = vrcp.f32 %v698_v56  ;;  %v699_v58 = vadd.f32 1.0, %v693_v57  ;;  %v1118_v0 = vadd.f32 -1.0, %v693_v57  ;;  %v696_v6 = vmul.f32 %v1117_v63, %v678_v44 }
 0x1d4   :  { %1393 = vrcp.f32 %v699_v58  ;;  %v697_v7 = vmul.f32 %v1118_v0, %v681_v47 }
 0x1d7   :  { %v926_v60 = vpop.f32.mrb[8].mxu0 }
 0x1d8   :  { %v927_v61 = vadd.f32 %v1128_v59, %v926_v60  ;;  %v1278_v62 = vpop.f32.mrb[9].mxu0 }
 0x1d9   :  { %v929_v1 = vpop.f32.mrb[10].mxu0 }
 0x1da   :  { %v932_v2 = vmin.f32 %v927_v61, 20.0  ;;  %v1279_v3 = vpop.f32.mrb[11].mxu0 }
 0x1dc   :  { %v1392_v4 = vpop.eup %1391  ;;  %v933_v5 = vmul.f32 1.442695, %v932_v2 }
 0x1dd   :  { %v702_v9 = vmul.f32 %v1392_v4, %v696_v6 }
 0x1de   :  { %v1394_v8 = vpop.eup %1393  ;;  %1395 = vpow2.f32 %v933_v5 }
 0x1df   :  { %v703_v10 = vmul.f32 %v1394_v8, %v697_v7 }
 0x1e1   :  { %v704_v12 = vpack.c.bf16 %v703_v10, %v702_v9 }
 0x1e3   :  { %1257 = vmatmul.mubr.bf16.vlgmr.msra.gmra.mrb[4].mxu1 %v704_v12 }
 0x1e4   :  { %1281 = vmatpush3.bf16.msra.mxu1 %v1379_v11  ;;  %1296 = vmatprep.mubr.msk.bf16.mxu1 %vm1621_vm0, %v1620_v43 }
 0x1e5   :  { %1282 = vmatprep.subr.bf16.mxu1 %v1620_v43 }
 0x1e8   :  { %v1396_v14 = vpop.eup %1395  ;;  %1283 = vmatpush3.bf16.msra.mxu1 %v1380_v13 }
 0x1e9   :  { %v935_v16 = vadd.f32 1.0, %v1396_v14  ;;  %1284 = vmatprep.subr.bf16.mxu1 %v1620_v43 }
 0x1eb   :  { %v936_v17 = vmul.f32 %v935_v16, %v935_v16 }
 0x1ec   :  { %1285 = vmatpush3.bf16.msra.mxu1 %v1381_v15 }
 0x1ed   :  { %v939_v19 = vadd.f32 1.0, %v936_v17  ;;  %1286 = vmatprep.subr.bf16.mxu1 %v1620_v43  ;;  %v1137_v22 = vadd.f32 -1.0, %v936_v17 }
 0x1ef   :  { %1397 = vrcp.f32 %v939_v19  ;;  %v938_v25 = vmul.f32 %v1137_v22, %v927_v61 }
 0x1f0   :  { %1287 = vmatpush3.bf16.msra.mxu1 %v1382_v18 }
 0x1f1   :  { %1288 = vmatprep.subr.bf16.mxu1 %v1620_v43 }
 0x1f4   :  { %1289 = vmatpush3.bf16.msra.mxu1 %v1383_v20 }
 0x1f5   :  { %1290 = vmatprep.subr.bf16.mxu1 %v1620_v43 }
 0x1f8   :  { %1291 = vmatpush3.bf16.msra.mxu1 %v1384_v21 }
 0x1f9   :  { %1292 = vmatprep.subr.bf16.mxu1 %v1620_v43  ;;  %v1398_v24 = vpop.eup %1397 }
 0x1fa   :  { %v941_v27 = vmul.f32 %v1398_v24, %v938_v25 }
 0x1fc   :  { %1293 = vmatpush3.bf16.msra.mxu1 %v1385_v23  ;;  %v942_v28 = vpack.c.bf16 %v941_v27, %v941_v27 }
 0x1fd   :  { %1294 = vmatprep.subr.bf16.mxu1 %v1620_v43 }
 0x200   :  { %1295 = vmatpush3.bf16.msra.mxu1 %v1386_v26 }
 0x203   :  { %1297 = vmatmul.mubr.bf16.vlgmr.msra.gmra.mrb[8].mxu1 %v942_v28 }
 0x2b6   :  { %v810_v30 = vpop.f32.mrb[4].mxu1 }
 0x2b7   :  { %v811_v31 = vadd.f32 %v1119_v29, %v810_v30  ;;  %v1258_v32 = vpop.f32.mrb[5].mxu1 }
 0x2b8   :  { %v813_v33 = vpop.f32.mrb[6].mxu1 }
 0x2b9   :  { %817 = vst [vmem:[%s1854_s10] sm:$0xff] %v811_v31  ;;  %v814_v34 = vadd.f32 %v1119_v29, %v813_v33  ;;  %v1259_v35 = vpop.f32.mrb[7].mxu1 }
 0x2bb   :  { %818 = vst [vmem:[%s1854_s10 + $0x8] sm:$0xff] %v814_v34 }
 0x2d6   :  { %v1048_v43 = vpop.f32.mrb[8].mxu1 }
 0x2d7   :  { %v1049_v37 = vadd.f32 %v1138_v36, %v1048_v43  ;;  %v1298_v38 = vpop.f32.mrb[9].mxu1 }
 0x2d8   :  { %v1051_v39 = vpop.f32.mrb[10].mxu1 }
 0x2d9   :  { %1054 = vst [vmem:[%s1855_s11] sm:$0x3] %v1049_v37  ;;  %v1299_v40 = vpop.f32.mrb[11].mxu1 }
 0x2da   :  { %1063 = vsyncpa [#allocation3], 1 }
 0x2db   :  { %1064 = vsyncpa [#allocation5], 1 }
 0x2dc   :  { %1065 = vsyncpa [#allocation8], 1 }
 0x2dd   :  { %1066 = vsyncpa [#allocation11], 1 }
 0x2de   :  { %1067 = vsyncpa [#allocation14], 1 }

// kernel: fdm_forward.3
= control target key start
LH: loop header
LB: loop body
LE: loop exit
PB: predicated region body
PF: predicated region fallthrough
CT: control target
= control target key end

     0   :  { %s19251_s0 = inlined_call_operand.vmem [shape: f32[44,128], index: 0, kind: input, shape index: {}]   ;;  %s19252_s1 = inlined_call_operand.hbm [shape: bf16[2,128,384], index: 1, kind: input, shape index: {}]   ;;  %s19253_s2 = inlined_call_operand.hbm [shape: bf16[2,128,128], index: 2, kind: input, shape index: {}]   ;;  %s19254_s3 = inlined_call_operand.hbm [shape: bf16[2,128,256], index: 3, kind: input, shape index: {}]   ;;  %s19255_s4 = inlined_call_operand.hbm [shape: bf16[2,256,128], index: 4, kind: input, shape index: {}]   ;;  %s19256_s5 = inlined_call_operand.hbm [shape: f32[2,16,128], index: 5, kind: input, shape index: {}]   ;;  %s19257_s6 = inlined_call_operand.hbm [shape: f32[2,1,256], index: 6, kind: input, shape index: {}]   ;;  %s19258_s7 = inlined_call_operand.hbm [shape: bf16[128,128], index: 7, kind: input, shape index: {}]   ;;  %s19259_s8 = inlined_call_operand.hbm [shape: f32[1,128], index: 8, kind: input, shape index: {}]   ;;  %s19260_s9 = inlined_call_operand.hbm [shape: bf16[128,128], index: 9, kind: input, shape index: {}]   ;;  %s19261_s10 = inlined_call_operand.vmem [shape: f32[16,128], index: 10, kind: output, shape index: {}]  }
   0x1   :  { %19417 = sst [smem:[#allocation98_spill]] %s19251_s0 }
   0x2   :  { %19418 = sst [smem:[#allocation99_spill]] %s19253_s2 }
   0x3   :  { %19419 = sst [smem:[#allocation100_spill]] %s19255_s4 }
   0x4   :  { %19420 = sst [smem:[#allocation101_spill]] %s19258_s7 }
   0x5   :  { %19421 = sst [smem:[#allocation102_spill]] %s19261_s10 }
   0x6   :  { %15 = vsyncpa [#allocation4], 0 }
   0x7   :  { %17 = vsyncpa [#allocation4 + $0x1], 0 }
   0x8   :  { %18 = vsyncpa [#allocation6], 0 }
   0x9   :  { %20 = vsyncpa [#allocation6 + $0x1], 0 }
   0xa   :  { %21 = vsyncpa [#allocation9], 0 }
   0xb   :  { %23 = vsyncpa [#allocation9 + $0x1], 0 }
   0xc   :  { %24 = vsyncpa [#allocation12], 0 }
   0xd   :  { %26 = vsyncpa [#allocation12 + $0x1], 0 }
   0xe   :  { %27 = vsyncpa [#allocation15], 0  ;;  %s15790_s13 = smov 0   ;;  %s15792_s14 = smov 0  }
   0xf   :  { %s15794_s15 = smov 0   ;;  %s15796_s16 = smov 0  }
  0x10 LB: > { %19422 = sst [smem:[#allocation23_spill]] %s15705_s15  ;;  %s15809_s17 = sadd.s32 4294967295, %s15709_s16   ;;  %s15709_s16 = sphi %s15796_s16, %s19676_s16   ;;  %s15705_s15 = sphi %s15794_s15, %s19678_s15   ;;  %s15701_s14 = sphi %s15792_s14, %s19680_s14   ;;  %s15697_s13 = sphi %s15790_s13, %s19679_s13  }
  0x11   : > { %19423 = sst [smem:[#allocation24_spill]] %s15809_s17  ;;  %s15812_s18 = sadd.s32 1, %s15709_s16  }
  0x12   : > { %19424 = sst [smem:[#allocation25_spill]] %s15812_s18  ;;  %s58_s19 = ssub.s32 %s15709_s16, %s15812_s18 }
  0x13   : > { %s61_s20 = sadd.s32 1, %s15705_s15  ;;  %p59_p0 = scmp.eq.s32.totalorder %s58_s19, 0 }
  0x14   : > { %p68_p1 = scmp.ne.s32.totalorder %s15705_s15, %s15701_s14  ;;  %p69_p2 = scmp.eq.s32.totalorder %s15709_s16, 0 }
  0x15   : > { %p74_p3 = scmp.ne.s32.totalorder %s15701_s14, %s15697_s13  ;;  %p19262_p5 = scmp.eq.s32.totalorder %s15809_s17, 0 }
  0x16   : > { %s15822_s21 = scalar_select %p59_p0, %s15705_s15, %s61_s20  }
  0x17   : > { %p15824_p4 = por %p69_p2, %p68_p1  ;;  %p12858_p6 = scmp.ge.s32.totalorder %s15709_s16, 1 }
  0x18   : > { %19425 = sst [smem:[#allocation26_spill]] %s15822_s21  ;;  %p299_p7 = scmp.lt.s32.totalorder %s15709_s16, 3 }
  0x19   : > { %p15833_p8 = por %p19262_p5, %p74_p3  ;;  %s15711_s25 = smov [#allocation13]  }
  0x1a   : > { %p15838_p10 = pnand %p12858_p6, %p299_p7  ;;  %s314_s26 = sshll.u32 %s15711_s25, 4  ;;  %s315_s26 = int_to_ptr.vmem [resolvable:$true] %s314_s26 }
  0x1b   : > { %s19427_s23 = scalar_select %p15833_p8, 1, 0 }
  0x1c   : > { %s19429_s24 = scalar_select %p15838_p10, 1, 0 }
  0x1d   : > { %19428 = sst [smem:[#allocation27_spill]] %s19427_s23  ;;  %p14818_p11 = pneg %p15838_p10 }
  0x1e   : > { %p14850_p13 = scmp.lt.s32.totalorder %s15709_s16, 2  ;;  %s15852_s28 = sand.u32 1, %s15705_s15  }
  0x1f   : > { %p15846_p12 = pnand %p14818_p11, %p19262_p5  ;;  %s19432_s7 = sld [smem:[#allocation101_spill]] }
  0x20   : > { %p15856_p0 = pnand %p14850_p13, %p15824_p4 }
  0x21   : > { %s19430_s27 = scalar_select %p15846_p12, 1, 0 }
  0x22   : > { %s19431_s29 = scalar_select %p15856_p0, 1, 0 }
  0x23   : > { %p15868_p2 = pneg %p15846_p12 }
  0x25   : > { %s15391_s12 = scalar_lea.hbm %s19432_s7, 1024 }
  0x26   : > { %p15392_p1 = scmp.ne.s32.totalorder %s19432_s7, %s15391_s12  ;;  %p15398_p6 = scmp.lt.u32.totalorder %s15391_s12, %s19432_s7 }
  0x27   : > { %s19433_s20 = scalar_select %p15868_p2, 1, 0 }
  0x28   : > { %p15394_p3 = pnand %p15868_p2, %p15392_p1 }
  0x2a   : > { %p15395_p4 = pneg %p15394_p3 }
  0x2c   : > { %p15400_p7 = pnand %p15398_p6, %p15395_p4 }
  0x2e   : > { %15403 = shalt.err (!%p15400_p7)
}
  0x2f   : > { %s15404_s30 = scalar_lea.vmem %s315_s26, 1024  ;;  %p15412_p5 = scmp.lt.s32.totalorder %s315_s26, %s315_s26 }
  0x30   : > { %p15405_p11 = scmp.ne.s32.totalorder %s315_s26, %s15404_s30  ;;  %p15413_p8 = scmp.lt.s32.totalorder %s15404_s30, %s15404_s30 }
  0x32   : > { %p15407_p13 = pnand %p15405_p11, %p15868_p2  ;;  %p15414_p10 = por %p15413_p8, %p15412_p5 }
  0x34   : > { %p15408_p9 = pneg %p15407_p13 }
  0x36   : > { %p15415_p0 = pnand %p15414_p10, %p15408_p9 }
  0x38   : > { %15418 = shalt.err (!%p15415_p0)
}
  0x39   : > { %s19279_s11 = smov 64   ;;  %s19281_s13 = smov 4  }
  0x3a   : > { %14821 = dma.hbm_to_vmem [thread:$0]  (!%p15846_p12), %s19432_s7, 1024, %s315_s26, [#allocation12], %s19279_s11, %s19279_s11, %s19281_s13  }
  0x3b   : > { %s15714_s22 = smov [#allocation14]   ;;  %s15888_s30 = sand.u32 1, %s15709_s16  }
  0x3c   : > { %s328_s25 = sshll.u32 %s15714_s22, 4  ;;  %s15419_s18 = scalar_lea.hbm %s19259_s8, 16  ;;  %s329_s25 = int_to_ptr.vmem [resolvable:$true] %s328_s25 }
  0x3d   : > { %p15420_p5 = scmp.ne.s32.totalorder %s19259_s8, %s15419_s18  ;;  %p15426_p10 = scmp.lt.u32.totalorder %s15419_s18, %s19259_s8 }
  0x3f   : > { %p15422_p8 = pnand %p15420_p5, %p15868_p2 }
  0x41   : > { %p15423_p9 = pneg %p15422_p8 }
  0x43   : > { %p15428_p0 = pnand %p15426_p10, %p15423_p9 }
  0x45   : > { %15431 = shalt.err (!%p15428_p0)
}
  0x46   : > { %s15432_s26 = scalar_lea.vmem %s329_s25, 16  ;;  %s15439_s15 = scalar_lea.vmem %s329_s25, 32 }
  0x47   : > { %p15433_p1 = scmp.ne.s32.totalorder %s329_s25, %s15432_s26  ;;  %p15440_p6 = scmp.lt.s32.totalorder %s329_s25, %s329_s25 }
  0x48   : > { %p15441_p7 = scmp.lt.s32.totalorder %s15439_s15, %s15432_s26 }
  0x49   : > { %p15435_p3 = pnand %p15433_p1, %p15868_p2 }
  0x4a   : > { %p15442_p11 = por %p15441_p7, %p15440_p6 }
  0x4b   : > { %p15436_p4 = pneg %p15435_p3 }
  0x4d   : > { %p15443_p13 = pnand %p15442_p11, %p15436_p4 }
  0x4f   : > { %15446 = shalt.err (!%p15443_p13)
}
  0x50   : > { %14824 = dma.hbm_to_vmem [thread:$0]  (!%p15846_p12), %s19259_s8, 16, %s329_s25, [#allocation15]  }
  0x51   : > { %s12864_s17 = sshll.u32 %s15852_s28, 6  ;;  %s13163_s18 = sshll.u32 %s15709_s16, 10 }
  0x52   : > { %s19434_s2 = sld [smem:[#allocation99_spill]]  ;;  %s377_s19 = scalar_lea.vmem [#allocation5], %s12864_s17 }
  0x53   : > { %s384_s22 = sshll.u32 %s377_s19, 4  ;;  %s12867_s26 = sshll.u32 %s15852_s28, 7  ;;  %s15915_s22 = int_to_ptr.vmem [resolvable:$true] %s384_s22 }
  0x54   : > { %s19278_s15 = scalar_lea.sflag [#allocation6], %s15888_s30  ;;  %p19435_p8 = scmp.ne.s32.totalorder %s19431_s29, 0 }
  0x56   : > { %p15923_p9 = pneg %p19435_p8 }
  0x58   : > { %s15913_s12 = scalar_lea.hbm %s19434_s2, %s13163_s18  ;;  %s15452_s17 = scalar_lea.hbm %s19434_s2, 2048 }
  0x59   : > { %s15447_s0 = scalar_lea.hbm %s15913_s12, 1024  ;;  %p15453_p1 = scmp.lt.u32.totalorder %s15913_s12, %s19434_s2 }
  0x5a   : > { %p15448_p5 = scmp.ne.s32.totalorder %s15913_s12, %s15447_s0  ;;  %p15454_p3 = scmp.lt.u32.totalorder %s15452_s17, %s15447_s0 }
  0x5b   : > { %p15456_p6 = scmp.lt.u32.totalorder %s15447_s0, %s15913_s12 }
  0x5c   : > { %p15450_p10 = pnand %p15923_p9, %p15448_p5  ;;  %p15455_p4 = por %p15454_p3, %p15453_p1 }
  0x5e   : > { %p15451_p0 = pneg %p15450_p10  ;;  %p15457_p7 = por %p15456_p6, %p15455_p4 }
  0x60   : > { %p15458_p11 = pnand %p15457_p7, %p15451_p0 }
  0x62   : > { %15461 = shalt.err (!%p15458_p11)
}
  0x63   : > { %s15462_s19 = scalar_lea.vmem %s15915_s22, 1024  ;;  %s15715_s10 = smov [#allocation5]  }
  0x64   : > { %p15463_p13 = scmp.ne.s32.totalorder %s15915_s22, %s15462_s19  ;;  %s15467_s18 = sshll.u32 %s15715_s10, 4  ;;  %s15468_s18 = int_to_ptr.vmem [resolvable:$false] %s15467_s18 }
  0x65   : > { %s15469_s21 = scalar_lea.vmem %s15468_s18, 2048  ;;  %p15470_p12 = scmp.lt.s32.totalorder %s15915_s22, %s15468_s18 }
  0x66   : > { %p15465_p5 = pnand %p15463_p13, %p15923_p9  ;;  %p15471_p2 = scmp.lt.s32.totalorder %s15469_s21, %s15462_s19 }
  0x68   : > { %p15466_p10 = pneg %p15465_p5  ;;  %p15472_p1 = por %p15471_p2, %p15470_p12 }
  0x6a   : > { %p15473_p3 = pnand %p15472_p1, %p15466_p10 }
  0x6c   : > { %15476 = shalt.err (!%p15473_p3)
}
  0x6d   : > { %14834 = dma.hbm_to_vmem [thread:$0]  (!%p19435_p8), %s15913_s12, 1024, %s15915_s22, %s19278_s15, %s19279_s11, %s19279_s11, %s19281_s13  }
  0x6e   : > { %s13164_s0 = sshll.u32 %s15709_s16, 11  ;;  %s398_s10 = scalar_lea.vmem [#allocation7], %s12867_s26 }
  0x6f   : > { %s15955_s19 = scalar_lea.hbm %s19254_s3, %s13164_s0  ;;  %s405_s18 = sshll.u32 %s398_s10, 4  ;;  %s15959_s18 = int_to_ptr.vmem [resolvable:$true] %s405_s18 }
  0x70   : > { %s19437_s4 = sld [smem:[#allocation100_spill]]  ;;  %s419_s12 = scalar_lea.vmem [#allocation8], %s12867_s26 }
  0x71   : > { %s426_s22 = sshll.u32 %s419_s12, 4  ;;  %s15716_s17 = smov [#allocation16]   ;;  %s15968_s22 = int_to_ptr.vmem [resolvable:$true] %s426_s22 }
  0x72   : > { %s15970_s23 = sshll.u32 %s15716_s17, 4  ;;  %s416_s10 = scalar_lea.sflag [#allocation9], %s15888_s30  ;;  %s339_s23 = int_to_ptr.vmem [resolvable:$true] %s15970_s23 }
  0x76   : > { %s15964_s7 = scalar_lea.hbm %s19437_s4, %s13164_s0  ;;  %s15482_s21 = scalar_lea.hbm %s19437_s4, 4096 }
  0x77   : > { %s15477_s15 = scalar_lea.hbm %s15964_s7, 2048  ;;  %p15483_p4 = scmp.lt.u32.totalorder %s15964_s7, %s19437_s4 }
  0x78   : > { %p15478_p12 = scmp.ne.s32.totalorder %s15964_s7, %s15477_s15  ;;  %p15484_p6 = scmp.lt.u32.totalorder %s15482_s21, %s15477_s15 }
  0x79   : > { %p15486_p11 = scmp.lt.u32.totalorder %s15477_s15, %s15964_s7 }
  0x7a   : > { %p15480_p2 = pnand %p15478_p12, %p15923_p9  ;;  %p15485_p7 = por %p15484_p6, %p15483_p4 }
  0x7c   : > { %p15481_p0 = pneg %p15480_p2  ;;  %p15487_p13 = por %p15486_p11, %p15485_p7 }
  0x7e   : > { %p15488_p5 = pnand %p15487_p13, %p15481_p0 }
  0x80   : > { %15491 = shalt.err (!%p15488_p5)
}
  0x81   : > { %s15492_s26 = scalar_lea.vmem %s15968_s22, 2048  ;;  %s15717_s12 = smov [#allocation8]  }
  0x82   : > { %p15493_p10 = scmp.ne.s32.totalorder %s15968_s22, %s15492_s26  ;;  %s15497_s17 = sshll.u32 %s15717_s12, 4  ;;  %s15498_s17 = int_to_ptr.vmem [resolvable:$false] %s15497_s17 }
  0x83   : > { %s15499_s11 = scalar_lea.vmem %s15498_s17, 4096  ;;  %p15500_p12 = scmp.lt.s32.totalorder %s15968_s22, %s15498_s17 }
  0x84   : > { %p15495_p1 = pnand %p15493_p10, %p15923_p9  ;;  %p15501_p2 = scmp.lt.s32.totalorder %s15499_s11, %s15492_s26 }
  0x86   : > { %p15496_p3 = pneg %p15495_p1  ;;  %p15502_p4 = por %p15501_p2, %p15500_p12 }
  0x88   : > { %p15503_p6 = pnand %p15502_p4, %p15496_p3 }
  0x8a   : > { %15506 = shalt.err (!%p15503_p6)
}
  0x8b   : > { %s19438_s13 = smov 4   ;;  %s19439_s15 = smov 64  }
  0x8c   : > { %14840 = dma.hbm_to_vmem [thread:$0]  (!%p19435_p8), %s15964_s7, 2048, %s15968_s22, %s416_s10, %s19439_s15, %s19439_s15, %s19438_s13  }
  0x8d   : > { %s15507_s21 = scalar_lea.hbm %s19260_s9, 1024  ;;  %p19440_p7 = scmp.ne.s32.totalorder %s19433_s20, 0 }
  0x8e   : > { %p15508_p0 = scmp.ne.s32.totalorder %s19260_s9, %s15507_s21  ;;  %p15514_p5 = scmp.lt.u32.totalorder %s15507_s21, %s19260_s9 }
  0x90   : > { %p15510_p11 = pnand %p15508_p0, %p19440_p7 }
  0x92   : > { %p15511_p13 = pneg %p15510_p11 }
  0x94   : > { %p15516_p10 = pnand %p15514_p5, %p15511_p13 }
  0x96   : > { %15519 = shalt.err (!%p15516_p10)
}
  0x97   : > { %s15520_s4 = scalar_lea.vmem %s339_s23, 1024  ;;  %p15528_p2 = scmp.lt.s32.totalorder %s339_s23, %s339_s23 }
  0x98   : > { %p15521_p1 = scmp.ne.s32.totalorder %s339_s23, %s15520_s4  ;;  %p15529_p4 = scmp.lt.s32.totalorder %s15520_s4, %s15520_s4 }
  0x9a   : > { %p15523_p3 = pnand %p15521_p1, %p19440_p7  ;;  %p15530_p6 = por %p15529_p4, %p15528_p2 }
  0x9c   : > { %p15524_p12 = pneg %p15523_p3 }
  0x9e   : > { %p15531_p8 = pnand %p15530_p6, %p15524_p12 }
  0xa0   : > { %15534 = shalt.err (!%p15531_p8)
}
  0xa1   : > { %p19441_p0 = scmp.ne.s32.totalorder %s19430_s27, 0  ;;  %s14791_s20 = smul.u32 192, %s15852_s28 }
  0xa2   : > { %s14792_s2 = smul.u32 3072, %s15709_s16  ;;  %s353_s12 = scalar_lea.sflag [#allocation4], %s15852_s28 }
  0xa3   : > { %14827 = dma.hbm_to_vmem [thread:$0]  (!%p19441_p0), %s19260_s9, 1024, %s339_s23, [#allocation15], %s19439_s15, %s19439_s15, %s19438_s13  }
  0xa4   : > { %s16026_s21 = scalar_lea.hbm %s19252_s1, %s14792_s2  ;;  %s356_s27 = scalar_lea.vmem [#allocation3], %s14791_s20 }
  0xa5   : > { %s363_s26 = sshll.u32 %s356_s27, 4  ;;  %s15535_s17 = scalar_lea.hbm %s16026_s21, 3072  ;;  %s16028_s26 = int_to_ptr.vmem [resolvable:$true] %s363_s26 }
  0xa6   : > { %p15536_p8 = scmp.ne.s32.totalorder %s16026_s21, %s15535_s17  ;;  %s15540_s15 = scalar_lea.hbm %s19252_s1, 6144 }
  0xa7   : > { %p15541_p13 = scmp.lt.u32.totalorder %s16026_s21, %s19252_s1  ;;  %p15542_p5 = scmp.lt.u32.totalorder %s15540_s15, %s15535_s17 }
  0xa8   : > { %p15538_p7 = pnand %p15536_p8, %p15923_p9  ;;  %p15544_p1 = scmp.lt.u32.totalorder %s15535_s17, %s16026_s21 }
  0xa9   : > { %p15543_p10 = por %p15542_p5, %p15541_p13 }
  0xaa   : > { %p15539_p11 = pneg %p15538_p7 }
  0xab   : > { %p15545_p3 = por %p15544_p1, %p15543_p10 }
  0xad   : > { %p15546_p12 = pnand %p15545_p3, %p15539_p11 }
  0xaf   : > { %15549 = shalt.err (!%p15546_p12)
}
  0xb0   : > { %s15550_s22 = scalar_lea.vmem %s16028_s26, 3072  ;;  %s15718_s20 = smov [#allocation3]  }
  0xb1   : > { %p15551_p2 = scmp.ne.s32.totalorder %s16028_s26, %s15550_s22  ;;  %s15555_s2 = sshll.u32 %s15718_s20, 4  ;;  %s15556_s2 = int_to_ptr.vmem [resolvable:$false] %s15555_s2 }
  0xb2   : > { %s15557_s0 = scalar_lea.vmem %s15556_s2, 6144  ;;  %p15558_p0 = scmp.lt.s32.totalorder %s16028_s26, %s15556_s2 }
  0xb3   : > { %p15553_p4 = pnand %p15551_p2, %p15923_p9  ;;  %p15559_p8 = scmp.lt.s32.totalorder %s15557_s0, %s15550_s22 }
  0xb5   : > { %p15554_p6 = pneg %p15553_p4  ;;  %p15560_p7 = por %p15559_p8, %p15558_p0 }
  0xb7   : > { %p15561_p13 = pnand %p15560_p7, %p15554_p6 }
  0xb9   : > { %15564 = shalt.err (!%p15561_p13)
}
  0xba   : > { %s15719_s4 = smov 192   ;;  %s15720_s27 = smov 12  }
  0xbb   : > { %p19442_p11 = scmp.ne.s32.totalorder %s19431_s29, 0  ;;  %s15565_s17 = scalar_lea.hbm %s15955_s19, 2048 }
  0xbc   : > { %p15566_p5 = scmp.ne.s32.totalorder %s15955_s19, %s15565_s17  ;;  %s15570_s15 = scalar_lea.hbm %s19254_s3, 4096 }
  0xbd   : > { %14831 = dma.hbm_to_vmem [thread:$0]  (!%p19442_p11), %s16026_s21, 3072, %s16028_s26, %s353_s12, %s15719_s4, %s15719_s4, %s15720_s27  }
  0xbe   : > { %p15568_p10 = pnand %p15566_p5, %p15923_p9  ;;  %p15571_p3 = scmp.lt.u32.totalorder %s15955_s19, %s19254_s3 }
  0xbf   : > { %p15572_p12 = scmp.lt.u32.totalorder %s15570_s15, %s15565_s17  ;;  %p15574_p4 = scmp.lt.u32.totalorder %s15565_s17, %s15955_s19 }
  0xc0   : > { %p15569_p1 = pneg %p15568_p10 }
  0xc1   : > { %p15573_p2 = por %p15572_p12, %p15571_p3 }
  0xc3   : > { %p15575_p6 = por %p15574_p4, %p15573_p2 }
  0xc5   : > { %p15576_p0 = pnand %p15575_p6, %p15569_p1 }
  0xc7   : > { %15579 = shalt.err (!%p15576_p0)
}
  0xc8   : > { %s15580_s21 = scalar_lea.vmem %s15959_s18, 2048  ;;  %s15721_s26 = smov [#allocation7]  }
  0xc9   : > { %p15581_p8 = scmp.ne.s32.totalorder %s15959_s18, %s15580_s21  ;;  %s15585_s12 = sshll.u32 %s15721_s26, 4  ;;  %s15586_s12 = int_to_ptr.vmem [resolvable:$false] %s15585_s12 }
  0xca   : > { %s15587_s22 = scalar_lea.vmem %s15586_s12, 4096  ;;  %p15588_p5 = scmp.lt.s32.totalorder %s15959_s18, %s15586_s12 }
  0xcb   : > { %p15583_p7 = pnand %p15581_p8, %p15923_p9  ;;  %p15589_p10 = scmp.lt.s32.totalorder %s15587_s22, %s15580_s21 }
  0xcd   : > { %p15584_p13 = pneg %p15583_p7  ;;  %p15590_p3 = por %p15589_p10, %p15588_p5 }
  0xcf   : > { %p15591_p12 = pnand %p15590_p3, %p15584_p13 }
  0xd1   : > { %15594 = shalt.err (!%p15591_p12)
}
  0xd2   : > { %s15722_s20 = smov 128   ;;  %s15723_s2 = smov 8  }
  0xd3   : > { %s19443_s0 = scalar_lea.sflag [#allocation6], %s15888_s30  ;;  %s12873_s4 = sshll.u32 %s15852_s28, 4 }
  0xd4   : > { %14837 = dma.hbm_to_vmem [thread:$0]  (!%p19442_p11), %s15955_s19, 2048, %s15959_s18, %s19443_s0, %s15722_s20, %s15722_s20, %s15723_s2  }
  0xd5   : > { %s13166_s27 = sshll.u32 %s15709_s16, 8  ;;  %s440_s15 = scalar_lea.vmem [#allocation10], %s12873_s4 }
  0xd6   : > { %s16085_s13 = scalar_lea.hbm %s19256_s5, %s13166_s27  ;;  %s447_s11 = sshll.u32 %s440_s15, 4  ;;  %s16087_s11 = int_to_ptr.vmem [resolvable:$true] %s447_s11 }
  0xd7   : > { %s12876_s7 = sshll.u32 %s15852_s28, 1  ;;  %s15595_s21 = scalar_lea.hbm %s16085_s13, 256 }
  0xd8   : > { %p15596_p1 = scmp.ne.s32.totalorder %s16085_s13, %s15595_s21  ;;  %s15600_s26 = scalar_lea.hbm %s19256_s5, 512 }
  0xd9   : > { %p15601_p6 = scmp.lt.u32.totalorder %s16085_s13, %s19256_s5  ;;  %p15602_p0 = scmp.lt.u32.totalorder %s15600_s26, %s15595_s21 }
  0xda   : > { %p15598_p2 = pnand %p15596_p1, %p15923_p9  ;;  %p15604_p7 = scmp.lt.u32.totalorder %s15595_s21, %s16085_s13 }
  0xdb   : > { %p15603_p8 = por %p15602_p0, %p15601_p6 }
  0xdc   : > { %p15599_p4 = pneg %p15598_p2 }
  0xdd   : > { %p15605_p13 = por %p15604_p7, %p15603_p8 }
  0xdf   : > { %p15606_p5 = pnand %p15605_p13, %p15599_p4 }
  0xe1   : > { %15609 = shalt.err (!%p15606_p5)
}
  0xe2   : > { %s15610_s0 = scalar_lea.vmem %s16087_s11, 256  ;;  %s15724_s4 = smov [#allocation10]  }
  0xe3   : > { %p15611_p10 = scmp.ne.s32.totalorder %s16087_s11, %s15610_s0  ;;  %s15615_s27 = sshll.u32 %s15724_s4, 4  ;;  %s15616_s27 = int_to_ptr.vmem [resolvable:$false] %s15615_s27 }
  0xe4   : > { %s15617_s17 = scalar_lea.vmem %s15616_s27, 512  ;;  %p15618_p1 = scmp.lt.s32.totalorder %s16087_s11, %s15616_s27 }
  0xe5   : > { %p15613_p3 = pnand %p15611_p10, %p15923_p9  ;;  %p15619_p2 = scmp.lt.s32.totalorder %s15617_s17, %s15610_s0 }
  0xe7   : > { %p15614_p12 = pneg %p15613_p3  ;;  %p15620_p6 = por %p15619_p2, %p15618_p1 }
  0xe9   : > { %p15621_p0 = pnand %p15620_p6, %p15614_p12 }
  0xeb   : > { %15624 = shalt.err (!%p15621_p0)
}
  0xec   : > { %14843 = dma.hbm_to_vmem [thread:$0]  (!%p19442_p11), %s16085_s13, 256, %s16087_s11, %s416_s10, %s15722_s20, %s15722_s20, %s15723_s2  }
  0xed   : > { %s13167_s23 = sshll.u32 %s15709_s16, 5  ;;  %s461_s18 = scalar_lea.vmem [#allocation11], %s12876_s7 }
  0xee   : > { %s16120_s19 = scalar_lea.hbm %s19257_s6, %s13167_s23  ;;  %s469_s26 = sshll.u32 %s461_s18, 4  ;;  %s470_s26 = int_to_ptr.vmem [resolvable:$true] %s469_s26 }
  0xef   : > { %s458_s12 = scalar_lea.sflag [#allocation12], %s15888_s30  ;;  %s15625_s22 = scalar_lea.hbm %s16120_s19, 32 }
  0xf0   : > { %p15626_p4 = scmp.ne.s32.totalorder %s16120_s19, %s15625_s22  ;;  %s15630_s20 = scalar_lea.hbm %s19257_s6, 64 }
  0xf1   : > { %p15631_p13 = scmp.lt.u32.totalorder %s16120_s19, %s19257_s6  ;;  %p15632_p5 = scmp.lt.u32.totalorder %s15630_s20, %s15625_s22 }
  0xf2   : > { %p15628_p8 = pnand %p15626_p4, %p15923_p9  ;;  %p15634_p3 = scmp.lt.u32.totalorder %s15625_s22, %s16120_s19 }
  0xf3   : > { %p15633_p10 = por %p15632_p5, %p15631_p13 }
  0xf4   : > { %p15629_p7 = pneg %p15628_p8 }
  0xf5   : > { %p15635_p12 = por %p15634_p3, %p15633_p10 }
  0xf7   : > { %p15636_p1 = pnand %p15635_p12, %p15629_p7 }
  0xf9   : > { %15639 = shalt.err (!%p15636_p1)
}
  0xfa   : > { %s15640_s28 = scalar_lea.vmem %s470_s26, 32  ;;  %s15725_s30 = smov [#allocation11]  }
  0xfb   : > { %p15641_p2 = scmp.ne.s32.totalorder %s470_s26, %s15640_s28  ;;  %s15645_s11 = sshll.u32 %s15725_s30, 4  ;;  %s15646_s11 = int_to_ptr.vmem [resolvable:$false] %s15645_s11 }
  0xfc   : > { %s15647_s7 = scalar_lea.vmem %s15646_s11, 64  ;;  %p15648_p4 = scmp.lt.s32.totalorder %s470_s26, %s15646_s11 }
  0xfd   : > { %p15643_p6 = pnand %p15641_p2, %p15923_p9  ;;  %p15649_p8 = scmp.lt.s32.totalorder %s15647_s7, %s15640_s28 }
  0xff   : > { %p15644_p0 = pneg %p15643_p6  ;;  %p15650_p11 = por %p15649_p8, %p15648_p4 }
 0x101   : > { %p15651_p5 = pnand %p15650_p11, %p15644_p0 }
 0x103   : > { %15654 = shalt.err (!%p15651_p5)
}
 0x104   : > { %p19444_p13 = scmp.ne.s32.totalorder %s19431_s29, 0  ;;  %p19445_p7 = scmp.ne.s32.totalorder %s19429_s24, 0 }
 0x106   : > { %14846 = dma.hbm_to_vmem [thread:$0]  (!%p19444_p13), %s16120_s19, 32, %s470_s26, %s458_s12  }
 0x107   : > { %478 = sbr.rel (%p19445_p7) target bundleno = 5954 (0x1742), region = 60 }
 0x10e   : > { %s19446_s25 = sld [smem:[#allocation27_spill]]  ;;  %s480_s0 = sand.u32 1, %s15701_s14  }
 0x10f   : > { %s14793_s4 = smul.u32 192, %s480_s0  ;;  %s481_s27 = scalar_lea.sflag [#allocation4], %s480_s0 }
 0x111   : > { %s16145_s17 = scalar_lea.vmem [#allocation3], %s14793_s4 }
 0x114   : > { %p19447_p9 = scmp.ne.s32.totalorder %s19446_s25, 0 }
 0x116   : > { %15672 = dma.done.wait (%p19447_p9), %s481_s27, 3072  }
 0x117   : > { %15674 = vsyncadd (%p19447_p9), %s481_s27, 4294964224  ;;  %s19448_s23 = sld [smem:[#allocation24_spill]]  ;;  %s12880_s15 = sshll.u32 %s480_s0, 6 }
 0x118   : > { %s16152_s19 = scalar_lea.vmem [#allocation5], %s12880_s15 }
 0x11d   : > { %s489_s29 = sand.u32 1, %s19448_s23  }
 0x11e   : > { %s490_s21 = scalar_lea.sflag [#allocation6], %s489_s29 }
 0x11f   : > { %15676 = dma.done.wait (%p19447_p9), %s490_s21, 3072  }
 0x120   : > { %15678 = vsyncadd (%p19447_p9), %s490_s21, 4294964224  ;;  %s12881_s24 = sshll.u32 %s480_s0, 7  ;;  %s508_s26 = scalar_lea.sflag [#allocation9], %s489_s29 }
 0x121   : > { %s16158_s18 = scalar_lea.vmem [#allocation7], %s12881_s24  ;;  %s16160_s12 = scalar_lea.vmem [#allocation8], %s12881_s24 }
 0x122   : > { %15680 = dma.done.wait (%p19447_p9), %s508_s26, 2304  }
 0x123   : > { %15682 = vsyncadd (%p19447_p9), %s508_s26, 4294964992  ;;  %s12883_s22 = sshll.u32 %s480_s0, 4  ;;  %s12884_s16 = sshll.u32 %s480_s0, 1 }
 0x124   : > { %s16166_s10 = scalar_lea.vmem [#allocation10], %s12883_s22  ;;  %s526_s20 = scalar_lea.sflag [#allocation12], %s489_s29 }
 0x125   : > { %s16168_s2 = scalar_lea.vmem [#allocation11], %s12884_s16 }
 0x126   : > { %15684 = dma.done.wait (%p19447_p9), %s526_s20, 32  }
 0x127   : > { %15686 = vsyncadd (%p19447_p9), %s526_s20, 4294967264  ;;  %p19449_p11 = scmp.eq.s32.totalorder %s19448_s23, 0 }
 0x129   : > { %15688 = dma.done.wait (%p19449_p11), [#allocation12], 1024   ;;  %p19450_p10 = pmov %p19449_p11 }
 0x12b   : > { %15690 = vsyncadd (%p19450_p10), [#allocation12], 4294966272  ;;  %p19451_p3 = pmov %p19450_p10 }
 0x12d   : > { %15692 = dma.done.wait (%p19451_p3), [#allocation15], 1040   ;;  %p19452_p12 = pmov %p19451_p3 }
 0x12e   : > { %p19453_p1 = scmp.ne.s32.totalorder %s19448_s23, 0 }
 0x12f   : > { %15694 = vsyncadd (%p19452_p12), [#allocation15], 4294966256  ;;  %s19454_s30 = sld [smem:[#allocation98_spill]] (!%p19453_p1) }
 0x130   : > { %602 = sbr.rel (%p19453_p1) target bundleno = 313 (0x139), region = 100 }
 0x135   : > { %v603_v0 = vld [vmem:[%s19454_s30] sm:$0xff] (!%p19453_p1)  ;;  %v604_v1 = vld [vmem:[%s19454_s30 + $0x8] sm:$0xff] (!%p19453_p1)  ;;  %v605_v2 = vld [vmem:[%s19454_s30 + $0x10] sm:$0xff] (!%p19453_p1) }
 0x136   : > { %609 = vst [vmem:[#allocation2] sm:$0xff] (!%p19453_p1), %v603_v0  ;;  %610 = vst [vmem:[#allocation2 + $0x8] sm:$0xff] (!%p19453_p1), %v604_v1  ;;  %v606_v3 = vld [vmem:[%s19454_s30 + $0x18] sm:$0xff] (!%p19453_p1)  ;;  %v607_v4 = vld [vmem:[%s19454_s30 + $0x20] sm:$0xff] (!%p19453_p1) }
 0x137   : > { %611 = vst [vmem:[#allocation2 + $0x10] sm:$0xff] %v605_v2  ;;  %v608_v5 = vld [vmem:[%s19454_s30 + $0x28] sm:$0xf]  ;;  %612 = vst [vmem:[#allocation2 + $0x18] sm:$0xff] %v606_v3 }
 0x138   : > { %613 = vst [vmem:[#allocation2 + $0x20] sm:$0xff] %v607_v4  ;;  %614 = vst [vmem:[#allocation2 + $0x28] sm:$0xf] %v608_v5 }
 0x139 PF: > { %v14904_v6 = vld [vmem:[%s16145_s17 + $0x4] ss:$12 sps:$4 sm:$0xff]   ;;  %v14906_v7 = vld [vmem:[%s16145_s17] ss:$12 sps:$4 sm:$0xff]   ;;  %v19286_v8 = vmov 0   ;;  %v19292_v9 = vmov 0.0   ;;  %v906_v41 = vlaneseq }
 0x13a   : > { %818 = vmatprep.mubr.bf16.mxu0 %v19286_v8  ;;  %13603 = vmatprep.subr.bf16.mxu1 %v19292_v9  ;;  %v14907_v10 = vld [vmem:[%s16145_s17 + $0x1c] ss:$12 sps:$4 sm:$0xff]   ;;  %vm15728_vm0 = vmmov 0   ;;  %v14909_v11 = vld [vmem:[%s16145_s17 + $0x18] ss:$12 sps:$4 sm:$0xff]   ;;  %vm1387_vm1 = vcmask 261120  }
 0x13b   : > { %786 = vmatprep.subr.bf16.mxu0 %v14904_v6  ;;  %13619 = vmatprep.mubr.msk.bf16.mxu1 %vm15728_vm0, %v19292_v9  ;;  %v14910_v12 = vld [vmem:[%s16145_s17 + $0x34] ss:$12 sps:$4 sm:$0xff]   ;;  %v14912_v13 = vld [vmem:[%s16145_s17 + $0x30] ss:$12 sps:$4 sm:$0xff]   ;;  %v14913_v14 = vld [vmem:[%s16145_s17 + $0x4c] ss:$12 sps:$4 sm:$0xff]  }
 0x13c   : > { %787 = vmatpush1.bf16.msra.mxu0 %v14906_v7  ;;  %v14915_v15 = vld [vmem:[%s16145_s17 + $0x48] ss:$12 sps:$4 sm:$0xff]   ;;  %v14916_v16 = vld [vmem:[%s16145_s17 + $0x64] ss:$12 sps:$4 sm:$0xff]   ;;  %v14918_v18 = vld [vmem:[%s16145_s17 + $0x60] ss:$12 sps:$4 sm:$0xff]  }
 0x13d   : > { %788 = vmatprep.subr.bf16.mxu0 %v14907_v10  ;;  %v14928_v17 = vld [vmem:[%s16145_s17 + $0x8] ss:$12 sps:$4 sm:$0xff]   ;;  %v14929_v19 = vld [vmem:[%s16145_s17 + $0x20] ss:$12 sps:$4 sm:$0xff]   ;;  %v14921_v21 = vld [vmem:[%s16145_s17 + $0x78] ss:$12 sps:$4 sm:$0xff]  }
 0x13e   : > { %13604 = vmatpush3.bf16.msra.mxu1 %v14928_v17  ;;  %v14919_v20 = vld [vmem:[%s16145_s17 + $0x7c] ss:$12 sps:$4 sm:$0xff]   ;;  %v14930_v22 = vld [vmem:[%s16145_s17 + $0x38] ss:$12 sps:$4 sm:$0xff]   ;;  %v14922_v23 = vld [vmem:[%s16145_s17 + $0x94] ss:$12 sps:$4 sm:$0xff]  }
 0x13f   : > { %13605 = vmatprep.subr.bf16.mxu1 %v19292_v9  ;;  %v14924_v24 = vld [vmem:[%s16145_s17 + $0x90] ss:$12 sps:$4 sm:$0xff]   ;;  %v14925_v26 = vld [vmem:[%s16145_s17 + $0xac] ss:$12 sps:$4 sm:$0xff]   ;;  %v14927_v27 = vld [vmem:[%s16145_s17 + $0xa8] ss:$12 sps:$4 sm:$0xff]  }
 0x140   : > { %789 = vmatpush1.bf16.msra.mxu0 %v14909_v11  ;;  %v14931_v25 = vld [vmem:[%s16145_s17 + $0x50] ss:$12 sps:$4 sm:$0xff]   ;;  %v14932_v30 = vld [vmem:[%s16145_s17 + $0x68] ss:$12 sps:$4 sm:$0xff]   ;;  %v14933_v31 = vld [vmem:[%s16145_s17 + $0x80] ss:$12 sps:$4 sm:$0xff]  }
 0x141   : > { %790 = vmatprep.subr.bf16.mxu0 %v14910_v12  ;;  %v615_v28 = vld [vmem:[#allocation2] sm:$0xff]  ;;  %v616_v29 = vld [vmem:[#allocation2 + $0x8] sm:$0xff]  ;;  %v617_v33 = vld [vmem:[#allocation2 + $0x10] sm:$0xff]  ;;  %v16249_v42 = vshrl.u32 %v906_v41, 7  ;;  %v15729_v43 = vmov 1983009808  }
 0x142   : > { %13606 = vmatpush3.bf16.msra.mxu1 %v14929_v19  ;;  %v623_v32 = vpack.c.bf16 %v616_v29, %v615_v28  ;;  %v618_v34 = vld [vmem:[#allocation2 + $0x18] sm:$0xff]  ;;  %v14934_v35 = vld [vmem:[%s16145_s17 + $0x98] ss:$12 sps:$4 sm:$0xff]   ;;  %v14935_v36 = vld [vmem:[%s16145_s17 + $0xb0] ss:$12 sps:$4 sm:$0xff]   ;;  %v944_v44 = vunpack.c.l.s4 %v15729_v43  ;;  %vm2669_vm2 = vcmask 1040384  }
 0x143   : > { %13607 = vmatprep.subr.bf16.mxu1 %v19292_v9  ;;  %v624_v37 = vpack.c.bf16 %v618_v34, %v617_v33  ;;  %v619_v38 = vld [vmem:[#allocation2 + $0x20] sm:$0xff]  ;;  %v620_v39 = vld [vmem:[#allocation2 + $0x28] sm:$0xf]  ;;  %19455 = vst [vmem:[#allocation28_spill] sm:$0xff] %v16249_v42  ;;  %v19285_v45 = vsub.s32 1, %v16249_v42  ;;  %v16256_v47 = vsub.s32 0, %v16249_v42 }
 0x144   : > { %791 = vmatpush1.bf16.msra.mxu0 %v14912_v13  ;;  %v625_v40 = vpack.c.bf16 %v620_v39, %v619_v38  ;;  %v16253_v46 = vld [vmem:[%s16166_s10] sm:$0xff]  ;;  %v945_v48 = vunpack.c.0.s8 %v944_v44  ;;  %vm2400_vm3 = vcmask 9216   ;;  %s15730_s17 = smov 96   ;;  %vm2665_vm4 = vcmask 15360   ;;  %s15731_s24 = smov 64  }
 0x145   : > { %792 = vmatprep.subr.bf16.mxu0 %v14913_v14  ;;  %19456 = vst [vmem:[#allocation29_spill] sm:$0xff] %v16256_v47  ;;  %v16261_v49 = vrot.slane %v16253_v46, %v19285_v45  ;;  %v16265_v51 = vrot.slane %v16253_v46, %v16256_v47  ;;  %s15732_s26 = smov 32   ;;  %vm11867_vm5 = vcmask 1043456  }
 0x146   : > { %13608 = vmatpush3.bf16.msra.mxu1 %v14930_v22  ;;  %v16268_v52 = vsub.s32 %v945_v48, %v16249_v42 }
 0x147   : > { %13609 = vmatprep.subr.bf16.mxu1 %v19292_v9 }
 0x148   : > { %793 = vmatpush1.bf16.msra.mxu0 %v14915_v15  ;;  %19457 = vst [vmem:[#allocation30_spill] sm:$0xff] %v16268_v52 }
 0x149   : > { %794 = vmatprep.subr.bf16.mxu0 %v14916_v16 }
 0x14a   : > { %13610 = vmatpush3.bf16.msra.mxu1 %v14931_v25 }
 0x14b   : > { %13611 = vmatprep.subr.bf16.mxu1 %v19292_v9 }
 0x14c   : > { %795 = vmatpush1.bf16.msra.mxu0 %v14918_v18 }
 0x14d   : > { %796 = vmatprep.subr.bf16.mxu0 %v14919_v20 }
 0x14e   : > { %13612 = vmatpush3.bf16.msra.mxu1 %v14932_v30 }
 0x14f   : > { %13613 = vmatprep.subr.bf16.mxu1 %v19292_v9 }
 0x150   : > { %797 = vmatpush1.bf16.msra.mxu0 %v14921_v21 }
 0x151   : > { %798 = vmatprep.subr.bf16.mxu0 %v14922_v23 }
 0x152   : > { %13614 = vmatpush3.bf16.msra.mxu1 %v14933_v31 }
 0x153   : > { %13615 = vmatprep.subr.bf16.mxu1 %v19292_v9 }
 0x154   : > { %799 = vmatpush1.bf16.msra.mxu0 %v14924_v24 }
 0x155   : > { %800 = vmatprep.subr.bf16.mxu0 %v14925_v26 }
 0x156   : > { %13616 = vmatpush3.bf16.msra.mxu1 %v14934_v35 }
 0x157   : > { %13617 = vmatprep.subr.bf16.mxu1 %v19292_v9 }
 0x158   : > { %801 = vmatpush1.bf16.msra.mxu0 %v14927_v27 }
 0x159   : > { %13631 = vmatprep.subr.bf16.mxu0 %v19292_v9 }
 0x15a   : > { %13618 = vmatpush3.bf16.msra.mxu1 %v14935_v36 }
 0x15b   : > { %819 = vmatmul.mubr.bf16.vlgmr.msra.gmra.mrb[0].mxu0 %v623_v32  ;;  %13637 = vmatprep.subr.bf16.mxu1 %v19292_v9 }
 0x15c   : > { %828 = vmatprep.mubr.bf16.mxu0 %v19286_v8 }
 0x15d   : > { %13620 = vmatmul.mubr.bf16.vlgmr.msra.gmra.mrb[0].mxu1 %v623_v32 }
 0x15e   : > { %13623 = vmatprep.mubr.msk.bf16.mxu1 %vm15728_vm0, %v19292_v9 }
 0x163   : > { %829 = vmatmul.mubr.bf16.gmra.mrb[4].mxu0 %v624_v37 }
 0x164   : > { %838 = vmatprep.mubr.bf16.mxu0 %v19286_v8 }
 0x165   : > { %13624 = vmatmul.mubr.bf16.gmra.mrb[4].mxu1 %v624_v37 }
 0x166   : > { %13627 = vmatprep.mubr.msk.bf16.mxu1 %vm15728_vm0, %v19292_v9 }
 0x16b   : > { %839 = vmatmul.mubr.bf16.gmra.mrb[8].mxu0 %v625_v40 }
 0x16c   : > { %13633 = vmatprep.mubr.msk.bf16.mxu0 %vm15728_vm0, %v19292_v9 }
 0x16d   : > { %13628 = vmatmul.mubr.bf16.gmra.mrb[8].mxu1 %v625_v40 }
 0x16e   : > { %13639 = vmatprep.mubr.msk.bf16.mxu1 %vm15728_vm0, %v19292_v9 }
 0x22e   : > { %v820_v50 = vpop.f32.mrb[0].mxu0 }
 0x22f   : > { %v822_v53 = vpop.f32.mrb[1].mxu0  ;;  %v910_v57 = vadd.f32 %v16265_v51, %v820_v50 }
 0x230   : > { %v920_v54 = vadd.f32 %v16261_v49, %v822_v53  ;;  %v824_v55 = vpop.f32.mrb[2].mxu0  ;;  %v16287_v10 = vpop.f32.mrb[0].mxu1 }
 0x231   : > { %v826_v56 = vpop.f32.mrb[3].mxu0  ;;  %v949_v61 = vrot.slane %v910_v57, %v16268_v52  ;;  %v942_v5 = vcombine.high %v910_v57, %v910_v57  ;;  %v13621_v11 = vpop.f32.mrb[1].mxu1  ;;  %v911_v31 = vadd.f32 %v16265_v51, %v824_v55 }
 0x232   : > { %v1070_v58 = vrot.slane %v920_v54, %v16268_v52  ;;  %v1063_v59 = vcombine.high %v920_v54, %v920_v54  ;;  %v921_v14 = vadd.f32 %v16261_v49, %v826_v56  ;;  %v16293_v16 = vpop.f32.mrb[2].mxu1 }
 0x233   : > { %v957_v6 = vcombine.high %v949_v61, %v949_v61  ;;  %v1299_v12 = vmul.f32 0.17677669, %v949_v61  ;;  %v13622_v17 = vpop.f32.mrb[3].mxu1  ;;  %v956_v18 = vrot.slane %v942_v5, %v16268_v52  ;;  %v966_v43 = vrot.slane %v911_v31, %v16268_v52 }
 0x234   : > { %v1078_v60 = vcombine.high %v1070_v58, %v1070_v58  ;;  %v16274_v62 = vpack.c.bf16 %v1070_v58, %v1070_v58  ;;  %v1077_v1 = vrot.slane %v1063_v59, %v16268_v52  ;;  %v1087_v26 = vrot.slane %v921_v14, %v16268_v52 }
 0x235   : > { %v1300_v19 = vmul.f32 0.17677669, %v957_v6  ;;  %v16302_v24 = vpack.c.bf16 %v1299_v12, %v1299_v12  ;;  %v958_v29 = vcombine.high %v956_v18, %v956_v18  ;;  %v1301_v35 = vmul.f32 0.17677669, %v956_v18 }
 0x236   : > { %v16276_v63 = vpop.f32.mrb[4].mxu0  ;;  %v16279_v2 = vpack.c.bf16 %v1078_v60, %v1078_v60  ;;  %v1392_v7 = vsel %vm1387_vm1, %v16274_v62, 0  ;;  %v1079_v13 = vcombine.high %v1077_v1, %v1077_v1  ;;  %v16296_v20 = vpack.c.bf16 %v1077_v1, %v1077_v1 }
 0x237   : > { %v832_v0 = vpop.f32.mrb[5].mxu0  ;;  %13632 = vmatpush3.bf16.xpose.msra.mxu0 %v1392_v7  ;;  %19459 = vst [vmem:[#allocation32_spill] sm:$0xff] %v16302_v24  ;;  %v16309_v30 = vpack.c.bf16 %v1300_v19, %v1300_v19  ;;  %v1080_v36 = vcombine.high %v921_v14, %v921_v14  ;;  %v1095_v37 = vcombine.high %v1087_v26, %v1087_v26  ;;  %v1302_v41 = vmul.f32 0.17677669, %v958_v29 }
 0x238   : > { %v16281_v3 = vpop.f32.mrb[6].mxu0  ;;  %v1438_v15 = vsel %vm1387_vm1, %v16279_v2, 0  ;;  %13643 = vmatprep.subr.bf16.mxu0 %v19292_v9  ;;  %19458 = vst [vmem:[#allocation31_spill] sm:$0xff] %v16296_v20  ;;  %v16304_v25 = vpack.c.bf16 %v1079_v13, %v1079_v13  ;;  %v1484_v32 = vsel %vm1387_vm1, %v16296_v20, 0  ;;  %v16316_v33 = vpop.f32.mrb[4].mxu1  ;;  %v16330_v44 = vpack.c.bf16 %v1087_v26, %v1087_v26 }
 0x239   : > { %v16283_v4 = vpop.f32.mrb[7].mxu0  ;;  %13638 = vmatpush3.bf16.xpose.msra.mxu1 %v1438_v15  ;;  %19461 = vst [vmem:[#allocation34_spill] sm:$0xff] %v16309_v30  ;;  %v13625_v34 = vpop.f32.mrb[5].mxu1  ;;  %v16333_v48 = vpack.c.bf16 %v1301_v35, %v1301_v35  ;;  %v1094_v50 = vrot.slane %v1080_v36, %v16268_v52  ;;  %v16336_v53 = vpack.c.bf16 %v1095_v37, %v1095_v37  ;;  %v1303_v61 = vmul.f32 0.17677669, %v966_v43 }
 0x23a   : > { %13649 = vmatprep.subr.bf16.mxu1 %v19292_v9  ;;  %19460 = vst [vmem:[#allocation33_spill] sm:$0xff] %v16304_v25  ;;  %v1530_v38 = vsel %vm1387_vm1, %v16304_v25, 0  ;;  %v16325_v39 = vpop.f32.mrb[6].mxu1  ;;  %19462 = vst [vmem:[#allocation35_spill] sm:$0xff] %v16330_v44  ;;  %v959_v54 = vcombine.high %v911_v31, %v911_v31  ;;  %v16338_v55 = vpack.c.bf16 %v1302_v41, %v1302_v41  ;;  %v1576_v57 = vsel %vm1387_vm1, %v16330_v44, 0 }
 0x23b   : > { %v13626_v40 = vpop.f32.mrb[7].mxu1  ;;  %19463 = vst [vmem:[#allocation36_spill] sm:$0xff] %v16333_v48  ;;  %19464 = vst [vmem:[#allocation37_spill] sm:$0xff] %v16336_v53  ;;  %v974_v56 = vcombine.high %v966_v43, %v966_v43  ;;  %v922_v58 = vadd.f32 %v16261_v49, %v832_v0  ;;  %v1096_v1 = vcombine.high %v1094_v50, %v1094_v50  ;;  %v1622_v5 = vsel %vm1387_vm1, %v16336_v53, 0 }
 0x23c   : > { %19465 = vst [vmem:[#allocation38_spill] sm:$0xff] %v16338_v55  ;;  %v973_v0 = vrot.slane %v959_v54, %v16268_v52  ;;  %v928_v12 = vsub.s32 2, %v16249_v42  ;;  %v16364_v15 = vpack.c.bf16 %v1094_v50, %v1094_v50  ;;  %v16368_v18 = vpack.c.bf16 %v1303_v61, %v1303_v61 }
 0x23d   : > { %v1304_v14 = vmul.f32 0.17677669, %v974_v56  ;;  %v1104_v17 = vrot.slane %v922_v58, %v16268_v52  ;;  %v16370_v19 = vpack.c.bf16 %v1096_v1, %v1096_v1  ;;  %v1097_v34 = vcombine.high %v922_v58, %v922_v58 }
 0x23e   : > { %v840_v21 = vpop.f32.mrb[8].mxu0  ;;  %13634 = vmatmul.mubr.msk.bf16.vlgmr.msra.gmra.mrb[12].mxu0 %vm1387_vm1, %v16302_v24  ;;  %19466 = vst [vmem:[#allocation39_spill] sm:$0xff] %v16364_v15  ;;  %19467 = vst [vmem:[#allocation40_spill] sm:$0xff] %v16368_v18  ;;  %v1668_v31 = vsel %vm1387_vm1, %v16364_v15, 0 }
 0x23f   : > { %v16300_v22 = vadd.f32 %v16265_v51, %v840_v21  ;;  %v842_v23 = vpop.f32.mrb[9].mxu0  ;;  %13644 = vmatpush3.bf16.xpose.msra.mxu0 %v1484_v32  ;;  %13645 = vmatprep.mubr.msk.bf16.mxu0 %vm15728_vm0, %v19292_v9  ;;  %19468 = vst [vmem:[#allocation41_spill] sm:$0xff] %v16370_v19  ;;  %v975_v21 = vcombine.high %v973_v0, %v973_v0  ;;  %v1305_v32 = vmul.f32 0.17677669, %v973_v0 }
 0x240   : > { %v844_v27 = vpop.f32.mrb[10].mxu0  ;;  %13640 = vmatmul.mubr.msk.bf16.vlgmr.msra.gmra.mrb[12].mxu1 %vm1387_vm1, %v16309_v30  ;;  %13655 = vmatprep.subr.bf16.mxu0 %v19292_v9  ;;  %v16345_v59 = vpop.f32.mrb[8].mxu1  ;;  %v16358_v7 = vadd.f32 %v16261_v49, %v842_v23  ;;  %v16373_v23 = vrot.slane %v16253_v46, %v928_v12  ;;  %v16375_v26 = vpack.c.bf16 %v1304_v14, %v1304_v14 }
 0x241   : > { %v16307_v28 = vpop.f32.mrb[11].mxu0  ;;  %13650 = vmatpush3.bf16.xpose.msra.mxu1 %v1530_v38  ;;  %13651 = vmatprep.mubr.msk.bf16.mxu1 %vm15728_vm0, %v19292_v9  ;;  %v13629_v60 = vpop.f32.mrb[9].mxu1  ;;  %v16361_v11 = vadd.f32 %v16265_v51, %v844_v27  ;;  %v912_v27 = vadd.f32 %v16265_v51, %v16276_v63  ;;  %v1112_v29 = vcombine.high %v1104_v17, %v1104_v17  ;;  %v1714_v63 = vsel %vm1387_vm1, %v16370_v19, 0 }
 0x242   : > { %13661 = vmatprep.subr.bf16.mxu1 %v19292_v9  ;;  %v902_v6 = vpop.f32.mrb[10].mxu1  ;;  %19469 = vst [vmem:[#allocation42_spill] sm:$0xff] %v16375_v26  ;;  %v16385_v46 = vpack.c.bf16 %v1104_v17, %v1104_v17  ;;  %v16394_v35 = vadd.f32 %v16261_v49, %v16307_v28  ;;  %v1306_v36 = vmul.f32 0.17677669, %v975_v21  ;;  %v16404_v40 = vadd.f32 %v16373_v23, %v16293_v16 }
 0x243   : > { %v13630_v13 = vpop.f32.mrb[11].mxu1  ;;  %v983_v37 = vrot.slane %v912_v27, %v16268_v52  ;;  %v16399_v38 = vpack.c.bf16 %v1112_v29, %v1112_v29  ;;  %v16408_v41 = vadd.f32 %v16373_v23, %v16316_v33  ;;  %v16412_v28 = vadd.f32 %v16373_v23, %v16325_v39 }
 0x244   : > { %19470 = vst [vmem:[#allocation43_spill] sm:$0xff] %v16385_v46  ;;  %v16414_v43 = vpack.c.bf16 %v1305_v32, %v1305_v32  ;;  %v1111_v50 = vrot.slane %v1097_v34, %v16268_v52  ;;  %v1760_v54 = vsel %vm1387_vm1, %v16385_v46, 0  ;;  %v16419_v56 = vpack.c.bf16 %v1306_v36, %v1306_v36 }
 0x245   : > { %19471 = vst [vmem:[#allocation44_spill] sm:$0xff] %v16399_v38  ;;  %19472 = vst [vmem:[#allocation45_spill] sm:$0xff] %v16408_v41  ;;  %v991_v16 = vcombine.high %v983_v37, %v983_v37  ;;  %v1806_v33 = vsel %vm1387_vm1, %v16399_v38, 0  ;;  %v1307_v39 = vmul.f32 0.17677669, %v983_v37  ;;  %v923_v60 = vadd.f32 %v16261_v49, %v16283_v4 }
 0x246   : > { %13646 = vmatmul.mubr.msk.bf16.vlgmr.msra.gmra.mrb[16].mxu0 %vm1387_vm1, %v16333_v48  ;;  %19473 = vst [vmem:[#allocation46_spill] sm:$0xff] %v16412_v28  ;;  %19474 = vst [vmem:[#allocation47_spill] sm:$0xff] %v16414_v43  ;;  %v1113_v58 = vcombine.high %v1111_v50, %v1111_v50  ;;  %v16440_v0 = vadd.f32 %v16373_v23, %v16345_v59  ;;  %v16443_v12 = vadd.f32 %v16373_v23, %v902_v6 }
 0x247   : > { %13656 = vmatpush3.bf16.xpose.msra.mxu0 %v1576_v57  ;;  %13657 = vmatprep.mubr.msk.bf16.mxu0 %vm15728_vm0, %v19292_v9  ;;  %19475 = vst [vmem:[#allocation48_spill] sm:$0xff] %v16419_v56  ;;  %v976_v57 = vcombine.high %v912_v27, %v912_v27  ;;  %v1308_v1 = vmul.f32 0.17677669, %v991_v16  ;;  %v16445_v49 = vpack.c.bf16 %v1307_v39, %v1307_v39 }
 0x248   : > { %13652 = vmatmul.mubr.msk.bf16.vlgmr.msra.gmra.mrb[16].mxu1 %vm1387_vm1, %v16338_v55  ;;  %13667 = vmatprep.subr.bf16.mxu0 %v19292_v9  ;;  %19477 = vst [vmem:[#allocation50_spill] sm:$0xff] %v16440_v0  ;;  %19478 = vst [vmem:[#allocation51_spill] sm:$0xff] %v16443_v12  ;;  %v16447_v4 = vpack.c.bf16 %v1113_v58, %v1113_v58  ;;  %v1121_v13 = vrot.slane %v923_v60, %v16268_v52 }
 0x249   : > { %13662 = vmatpush3.bf16.xpose.msra.mxu1 %v1622_v5  ;;  %13663 = vmatprep.mubr.msk.bf16.mxu1 %vm15728_vm0, %v19292_v9  ;;  %v990_v61 = vrot.slane %v976_v57, %v16268_v52  ;;  %v16435_v5 = vpack.c.bf16 %v1111_v50, %v1111_v50  ;;  %19479 = vst [vmem:[#allocation52_spill] sm:$0xff] %v16445_v49 }
 0x24a   : > { %13673 = vmatprep.subr.bf16.mxu1 %v19292_v9  ;;  %19480 = vst [vmem:[#allocation53_spill] sm:$0xff] %v16447_v4  ;;  %v16450_v17 = vpack.c.bf16 %v1308_v1, %v1308_v1  ;;  %v913_v21 = vadd.f32 %v16265_v51, %v16281_v3  ;;  %v1114_v27 = vcombine.high %v923_v60, %v923_v60 }
 0x24b   : > { %19476 = vst [vmem:[#allocation49_spill] sm:$0xff] %v16435_v5  ;;  %v992_v14 = vcombine.high %v990_v61, %v990_v61  ;;  %v1852_v59 = vsel %vm1387_vm1, %v16435_v5, 0  ;;  %v1309_v6 = vmul.f32 0.17677669, %v990_v61  ;;  %v1129_v29 = vcombine.high %v1121_v13, %v1121_v13 }
 0x24c   : > { %19481 = vst [vmem:[#allocation54_spill] sm:$0xff] %v16450_v17  ;;  %v1000_v3 = vrot.slane %v913_v21, %v16268_v52  ;;  %v16468_v32 = vpack.c.bf16 %v1121_v13, %v1121_v13  ;;  %v993_v50 = vcombine.high %v913_v21, %v913_v21  ;;  %v1138_v1 = vrot.slane %v16358_v7, %v16268_v52 }
 0x24d   : > { %v1310_v51 = vmul.f32 0.17677669, %v992_v14  ;;  %v16471_v34 = vpack.c.bf16 %v1309_v6, %v1309_v6  ;;  %v16474_v36 = vpack.c.bf16 %v1129_v29, %v1129_v29 }
 0x24e   : > { %13658 = vmatmul.mubr.msk.bf16.vlgmr.msra.gmra.mrb[20].mxu0 %vm1387_vm1, %v16368_v18  ;;  %19482 = vst [vmem:[#allocation55_spill] sm:$0xff] %v16468_v32  ;;  %v1944_v57 = vsel %vm1387_vm1, %v16468_v32, 0  ;;  %v1311_v16 = vmul.f32 0.17677669, %v1000_v3  ;;  %v1007_v58 = vrot.slane %v993_v50, %v16268_v52  ;;  %v1146_v6 = vcombine.high %v1138_v1, %v1138_v1 }
 0x24f   : > { %13668 = vmatpush3.bf16.xpose.msra.mxu0 %v1668_v31  ;;  %13669 = vmatprep.mubr.msk.bf16.mxu0 %vm15728_vm0, %v19292_v9  ;;  %v1898_v31 = vsel %vm1387_vm1, %v16447_v4, 0  ;;  %19483 = vst [vmem:[#allocation56_spill] sm:$0xff] %v16471_v34  ;;  %19484 = vst [vmem:[#allocation57_spill] sm:$0xff] %v16474_v36  ;;  %v16476_v37 = vpack.c.bf16 %v1310_v51, %v1310_v51  ;;  %v1990_v39 = vsel %vm1387_vm1, %v16474_v36, 0 }
 0x250   : > { %13664 = vmatmul.mubr.msk.bf16.vlgmr.msra.gmra.mrb[20].mxu1 %vm1387_vm1, %v16375_v26  ;;  %13679 = vmatprep.subr.bf16.mxu0 %v19292_v9  ;;  %v16497_v13 = vpack.c.bf16 %v1311_v16, %v1311_v16  ;;  %v1009_v21 = vcombine.high %v1007_v58, %v1007_v58  ;;  %v1313_v29 = vmul.f32 0.17677669, %v1007_v58  ;;  %v16511_v51 = vpack.c.bf16 %v1138_v1, %v1138_v1 }
 0x251   : > { %13674 = vmatpush3.bf16.xpose.msra.mxu1 %v1714_v63  ;;  %13675 = vmatprep.mubr.msk.bf16.mxu1 %vm15728_vm0, %v19292_v9  ;;  %v1128_v63 = vrot.slane %v1114_v27, %v16268_v52  ;;  %19485 = vst [vmem:[#allocation58_spill] sm:$0xff] %v16476_v37  ;;  %v1017_v50 = vrot.slane %v16300_v22, %v16268_v52 }
 0x252   : > { %13685 = vmatprep.subr.bf16.mxu1 %v19292_v9  ;;  %19487 = vst [vmem:[#allocation60_spill] sm:$0xff] %v16497_v13  ;;  %19490 = vst [vmem:[#allocation63_spill] sm:$0xff] %v16511_v51  ;;  %v2128_v16 = vsel %vm1387_vm1, %v16511_v51, 0 }
 0x253   : > { %v16492_v61 = vpack.c.bf16 %v1128_v63, %v1128_v63  ;;  %v1025_v58 = vcombine.high %v1017_v50, %v1017_v50  ;;  %v1315_v1 = vmul.f32 0.17677669, %v1017_v50 }
 0x255   : > { %19486 = vst [vmem:[#allocation59_spill] sm:$0xff] %v16492_v61  ;;  %v2036_v27 = vsel %vm1387_vm1, %v16492_v61, 0 }
 0x256   : > { %13670 = vmatmul.mubr.msk.bf16.vlgmr.msra.gmra.mrb[24].mxu0 %vm1387_vm1, %v16414_v43 }
 0x257   : > { %13680 = vmatpush3.bf16.xpose.msra.mxu0 %v1760_v54  ;;  %13681 = vmatprep.mubr.msk.bf16.mxu0 %vm15728_vm0, %v19292_v9  ;;  %v1008_v54 = vcombine.high %v1000_v3, %v1000_v3 }
 0x258   : > { %13676 = vmatmul.mubr.msk.bf16.vlgmr.msra.gmra.mrb[24].mxu1 %vm1387_vm1, %v16419_v56  ;;  %13691 = vmatprep.subr.bf16.mxu0 %v19292_v9 }
 0x259   : > { %13686 = vmatpush3.bf16.xpose.msra.mxu1 %v1806_v33  ;;  %13687 = vmatprep.mubr.msk.bf16.mxu1 %vm15728_vm0, %v19292_v9  ;;  %v1130_v33 = vcombine.high %v1128_v63, %v1128_v63  ;;  %v1312_v60 = vmul.f32 0.17677669, %v1008_v54  ;;  %v1314_v63 = vmul.f32 0.17677669, %v1009_v21  ;;  %v16522_v54 = vpack.c.bf16 %v1146_v6, %v1146_v6 }
 0x25a   : > { %13697 = vmatprep.subr.bf16.mxu1 %v19292_v9  ;;  %v1316_v6 = vmul.f32 0.17677669, %v1025_v58 }
 0x25b   : > { %v16499_v14 = vpack.c.bf16 %v1130_v33, %v1130_v33  ;;  %19491 = vst [vmem:[#allocation64_spill] sm:$0xff] %v16522_v54  ;;  %v16530_v33 = vpack.c.bf16 %v1314_v63, %v1314_v63 }
 0x25c   : > { %v16555_v50 = vpack.c.bf16 %v1316_v6, %v1316_v6 }
 0x25d   : > { %19488 = vst [vmem:[#allocation61_spill] sm:$0xff] %v16499_v14  ;;  %v2082_v3 = vsel %vm1387_vm1, %v16499_v14, 0  ;;  %19493 = vst [vmem:[#allocation66_spill] sm:$0xff] %v16530_v33 }
 0x25e   : > { %13682 = vmatmul.mubr.msk.bf16.vlgmr.msra.gmra.mrb[28].mxu0 %vm1387_vm1, %v16445_v49  ;;  %19497 = vst [vmem:[#allocation70_spill] sm:$0xff] %v16555_v50 }
 0x25f   : > { %13692 = vmatpush3.bf16.xpose.msra.mxu0 %v1852_v59  ;;  %13693 = vmatprep.mubr.msk.bf16.mxu0 %vm15728_vm0, %v19292_v9  ;;  %v16501_v59 = vpack.c.bf16 %v1312_v60, %v1312_v60  ;;  %v2174_v60 = vsel %vm1387_vm1, %v16522_v54, 0 }
 0x260   : > { %13688 = vmatmul.mubr.msk.bf16.vlgmr.msra.gmra.mrb[28].mxu1 %vm1387_vm1, %v16450_v17  ;;  %13703 = vmatprep.subr.bf16.mxu0 %v19292_v9 }
 0x261   : > { %13698 = vmatpush3.bf16.xpose.msra.mxu1 %v1898_v31  ;;  %13699 = vmatprep.mubr.msk.bf16.mxu1 %vm15728_vm0, %v19292_v9  ;;  %19489 = vst [vmem:[#allocation62_spill] sm:$0xff] %v16501_v59  ;;  %v1131_v31 = vcombine.high %v16358_v7, %v16358_v7  ;;  %v16525_v7 = vpack.c.bf16 %v1313_v29, %v1313_v29 }
 0x262   : > { %13709 = vmatprep.subr.bf16.mxu1 %v19292_v9  ;;  %v16549_v29 = vpack.c.bf16 %v1315_v1, %v1315_v1 }
 0x263   : > { %19492 = vst [vmem:[#allocation65_spill] sm:$0xff] %v16525_v7 }
 0x264   : > { %19495 = vst [vmem:[#allocation68_spill] sm:$0xff] %v16549_v29 }
 0x266   : > { %13694 = vmatmul.mubr.msk.bf16.vlgmr.msra.gmra.mrb[32].mxu0 %vm1387_vm1, %v16471_v34 }
 0x267   : > { %13704 = vmatpush3.bf16.xpose.msra.mxu0 %v1944_v57  ;;  %13705 = vmatprep.mubr.msk.bf16.mxu0 %vm15728_vm0, %v19292_v9  ;;  %v1145_v57 = vrot.slane %v1131_v31, %v16268_v52 }
 0x268   : > { %13700 = vmatmul.mubr.msk.bf16.vlgmr.msra.gmra.mrb[32].mxu1 %vm1387_vm1, %v16476_v37  ;;  %13715 = vmatprep.subr.bf16.mxu0 %v19292_v9 }
 0x269   : > { %13710 = vmatpush3.bf16.xpose.msra.mxu1 %v1990_v39  ;;  %13711 = vmatprep.mubr.msk.bf16.mxu1 %vm15728_vm0, %v19292_v9  ;;  %v1010_v39 = vcombine.high %v16300_v22, %v16300_v22  ;;  %v1147_v21 = vcombine.high %v1145_v57, %v1145_v57 }
 0x26a   : > { %13721 = vmatprep.subr.bf16.mxu1 %v19292_v9 }
 0x26b   : > { %v1024_v22 = vrot.slane %v1010_v39, %v16268_v52  ;;  %v16551_v31 = vpack.c.bf16 %v1147_v21, %v1147_v21 }
 0x26d   : > { %19496 = vst [vmem:[#allocation69_spill] sm:$0xff] %v16551_v31  ;;  %v1026_v63 = vcombine.high %v1024_v22, %v1024_v22  ;;  %v1317_v39 = vmul.f32 0.17677669, %v1024_v22 }
 0x26e   : > { %13706 = vmatmul.mubr.msk.bf16.vlgmr.msra.gmra.mrb[36].mxu0 %vm1387_vm1, %v16497_v13 }
 0x26f   : > { %13716 = vmatpush3.bf16.xpose.msra.mxu0 %v2036_v27  ;;  %13717 = vmatprep.mubr.msk.bf16.mxu0 %vm15728_vm0, %v19292_v9  ;;  %v16546_v27 = vpack.c.bf16 %v1145_v57, %v1145_v57  ;;  %v16563_v57 = vadd.f32 %v16373_v23, %v16287_v10  ;;  %v1318_v10 = vmul.f32 0.17677669, %v1026_v63  ;;  %v1033_v23 = vrot.slane %v16361_v11, %v16268_v52 }
 0x270   : > { %13712 = vmatmul.mubr.msk.bf16.vlgmr.msra.gmra.mrb[36].mxu1 %vm1387_vm1, %v16501_v59  ;;  %13727 = vmatprep.subr.bf16.mxu0 %v19292_v9  ;;  %v16581_v21 = vpack.c.bf16 %v1317_v39, %v1317_v39 }
 0x271   : > { %13722 = vmatpush3.bf16.xpose.msra.mxu1 %v2082_v3  ;;  %13723 = vmatprep.mubr.msk.bf16.mxu1 %vm15728_vm0, %v19292_v9  ;;  %19494 = vst [vmem:[#allocation67_spill] sm:$0xff] %v16546_v27  ;;  %v1154_v3 = vrot.slane %v16394_v35, %v16268_v52  ;;  %v2266_v35 = vsel %vm1387_vm1, %v16551_v31, 0  ;;  %v1191_v1 = vrot.slane %v16563_v57, %v16268_v52  ;;  %v1319_v63 = vmul.f32 0.17677669, %v1033_v23 }
 0x272   : > { %13733 = vmatprep.subr.bf16.mxu1 %v19292_v9  ;;  %19499 = vst [vmem:[#allocation72_spill] sm:$0xff] %v16581_v21  ;;  %v16585_v6 = vpack.c.bf16 %v1318_v10, %v1318_v10 }
 0x273   : > { %v1155_v58 = vcombine.high %v1154_v3, %v1154_v3 }
 0x274   : > { %19501 = vst [vmem:[#allocation74_spill] sm:$0xff] %v16585_v6 }
 0x275   : > { %v16583_v22 = vpack.c.bf16 %v1155_v58, %v1155_v58  ;;  %v16597_v58 = vpack.c.bf16 %v1191_v1, %v1191_v1 }
 0x276   : > { %13718 = vmatmul.mubr.msk.bf16.vlgmr.msra.gmra.mrb[40].mxu0 %vm1387_vm1, %v16525_v7 }
 0x277   : > { %13728 = vmatpush3.bf16.xpose.msra.mxu0 %v2128_v16  ;;  %13729 = vmatprep.mubr.msk.bf16.mxu0 %vm15728_vm0, %v19292_v9  ;;  %v2220_v16 = vsel %vm1387_vm1, %v16546_v27, 0  ;;  %19500 = vst [vmem:[#allocation73_spill] sm:$0xff] %v16583_v22  ;;  %v2358_v39 = vsel %vm1387_vm1, %v16583_v22, 0  ;;  %19502 = vst [vmem:[#allocation75_spill] sm:$0xff] %v16597_v58 }
 0x278   : > { %13724 = vmatmul.mubr.msk.bf16.vlgmr.msra.gmra.mrb[40].mxu1 %vm1387_vm1, %v16530_v33  ;;  %13739 = vmatprep.subr.bf16.mxu0 %v19292_v9 }
 0x279   : > { %13734 = vmatpush3.bf16.xpose.msra.mxu1 %v2174_v60  ;;  %13735 = vmatprep.mubr.msk.bf16.mxu1 %vm15728_vm0, %v19292_v9  ;;  %v16576_v60 = vpack.c.bf16 %v1154_v3, %v1154_v3  ;;  %v1199_v3 = vcombine.high %v1191_v1, %v1191_v1 }
 0x27a   : > { %13745 = vmatprep.subr.bf16.mxu1 %v19292_v9 }
 0x27b   : > { %19498 = vst [vmem:[#allocation71_spill] sm:$0xff] %v16576_v60  ;;  %v2312_v11 = vsel %vm1387_vm1, %v16576_v60, 0  ;;  %v16602_v10 = vpack.c.bf16 %v1199_v3, %v1199_v3 }
 0x27d   : > { %19503 = vst [vmem:[#allocation76_spill] sm:$0xff] %v16602_v10  ;;  %v2717_v1 = vsel %vm2669_vm2, %v16602_v10, 0 }
 0x27e   : > { %13730 = vmatmul.mubr.msk.bf16.vlgmr.msra.gmra.mrb[44].mxu0 %vm1387_vm1, %v16549_v29 }
 0x27f   : > { %13740 = vmatpush3.bf16.xpose.msra.mxu0 %v2220_v16  ;;  %13741 = vmatprep.mubr.msk.bf16.mxu0 %vm15728_vm0, %v19292_v9  ;;  %v1034_v16 = vcombine.high %v1033_v23, %v1033_v23  ;;  %v16605_v23 = vpack.c.bf16 %v1319_v63, %v1319_v63 }
 0x280   : > { %13736 = vmatmul.mubr.msk.bf16.vlgmr.msra.gmra.mrb[44].mxu1 %vm1387_vm1, %v16555_v50  ;;  %13751 = vmatprep.subr.bf16.mxu0 %v19292_v9 }
 0x281   : > { %13746 = vmatpush3.bf16.xpose.msra.mxu1 %v2266_v35  ;;  %13747 = vmatprep.mubr.msk.bf16.mxu1 %vm15728_vm0, %v19292_v9  ;;  %v1320_v35 = vmul.f32 0.17677669, %v1034_v16  ;;  %19504 = vst [vmem:[#allocation77_spill] sm:$0xff] %v16605_v23 }
 0x282   : > { %13757 = vmatprep.subr.bf16.mxu1 %v19292_v9 }
 0x283   : > { %v16609_v45 = vpack.c.bf16 %v1320_v35, %v1320_v35 }
 0x285   : > { %19505 = vst [vmem:[#allocation78_spill] sm:$0xff] %v16609_v45 }
 0x286   : > { %13742 = vmatmul.mubr.msk.bf16.vlgmr.msra.gmra.mrb[48].mxu0 %vm1387_vm1, %v16581_v21 }
 0x287   : > { %13752 = vmatpush3.bf16.xpose.msra.mxu0 %v2312_v11  ;;  %13753 = vmatprep.mubr.msk.bf16.mxu0 %vm15728_vm0, %v19292_v9  ;;  %v2671_v11 = vsel %vm2669_vm2, %v16597_v58, 0 }
 0x288   : > { %13748 = vmatmul.mubr.msk.bf16.vlgmr.msra.gmra.mrb[48].mxu1 %vm1387_vm1, %v16585_v6  ;;  %13763 = vmatprep.subr.bf16.mxu0 %v19292_v9 }
 0x289   : > { %13758 = vmatpush3.bf16.xpose.msra.mxu1 %v2358_v39  ;;  %13759 = vmatprep.mubr.msk.bf16.mxu1 %vm15728_vm0, %v19292_v9 }
 0x28a   : > { %13769 = vmatprep.subr.bf16.mxu1 %v19292_v9 }
 0x28e   : > { %13754 = vmatmul.mubr.msk.bf16.vlgmr.msra.gmra.mrb[52].mxu0 %vm1387_vm1, %v16605_v23 }
 0x28f   : > { %13764 = vmatpush3.bf16.msra.mxu0 %v2671_v11  ;;  %13765 = vmatprep.mubr.msk.bf16.mxu0 %vm15728_vm0, %v19292_v9 }
 0x290   : > { %13760 = vmatmul.mubr.msk.bf16.vlgmr.msra.gmra.mrb[52].mxu1 %vm1387_vm1, %v16609_v45  ;;  %13775 = vmatprep.subr.bf16.mxu0 %v19292_v9 }
 0x291   : > { %13770 = vmatpush3.bf16.msra.mxu1 %v2717_v1  ;;  %13771 = vmatprep.mubr.msk.bf16.mxu1 %vm15728_vm0, %v19292_v9 }
 0x292   : > { %13781 = vmatprep.subr.bf16.mxu1 %v19292_v9 }
 0x311   : > { %v16623_v16 = vpop.f32.mrb[12].mxu0 }
 0x312   : > { %v13635_v3 = vpop.f32.mrb[13].mxu0  ;;  %v2401_v63 = vsel %vm2400_vm3, %v16623_v16, -inf }
 0x313   : > { %v16627_v39 = vpop.f32.mrb[12].mxu1  ;;  %2402 = vmax.xlane.f32.xlu0 %v2401_v63  ;;  %v1431_v35 = vpop.f32.mrb[14].mxu0 }
 0x314   : > { %v13636_v11 = vpop.f32.mrb[15].mxu0  ;;  %v13641_v8 = vpop.f32.mrb[13].mxu1  ;;  %v2404_v42 = vsel %vm2400_vm3, %v16627_v39, -inf }
 0x315   : > { %v1477_v47 = vpop.f32.mrb[14].mxu1 }
 0x316   : > { %v13642_v1 = vpop.f32.mrb[15].mxu1 }
 0x317   : > { %2405 = vmax.xlane.f32.xlu0 %v2404_v42 }
 0x319   : > { %v16631_v9 = vpop.f32.mrb[16].mxu0 }
 0x31a   : > { %v13647_v10 = vpop.f32.mrb[17].mxu0  ;;  %v2407_v3 = vsel %vm2400_vm3, %v16631_v9, -inf }
 0x31b   : > { %v16635_v45 = vpop.f32.mrb[16].mxu1  ;;  %2408 = vmax.xlane.f32.xlu1 %v2407_v3  ;;  %v1523_v22 = vpop.f32.mrb[18].mxu0 }
 0x31c   : > { %v13648_v63 = vpop.f32.mrb[19].mxu0  ;;  %v13653_v35 = vpop.f32.mrb[17].mxu1  ;;  %v2410_v47 = vsel %vm2400_vm3, %v16635_v45, -inf }
 0x31d   : > { %v1569_v11 = vpop.f32.mrb[18].mxu1 }
 0x31e   : > { %v13654_v8 = vpop.f32.mrb[19].mxu1 }
 0x31f   : > { %2411 = vmax.xlane.f32.xlu1 %v2410_v47 }
 0x321   : > { %v16639_v1 = vpop.f32.mrb[20].mxu0 }
 0x322   : > { %v13659_v42 = vpop.f32.mrb[21].mxu0  ;;  %v2413_v10 = vsel %vm2400_vm3, %v16639_v1, -inf }
 0x323   : > { %v16643_v12 = vpop.f32.mrb[20].mxu1  ;;  %2414 = vmax.xlane.f32.xlu0 %v2413_v10  ;;  %v1615_v6 = vpop.f32.mrb[22].mxu0 }
 0x324   : > { %v13660_v3 = vpop.f32.mrb[23].mxu0  ;;  %v13665_v22 = vpop.f32.mrb[21].mxu1  ;;  %v2416_v63 = vsel %vm2400_vm3, %v16643_v12, -inf }
 0x325   : > { %v1661_v35 = vpop.f32.mrb[22].mxu1  ;;  %2417 = vmax.xlane.f32.xlu1 %v2416_v63 }
 0x326   : > { %v13666_v11 = vpop.f32.mrb[23].mxu1 }
 0x329   : > { %v16647_v8 = vpop.f32.mrb[24].mxu0 }
 0x32a   : > { %v13671_v47 = vpop.f32.mrb[25].mxu0  ;;  %v2419_v42 = vsel %vm2400_vm3, %v16647_v8, -inf }
 0x32b   : > { %v16651_v31 = vpop.f32.mrb[24].mxu1  ;;  %2420 = vmax.xlane.f32.xlu0 %v2419_v42  ;;  %v1707_v50 = vpop.f32.mrb[26].mxu0 }
 0x32c   : > { %v13672_v10 = vpop.f32.mrb[27].mxu0  ;;  %v13677_v6 = vpop.f32.mrb[25].mxu1  ;;  %v2422_v3 = vsel %vm2400_vm3, %v16651_v31, -inf }
 0x32d   : > { %v1753_v22 = vpop.f32.mrb[26].mxu1  ;;  %2423 = vmax.xlane.f32.xlu1 %v2422_v3 }
 0x32e   : > { %v13678_v35 = vpop.f32.mrb[27].mxu1 }
 0x331   : > { %v16655_v63 = vpop.f32.mrb[28].mxu0 }
 0x332   : > { %v2425_v11 = vsel %vm2400_vm3, %v16655_v63, -inf  ;;  %v13683_v47 = vpop.f32.mrb[29].mxu0 }
 0x333   : > { %v16659_v54 = vpop.f32.mrb[28].mxu1  ;;  %2426 = vmax.xlane.f32.xlu0 %v2425_v11  ;;  %v1799_v0 = vpop.f32.mrb[30].mxu0 }
 0x334   : > { %v2428_v50 = vsel %vm2400_vm3, %v16659_v54, -inf  ;;  %v13684_v42 = vpop.f32.mrb[31].mxu0  ;;  %v13689_v10 = vpop.f32.mrb[29].mxu1 }
 0x335   : > { %2429 = vmax.xlane.f32.xlu1 %v2428_v50  ;;  %v1845_v6 = vpop.f32.mrb[30].mxu1 }
 0x336   : > { %v13690_v22 = vpop.f32.mrb[31].mxu1 }
 0x339   : > { %v16663_v3 = vpop.f32.mrb[32].mxu0 }
 0x33a   : > { %v13695_v35 = vpop.f32.mrb[33].mxu0  ;;  %v2431_v33 = vsel %vm2400_vm3, %v16663_v3, -inf }
 0x33b   : > { %v16667_v14 = vpop.f32.mrb[32].mxu1  ;;  %2432 = vmax.xlane.f32.xlu0 %v2431_v33  ;;  %v1891_v47 = vpop.f32.mrb[34].mxu0 }
 0x33c   : > { %v13696_v11 = vpop.f32.mrb[35].mxu0  ;;  %v13701_v0 = vpop.f32.mrb[33].mxu1  ;;  %v2434_v59 = vsel %vm2400_vm3, %v16667_v14, -inf }
 0x33d   : > { %v1937_v42 = vpop.f32.mrb[34].mxu1  ;;  %2435 = vmax.xlane.f32.xlu1 %v2434_v59 }
 0x33e   : > { %v13702_v50 = vpop.f32.mrb[35].mxu1 }
 0x341   : > { %v16671_v10 = vpop.f32.mrb[36].mxu0 }
 0x342   : > { %v13707_v6 = vpop.f32.mrb[37].mxu0  ;;  %v2437_v22 = vsel %vm2400_vm3, %v16671_v10, -inf }
 0x343   : > { %v16675_v35 = vpop.f32.mrb[36].mxu1  ;;  %2438 = vmax.xlane.f32.xlu0 %v2437_v22  ;;  %v1983_v36 = vpop.f32.mrb[38].mxu0 }
 0x344   : > { %v13708_v33 = vpop.f32.mrb[39].mxu0  ;;  %v13713_v47 = vpop.f32.mrb[37].mxu1  ;;  %v2440_v11 = vsel %vm2400_vm3, %v16675_v35, -inf }
 0x345   : > { %v2029_v0 = vpop.f32.mrb[38].mxu1  ;;  %2441 = vmax.xlane.f32.xlu1 %v2440_v11 }
 0x346   : > { %v13714_v42 = vpop.f32.mrb[39].mxu1 }
 0x349   : > { %v16679_v59 = vpop.f32.mrb[40].mxu0 }
 0x34a   : > { %v13719_v50 = vpop.f32.mrb[41].mxu0  ;;  %v2443_v6 = vsel %vm2400_vm3, %v16679_v59, -inf }
 0x34b   : > { %v16683_v28 = vpop.f32.mrb[40].mxu1  ;;  %2444 = vmax.xlane.f32.xlu0 %v2443_v6  ;;  %v2075_v37 = vpop.f32.mrb[42].mxu0 }
 0x34c   : > { %v13720_v22 = vpop.f32.mrb[43].mxu0  ;;  %v13725_v36 = vpop.f32.mrb[41].mxu1  ;;  %v2446_v33 = vsel %vm2400_vm3, %v16683_v28, -inf }
 0x34d   : > { %v2121_v47 = vpop.f32.mrb[42].mxu1  ;;  %2447 = vmax.xlane.f32.xlu1 %v2446_v33 }
 0x34e   : > { %v13726_v0 = vpop.f32.mrb[43].mxu1 }
 0x351   : > { %v16687_v11 = vpop.f32.mrb[44].mxu0 }
 0x352   : > { %v2449_v42 = vsel %vm2400_vm3, %v16687_v11, -inf  ;;  %v13731_v50 = vpop.f32.mrb[45].mxu0 }
 0x353   : > { %v16691_v58 = vpop.f32.mrb[44].mxu1  ;;  %2450 = vmax.xlane.f32.xlu0 %v2449_v42  ;;  %v2167_v4 = vpop.f32.mrb[46].mxu0 }
 0x354   : > { %v2452_v37 = vsel %vm2400_vm3, %v16691_v58, -inf  ;;  %v13732_v6 = vpop.f32.mrb[47].mxu0  ;;  %v13737_v22 = vpop.f32.mrb[45].mxu1 }
 0x355   : > { %2453 = vmax.xlane.f32.xlu1 %v2452_v37  ;;  %v2213_v36 = vpop.f32.mrb[46].mxu1 }
 0x356   : > { %v13738_v47 = vpop.f32.mrb[47].mxu1 }
 0x359   : > { %v16695_v33 = vpop.f32.mrb[48].mxu0 }
 0x35a   : > { %v13743_v0 = vpop.f32.mrb[49].mxu0  ;;  %v2455_v23 = vsel %vm2400_vm3, %v16695_v33, -inf }
 0x35b   : > { %v16699_v17 = vpop.f32.mrb[48].mxu1  ;;  %2456 = vmax.xlane.f32.xlu0 %v2455_v23  ;;  %v2259_v50 = vpop.f32.mrb[50].mxu0 }
 0x35c   : > { %v13744_v42 = vpop.f32.mrb[51].mxu0  ;;  %v13749_v4 = vpop.f32.mrb[49].mxu1  ;;  %v2458_v60 = vsel %vm2400_vm3, %v16699_v17, -inf }
 0x35d   : > { %v2305_v6 = vpop.f32.mrb[50].mxu1  ;;  %2459 = vmax.xlane.f32.xlu1 %v2458_v60 }
 0x35e   : > { %v13750_v37 = vpop.f32.mrb[51].mxu1 }
 0x361   : > { %v16703_v22 = vpop.f32.mrb[52].mxu0 }
 0x362   : > { %v13755_v36 = vpop.f32.mrb[53].mxu0  ;;  %v2461_v47 = vsel %vm2400_vm3, %v16703_v22, -inf }
 0x363   : > { %2462 = vmax.xlane.f32.xlu0 %v2461_v47  ;;  %v2351_v0 = vpop.f32.mrb[54].mxu0  ;;  %v16707_v38 = vpop.f32.mrb[52].mxu1 }
 0x364   : > { %v13756_v23 = vpop.f32.mrb[55].mxu0  ;;  %v13761_v50 = vpop.f32.mrb[53].mxu1  ;;  %v2464_v42 = vsel %vm2400_vm3, %v16707_v38, -inf }
 0x365   : > { %2465 = vmax.xlane.f32.xlu1 %v2464_v42  ;;  %v2397_v4 = vpop.f32.mrb[54].mxu1 }
 0x366   : > { %v13762_v6 = vpop.f32.mrb[55].mxu1 }
 0x3a0   : > { %v2403_v60 = vpop.xlane.xlu0 %2402 }
 0x3a1   : > { %v2467_v37 = vsub.f32 %v16623_v16, %v2403_v60 }
 0x3a3   : > { %v2489_v21 = vmul.f32 1.442695, %v2467_v37 }
 0x3a4   : > { %v2406_v36 = vpop.xlane.xlu0 %2405 }
 0x3a5   : > { %14984 = vpow2.f32 %v2489_v21  ;;  %v2468_v41 = vsub.f32 %v16627_v39, %v2406_v36 }
 0x3a7   : > { %v2491_v47 = vmul.f32 1.442695, %v2468_v41 }
 0x3a8   : > { %v2409_v0 = vpop.xlane.xlu1 %2408 }
 0x3a9   : > { %14986 = vpow2.f32 %v2491_v47  ;;  %v2469_v23 = vsub.f32 %v16631_v9, %v2409_v0 }
 0x3ab   : > { %v2493_v50 = vmul.f32 1.442695, %v2469_v23 }
 0x3ac   : > { %v2412_v56 = vpop.xlane.xlu1 %2411 }
 0x3ad   : > { %14988 = vpow2.f32 %v2493_v50  ;;  %v2470_v42 = vsub.f32 %v16635_v45, %v2412_v56 }
 0x3af   : > { %v16715_v4 = vpop.eup %14984  ;;  %v2495_v6 = vmul.f32 1.442695, %v2470_v42 }
 0x3b0   : > { %v2415_v27 = vpop.xlane.xlu0 %2414  ;;  %v2533_v16 = vsel %vm2400_vm3, %v16715_v4, 0.0 }
 0x3b1   : > { %14990 = vpow2.f32 %v2495_v6  ;;  %v2471_v21 = vsub.f32 %v16639_v1, %v2415_v27  ;;  %2534 = vadd.xlane.f32.xlu0 %v2533_v16 }
 0x3b2   : > { %v2418_v41 = vpop.xlane.xlu1 %2417 }
 0x3b3   : > { %v16720_v39 = vpop.eup %14986  ;;  %v2497_v9 = vmul.f32 1.442695, %v2471_v21  ;;  %v2472_v60 = vsub.f32 %v16643_v12, %v2418_v41 }
 0x3b4   : > { %v2536_v45 = vsel %vm2400_vm3, %v16720_v39, 0.0 }
 0x3b5   : > { %14992 = vpow2.f32 %v2497_v9  ;;  %v2499_v56 = vmul.f32 1.442695, %v2472_v60  ;;  %2537 = vadd.xlane.f32.xlu1 %v2536_v45 }
 0x3b7   : > { %v16725_v37 = vpop.eup %14988  ;;  %14994 = vpow2.f32 %v2499_v56 }
 0x3b8   : > { %v2421_v36 = vpop.xlane.xlu0 %2420  ;;  %v2539_v27 = vsel %vm2400_vm3, %v16725_v37, 0.0 }
 0x3b9   : > { %v2473_v1 = vsub.f32 %v16647_v8, %v2421_v36  ;;  %2540 = vadd.xlane.f32.xlu0 %v2539_v27 }
 0x3ba   : > { %v2424_v47 = vpop.xlane.xlu1 %2423 }
 0x3bb   : > { %v16730_v0 = vpop.eup %14990  ;;  %v2501_v12 = vmul.f32 1.442695, %v2473_v1  ;;  %v2474_v23 = vsub.f32 %v16651_v31, %v2424_v47 }
 0x3bc   : > { %v2542_v50 = vsel %vm2400_vm3, %v16730_v0, 0.0 }
 0x3bd   : > { %14996 = vpow2.f32 %v2501_v12  ;;  %v2503_v42 = vmul.f32 1.442695, %v2474_v23  ;;  %2543 = vadd.xlane.f32.xlu1 %v2542_v50 }
 0x3bf   : > { %v16735_v6 = vpop.eup %14992  ;;  %14998 = vpow2.f32 %v2503_v42 }
 0x3c0   : > { %v2427_v16 = vpop.xlane.xlu0 %2426  ;;  %v2545_v8 = vsel %vm2400_vm3, %v16735_v6, 0.0 }
 0x3c1   : > { %v16739_v21 = vpop.eup %14994  ;;  %v2475_v41 = vsub.f32 %v16655_v63, %v2427_v16  ;;  %2546 = vadd.xlane.f32.xlu0 %v2545_v8 }
 0x3c2   : > { %v2430_v9 = vpop.xlane.xlu1 %2429  ;;  %v2548_v31 = vsel %vm2400_vm3, %v16739_v21, 0.0 }
 0x3c3   : > { %v2505_v60 = vmul.f32 1.442695, %v2475_v41  ;;  %v2476_v45 = vsub.f32 %v16659_v54, %v2430_v9  ;;  %2549 = vadd.xlane.f32.xlu1 %v2548_v31 }
 0x3c5   : > { %15000 = vpow2.f32 %v2505_v60  ;;  %v2507_v56 = vmul.f32 1.442695, %v2476_v45 }
 0x3c7   : > { %v16745_v36 = vpop.eup %14996  ;;  %15002 = vpow2.f32 %v2507_v56 }
 0x3c8   : > { %v2433_v27 = vpop.xlane.xlu0 %2432  ;;  %v2551_v1 = vsel %vm2400_vm3, %v16745_v36, 0.0 }
 0x3c9   : > { %v16749_v47 = vpop.eup %14998  ;;  %v2477_v63 = vsub.f32 %v16663_v3, %v2433_v27  ;;  %2552 = vadd.xlane.f32.xlu0 %v2551_v1 }
 0x3ca   : > { %v2436_v12 = vpop.xlane.xlu1 %2435  ;;  %v2554_v23 = vsel %vm2400_vm3, %v16749_v47, 0.0 }
 0x3cb   : > { %v2509_v54 = vmul.f32 1.442695, %v2477_v63  ;;  %v2478_v50 = vsub.f32 %v16667_v14, %v2436_v12  ;;  %2555 = vadd.xlane.f32.xlu1 %v2554_v23 }
 0x3cd   : > { %15004 = vpow2.f32 %v2509_v54  ;;  %v2511_v42 = vmul.f32 1.442695, %v2478_v50 }
 0x3cf   : > { %v16755_v16 = vpop.eup %15000  ;;  %15006 = vpow2.f32 %v2511_v42 }
 0x3d0   : > { %v2439_v8 = vpop.xlane.xlu0 %2438  ;;  %v2557_v41 = vsel %vm2400_vm3, %v16755_v16, 0.0 }
 0x3d1   : > { %v16759_v9 = vpop.eup %15002  ;;  %v2479_v3 = vsub.f32 %v16671_v10, %v2439_v8  ;;  %2558 = vadd.xlane.f32.xlu0 %v2557_v41 }
 0x3d2   : > { %v2442_v31 = vpop.xlane.xlu1 %2441  ;;  %v2560_v60 = vsel %vm2400_vm3, %v16759_v9, 0.0 }
 0x3d3   : > { %v2513_v14 = vmul.f32 1.442695, %v2479_v3  ;;  %v2480_v45 = vsub.f32 %v16675_v35, %v2442_v31  ;;  %2561 = vadd.xlane.f32.xlu1 %v2560_v60 }
 0x3d5   : > { %15008 = vpow2.f32 %v2513_v14  ;;  %v2515_v56 = vmul.f32 1.442695, %v2480_v45 }
 0x3d7   : > { %v16765_v27 = vpop.eup %15004  ;;  %15010 = vpow2.f32 %v2515_v56 }
 0x3d8   : > { %v2445_v1 = vpop.xlane.xlu0 %2444  ;;  %v2563_v63 = vsel %vm2400_vm3, %v16765_v27, 0.0 }
 0x3d9   : > { %v16769_v12 = vpop.eup %15006  ;;  %v2481_v10 = vsub.f32 %v16679_v59, %v2445_v1  ;;  %2564 = vadd.xlane.f32.xlu0 %v2563_v63 }
 0x3da   : > { %v2448_v23 = vpop.xlane.xlu1 %2447  ;;  %v2566_v54 = vsel %vm2400_vm3, %v16769_v12, 0.0 }
 0x3db   : > { %v2517_v35 = vmul.f32 1.442695, %v2481_v10  ;;  %v2482_v50 = vsub.f32 %v16683_v28, %v2448_v23  ;;  %2567 = vadd.xlane.f32.xlu1 %v2566_v54 }
 0x3dd   : > { %15012 = vpow2.f32 %v2517_v35  ;;  %v2519_v42 = vmul.f32 1.442695, %v2482_v50 }
 0x3df   : > { %v16775_v8 = vpop.eup %15008  ;;  %15014 = vpow2.f32 %v2519_v42 }
 0x3e0   : > { %v2451_v41 = vpop.xlane.xlu0 %2450  ;;  %v2569_v3 = vsel %vm2400_vm3, %v16775_v8, 0.0 }
 0x3e1   : > { %v16779_v31 = vpop.eup %15010  ;;  %v2483_v59 = vsub.f32 %v16687_v11, %v2451_v41  ;;  %2570 = vadd.xlane.f32.xlu0 %v2569_v3 }
 0x3e2   : > { %v2454_v60 = vpop.xlane.xlu1 %2453  ;;  %v2572_v14 = vsel %vm2400_vm3, %v16779_v31, 0.0 }
 0x3e3   : > { %v2521_v28 = vmul.f32 1.442695, %v2483_v59  ;;  %v2484_v45 = vsub.f32 %v16691_v58, %v2454_v60  ;;  %2573 = vadd.xlane.f32.xlu1 %v2572_v14 }
 0x3e5   : > { %15016 = vpow2.f32 %v2521_v28  ;;  %v2523_v56 = vmul.f32 1.442695, %v2484_v45 }
 0x3e7   : > { %v16785_v1 = vpop.eup %15012  ;;  %15018 = vpow2.f32 %v2523_v56 }
 0x3e8   : > { %v2457_v63 = vpop.xlane.xlu0 %2456  ;;  %v2575_v10 = vsel %vm2400_vm3, %v16785_v1, 0.0 }
 0x3e9   : > { %v16789_v23 = vpop.eup %15014  ;;  %v2485_v11 = vsub.f32 %v16695_v33, %v2457_v63  ;;  %2576 = vadd.xlane.f32.xlu0 %v2575_v10 }
 0x3ea   : > { %v2460_v54 = vpop.xlane.xlu1 %2459  ;;  %v2578_v35 = vsel %vm2400_vm3, %v16789_v23, 0.0 }
 0x3eb   : > { %v2525_v58 = vmul.f32 1.442695, %v2485_v11  ;;  %v2486_v50 = vsub.f32 %v16699_v17, %v2460_v54  ;;  %2579 = vadd.xlane.f32.xlu1 %v2578_v35 }
 0x3ed   : > { %15020 = vpow2.f32 %v2525_v58  ;;  %v2527_v42 = vmul.f32 1.442695, %v2486_v50 }
 0x3ef   : > { %v16795_v41 = vpop.eup %15016  ;;  %15022 = vpow2.f32 %v2527_v42  ;;  %v1184_v42 = vcombine.high %v16563_v57, %v16563_v57 }
 0x3f0   : > { %v2463_v3 = vpop.xlane.xlu0 %2462  ;;  %v2581_v59 = vsel %vm2400_vm3, %v16795_v41, 0.0 }
 0x3f1   : > { %v16799_v60 = vpop.eup %15018  ;;  %v2487_v33 = vsub.f32 %v16703_v22, %v2463_v3  ;;  %2582 = vadd.xlane.f32.xlu0 %v2581_v59  ;;  %v1198_v59 = vrot.slane %v1184_v42, %v16268_v52 }
 0x3f2   : > { %v2584_v14 = vsel %vm2400_vm3, %v16799_v60, 0.0  ;;  %v2466_v11 = vpop.xlane.xlu1 %2465 }
 0x3f3   : > { %v2529_v28 = vmul.f32 1.442695, %v2487_v33  ;;  %2585 = vadd.xlane.f32.xlu1 %v2584_v14  ;;  %v2488_v54 = vsub.f32 %v16707_v38, %v2466_v11  ;;  %v1200_v57 = vcombine.high %v1198_v59, %v1198_v59 }
 0x3f5   : > { %15024 = vpow2.f32 %v2529_v28  ;;  %v2531_v35 = vmul.f32 1.442695, %v2488_v54  ;;  %v16858_v28 = vpack.c.bf16 %v1198_v59, %v1198_v59  ;;  %v16865_v54 = vpack.c.bf16 %v1200_v57, %v1200_v57 }
 0x3f6   : > { %v19508_v59 = vmov 0.0  }
 0x3f7   : > { %v16804_v17 = vpop.eup %15020  ;;  %15026 = vpow2.f32 %v2531_v35  ;;  %19506 = vst [vmem:[#allocation79_spill] sm:$0xff] %v16858_v28  ;;  %19507 = vst [vmem:[#allocation80_spill] sm:$0xff] %v16865_v54  ;;  %v1208_v35 = vrot.slane %v16404_v40, %v16268_v52 }
 0x3f8   : > { %v2587_v45 = vsel %vm2400_vm3, %v16804_v17, 0.0 }
 0x3f9   : > { %v16808_v56 = vpop.eup %15022  ;;  %2588 = vadd.xlane.f32.xlu0 %v2587_v45  ;;  %v16882_v57 = vpack.c.bf16 %v1208_v35, %v1208_v35 }
 0x3fa   : > { %v2590_v63 = vsel %vm2400_vm3, %v16808_v56, 0.0 }
 0x3fb   : > { %2591 = vadd.xlane.f32.xlu1 %v2590_v63  ;;  %19509 = vst [vmem:[#allocation81_spill] sm:$0xff] %v16882_v57 }
 0x3ff   : > { %v16812_v22 = vpop.eup %15024 }
 0x400   : > { %v2593_v10 = vsel %vm2400_vm3, %v16812_v22, 0.0 }
 0x401   : > { %2594 = vadd.xlane.f32.xlu0 %v2593_v10  ;;  %v16835_v58 = vpop.eup %15026 }
 0x402   : > { %v2596_v38 = vsel %vm2400_vm3, %v16835_v58, 0.0 }
 0x40c   : > { %3863 = vrot.lane.b32.xlu1 %v16279_v2, %s15730_s17 }
 0x410   : > { %3808 = vrot.lane.b32.xlu1 %v16302_v24, %s15730_s17 }
 0x417   : > { %3811 = vrot.lane.b32.xlu0 %v16274_v62, %s15730_s17 }
 0x41b   : > { %3915 = vrot.lane.b32.xlu0 %v16296_v20, %s15730_s17 }
 0x41f   : > { %3912 = vrot.lane.b32.xlu0 %v16333_v48, %s15730_s17 }
 0x423   : > { %4019 = vrot.lane.b32.xlu0 %v16330_v44, %s15730_s17 }
 0x427   : > { %4016 = vrot.lane.b32.xlu0 %v16368_v18, %s15730_s17 }
 0x42b   : > { %4123 = vrot.lane.b32.xlu0 %v16364_v15, %s15730_s17 }
 0x42f   : > { %4120 = vrot.lane.b32.xlu0 %v16414_v43, %s15730_s17 }
 0x433   : > { %4227 = vrot.lane.b32.xlu0 %v16385_v46, %s15730_s17 }
 0x434   : > { %2597 = vadd.xlane.f32.xlu1 %v2596_v38 }
 0x437   : > { %4224 = vrot.lane.b32.xlu0 %v16445_v49, %s15730_s17 }
 0x43b   : > { %4331 = vrot.lane.b32.xlu0 %v16435_v5, %s15730_s17 }
 0x43e   : > { %v2535_v50 = vpop.xlane.xlu0 %2534 }
 0x43f   : > { %15028 = vrcp.f32 %v2535_v50  ;;  %4328 = vrot.lane.b32.xlu0 %v16471_v34, %s15730_s17 }
 0x442   : > { %v2538_v3 = vpop.xlane.xlu1 %2537 }
 0x443   : > { %15030 = vrcp.f32 %v2538_v3  ;;  %4435 = vrot.lane.b32.xlu0 %v16468_v32, %s15730_s17 }
 0x445   : > { %3860 = vrot.lane.b32.xlu1 %v16309_v30, %s15730_s17 }
 0x446   : > { %v2541_v33 = vpop.xlane.xlu0 %2540 }
 0x447   : > { %15032 = vrcp.f32 %v2541_v33  ;;  %4432 = vrot.lane.b32.xlu0 %v16497_v13, %s15730_s17 }
 0x449   : > { %v15029_v14 = vpop.eup %15028  ;;  %3967 = vrot.lane.b32.xlu1 %v16304_v25, %s15730_s17 }
 0x44a   : > { %v2544_v45 = vpop.xlane.xlu1 %2543  ;;  %v2621_v63 = vmul.f32 %v15029_v14, %v16715_v4  ;;  %v2763_v4 = vsel %vm2669_vm2, %v16858_v28, 0  ;;  %v1201_v14 = vcombine.high %v16404_v40, %v16404_v40 }
 0x44b   : > { %15034 = vrcp.f32 %v2544_v45  ;;  %4539 = vrot.lane.b32.xlu0 %v16492_v61, %s15730_s17  ;;  %v2809_v45 = vsel %vm2669_vm2, %v16865_v54, 0 }
 0x44c   : > { %v2643_v10 = vpack.c.bf16 %v2621_v63, %v2621_v63 }
 0x44d   : > { %v15031_v11 = vpop.eup %15030  ;;  %3964 = vrot.lane.b32.xlu1 %v16338_v55, %s15730_s17 }
 0x44e   : > { %13766 = vmatmul.mubr.msk.bf16.vlgmr.msra.gmra.mrb[56].mxu0 %vm2665_vm4, %v2643_v10  ;;  %v2547_v38 = vpop.xlane.xlu0 %2546  ;;  %v2622_v50 = vmul.f32 %v15031_v11, %v16720_v39  ;;  %v1216_v39 = vcombine.high %v1208_v35, %v1208_v35  ;;  %v1215_v11 = vrot.slane %v1201_v14, %v16268_v52 }
 0x44f   : > { %13776 = vmatpush3.bf16.msra.mxu0 %v2763_v4  ;;  %15036 = vrcp.f32 %v2547_v38  ;;  %4536 = vrot.lane.b32.xlu0 %v16525_v7, %s15730_s17 }
 0x450   : > { %v2550_v42 = vpop.xlane.xlu1 %2549  ;;  %v2644_v3 = vpack.c.bf16 %v2622_v50, %v2622_v50  ;;  %13777 = vmatprep.mubr.msk.bf16.mxu0 %vm15728_vm0, %v19508_v59  ;;  %13787 = vmatprep.subr.bf16.mxu0 %v19508_v59  ;;  %v16896_v35 = vpack.c.bf16 %v1216_v39, %v1216_v39  ;;  %v16909_v14 = vpack.c.bf16 %v1215_v11, %v1215_v11 }
 0x451   : > { %v15033_v33 = vpop.eup %15032  ;;  %15038 = vrcp.f32 %v2550_v42  ;;  %4071 = vrot.lane.b32.xlu1 %v16336_v53, %s15730_s17 }
 0x452   : > { %13772 = vmatmul.mubr.msk.bf16.vlgmr.msra.gmra.mrb[56].mxu1 %vm2665_vm4, %v2644_v3  ;;  %v2623_v63 = vmul.f32 %v15033_v33, %v16725_v37  ;;  %19510 = vst [vmem:[#allocation82_spill] sm:$0xff] %v16896_v35  ;;  %v2855_v37 = vsel %vm2669_vm2, %v16882_v57, 0  ;;  %v1217_v33 = vcombine.high %v1215_v11, %v1215_v11  ;;  %19511 = vst [vmem:[#allocation83_spill] sm:$0xff] %v16909_v14  ;;  %v19513_v11 = vld [vmem:[#allocation48_spill] sm:$0xff] }
 0x453   : > { %13782 = vmatpush3.bf16.msra.mxu1 %v2809_v45  ;;  %4643 = vrot.lane.b32.xlu0 %v16511_v51, %s15730_s17 }
 0x454   : > { %v2645_v10 = vpack.c.bf16 %v2623_v63, %v2623_v63  ;;  %13783 = vmatprep.mubr.msk.bf16.mxu1 %vm15728_vm0, %v19508_v59  ;;  %13793 = vmatprep.subr.bf16.mxu1 %v19508_v59  ;;  %v19512_v63 = vld [vmem:[#allocation67_spill] sm:$0xff] }
 0x455   : > { %v15035_v40 = vpop.eup %15034  ;;  %4068 = vrot.lane.b32.xlu1 %v16375_v26, %s15730_s17 }
 0x456   : > { %13778 = vmatmul.mubr.msk.bf16.vlgmr.msra.gmra.mrb[60].mxu0 %vm2665_vm4, %v2645_v10  ;;  %v2553_v4 = vpop.xlane.xlu0 %2552  ;;  %v2624_v38 = vmul.f32 %v15035_v40, %v16730_v0  ;;  %v2901_v0 = vsel %vm2669_vm2, %v16896_v35, 0 }
 0x457   : > { %13788 = vmatpush3.bf16.msra.mxu0 %v2855_v37  ;;  %15040 = vrcp.f32 %v2553_v4  ;;  %4640 = vrot.lane.b32.xlu0 %v16549_v29, %s15730_s17  ;;  %v16923_v37 = vpack.c.bf16 %v1217_v33, %v1217_v33 }
 0x458   : > { %v2556_v50 = vpop.xlane.xlu1 %2555  ;;  %v2646_v42 = vpack.c.bf16 %v2624_v38, %v2624_v38  ;;  %13789 = vmatprep.mubr.msk.bf16.mxu0 %vm15728_vm0, %v19508_v59  ;;  %13799 = vmatprep.subr.bf16.mxu0 %v19508_v59  ;;  %v2947_v38 = vsel %vm2669_vm2, %v16909_v14, 0 }
 0x459   : > { %v15037_v3 = vpop.eup %15036  ;;  %15042 = vrcp.f32 %v2556_v50  ;;  %4175 = vrot.lane.b32.xlu1 %v16370_v19, %s15730_s17  ;;  %19514 = vst [vmem:[#allocation84_spill] sm:$0xff] %v16923_v37 }
 0x45a   : > { %13784 = vmatmul.mubr.msk.bf16.vlgmr.msra.gmra.mrb[60].mxu1 %vm2665_vm4, %v2646_v42  ;;  %v2625_v39 = vmul.f32 %v15037_v3, %v16735_v6  ;;  %v19515_v6 = vld [vmem:[#allocation45_spill] sm:$0xff]  ;;  %v19516_v42 = vld [vmem:[#allocation72_spill] sm:$0xff] }
 0x45b   : > { %v15039_v45 = vpop.eup %15038  ;;  %13794 = vmatpush3.bf16.msra.mxu1 %v2901_v0  ;;  %4747 = vrot.lane.b32.xlu0 %v19512_v63, %s15730_s17  ;;  %v1225_v4 = vrot.slane %v19515_v6, %v16268_v52  ;;  %v1218_v0 = vcombine.high %v19515_v6, %v19515_v6 }
 0x45c   : > { %v2647_v10 = vpack.c.bf16 %v2625_v39, %v2625_v39  ;;  %13795 = vmatprep.mubr.msk.bf16.mxu1 %vm15728_vm0, %v19508_v59  ;;  %13805 = vmatprep.subr.bf16.mxu1 %v19508_v59  ;;  %v2626_v40 = vmul.f32 %v15039_v45, %v16739_v21  ;;  %v19517_v39 = vld [vmem:[#allocation44_spill] sm:$0xff] }
 0x45d   : > { %4172 = vrot.lane.b32.xlu1 %v19513_v11, %s15730_s17  ;;  %v1233_v45 = vcombine.high %v1225_v4, %v1225_v4 }
 0x45e   : > { %13790 = vmatmul.mubr.msk.bf16.vlgmr.msra.gmra.mrb[64].mxu0 %vm2665_vm4, %v2647_v10  ;;  %v2559_v50 = vpop.xlane.xlu0 %2558  ;;  %v2648_v3 = vpack.c.bf16 %v2626_v40, %v2626_v40  ;;  %v16939_v10 = vpack.c.bf16 %v1225_v4, %v1225_v4  ;;  %v2993_v40 = vsel %vm2669_vm2, %v16923_v37, 0 }
 0x45f   : > { %13800 = vmatpush3.bf16.msra.mxu0 %v2947_v38  ;;  %15044 = vrcp.f32 %v2559_v50  ;;  %4744 = vrot.lane.b32.xlu0 %v19516_v42, %s15730_s17  ;;  %v19519_v42 = vld [vmem:[#allocation71_spill] sm:$0xff]  ;;  %v16954_v63 = vpack.c.bf16 %v1233_v45, %v1233_v45  ;;  %v19523_v45 = vld [vmem:[#allocation53_spill] sm:$0xff] }
 0x460   : > { %v2562_v21 = vpop.xlane.xlu1 %2561  ;;  %13801 = vmatprep.mubr.msk.bf16.mxu0 %vm15728_vm0, %v19508_v59  ;;  %13811 = vmatprep.subr.bf16.mxu0 %v19508_v59  ;;  %19518 = vst [vmem:[#allocation45_spill] sm:$0xff] %v16939_v10 }
 0x461   : > { %v15041_v33 = vpop.eup %15040  ;;  %15046 = vrcp.f32 %v2562_v21  ;;  %4279 = vrot.lane.b32.xlu1 %v19517_v39, %s15730_s17  ;;  %v19520_v21 = vld [vmem:[#allocation54_spill] sm:$0xff]  ;;  %19521 = vst [vmem:[#allocation85_spill] sm:$0xff] %v16954_v63 }
 0x462   : > { %13796 = vmatmul.mubr.msk.bf16.vlgmr.msra.gmra.mrb[64].mxu1 %vm2665_vm4, %v2648_v3  ;;  %v2627_v38 = vmul.f32 %v15041_v33, %v16745_v36  ;;  %v1232_v3 = vrot.slane %v1218_v0, %v16268_v52  ;;  %v3039_v36 = vsel %vm2669_vm2, %v16939_v10, 0 }
 0x463   : > { %v15043_v50 = vpop.eup %15042  ;;  %13806 = vmatpush3.bf16.msra.mxu1 %v2993_v40  ;;  %4851 = vrot.lane.b32.xlu0 %v19519_v42, %s15730_s17  ;;  %v19522_v40 = vld [vmem:[#allocation77_spill] sm:$0xff] }
 0x464   : > { %v2649_v6 = vpack.c.bf16 %v2627_v38, %v2627_v38  ;;  %13807 = vmatprep.mubr.msk.bf16.mxu1 %vm15728_vm0, %v19508_v59  ;;  %13817 = vmatprep.subr.bf16.mxu1 %v19508_v59  ;;  %v2628_v4 = vmul.f32 %v15043_v50, %v16749_v47  ;;  %v1234_v50 = vcombine.high %v1232_v3, %v1232_v3 }
 0x465   : > { %4276 = vrot.lane.b32.xlu1 %v19520_v21, %s15730_s17 }
 0x466   : > { %13802 = vmatmul.mubr.msk.bf16.vlgmr.msra.gmra.mrb[68].mxu0 %vm2665_vm4, %v2649_v6  ;;  %v2565_v33 = vpop.xlane.xlu0 %2564  ;;  %v2650_v47 = vpack.c.bf16 %v2628_v4, %v2628_v4  ;;  %v16966_v6 = vpack.c.bf16 %v1232_v3, %v1232_v3 }
 0x467   : > { %13812 = vmatpush3.bf16.msra.mxu0 %v3039_v36  ;;  %15048 = vrcp.f32 %v2565_v33  ;;  %4848 = vrot.lane.b32.xlu0 %v19522_v40, %s15730_s17  ;;  %v3085_v36 = vsel %vm2669_vm2, %v16954_v63, 0  ;;  %v19525_v40 = vld [vmem:[#allocation75_spill] sm:$0xff] }
 0x468   : > { %v2568_v38 = vpop.xlane.xlu1 %2567  ;;  %13813 = vmatprep.mubr.msk.bf16.mxu0 %vm15728_vm0, %v19508_v59  ;;  %13823 = vmatprep.subr.bf16.mxu0 %v19508_v59  ;;  %19524 = vst [vmem:[#allocation86_spill] sm:$0xff] %v16966_v6 }
 0x469   : > { %v15045_v0 = vpop.eup %15044  ;;  %15050 = vrcp.f32 %v2568_v38  ;;  %4383 = vrot.lane.b32.xlu1 %v19523_v45, %s15730_s17  ;;  %v19526_v38 = vld [vmem:[#allocation58_spill] sm:$0xff] }
 0x46a   : > { %13808 = vmatmul.mubr.msk.bf16.vlgmr.msra.gmra.mrb[68].mxu1 %vm2665_vm4, %v2650_v47  ;;  %v2629_v4 = vmul.f32 %v15045_v0, %v16755_v16  ;;  %v16980_v47 = vpack.c.bf16 %v1234_v50, %v1234_v50  ;;  %v19528_v16 = vld [vmem:[#allocation46_spill] sm:$0xff] }
 0x46b   : > { %v15047_v33 = vpop.eup %15046  ;;  %13818 = vmatpush3.bf16.msra.mxu1 %v3085_v36  ;;  %5216 = vrot.lane.b32.xlu0 %v19525_v40, %s15730_s17  ;;  %v1242_v0 = vrot.slane %v19528_v16, %v16268_v52  ;;  %v3131_v36 = vsel %vm2669_vm2, %v16966_v6, 0  ;;  %v19529_v40 = vld [vmem:[#allocation57_spill] sm:$0xff] }
 0x46c   : > { %v2651_v42 = vpack.c.bf16 %v2629_v4, %v2629_v4  ;;  %13819 = vmatprep.mubr.msk.bf16.mxu1 %vm15728_vm0, %v19508_v59  ;;  %13829 = vmatprep.subr.bf16.mxu1 %v19508_v59  ;;  %v2630_v3 = vmul.f32 %v15047_v33, %v16759_v9  ;;  %19527 = vst [vmem:[#allocation87_spill] sm:$0xff] %v16980_v47 }
 0x46d   : > { %4380 = vrot.lane.b32.xlu1 %v19526_v38, %s15730_s17 }
 0x46e   : > { %13814 = vmatmul.mubr.msk.bf16.vlgmr.msra.gmra.mrb[72].mxu0 %vm2665_vm4, %v2651_v42  ;;  %v2571_v4 = vpop.xlane.xlu0 %2570  ;;  %v2652_v33 = vpack.c.bf16 %v2630_v3, %v2630_v3  ;;  %v1235_v42 = vcombine.high %v19528_v16, %v19528_v16  ;;  %v3177_v3 = vsel %vm2669_vm2, %v16980_v47, 0 }
 0x46f   : > { %13824 = vmatpush3.bf16.msra.mxu0 %v3131_v36  ;;  %15052 = vrcp.f32 %v2571_v4  ;;  %5314 = vrot.lane.b32.xlu0 %v16858_v28, %s15730_s17  ;;  %v1250_v36 = vcombine.high %v1242_v0, %v1242_v0  ;;  %v16996_v4 = vpack.c.bf16 %v1242_v0, %v1242_v0 }
 0x470   : > { %v2574_v9 = vpop.xlane.xlu1 %2573  ;;  %13825 = vmatprep.mubr.msk.bf16.mxu0 %vm15728_vm0, %v19508_v59  ;;  %13835 = vmatprep.subr.bf16.mxu0 %v19508_v59 }
 0x471   : > { %v15049_v50 = vpop.eup %15048  ;;  %15054 = vrcp.f32 %v2574_v9  ;;  %4487 = vrot.lane.b32.xlu1 %v19529_v40, %s15730_s17  ;;  %19530 = vst [vmem:[#allocation46_spill] sm:$0xff] %v16996_v4  ;;  %v19531_v9 = vld [vmem:[#allocation62_spill] sm:$0xff]  ;;  %v17011_v51 = vpack.c.bf16 %v1250_v36, %v1250_v36 }
 0x472   : > { %13820 = vmatmul.mubr.msk.bf16.vlgmr.msra.gmra.mrb[72].mxu1 %vm2665_vm4, %v2652_v33  ;;  %v2631_v28 = vmul.f32 %v15049_v50, %v16765_v27  ;;  %v1249_v33 = vrot.slane %v1235_v42, %v16268_v52  ;;  %v3223_v27 = vsel %vm2669_vm2, %v16996_v4, 0  ;;  %v19533_v42 = vld [vmem:[#allocation61_spill] sm:$0xff] }
 0x473   : > { %v15051_v29 = vpop.eup %15050  ;;  %13830 = vmatpush3.bf16.msra.mxu1 %v3177_v3  ;;  %5412 = vrot.lane.b32.xlu0 %v16882_v57, %s15730_s17  ;;  %19532 = vst [vmem:[#allocation88_spill] sm:$0xff] %v17011_v51 }
 0x474   : > { %v2653_v16 = vpack.c.bf16 %v2631_v28, %v2631_v28  ;;  %13831 = vmatprep.mubr.msk.bf16.mxu1 %vm15728_vm0, %v19508_v59  ;;  %13841 = vmatprep.subr.bf16.mxu1 %v19508_v59  ;;  %v2632_v0 = vmul.f32 %v15051_v29, %v16769_v12  ;;  %v1251_v36 = vcombine.high %v1249_v33, %v1249_v33 }
 0x475   : > { %4484 = vrot.lane.b32.xlu1 %v19531_v9, %s15730_s17  ;;  %v17023_v3 = vpack.c.bf16 %v1249_v33, %v1249_v33 }
 0x476   : > { %13826 = vmatmul.mubr.msk.bf16.vlgmr.msra.gmra.mrb[76].mxu0 %vm2665_vm4, %v2653_v16  ;;  %v2577_v28 = vpop.xlane.xlu0 %2576  ;;  %v2654_v29 = vpack.c.bf16 %v2632_v0, %v2632_v0  ;;  %v3269_v16 = vsel %vm2669_vm2, %v17011_v51, 0 }
 0x477   : > { %13836 = vmatpush3.bf16.msra.mxu0 %v3223_v27  ;;  %15056 = vrcp.f32 %v2577_v28  ;;  %5510 = vrot.lane.b32.xlu0 %v16909_v14, %s15730_s17  ;;  %19534 = vst [vmem:[#allocation89_spill] sm:$0xff] %v17023_v3 }
 0x478   : > { %v2580_v50 = vpop.xlane.xlu1 %2579  ;;  %13837 = vmatprep.mubr.msk.bf16.mxu0 %vm15728_vm0, %v19508_v59  ;;  %13847 = vmatprep.subr.bf16.mxu0 %v19508_v59 }
 0x479   : > { %v15053_v12 = vpop.eup %15052  ;;  %15058 = vrcp.f32 %v2580_v50  ;;  %4591 = vrot.lane.b32.xlu1 %v19533_v42, %s15730_s17  ;;  %v19535_v50 = vld [vmem:[#allocation66_spill] sm:$0xff] }
 0x47a   : > { %13832 = vmatmul.mubr.msk.bf16.vlgmr.msra.gmra.mrb[76].mxu1 %vm2665_vm4, %v2654_v29  ;;  %v2633_v0 = vmul.f32 %v15053_v12, %v16775_v8  ;;  %v17037_v29 = vpack.c.bf16 %v1251_v36, %v1251_v36  ;;  %v19537_v8 = vld [vmem:[#allocation50_spill] sm:$0xff] }
 0x47b   : > { %v15055_v27 = vpop.eup %15054  ;;  %13842 = vmatpush3.bf16.msra.mxu1 %v3269_v16  ;;  %5608 = vrot.lane.b32.xlu0 %v16939_v10, %s15730_s17  ;;  %v1259_v12 = vrot.slane %v19537_v8, %v16268_v52  ;;  %v3315_v16 = vsel %vm2669_vm2, %v17023_v3, 0  ;;  %v19538_v10 = vld [vmem:[#allocation64_spill] sm:$0xff] }
 0x47c   : > { %v2655_v28 = vpack.c.bf16 %v2633_v0, %v2633_v0  ;;  %13843 = vmatprep.mubr.msk.bf16.mxu1 %vm15728_vm0, %v19508_v59  ;;  %13853 = vmatprep.subr.bf16.mxu1 %v19508_v59  ;;  %v2634_v33 = vmul.f32 %v15055_v27, %v16779_v31  ;;  %19536 = vst [vmem:[#allocation90_spill] sm:$0xff] %v17037_v29 }
 0x47d   : > { %4588 = vrot.lane.b32.xlu1 %v19535_v50, %s15730_s17 }
 0x47e   : > { %13838 = vmatmul.mubr.msk.bf16.vlgmr.msra.gmra.mrb[80].mxu0 %vm2665_vm4, %v2655_v28  ;;  %v2583_v0 = vpop.xlane.xlu0 %2582  ;;  %v2656_v27 = vpack.c.bf16 %v2634_v33, %v2634_v33  ;;  %v1252_v28 = vcombine.high %v19537_v8, %v19537_v8  ;;  %v3361_v33 = vsel %vm2669_vm2, %v17037_v29, 0 }
 0x47f   : > { %13848 = vmatpush3.bf16.msra.mxu0 %v3315_v16  ;;  %15060 = vrcp.f32 %v2583_v0  ;;  %5706 = vrot.lane.b32.xlu0 %v16966_v6, %s15730_s17  ;;  %v1267_v16 = vcombine.high %v1259_v12, %v1259_v12  ;;  %v17053_v0 = vpack.c.bf16 %v1259_v12, %v1259_v12 }
 0x480   : > { %v2586_v31 = vpop.xlane.xlu1 %2585  ;;  %13849 = vmatprep.mubr.msk.bf16.mxu0 %vm15728_vm0, %v19508_v59  ;;  %13859 = vmatprep.subr.bf16.mxu0 %v19508_v59 }
 0x481   : > { %v15057_v36 = vpop.eup %15056  ;;  %15062 = vrcp.f32 %v2586_v31  ;;  %4695 = vrot.lane.b32.xlu1 %v19538_v10, %s15730_s17  ;;  %19539 = vst [vmem:[#allocation50_spill] sm:$0xff] %v17053_v0  ;;  %v19540_v31 = vld [vmem:[#allocation70_spill] sm:$0xff]  ;;  %v17068_v57 = vpack.c.bf16 %v1267_v16, %v1267_v16 }
 0x482   : > { %13844 = vmatmul.mubr.msk.bf16.vlgmr.msra.gmra.mrb[80].mxu1 %vm2665_vm4, %v2656_v27  ;;  %v2635_v6 = vmul.f32 %v15057_v36, %v16785_v1  ;;  %v1266_v27 = vrot.slane %v1252_v28, %v16268_v52  ;;  %v3407_v1 = vsel %vm2669_vm2, %v17053_v0, 0  ;;  %v19542_v28 = vld [vmem:[#allocation69_spill] sm:$0xff] }
 0x483   : > { %v15059_v14 = vpop.eup %15058  ;;  %13854 = vmatpush3.bf16.msra.mxu1 %v3361_v33  ;;  %5804 = vrot.lane.b32.xlu0 %v16996_v4, %s15730_s17  ;;  %19541 = vst [vmem:[#allocation91_spill] sm:$0xff] %v17068_v57 }
 0x484   : > { %v2657_v8 = vpack.c.bf16 %v2635_v6, %v2635_v6  ;;  %13855 = vmatprep.mubr.msk.bf16.mxu1 %vm15728_vm0, %v19508_v59  ;;  %13865 = vmatprep.subr.bf16.mxu1 %v19508_v59  ;;  %v2636_v12 = vmul.f32 %v15059_v14, %v16789_v23  ;;  %v1268_v16 = vcombine.high %v1266_v27, %v1266_v27 }
 0x485   : > { %4692 = vrot.lane.b32.xlu1 %v19540_v31, %s15730_s17  ;;  %v17078_v33 = vpack.c.bf16 %v1266_v27, %v1266_v27  ;;  %v19543_v27 = vld [vmem:[#allocation74_spill] sm:$0xff] }
 0x486   : > { %13850 = vmatmul.mubr.msk.bf16.vlgmr.msra.gmra.mrb[84].mxu0 %vm2665_vm4, %v2657_v8  ;;  %v2589_v6 = vpop.xlane.xlu0 %2588  ;;  %v2658_v23 = vpack.c.bf16 %v2636_v12, %v2636_v12  ;;  %v3453_v8 = vsel %vm2669_vm2, %v17068_v57, 0  ;;  %v17090_v4 = vpack.c.bf16 %v1268_v16, %v1268_v16  ;;  %v19545_v16 = vld [vmem:[#allocation73_spill] sm:$0xff] }
 0x487   : > { %13860 = vmatpush3.bf16.msra.mxu0 %v3407_v1  ;;  %15064 = vrcp.f32 %v2589_v6  ;;  %13861 = vmatprep.mubr.msk.bf16.mxu0 %vm15728_vm0, %v19508_v59 }
 0x488   : > { %v2592_v36 = vpop.xlane.xlu1 %2591  ;;  %13871 = vmatprep.subr.bf16.mxu0 %v19508_v59 }
 0x489   : > { %v15061_v14 = vpop.eup %15060  ;;  %15066 = vrcp.f32 %v2592_v36  ;;  %4799 = vrot.lane.b32.xlu1 %v19542_v28, %s15730_s17 }
 0x48a   : > { %13856 = vmatmul.mubr.msk.bf16.vlgmr.msra.gmra.mrb[84].mxu1 %vm2665_vm4, %v2658_v23  ;;  %v2637_v1 = vmul.f32 %v15061_v14, %v16795_v41  ;;  %v19544_v23 = vld [vmem:[#allocation51_spill] sm:$0xff]  ;;  %v3499_v41 = vsel %vm2669_vm2, %v17078_v33, 0 }
 0x48b   : > { %v15063_v6 = vpop.eup %15062  ;;  %13866 = vmatpush3.bf16.msra.mxu1 %v3453_v8  ;;  %13867 = vmatprep.mubr.msk.bf16.mxu1 %vm15728_vm0, %v19508_v59  ;;  %v1275_v7 = vrot.slane %v19544_v23, %v16268_v52  ;;  %v3545_v23 = vsel %vm2669_vm2, %v17090_v4, 0 }
 0x48c   : > { %v2659_v12 = vpack.c.bf16 %v2637_v1, %v2637_v1  ;;  %13877 = vmatprep.subr.bf16.mxu1 %v19508_v59  ;;  %v2638_v36 = vmul.f32 %v15063_v6, %v16799_v60 }
 0x48d   : > { %4796 = vrot.lane.b32.xlu1 %v19543_v27, %s15730_s17  ;;  %v1276_v1 = vcombine.high %v1275_v7, %v1275_v7  ;;  %v17102_v6 = vpack.c.bf16 %v1275_v7, %v1275_v7  ;;  %v19546_v7 = vld [vmem:[#allocation78_spill] sm:$0xff] }
 0x48e   : > { %13862 = vmatmul.mubr.msk.bf16.vlgmr.msra.gmra.mrb[88].mxu0 %vm2665_vm4, %v2659_v12  ;;  %v2595_v14 = vpop.xlane.xlu0 %2594  ;;  %v2660_v60 = vpack.c.bf16 %v2638_v36, %v2638_v36 }
 0x48f   : > { %13872 = vmatpush3.bf16.msra.mxu0 %v3499_v41  ;;  %15068 = vrcp.f32 %v2595_v14  ;;  %13873 = vmatprep.mubr.msk.bf16.mxu0 %vm15728_vm0, %v19508_v59  ;;  %v17114_v13 = vpack.c.bf16 %v1276_v1, %v1276_v1 }
 0x490   : > { %13883 = vmatprep.subr.bf16.mxu0 %v19508_v59 }
 0x491   : > { %v15065_v8 = vpop.eup %15064  ;;  %4903 = vrot.lane.b32.xlu1 %v19545_v16, %s15730_s17  ;;  %v3637_v1 = vsel %vm2669_vm2, %v17114_v13, 0 }
 0x492   : > { %v3812_v12 = vpop.permute.xlu0 %3811  ;;  %13868 = vmatmul.mubr.msk.bf16.vlgmr.msra.gmra.mrb[88].mxu1 %vm2665_vm4, %v2660_v60  ;;  %v2639_v41 = vmul.f32 %v15065_v8, %v16804_v17  ;;  %v3591_v17 = vsel %vm2669_vm2, %v17102_v6, 0 }
 0x493   : > { %v15067_v14 = vpop.eup %15066  ;;  %13878 = vmatpush3.bf16.msra.mxu1 %v3545_v23  ;;  %13879 = vmatprep.mubr.msk.bf16.mxu1 %vm15728_vm0, %v19508_v59 }
 0x494   : > { %v2661_v36 = vpack.c.bf16 %v2639_v41, %v2639_v41  ;;  %13889 = vmatprep.subr.bf16.mxu1 %v19508_v59  ;;  %v2640_v61 = vmul.f32 %v15067_v14, %v16808_v56  ;;  %v19547_v56 = vld [vmem:[#allocation76_spill] sm:$0xff] }
 0x495   : > { %4900 = vrot.lane.b32.xlu1 %v19546_v7, %s15730_s17 }
 0x496   : > { %13874 = vmatmul.mubr.msk.bf16.vlgmr.msra.gmra.mrb[92].mxu0 %vm2665_vm4, %v2661_v36  ;;  %v3916_v60 = vpop.permute.xlu0 %3915  ;;  %v2662_v8 = vpack.c.bf16 %v2640_v61, %v2640_v61 }
 0x497   : > { %13884 = vmatpush3.bf16.msra.mxu0 %v3591_v17  ;;  %13885 = vmatprep.mubr.msk.bf16.mxu0 %vm15728_vm0, %v19508_v59  ;;  %v3817_v17 = vsel %vm1387_vm1, %v3812_v12, 0 }
 0x498   : > { %13895 = vmatprep.subr.bf16.mxu0 %v19508_v59 }
 0x499   : > { %v15069_v23 = vpop.eup %15068  ;;  %5265 = vrot.lane.b32.xlu1 %v19547_v56, %s15730_s17 }
 0x49a   : > { %v3913_v41 = vpop.permute.xlu0 %3912  ;;  %13880 = vmatmul.mubr.msk.bf16.vlgmr.msra.gmra.mrb[92].mxu1 %vm2665_vm4, %v2662_v8  ;;  %v2641_v14 = vmul.f32 %v15069_v23, %v16812_v22  ;;  %v3864_v8 = vpop.permute.xlu1 %3863 }
 0x49b   : > { %13890 = vmatpush3.bf16.msra.mxu1 %v3637_v1  ;;  %13891 = vmatprep.mubr.msk.bf16.mxu1 %vm15728_vm0, %v19508_v59 }
 0x49c   : > { %v2663_v36 = vpack.c.bf16 %v2641_v14, %v2641_v14  ;;  %13901 = vmatprep.subr.bf16.mxu1 %v19508_v59  ;;  %v3921_v14 = vsel %vm1387_vm1, %v3916_v60, 0 }
 0x49d   : > { %5363 = vrot.lane.b32.xlu1 %v16865_v54, %s15730_s17 }
 0x49e   : > { %13886 = vmatmul.mubr.msk.bf16.vlgmr.msra.gmra.mrb[96].mxu0 %vm2665_vm4, %v2663_v36  ;;  %v4020_v61 = vpop.permute.xlu0 %4019  ;;  %v3809_v23 = vpop.permute.xlu1 %3808 }
 0x49f   : > { %13897 = vmatprep.mubr.msk.bf16.mxu0 %vm15728_vm0, %v19508_v59 }
 0x4a0   : > { %13896 = vmatpush3.bf16.xpose.msra.mxu0 %v3817_v17  ;;  %v4025_v17 = vsel %vm1387_vm1, %v4020_v61, 0 }
 0x4a1   : > { %5461 = vrot.lane.b32.xlu1 %v16896_v35, %s15730_s17  ;;  %13907 = vmatprep.subr.bf16.mxu0 %v19508_v59 }
 0x4a2   : > { %v4017_v22 = vpop.permute.xlu0 %4016 }
 0x4a5   : > { %5559 = vrot.lane.b32.xlu1 %v16923_v37, %s15730_s17 }
 0x4a6   : > { %v4124_v1 = vpop.permute.xlu0 %4123 }
 0x4a7   : > { %13898 = vmatmul.mubr.msk.bf16.vlgmr.msra.gmra.mrb[100].mxu0 %vm1387_vm1, %v3809_v23 }
 0x4a8   : > { %13908 = vmatpush3.bf16.xpose.msra.mxu0 %v3921_v14  ;;  %13909 = vmatprep.mubr.msk.bf16.mxu0 %vm15728_vm0, %v19508_v59  ;;  %v4129_v14 = vsel %vm1387_vm1, %v4124_v1, 0 }
 0x4a9   : > { %5657 = vrot.lane.b32.xlu1 %v16954_v63, %s15730_s17  ;;  %13919 = vmatprep.subr.bf16.mxu0 %v19508_v59 }
 0x4aa   : > { %v4121_v12 = vpop.permute.xlu0 %4120 }
 0x4ad   : > { %5755 = vrot.lane.b32.xlu1 %v16980_v47, %s15730_s17 }
 0x4ae   : > { %v4228_v36 = vpop.permute.xlu0 %4227 }
 0x4af   : > { %13910 = vmatmul.mubr.msk.bf16.vlgmr.msra.gmra.mrb[104].mxu0 %vm1387_vm1, %v3913_v41 }
 0x4b0   : > { %13920 = vmatpush3.bf16.xpose.msra.mxu0 %v4025_v17  ;;  %13921 = vmatprep.mubr.msk.bf16.mxu0 %vm15728_vm0, %v19508_v59  ;;  %v4233_v17 = vsel %vm1387_vm1, %v4228_v36, 0 }
 0x4b1   : > { %5853 = vrot.lane.b32.xlu1 %v17011_v51, %s15730_s17  ;;  %13931 = vmatprep.subr.bf16.mxu0 %v19508_v59 }
 0x4b2   : > { %v4225_v60 = vpop.permute.xlu0 %4224 }
 0x4b6   : > { %v4332_v23 = vpop.permute.xlu0 %4331 }
 0x4b7   : > { %13922 = vmatmul.mubr.msk.bf16.vlgmr.msra.gmra.mrb[108].mxu0 %vm1387_vm1, %v4017_v22  ;;  %v4337_v47 = vsel %vm1387_vm1, %v4332_v23, 0 }
 0x4b8   : > { %13932 = vmatpush3.bf16.xpose.msra.mxu0 %v4129_v14  ;;  %13933 = vmatprep.mubr.msk.bf16.mxu0 %vm15728_vm0, %v19508_v59 }
 0x4b9   : > { %13943 = vmatprep.subr.bf16.mxu0 %v19508_v59 }
 0x4ba   : > { %v4329_v41 = vpop.permute.xlu0 %4328 }
 0x4be   : > { %v4436_v61 = vpop.permute.xlu0 %4435 }
 0x4bf   : > { %13934 = vmatmul.mubr.msk.bf16.vlgmr.msra.gmra.mrb[112].mxu0 %vm1387_vm1, %v4121_v12 }
 0x4c0   : > { %13944 = vmatpush3.bf16.xpose.msra.mxu0 %v4233_v17  ;;  %13945 = vmatprep.mubr.msk.bf16.mxu0 %vm15728_vm0, %v19508_v59 }
 0x4c1   : > { %v2598_v51 = vpop.xlane.xlu1 %2597  ;;  %13955 = vmatprep.subr.bf16.mxu0 %v19508_v59 }
 0x4c2   : > { %15070 = vrcp.f32 %v2598_v51  ;;  %v4433_v22 = vpop.permute.xlu0 %4432  ;;  %v4441_v51 = vsel %vm1387_vm1, %v4436_v61, 0 }
 0x4c5   : > { %v3861_v1 = vpop.permute.xlu1 %3860 }
 0x4c6   : > { %v4540_v14 = vpop.permute.xlu0 %4539 }
 0x4c7   : > { %13946 = vmatmul.mubr.msk.bf16.vlgmr.msra.gmra.mrb[116].mxu0 %vm1387_vm1, %v4225_v60 }
 0x4c8   : > { %13956 = vmatpush3.bf16.xpose.msra.mxu0 %v4337_v47  ;;  %13957 = vmatprep.mubr.msk.bf16.mxu0 %vm15728_vm0, %v19508_v59  ;;  %v3869_v47 = vsel %vm1387_vm1, %v3864_v8, 0 }
 0x4c9   : > { %v3968_v12 = vpop.permute.xlu1 %3967  ;;  %13967 = vmatprep.subr.bf16.mxu0 %v19508_v59 }
 0x4ca   : > { %v4537_v36 = vpop.permute.xlu0 %4536 }
 0x4cc   : > { %v15071_v17 = vpop.eup %15070 }
 0x4cd   : > { %v3965_v63 = vpop.permute.xlu1 %3964  ;;  %v2642_v37 = vmul.f32 %v15071_v17, %v16835_v58 }
 0x4ce   : > { %v4644_v23 = vpop.permute.xlu0 %4643 }
 0x4cf   : > { %13958 = vmatmul.mubr.msk.bf16.vlgmr.msra.gmra.mrb[120].mxu0 %vm1387_vm1, %v4329_v41  ;;  %v2664_v35 = vpack.c.bf16 %v2642_v37, %v2642_v37  ;;  %v4545_v41 = vsel %vm1387_vm1, %v4540_v14, 0 }
 0x4d0   : > { %13968 = vmatpush3.bf16.xpose.msra.mxu0 %v4441_v51  ;;  %13969 = vmatprep.mubr.msk.bf16.mxu0 %vm15728_vm0, %v19508_v59 }
 0x4d1   : > { %13892 = vmatmul.mubr.msk.bf16.vlgmr.msra.gmra.mrb[96].mxu1 %vm2665_vm4, %v2664_v35  ;;  %v4072_v60 = vpop.permute.xlu1 %4071  ;;  %13979 = vmatprep.subr.bf16.mxu0 %v19508_v59  ;;  %v3973_v35 = vsel %vm1387_vm1, %v3968_v12, 0 }
 0x4d2   : > { %13902 = vmatpush3.bf16.xpose.msra.mxu1 %v3869_v47  ;;  %13903 = vmatprep.mubr.msk.bf16.mxu1 %vm15728_vm0, %v19508_v59  ;;  %v4641_v37 = vpop.permute.xlu0 %4640 }
 0x4d3   : > { %13913 = vmatprep.subr.bf16.mxu1 %v19508_v59 }
 0x4d5   : > { %v4069_v58 = vpop.permute.xlu1 %4068 }
 0x4d6   : > { %v4748_v61 = vpop.permute.xlu0 %4747 }
 0x4d7   : > { %13970 = vmatmul.mubr.msk.bf16.vlgmr.msra.gmra.mrb[124].mxu0 %vm1387_vm1, %v4433_v22  ;;  %v4649_v22 = vsel %vm1387_vm1, %v4644_v23, 0 }
 0x4d8   : > { %13980 = vmatpush3.bf16.xpose.msra.mxu0 %v4545_v41  ;;  %13981 = vmatprep.mubr.msk.bf16.mxu0 %vm15728_vm0, %v19508_v59 }
 0x4d9   : > { %13904 = vmatmul.mubr.msk.bf16.vlgmr.msra.gmra.mrb[100].mxu1 %vm1387_vm1, %v3861_v1  ;;  %v4176_v8 = vpop.permute.xlu1 %4175  ;;  %13991 = vmatprep.subr.bf16.mxu0 %v19508_v59  ;;  %v4077_v1 = vsel %vm1387_vm1, %v4072_v60, 0 }
 0x4da   : > { %13914 = vmatpush3.bf16.xpose.msra.mxu1 %v3973_v35  ;;  %13915 = vmatprep.mubr.msk.bf16.mxu1 %vm15728_vm0, %v19508_v59  ;;  %v4745_v17 = vpop.permute.xlu0 %4744 }
 0x4db   : > { %13925 = vmatprep.subr.bf16.mxu1 %v19508_v59 }
 0x4dd   : > { %v4173_v14 = vpop.permute.xlu1 %4172 }
 0x4de   : > { %v4852_v23 = vpop.permute.xlu0 %4851 }
 0x4df   : > { %13982 = vmatmul.mubr.msk.bf16.vlgmr.msra.gmra.mrb[128].mxu0 %vm1387_vm1, %v4537_v36  ;;  %v4753_v36 = vsel %vm1387_vm1, %v4748_v61, 0  ;;  %v4857_v41 = vsel %vm1387_vm1, %v4852_v23, 0 }
 0x4e0   : > { %13992 = vmatpush3.bf16.xpose.msra.mxu0 %v4649_v22  ;;  %13993 = vmatprep.mubr.msk.bf16.mxu0 %vm15728_vm0, %v19508_v59 }
 0x4e1   : > { %13916 = vmatmul.mubr.msk.bf16.vlgmr.msra.gmra.mrb[104].mxu1 %vm1387_vm1, %v3965_v63  ;;  %v4280_v12 = vpop.permute.xlu1 %4279  ;;  %14003 = vmatprep.subr.bf16.mxu0 %v19508_v59  ;;  %v4181_v63 = vsel %vm1387_vm1, %v4176_v8, 0 }
 0x4e2   : > { %13926 = vmatpush3.bf16.xpose.msra.mxu1 %v4077_v1  ;;  %13927 = vmatprep.mubr.msk.bf16.mxu1 %vm15728_vm0, %v19508_v59 }
 0x4e3   : > { %13937 = vmatprep.subr.bf16.mxu1 %v19508_v59 }
 0x4e5   : > { %v4277_v51 = vpop.permute.xlu1 %4276 }
 0x4e7   : > { %13994 = vmatmul.mubr.msk.bf16.vlgmr.msra.gmra.mrb[132].mxu0 %vm1387_vm1, %v4641_v37  ;;  %v4849_v37 = vpop.permute.xlu0 %4848 }
 0x4e8   : > { %14004 = vmatpush3.bf16.xpose.msra.mxu0 %v4753_v36  ;;  %14005 = vmatprep.mubr.msk.bf16.mxu0 %vm15728_vm0, %v19508_v59 }
 0x4e9   : > { %13928 = vmatmul.mubr.msk.bf16.vlgmr.msra.gmra.mrb[108].mxu1 %vm1387_vm1, %v4069_v58  ;;  %v4384_v47 = vpop.permute.xlu1 %4383  ;;  %14015 = vmatprep.subr.bf16.mxu0 %v19508_v59  ;;  %v4285_v58 = vsel %vm1387_vm1, %v4280_v12, 0 }
 0x4ea   : > { %13938 = vmatpush3.bf16.xpose.msra.mxu1 %v4181_v63  ;;  %13939 = vmatprep.mubr.msk.bf16.mxu1 %vm15728_vm0, %v19508_v59 }
 0x4eb   : > { %13949 = vmatprep.subr.bf16.mxu1 %v19508_v59  ;;  %v5217_v8 = vpop.permute.xlu0 %5216 }
 0x4ec   : > { %v5222_v22 = vsel %vm2669_vm2, %v5217_v8, 0 }
 0x4ed   : > { %v4381_v60 = vpop.permute.xlu1 %4380 }
 0x4ef   : > { %14006 = vmatmul.mubr.msk.bf16.vlgmr.msra.gmra.mrb[136].mxu0 %vm1387_vm1, %v4745_v17  ;;  %v17351_v31 = vpop.permute.xlu0 %5314 }
 0x4f0   : > { %14016 = vmatpush3.bf16.xpose.msra.mxu0 %v4857_v41  ;;  %14017 = vmatprep.mubr.msk.bf16.mxu0 %vm15728_vm0, %v19508_v59 }
 0x4f1   : > { %13940 = vmatmul.mubr.msk.bf16.vlgmr.msra.gmra.mrb[112].mxu1 %vm1387_vm1, %v4173_v14  ;;  %v4488_v35 = vpop.permute.xlu1 %4487  ;;  %14027 = vmatprep.subr.bf16.mxu0 %v19508_v59  ;;  %v4389_v14 = vsel %vm1387_vm1, %v4384_v47, 0 }
 0x4f2   : > { %13950 = vmatpush3.bf16.xpose.msra.mxu1 %v4285_v58  ;;  %13951 = vmatprep.mubr.msk.bf16.mxu1 %vm15728_vm0, %v19508_v59  ;;  %v4493_v17 = vsel %vm1387_vm1, %v4488_v35, 0 }
 0x4f3   : > { %13961 = vmatprep.subr.bf16.mxu1 %v19508_v59 }
 0x4f5   : > { %v4485_v61 = vpop.permute.xlu1 %4484 }
 0x4f7   : > { %14018 = vmatmul.mubr.msk.bf16.vlgmr.msra.gmra.mrb[140].mxu0 %vm1387_vm1, %v4849_v37 }
 0x4f8   : > { %14028 = vmatpush3.bf16.msra.mxu0 %v5222_v22  ;;  %14029 = vmatprep.mubr.msk.bf16.mxu0 %vm15728_vm0, %v19508_v59 }
 0x4f9   : > { %13952 = vmatmul.mubr.msk.bf16.vlgmr.msra.gmra.mrb[116].mxu1 %vm1387_vm1, %v4277_v51  ;;  %v4592_v1 = vpop.permute.xlu1 %4591  ;;  %14039 = vmatprep.subr.bf16.mxu0 %v19508_v59 }
 0x4fa   : > { %13962 = vmatpush3.bf16.xpose.msra.mxu1 %v4389_v14  ;;  %13963 = vmatprep.mubr.msk.bf16.mxu1 %vm15728_vm0, %v19508_v59  ;;  %v4597_v23 = vsel %vm1387_vm1, %v4592_v1, 0 }
 0x4fb   : > { %13973 = vmatprep.subr.bf16.mxu1 %v19508_v59 }
 0x4fd   : > { %v4589_v12 = vpop.permute.xlu1 %4588 }
 0x501   : > { %13964 = vmatmul.mubr.msk.bf16.vlgmr.msra.gmra.mrb[120].mxu1 %vm1387_vm1, %v4381_v60  ;;  %v4696_v36 = vpop.permute.xlu1 %4695 }
 0x502   : > { %13974 = vmatpush3.bf16.xpose.msra.mxu1 %v4493_v17  ;;  %13975 = vmatprep.mubr.msk.bf16.mxu1 %vm15728_vm0, %v19508_v59  ;;  %v4701_v47 = vsel %vm1387_vm1, %v4696_v36, 0 }
 0x503   : > { %13985 = vmatprep.subr.bf16.mxu1 %v19508_v59 }
 0x505   : > { %v4693_v51 = vpop.permute.xlu1 %4692 }
 0x509   : > { %13976 = vmatmul.mubr.msk.bf16.vlgmr.msra.gmra.mrb[124].mxu1 %vm1387_vm1, %v4485_v61  ;;  %v4800_v63 = vpop.permute.xlu1 %4799 }
 0x50a   : > { %13986 = vmatpush3.bf16.xpose.msra.mxu1 %v4597_v23  ;;  %13987 = vmatprep.mubr.msk.bf16.mxu1 %vm15728_vm0, %v19508_v59  ;;  %v4805_v37 = vsel %vm1387_vm1, %v4800_v63, 0 }
 0x50b   : > { %13997 = vmatprep.subr.bf16.mxu1 %v19508_v59 }
 0x50d   : > { %v4797_v60 = vpop.permute.xlu1 %4796 }
 0x511   : > { %13988 = vmatmul.mubr.msk.bf16.vlgmr.msra.gmra.mrb[128].mxu1 %vm1387_vm1, %v4589_v12  ;;  %v4904_v41 = vpop.permute.xlu1 %4903 }
 0x512   : > { %13998 = vmatpush3.bf16.xpose.msra.mxu1 %v4701_v47  ;;  %13999 = vmatprep.mubr.msk.bf16.mxu1 %vm15728_vm0, %v19508_v59  ;;  %v4909_v35 = vsel %vm1387_vm1, %v4904_v41, 0 }
 0x513   : > { %14009 = vmatprep.subr.bf16.mxu1 %v19508_v59 }
 0x515   : > { %v4901_v58 = vpop.permute.xlu1 %4900 }
 0x519   : > { %14000 = vmatmul.mubr.msk.bf16.vlgmr.msra.gmra.mrb[132].mxu1 %vm1387_vm1, %v4693_v51  ;;  %v5266_v12 = vpop.permute.xlu1 %5265 }
 0x51a   : > { %14010 = vmatpush3.bf16.xpose.msra.mxu1 %v4805_v37  ;;  %14011 = vmatprep.mubr.msk.bf16.mxu1 %vm15728_vm0, %v19508_v59  ;;  %v5271_v63 = vsel %vm2669_vm2, %v5266_v12, 0 }
 0x51b   : > { %14021 = vmatprep.subr.bf16.mxu1 %v19508_v59 }
 0x51d   : > { %v17385_v15 = vpop.permute.xlu1 %5363 }
 0x521   : > { %v2707_v8 = vpop.f32.mrb[56].mxu0  ;;  %14012 = vmatmul.mubr.msk.bf16.vlgmr.msra.gmra.mrb[136].mxu1 %vm1387_vm1, %v4797_v60 }
 0x522   : > { %14022 = vmatpush3.bf16.xpose.msra.mxu1 %v4909_v35  ;;  %v13767_v61 = vpop.f32.mrb[57].mxu0  ;;  %14023 = vmatprep.mubr.msk.bf16.mxu1 %vm15728_vm0, %v19508_v59 }
 0x523   : > { %v2710_v22 = vpop.f32.mrb[58].mxu0  ;;  %14033 = vmatprep.subr.bf16.mxu1 %v19508_v59 }
 0x524   : > { %v13768_v14 = vpop.f32.mrb[59].mxu0 }
 0x525   : > { %v2753_v1 = vpop.f32.mrb[56].mxu1 }
 0x526   : > { %v3701_v17 = vcombine.low %v2707_v8, %v2753_v1  ;;  %v13773_v36 = vpop.f32.mrb[57].mxu1 }
 0x527   : > { %v2756_v51 = vpop.f32.mrb[58].mxu1 }
 0x528   : > { %v13774_v23 = vpop.f32.mrb[59].mxu1  ;;  %v3709_v14 = vrot.slane %v3701_v17, %v16268_v52 }
 0x529   : > { %v2799_v47 = vpop.f32.mrb[60].mxu0  ;;  %14024 = vmatmul.mubr.msk.bf16.vlgmr.msra.gmra.mrb[140].mxu1 %vm1387_vm1, %v4901_v58 }
 0x52a   : > { %14034 = vmatpush3.bf16.msra.mxu1 %v5271_v63  ;;  %v13779_v60 = vpop.f32.mrb[61].mxu0  ;;  %14035 = vmatprep.mubr.msk.bf16.mxu1 %vm15728_vm0, %v19508_v59 }
 0x52b   : > { %v2802_v37 = vpop.f32.mrb[62].mxu0  ;;  %14045 = vmatprep.subr.bf16.mxu1 %v19508_v59 }
 0x52c   : > { %v13780_v41 = vpop.f32.mrb[63].mxu0 }
 0x52d   : > { %v2845_v35 = vpop.f32.mrb[60].mxu1 }
 0x52e   : > { %v3702_v61 = vcombine.low %v2799_v47, %v2845_v35  ;;  %v13785_v8 = vpop.f32.mrb[61].mxu1 }
 0x52f   : > { %v2848_v22 = vpop.f32.mrb[62].mxu1 }
 0x530   : > { %v3716_v1 = vrot.slane %v3702_v61, %v16268_v52  ;;  %v13786_v12 = vpop.f32.mrb[63].mxu1 }
 0x531   : > { %v2891_v36 = vpop.f32.mrb[64].mxu0 }
 0x532   : > { %v3717_v58 = vcombine.low %v3709_v14, %v3716_v1  ;;  %v13791_v51 = vpop.f32.mrb[65].mxu0 }
 0x533   : > { %v2894_v23 = vpop.f32.mrb[66].mxu0 }
 0x534   : > { %v13792_v63 = vpop.f32.mrb[67].mxu0 }
 0x535   : > { %v2937_v60 = vpop.f32.mrb[64].mxu1 }
 0x536   : > { %v3718_v54 = vcombine.low %v2891_v36, %v2937_v60  ;;  %v13797_v37 = vpop.f32.mrb[65].mxu1 }
 0x537   : > { %v2940_v56 = vpop.f32.mrb[66].mxu1 }
 0x538   : > { %v13798_v7 = vpop.f32.mrb[67].mxu1  ;;  %v3726_v61 = vrot.slane %v3718_v54, %v16268_v52 }
 0x539   : > { %v2983_v41 = vpop.f32.mrb[68].mxu0 }
 0x53a   : > { %v13803_v32 = vpop.f32.mrb[69].mxu0 }
 0x53b   : > { %v2986_v47 = vpop.f32.mrb[70].mxu0 }
 0x53c   : > { %v13804_v35 = vpop.f32.mrb[71].mxu0 }
 0x53d   : > { %v3029_v8 = vpop.f32.mrb[68].mxu1 }
 0x53e   : > { %v3719_v22 = vcombine.low %v2983_v41, %v3029_v8  ;;  %v13809_v17 = vpop.f32.mrb[69].mxu1 }
 0x53f   : > { %v3032_v16 = vpop.f32.mrb[70].mxu1 }
 0x540   : > { %v3733_v14 = vrot.slane %v3719_v22, %v16268_v52  ;;  %v13810_v1 = vpop.f32.mrb[71].mxu1 }
 0x541   : > { %v3075_v12 = vpop.f32.mrb[72].mxu0 }
 0x542   : > { %v3734_v51 = vcombine.low %v3726_v61, %v3733_v14  ;;  %v13815_v23 = vpop.f32.mrb[73].mxu0 }
 0x543   : > { %v3078_v36 = vpop.f32.mrb[74].mxu0 }
 0x544   : > { %v17268_v63 = vpack.c.bf16 %v3734_v51, %v3717_v58  ;;  %v13816_v7 = vpop.f32.mrb[75].mxu0 }
 0x545   : > { %v3121_v56 = vpop.f32.mrb[72].mxu1 }
 0x546   : > { %19548 = vst [vmem:[#allocation51_spill] sm:$0xff] %v17268_v63  ;;  %v3735_v32 = vcombine.low %v3075_v12, %v3121_v56  ;;  %v13821_v60 = vpop.f32.mrb[73].mxu1 }
 0x547   : > { %v3124_v37 = vpop.f32.mrb[74].mxu1 }
 0x548   : > { %v13822_v47 = vpop.f32.mrb[75].mxu1  ;;  %v3743_v61 = vrot.slane %v3735_v32, %v16268_v52 }
 0x549   : > { %v3167_v41 = vpop.f32.mrb[76].mxu0 }
 0x54a   : > { %v13827_v35 = vpop.f32.mrb[77].mxu0 }
 0x54b   : > { %v3170_v16 = vpop.f32.mrb[78].mxu0 }
 0x54c   : > { %v13828_v8 = vpop.f32.mrb[79].mxu0 }
 0x54d   : > { %v3213_v54 = vpop.f32.mrb[76].mxu1 }
 0x54e   : > { %v3736_v17 = vcombine.low %v3167_v41, %v3213_v54  ;;  %v13833_v22 = vpop.f32.mrb[77].mxu1 }
 0x54f   : > { %v3216_v1 = vpop.f32.mrb[78].mxu1 }
 0x550   : > { %v3750_v14 = vrot.slane %v3736_v17, %v16268_v52  ;;  %v13834_v58 = vpop.f32.mrb[79].mxu1 }
 0x551   : > { %v3259_v51 = vpop.f32.mrb[80].mxu0 }
 0x552   : > { %v3751_v23 = vcombine.low %v3743_v61, %v3750_v14  ;;  %v13839_v36 = vpop.f32.mrb[81].mxu0 }
 0x553   : > { %v3262_v12 = vpop.f32.mrb[82].mxu0 }
 0x554   : > { %v13840_v7 = vpop.f32.mrb[83].mxu0 }
 0x555   : > { %v3305_v56 = vpop.f32.mrb[80].mxu1 }
 0x556   : > { %v3752_v60 = vcombine.low %v3259_v51, %v3305_v56  ;;  %v13845_v37 = vpop.f32.mrb[81].mxu1 }
 0x557   : > { %v3308_v47 = vpop.f32.mrb[82].mxu1 }
 0x558   : > { %v13846_v35 = vpop.f32.mrb[83].mxu1  ;;  %v3760_v17 = vrot.slane %v3752_v60, %v16268_v52 }
 0x559   : > { %v3351_v16 = vpop.f32.mrb[84].mxu0 }
 0x55a   : > { %v13851_v8 = vpop.f32.mrb[85].mxu0 }
 0x55b   : > { %v3354_v41 = vpop.f32.mrb[86].mxu0 }
 0x55c   : > { %v13852_v54 = vpop.f32.mrb[87].mxu0 }
 0x55d   : > { %v3397_v22 = vpop.f32.mrb[84].mxu1 }
 0x55e   : > { %v3753_v1 = vcombine.low %v3351_v16, %v3397_v22  ;;  %v13857_v32 = vpop.f32.mrb[85].mxu1 }
 0x55f   : > { %v3400_v63 = vpop.f32.mrb[86].mxu1 }
 0x560   : > { %v3767_v61 = vrot.slane %v3753_v1, %v16268_v52  ;;  %v13858_v14 = vpop.f32.mrb[87].mxu1 }
 0x561   : > { %v3443_v58 = vpop.f32.mrb[88].mxu0 }
 0x562   : > { %v3768_v36 = vcombine.low %v3760_v17, %v3767_v61  ;;  %v13863_v12 = vpop.f32.mrb[89].mxu0 }
 0x563   : > { %v3446_v51 = vpop.f32.mrb[90].mxu0 }
 0x564   : > { %v13864_v7 = vpop.f32.mrb[91].mxu0  ;;  %v17274_v56 = vpack.c.bf16 %v3768_v36, %v3751_v23 }
 0x565   : > { %v3489_v37 = vpop.f32.mrb[88].mxu1 }
 0x566   : > { %19549 = vst [vmem:[#allocation92_spill] sm:$0xff] %v17274_v56  ;;  %v3769_v47 = vcombine.low %v3443_v58, %v3489_v37  ;;  %v13869_v35 = vpop.f32.mrb[89].mxu1 }
 0x567   : > { %v3492_v8 = vpop.f32.mrb[90].mxu1 }
 0x568   : > { %v13870_v41 = vpop.f32.mrb[91].mxu1  ;;  %v3777_v17 = vrot.slane %v3769_v47, %v16268_v52 }
 0x569   : > { %v3535_v16 = vpop.f32.mrb[92].mxu0 }
 0x56a   : > { %v13875_v54 = vpop.f32.mrb[93].mxu0 }
 0x56b   : > { %v3538_v63 = vpop.f32.mrb[94].mxu0 }
 0x56c   : > { %v13876_v22 = vpop.f32.mrb[95].mxu0 }
 0x56d   : > { %v3581_v60 = vpop.f32.mrb[92].mxu1 }
 0x56e   : > { %v3770_v32 = vcombine.low %v3535_v16, %v3581_v60  ;;  %v13881_v1 = vpop.f32.mrb[93].mxu1 }
 0x56f   : > { %v3584_v14 = vpop.f32.mrb[94].mxu1 }
 0x570   : > { %v3784_v61 = vrot.slane %v3770_v32, %v16268_v52  ;;  %v13882_v12 = vpop.f32.mrb[95].mxu1 }
 0x571   : > { %v3627_v23 = vpop.f32.mrb[96].mxu0 }
 0x572   : > { %v3785_v36 = vcombine.low %v3777_v17, %v3784_v61  ;;  %v13887_v51 = vpop.f32.mrb[97].mxu0 }
 0x573   : > { %v3630_v58 = vpop.f32.mrb[98].mxu0 }
 0x574   : > { %v13888_v7 = vpop.f32.mrb[99].mxu0 }
 0x57a   : > { %v17278_v37 = vpop.f32.mrb[100].mxu0 }
 0x57b   : > { %v13899_v35 = vpop.f32.mrb[101].mxu0  ;;  %v4951_v8 = vsel %vm2400_vm3, %v17278_v37, -inf }
 0x57c   : > { %4952 = vmax.xlane.f32.xlu0 %v4951_v8  ;;  %v3856_v41 = vpop.f32.mrb[102].mxu0 }
 0x57d   : > { %v13900_v16 = vpop.f32.mrb[103].mxu0 }
 0x582   : > { %v17282_v54 = vpop.f32.mrb[104].mxu0 }
 0x583   : > { %v13911_v47 = vpop.f32.mrb[105].mxu0  ;;  %v4957_v63 = vsel %vm2400_vm3, %v17282_v54, -inf }
 0x584   : > { %4958 = vmax.xlane.f32.xlu0 %v4957_v63  ;;  %v3960_v22 = vpop.f32.mrb[106].mxu0 }
 0x585   : > { %v13912_v60 = vpop.f32.mrb[107].mxu0 }
 0x58a   : > { %v17286_v32 = vpop.f32.mrb[108].mxu0 }
 0x58b   : > { %v13923_v1 = vpop.f32.mrb[109].mxu0 }
 0x58c   : > { %v4064_v14 = vpop.f32.mrb[110].mxu0 }
 0x58d   : > { %v13924_v17 = vpop.f32.mrb[111].mxu0 }
 0x592   : > { %v17288_v61 = vpop.f32.mrb[112].mxu0 }
 0x593   : > { %v13935_v12 = vpop.f32.mrb[113].mxu0 }
 0x594   : > { %v4168_v51 = vpop.f32.mrb[114].mxu0 }
 0x595   : > { %v13936_v58 = vpop.f32.mrb[115].mxu0 }
 0x59a   : > { %v17290_v7 = vpop.f32.mrb[116].mxu0 }
 0x59b   : > { %v13947_v35 = vpop.f32.mrb[117].mxu0 }
 0x59c   : > { %v4272_v8 = vpop.f32.mrb[118].mxu0 }
 0x59d   : > { %v13948_v41 = vpop.f32.mrb[119].mxu0 }
 0x5a2   : > { %v17292_v16 = vpop.f32.mrb[120].mxu0 }
 0x5a3   : > { %v13959_v47 = vpop.f32.mrb[121].mxu0 }
 0x5a4   : > { %v4376_v63 = vpop.f32.mrb[122].mxu0  ;;  %v3673_v22 = vpop.f32.mrb[96].mxu1 }
 0x5a5   : > { %v3786_v60 = vcombine.low %v3627_v23, %v3673_v22  ;;  %v13960_v56 = vpop.f32.mrb[123].mxu0  ;;  %v13893_v1 = vpop.f32.mrb[97].mxu1 }
 0x5a6   : > { %v3676_v14 = vpop.f32.mrb[98].mxu1 }
 0x5a7   : > { %v3793_v17 = vrot.slane %v3786_v60, %v16268_v52  ;;  %v13894_v34 = vpop.f32.mrb[99].mxu1  ;;  %v4981_v52 = vsel %vm2400_vm3, %v17292_v16, -inf }
 0x5a9   : > { %v17295_v12 = vpack.c.bf16 %v3793_v17, %v3785_v36 }
 0x5aa   : > { %v17297_v51 = vpop.f32.mrb[124].mxu0 }
 0x5ab   : > { %19550 = vst [vmem:[#allocation93_spill] sm:$0xff] %v17295_v12  ;;  %v13971_v58 = vpop.f32.mrb[125].mxu0 }
 0x5ac   : > { %v4480_v35 = vpop.f32.mrb[126].mxu0  ;;  %v17299_v8 = vpop.f32.mrb[100].mxu1  ;;  %v4963_v58 = vsel %vm2400_vm3, %v17286_v32, -inf }
 0x5ad   : > { %v13972_v41 = vpop.f32.mrb[127].mxu0  ;;  %v13905_v27 = vpop.f32.mrb[101].mxu1  ;;  %v4954_v47 = vsel %vm2400_vm3, %v17299_v8, -inf }
 0x5ae   : > { %4955 = vmax.xlane.f32.xlu1 %v4954_v47  ;;  %v3908_v56 = vpop.f32.mrb[102].mxu1 }
 0x5af   : > { %v13906_v23 = vpop.f32.mrb[103].mxu1 }
 0x5b2   : > { %v17303_v63 = vpop.f32.mrb[128].mxu0 }
 0x5b3   : > { %v13983_v22 = vpop.f32.mrb[129].mxu0  ;;  %v4993_v5 = vsel %vm2400_vm3, %v17303_v63, -inf }
 0x5b4   : > { %v4584_v34 = vpop.f32.mrb[130].mxu0  ;;  %v17305_v36 = vpop.f32.mrb[104].mxu1 }
 0x5b5   : > { %v13984_v60 = vpop.f32.mrb[131].mxu0  ;;  %v13917_v1 = vpop.f32.mrb[105].mxu1  ;;  %v4960_v14 = vsel %vm2400_vm3, %v17305_v36, -inf  ;;  %v4969_v34 = vsel %vm2400_vm3, %v17288_v61, -inf }
 0x5b6   : > { %4961 = vmax.xlane.f32.xlu0 %v4960_v14  ;;  %v4012_v17 = vpop.f32.mrb[106].mxu1 }
 0x5b7   : > { %v13918_v27 = vpop.f32.mrb[107].mxu1  ;;  %v4975_v17 = vsel %vm2400_vm3, %v17290_v7, -inf }
 0x5ba   : > { %v17311_v35 = vpop.f32.mrb[132].mxu0  ;;  %4964 = vmax.xlane.f32.xlu0 %v4963_v58 }
 0x5bb   : > { %v13995_v41 = vpop.f32.mrb[133].mxu0 }
 0x5bc   : > { %v4688_v47 = vpop.f32.mrb[134].mxu0  ;;  %v17313_v56 = vpop.f32.mrb[108].mxu1 }
 0x5bd   : > { %v13996_v23 = vpop.f32.mrb[135].mxu0  ;;  %v13929_v22 = vpop.f32.mrb[109].mxu1  ;;  %v4966_v60 = vsel %vm2400_vm3, %v17313_v56, -inf }
 0x5be   : > { %4970 = vmax.xlane.f32.xlu0 %v4969_v34  ;;  %4967 = vmax.xlane.f32.xlu1 %v4966_v60  ;;  %v4116_v1 = vpop.f32.mrb[110].mxu1 }
 0x5bf   : > { %v13930_v14 = vpop.f32.mrb[111].mxu1 }
 0x5c0   : > { %v4987_v14 = vsel %vm2400_vm3, %v17297_v51, -inf }
 0x5c2   : > { %v17321_v27 = vpop.f32.mrb[136].mxu0  ;;  %4976 = vmax.xlane.f32.xlu0 %v4975_v17 }
 0x5c3   : > { %v14007_v58 = vpop.f32.mrb[137].mxu0 }
 0x5c4   : > { %v4792_v41 = vpop.f32.mrb[138].mxu0  ;;  %v17323_v47 = vpop.f32.mrb[112].mxu1 }
 0x5c5   : > { %v14008_v23 = vpop.f32.mrb[139].mxu0  ;;  %v13941_v22 = vpop.f32.mrb[113].mxu1  ;;  %v4972_v34 = vsel %vm2400_vm3, %v17323_v47, -inf }
 0x5c6   : > { %4982 = vmax.xlane.f32.xlu0 %v4981_v52  ;;  %4973 = vmax.xlane.f32.xlu1 %v4972_v34  ;;  %v4220_v60 = vpop.f32.mrb[114].mxu1 }
 0x5c7   : > { %v13942_v1 = vpop.f32.mrb[115].mxu1 }
 0x5ca   : > { %v17331_v17 = vpop.f32.mrb[140].mxu0  ;;  %4988 = vmax.xlane.f32.xlu0 %v4987_v14 }
 0x5cb   : > { %v14019_v58 = vpop.f32.mrb[141].mxu0 }
 0x5cc   : > { %v4896_v41 = vpop.f32.mrb[142].mxu0  ;;  %v17333_v23 = vpop.f32.mrb[116].mxu1 }
 0x5cd   : > { %v14020_v22 = vpop.f32.mrb[143].mxu0  ;;  %v13953_v12 = vpop.f32.mrb[117].mxu1  ;;  %v4978_v52 = vsel %vm2400_vm3, %v17333_v23, -inf }
 0x5ce   : > { %4994 = vmax.xlane.f32.xlu0 %v4993_v5  ;;  %4979 = vmax.xlane.f32.xlu1 %v4978_v52  ;;  %v4324_v34 = vpop.f32.mrb[118].mxu1 }
 0x5cf   : > { %v13954_v60 = vpop.f32.mrb[119].mxu1 }
 0x5d4   : > { %v17339_v1 = vpop.f32.mrb[120].mxu1 }
 0x5d5   : > { %v13965_v28 = vpop.f32.mrb[121].mxu1  ;;  %v4984_v14 = vsel %vm2400_vm3, %v17339_v1, -inf }
 0x5d6   : > { %4985 = vmax.xlane.f32.xlu1 %v4984_v14  ;;  %v4428_v58 = vpop.f32.mrb[122].mxu1 }
 0x5d7   : > { %v13966_v41 = vpop.f32.mrb[123].mxu1 }
 0x5d8   : > { %v17355_v41 = vpop.permute.xlu0 %5412 }
 0x5dc   : > { %v17343_v12 = vpop.f32.mrb[124].mxu1 }
 0x5dd   : > { %v13977_v22 = vpop.f32.mrb[125].mxu1  ;;  %v4990_v49 = vsel %vm2400_vm3, %v17343_v12, -inf }
 0x5de   : > { %4991 = vmax.xlane.f32.xlu1 %v4990_v49  ;;  %v4532_v5 = vpop.f32.mrb[126].mxu1 }
 0x5df   : > { %v13978_v52 = vpop.f32.mrb[127].mxu1  ;;  %v17359_v5 = vpop.permute.xlu0 %5510 }
 0x5e4   : > { %5902 = vrot.lane.b32.xlu0 %v17023_v3, %s15730_s17  ;;  %v17349_v34 = vpop.f32.mrb[128].mxu1  ;;  %v17367_v3 = vpop.permute.xlu0 %5608 }
 0x5e5   : > { %v13989_v28 = vpop.f32.mrb[129].mxu1 }
 0x5e6   : > { %v4636_v60 = vpop.f32.mrb[130].mxu1 }
 0x5e7   : > { %v13990_v14 = vpop.f32.mrb[131].mxu1 }
 0x5ec   : > { %v17353_v58 = vpop.f32.mrb[132].mxu1 }
 0x5ed   : > { %v14001_v22 = vpop.f32.mrb[133].mxu1 }
 0x5ee   : > { %v4740_v46 = vpop.f32.mrb[134].mxu1 }
 0x5ef   : > { %5951 = vrot.lane.b32.xlu1 %v17037_v29, %s15730_s17  ;;  %v14002_v49 = vpop.f32.mrb[135].mxu1 }
 0x5f0   : > { %v17371_v49 = vpop.permute.xlu0 %5706 }
 0x5f3   : > { %6000 = vrot.lane.b32.xlu1 %v17053_v0, %s15730_s17  ;;  %v4999_v0 = vsel %vm2400_vm3, %v17311_v35, -inf }
 0x5f4   : > { %v17363_v52 = vpop.f32.mrb[136].mxu1  ;;  %v17375_v43 = vpop.permute.xlu0 %5804 }
 0x5f5   : > { %v14013_v28 = vpop.f32.mrb[137].mxu1 }
 0x5f6   : > { %v4844_v60 = vpop.f32.mrb[138].mxu1  ;;  %v5005_v28 = vsel %vm2400_vm3, %v17321_v27, -inf }
 0x5f7   : > { %6049 = vrot.lane.b32.xlu1 %v17068_v57, %s15730_s17  ;;  %v14014_v14 = vpop.f32.mrb[139].mxu1 }
 0x5fc   : > { %v17369_v46 = vpop.f32.mrb[140].mxu1 }
 0x5fd   : > { %v14025_v22 = vpop.f32.mrb[141].mxu1 }
 0x5fe   : > { %v4948_v29 = vpop.f32.mrb[142].mxu1  ;;  %v5011_v22 = vsel %vm2400_vm3, %v17331_v17, -inf }
 0x5ff   : > { %v14026_v10 = vpop.f32.mrb[143].mxu1 }
 0x603   : > { %5000 = vmax.xlane.f32.xlu0 %v4999_v0 }
 0x607   : > { %5006 = vmax.xlane.f32.xlu0 %v5005_v28 }
 0x609   : > { %v4953_v60 = vpop.xlane.xlu0 %4952 }
 0x60a   : > { %v5017_v14 = vsub.f32 %v17278_v37, %v4953_v60  ;;  %v4996_v37 = vsel %vm2400_vm3, %v17349_v34, -inf  ;;  %v5002_v60 = vsel %vm2400_vm3, %v17353_v58, -inf }
 0x60b   : > { %5012 = vmax.xlane.f32.xlu0 %v5011_v22 }
 0x60c   : > { %v5039_v29 = vmul.f32 1.442695, %v5017_v14  ;;  %v17393_v14 = vpop.permute.xlu1 %5461 }
 0x60e   : > { %15072 = vpow2.f32 %v5039_v29  ;;  %v5014_v29 = vsel %vm2400_vm3, %v17369_v46, -inf }
 0x610   : > { %v17401_v22 = vpop.permute.xlu1 %5559 }
 0x611   : > { %v4959_v10 = vpop.xlane.xlu0 %4958 }
 0x612   : > { %v5019_v57 = vsub.f32 %v17282_v54, %v4959_v10  ;;  %v5008_v54 = vsel %vm2400_vm3, %v17363_v52, -inf }
 0x614   : > { %v5043_v50 = vmul.f32 1.442695, %v5019_v57  ;;  %v17405_v10 = vpop.permute.xlu1 %5657 }
 0x616   : > { %15074 = vpow2.f32 %v5043_v50 }
 0x618   : > { %v17383_v0 = vpop.eup %15072 }
 0x619   : > { %v5083_v28 = vsel %vm2400_vm3, %v17383_v0, 0.0 }
 0x61a   : > { %5084 = vadd.xlane.f32.xlu0 %v5083_v28  ;;  %v17407_v28 = vpop.permute.xlu1 %5755 }
 0x61b   : > { %4997 = vmax.xlane.f32.xlu1 %v4996_v37 }
 0x61e   : > { %v17409_v37 = vpop.permute.xlu1 %5853 }
 0x61f   : > { %5003 = vmax.xlane.f32.xlu1 %v5002_v60 }
 0x620   : > { %v17395_v57 = vpop.eup %15074 }
 0x621   : > { %v5089_v50 = vsel %vm2400_vm3, %v17395_v57, 0.0 }
 0x622   : > { %5090 = vadd.xlane.f32.xlu0 %v5089_v50 }
 0x623   : > { %5009 = vmax.xlane.f32.xlu1 %v5008_v54 }
 0x627   : > { %5015 = vmax.xlane.f32.xlu1 %v5014_v29 }
 0x63b   : > { %v4956_v60 = vpop.xlane.xlu1 %4955 }
 0x63c   : > { %v5018_v42 = vsub.f32 %v17299_v8, %v4956_v60 }
 0x63e   : > { %v5041_v50 = vmul.f32 1.442695, %v5018_v42 }
 0x640   : > { %15076 = vpow2.f32 %v5041_v50 }
 0x643   : > { %v4962_v18 = vpop.xlane.xlu0 %4961 }
 0x644   : > { %v5020_v54 = vsub.f32 %v17305_v36, %v4962_v18 }
 0x646   : > { %v5045_v9 = vmul.f32 1.442695, %v5020_v54 }
 0x647   : > { %v4965_v44 = vpop.xlane.xlu0 %4964 }
 0x648   : > { %15078 = vpow2.f32 %v5045_v9  ;;  %v5021_v40 = vsub.f32 %v17286_v32, %v4965_v44 }
 0x64a   : > { %v17414_v29 = vpop.eup %15076  ;;  %v5047_v48 = vmul.f32 1.442695, %v5021_v40 }
 0x64b   : > { %v4971_v38 = vpop.xlane.xlu0 %4970  ;;  %v4968_v20 = vpop.xlane.xlu1 %4967  ;;  %v5086_v45 = vsel %vm2400_vm3, %v17414_v29, 0.0 }
 0x64c   : > { %15080 = vpow2.f32 %v5047_v48  ;;  %v5023_v42 = vsub.f32 %v17288_v61, %v4971_v38  ;;  %v5022_v8 = vsub.f32 %v17313_v56, %v4968_v20  ;;  %5087 = vadd.xlane.f32.xlu1 %v5086_v45 }
 0x64e   : > { %v5051_v18 = vmul.f32 1.442695, %v5023_v42  ;;  %v5049_v36 = vmul.f32 1.442695, %v5022_v8 }
 0x64f   : > { %v4977_v60 = vpop.xlane.xlu0 %4976 }
 0x650   : > { %15082 = vpow2.f32 %v5051_v18  ;;  %v5025_v40 = vsub.f32 %v17290_v7, %v4977_v60 }
 0x651   : > { %15084 = vpow2.f32 %v5049_v36 }
 0x652   : > { %v17420_v44 = vpop.eup %15078  ;;  %v5055_v45 = vmul.f32 1.442695, %v5025_v40 }
 0x653   : > { %v4983_v9 = vpop.xlane.xlu0 %4982  ;;  %v4974_v32 = vpop.xlane.xlu1 %4973  ;;  %v5092_v50 = vsel %vm2400_vm3, %v17420_v44, 0.0 }
 0x654   : > { %v5024_v48 = vsub.f32 %v17323_v47, %v4974_v32  ;;  %5093 = vadd.xlane.f32.xlu1 %v5092_v50  ;;  %v5027_v61 = vsub.f32 %v17292_v16, %v4983_v9 }
 0x656   : > { %v17426_v38 = vpop.eup %15080  ;;  %v5053_v20 = vmul.f32 1.442695, %v5024_v48  ;;  %v5059_v8 = vmul.f32 1.442695, %v5027_v61 }
 0x657   : > { %v4989_v56 = vpop.xlane.xlu0 %4988  ;;  %v5095_v54 = vsel %vm2400_vm3, %v17426_v38, 0.0 }
 0x658   : > { %5096 = vadd.xlane.f32.xlu0 %v5095_v54  ;;  %15086 = vpow2.f32 %v5053_v20  ;;  %v5029_v47 = vsub.f32 %v17297_v51, %v4989_v56 }
 0x659   : > { %15088 = vpow2.f32 %v5055_v45 }
 0x65a   : > { %v17431_v7 = vpop.eup %15082  ;;  %15090 = vpow2.f32 %v5059_v8  ;;  %v5063_v32 = vmul.f32 1.442695, %v5029_v47 }
 0x65b   : > { %v17433_v42 = vpop.eup %15084  ;;  %v4980_v18 = vpop.xlane.xlu1 %4979  ;;  %v5101_v36 = vsel %vm2400_vm3, %v17431_v7, 0.0 }
 0x65c   : > { %v4995_v60 = vpop.xlane.xlu0 %4994  ;;  %v5026_v16 = vsub.f32 %v17333_v23, %v4980_v18  ;;  %5102 = vadd.xlane.f32.xlu0 %v5101_v36  ;;  %v5098_v40 = vsel %vm2400_vm3, %v17433_v42, 0.0 }
 0x65d   : > { %5099 = vadd.xlane.f32.xlu1 %v5098_v40  ;;  %v5031_v50 = vsub.f32 %v17303_v63, %v4995_v60 }
 0x65e   : > { %v5057_v9 = vmul.f32 1.442695, %v5026_v16 }
 0x65f   : > { %v5067_v51 = vmul.f32 1.442695, %v5031_v50 }
 0x660   : > { %15092 = vpow2.f32 %v5057_v9 }
 0x661   : > { %15094 = vpow2.f32 %v5063_v32 }
 0x662   : > { %v17442_v48 = vpop.eup %15086  ;;  %15096 = vpow2.f32 %v5067_v51 }
 0x663   : > { %v4986_v20 = vpop.xlane.xlu1 %4985  ;;  %v5104_v23 = vsel %vm2400_vm3, %v17442_v48, 0.0  ;;  %v17447_v61 = vpop.eup %15088 }
 0x664   : > { %v5028_v45 = vsub.f32 %v17339_v1, %v4986_v20  ;;  %5105 = vadd.xlane.f32.xlu1 %v5104_v23  ;;  %v5107_v63 = vsel %vm2400_vm3, %v17447_v61, 0.0  ;;  %v17451_v54 = vpop.eup %15090 }
 0x665   : > { %v5113_v36 = vsel %vm2400_vm3, %v17451_v54, 0.0 }
 0x666   : > { %v5061_v56 = vmul.f32 1.442695, %v5028_v45  ;;  %v17476_v45 = vpop.permute.xlu0 %5902 }
 0x668   : > { %15098 = vpow2.f32 %v5061_v56  ;;  %5108 = vadd.xlane.f32.xlu1 %v5107_v63 }
 0x66a   : > { %v17453_v8 = vpop.eup %15092 }
 0x66b   : > { %v4992_v47 = vpop.xlane.xlu1 %4991  ;;  %v5110_v18 = vsel %vm2400_vm3, %v17453_v8, 0.0  ;;  %v17460_v60 = vpop.eup %15094 }
 0x66c   : > { %v5030_v1 = vsub.f32 %v17343_v12, %v4992_v47  ;;  %5111 = vadd.xlane.f32.xlu0 %v5110_v18  ;;  %5114 = vadd.xlane.f32.xlu1 %v5113_v36  ;;  %v5119_v40 = vsel %vm2400_vm3, %v17460_v60, 0.0  ;;  %v17464_v9 = vpop.eup %15096 }
 0x66d   : > { %19551 = vst [vmem:[#allocation94_spill] sm:$0xff] %v17464_v9  ;;  %v5125_v50 = vsel %vm2400_vm3, %v17464_v9, 0.0 }
 0x66e   : > { %v5065_v16 = vmul.f32 1.442695, %v5030_v1 }
 0x66f   : > { %v17479_v47 = vpop.permute.xlu1 %5951 }
 0x670   : > { %15100 = vpow2.f32 %v5065_v16  ;;  %5120 = vadd.xlane.f32.xlu1 %v5119_v40  ;;  %19552 = vst [vmem:[#allocation95_spill] sm:$0xff] %v17479_v47 }
 0x672   : > { %v17466_v32 = vpop.eup %15098 }
 0x673   : > { %v5116_v12 = vsel %vm2400_vm3, %v17466_v32, 0.0  ;;  %v17481_v18 = vpop.permute.xlu1 %6000 }
 0x674   : > { %5117 = vadd.xlane.f32.xlu0 %v5116_v12  ;;  %5126 = vadd.xlane.f32.xlu1 %v5125_v50  ;;  %19553 = vst [vmem:[#allocation96_spill] sm:$0xff] %v17481_v18 }
 0x677   : > { %v17487_v12 = vpop.permute.xlu1 %6049 }
 0x678   : > { %19554 = vst [vmem:[#allocation97_spill] sm:$0xff] %v17487_v12 }
 0x67a   : > { %v17472_v51 = vpop.eup %15100 }
 0x67b   : > { %v5122_v20 = vsel %vm2400_vm3, %v17472_v51, 0.0 }
 0x67c   : > { %5123 = vadd.xlane.f32.xlu0 %v5122_v20 }
 0x690   : > { %v5001_v23 = vpop.xlane.xlu0 %5000 }
 0x691   : > { %v5033_v56 = vsub.f32 %v17311_v35, %v5001_v23 }
 0x693   : > { %v5071_v63 = vmul.f32 1.442695, %v5033_v56 }
 0x694   : > { %v5007_v1 = vpop.xlane.xlu0 %5006 }
 0x695   : > { %15102 = vpow2.f32 %v5071_v63 }
 0x698   : > { %v5013_v40 = vpop.xlane.xlu0 %5012 }
 0x69f   : > { %v17483_v36 = vpop.eup %15102 }
 0x6a0   : > { %v5131_v16 = vsel %vm2400_vm3, %v17483_v36, 0.0 }
 0x6a1   : > { %5132 = vadd.xlane.f32.xlu1 %v5131_v16 }
 0x6a7   : > { %v5085_v50 = vpop.xlane.xlu0 %5084 }
 0x6a8   : > { %15104 = vrcp.f32 %v5085_v50  ;;  %v4998_v20 = vpop.xlane.xlu1 %4997 }
 0x6a9   : > { %v5032_v35 = vsub.f32 %v17349_v34, %v4998_v20  ;;  %v5320_v34 = vsel %vm2669_vm2, %v17351_v31, 0  ;;  %v5035_v20 = vsub.f32 %v17321_v27, %v5007_v1 }
 0x6ab   : > { %v5069_v23 = vmul.f32 1.442695, %v5032_v35  ;;  %v5075_v35 = vmul.f32 1.442695, %v5035_v20 }
 0x6ac   : > { %v5004_v56 = vpop.xlane.xlu1 %5003 }
 0x6ad   : > { %15106 = vpow2.f32 %v5069_v23  ;;  %v5034_v63 = vsub.f32 %v17353_v58, %v5004_v56 }
 0x6af   : > { %v5073_v18 = vmul.f32 1.442695, %v5034_v63  ;;  %v5091_v47 = vpop.xlane.xlu0 %5090 }
 0x6b0   : > { %15108 = vrcp.f32 %v5091_v47  ;;  %v5010_v56 = vpop.xlane.xlu1 %5009 }
 0x6b1   : > { %15110 = vpow2.f32 %v5073_v18 }
 0x6b2   : > { %v15105_v9 = vpop.eup %15104  ;;  %6147 = vrot.lane.b32.xlu1 %v17090_v4, %s15730_s17  ;;  %15112 = vpow2.f32 %v5075_v35  ;;  %v5369_v35 = vsel %vm2669_vm2, %v17385_v15, 0 }
 0x6b3   : > { %v5171_v16 = vmul.f32 %v15105_v9, %v17383_v0 }
 0x6b5   : > { %v5193_v12 = vpack.c.bf16 %v5171_v16, %v5171_v16 }
 0x6b7   : > { %v17494_v50 = vpop.eup %15106  ;;  %14030 = vmatmul.mubr.msk.bf16.vlgmr.msra.gmra.mrb[144].mxu0 %vm2665_vm4, %v5193_v12  ;;  %v5418_v12 = vsel %vm2669_vm2, %v17355_v41, 0  ;;  %v5016_v41 = vpop.xlane.xlu1 %5015 }
 0x6b8   : > { %14040 = vmatpush3.bf16.msra.mxu0 %v5320_v34  ;;  %v5128_v58 = vsel %vm2400_vm3, %v17494_v50, 0.0  ;;  %14041 = vmatprep.mubr.msk.bf16.mxu0 %vm15728_vm0, %v19508_v59 }
 0x6b9   : > { %5129 = vadd.xlane.f32.xlu0 %v5128_v58  ;;  %14051 = vmatprep.subr.bf16.mxu0 %v19508_v59  ;;  %v5038_v58 = vsub.f32 %v17369_v46, %v5016_v41  ;;  %v5467_v41 = vsel %vm2669_vm2, %v17393_v14, 0 }
 0x6ba   : > { %v15109_v47 = vpop.eup %15108 }
 0x6bb   : > { %v17504_v0 = vpop.eup %15110  ;;  %v5173_v9 = vmul.f32 %v15109_v47, %v17395_v57  ;;  %v5037_v57 = vsub.f32 %v17331_v17, %v5013_v40  ;;  %v5036_v40 = vsub.f32 %v17363_v52, %v5010_v56 }
 0x6bc   : > { %v5134_v31 = vsel %vm2400_vm3, %v17504_v0, 0.0  ;;  %v17517_v63 = vpop.eup %15112 }
 0x6bd   : > { %5135 = vadd.xlane.f32.xlu0 %v5134_v31  ;;  %v5195_v18 = vpack.c.bf16 %v5173_v9, %v5173_v9  ;;  %v5079_v23 = vmul.f32 1.442695, %v5037_v57  ;;  %v5137_v27 = vsel %vm2400_vm3, %v17517_v63, 0.0  ;;  %v5077_v34 = vmul.f32 1.442695, %v5036_v40 }
 0x6be   : > { %v5081_v31 = vmul.f32 1.442695, %v5038_v58 }
 0x6bf   : > { %14042 = vmatmul.mubr.msk.bf16.vlgmr.msra.gmra.mrb[148].mxu0 %vm2665_vm4, %v5195_v18  ;;  %15114 = vpow2.f32 %v5079_v23 }
 0x6c0   : > { %14052 = vmatpush3.bf16.msra.mxu0 %v5418_v12  ;;  %14053 = vmatprep.mubr.msk.bf16.mxu0 %vm15728_vm0, %v19508_v59 }
 0x6c1   : > { %14063 = vmatprep.subr.bf16.mxu0 %v19508_v59 }
 0x6c9   : > { %v17523_v1 = vpop.eup %15114 }
 0x6ca   : > { %v5143_v17 = vsel %vm2400_vm3, %v17523_v1, 0.0 }
 0x6d3   : > { %6098 = vrot.lane.b32.xlu0 %v17078_v33, %s15730_s17 }
 0x6d6   : > { %5138 = vadd.xlane.f32.xlu1 %v5137_v27 }
 0x6d9   : > { %v5088_v16 = vpop.xlane.xlu1 %5087 }
 0x6da   : > { %15116 = vrcp.f32 %v5088_v16  ;;  %5144 = vadd.xlane.f32.xlu1 %v5143_v17 }
 0x6e1   : > { %v5094_v47 = vpop.xlane.xlu1 %5093 }
 0x6e2   : > { %15118 = vrcp.f32 %v5094_v47 }
 0x6e3   : > { %15120 = vpow2.f32 %v5077_v34 }
 0x6e4   : > { %v15117_v9 = vpop.eup %15116 }
 0x6e5   : > { %v5097_v18 = vpop.xlane.xlu0 %5096  ;;  %v5172_v12 = vmul.f32 %v15117_v9, %v17414_v29 }
 0x6e6   : > { %15122 = vrcp.f32 %v5097_v18  ;;  %v5565_v18 = vsel %vm2669_vm2, %v17401_v22, 0  ;;  %v5614_v22 = vsel %vm2669_vm2, %v17367_v3, 0  ;;  %v5663_v3 = vsel %vm2669_vm2, %v17405_v10, 0 }
 0x6e7   : > { %v5194_v20 = vpack.c.bf16 %v5172_v12, %v5172_v12  ;;  %15124 = vpow2.f32 %v5081_v31  ;;  %v5712_v10 = vsel %vm2669_vm2, %v17371_v49, 0  ;;  %v5761_v49 = vsel %vm2669_vm2, %v17407_v28, 0 }
 0x6e9   : > { %v5103_v57 = vpop.xlane.xlu0 %5102  ;;  %14036 = vmatmul.mubr.msk.bf16.vlgmr.msra.gmra.mrb[144].mxu1 %vm2665_vm4, %v5194_v20 }
 0x6ea   : > { %15126 = vrcp.f32 %v5103_v57  ;;  %14046 = vmatpush3.bf16.msra.mxu1 %v5369_v35  ;;  %v5100_v52 = vpop.xlane.xlu1 %5099  ;;  %14047 = vmatprep.mubr.msk.bf16.mxu1 %vm15728_vm0, %v19508_v59 }
 0x6eb   : > { %15128 = vrcp.f32 %v5100_v52  ;;  %6245 = vrot.lane.b32.xlu1 %v17114_v13, %s15730_s17  ;;  %14057 = vmatprep.subr.bf16.mxu1 %v19508_v59 }
 0x6ec   : > { %v15119_v46 = vpop.eup %15118 }
 0x6ed   : > { %v5174_v29 = vmul.f32 %v15119_v46, %v17420_v44  ;;  %v17539_v23 = vpop.eup %15120 }
 0x6ee   : > { %v5140_v27 = vsel %vm2400_vm3, %v17539_v23, 0.0 }
 0x6ef   : > { %6629 = vrot.lane.b32.xlu1 %v16279_v2, %s15731_s24  ;;  %v5196_v15 = vpack.c.bf16 %v5174_v29, %v5174_v29 }
 0x6f0   : > { %v15123_v56 = vpop.eup %15122 }
 0x6f1   : > { %14048 = vmatmul.mubr.msk.bf16.vlgmr.msra.gmra.mrb[148].mxu1 %vm2665_vm4, %v5196_v15  ;;  %v5175_v16 = vmul.f32 %v15123_v56, %v17426_v38  ;;  %v17549_v17 = vpop.eup %15124  ;;  %v5106_v44 = vpop.xlane.xlu1 %5105  ;;  %v5516_v38 = vsel %vm2669_vm2, %v17359_v5, 0 }
 0x6f2   : > { %14058 = vmatpush3.bf16.msra.mxu1 %v5467_v41  ;;  %5141 = vadd.xlane.f32.xlu0 %v5140_v27  ;;  %15130 = vrcp.f32 %v5106_v44  ;;  %v5146_v58 = vsel %vm2400_vm3, %v17549_v17, 0.0 }
 0x6f3   : > { %6627 = vrot.lane.b32.xlu1 %v16309_v30, %s15731_s24  ;;  %v5197_v40 = vpack.c.bf16 %v5175_v16, %v5175_v16  ;;  %14059 = vmatprep.mubr.msk.bf16.mxu1 %vm15728_vm0, %v19508_v59 }
 0x6f4   : > { %v15127_v14 = vpop.eup %15126  ;;  %14069 = vmatprep.subr.bf16.mxu1 %v19508_v59 }
 0x6f5   : > { %v15129_v34 = vpop.eup %15128  ;;  %14054 = vmatmul.mubr.msk.bf16.vlgmr.msra.gmra.mrb[152].mxu0 %vm2665_vm4, %v5197_v40  ;;  %v5109_v47 = vpop.xlane.xlu1 %5108  ;;  %v5177_v31 = vmul.f32 %v15127_v14, %v17431_v7 }
 0x6f6   : > { %14064 = vmatpush3.bf16.msra.mxu0 %v5516_v38  ;;  %5147 = vadd.xlane.f32.xlu0 %v5146_v58  ;;  %v5176_v9 = vmul.f32 %v15129_v34, %v17433_v42  ;;  %15132 = vrcp.f32 %v5109_v47  ;;  %v5810_v34 = vsel %vm2669_vm2, %v17375_v43, 0  ;;  %v5859_v43 = vsel %vm2669_vm2, %v17409_v37, 0 }
 0x6f7   : > { %6729 = vrot.lane.b32.xlu1 %v16304_v25, %s15731_s24  ;;  %14065 = vmatprep.mubr.msk.bf16.mxu0 %vm15728_vm0, %v19508_v59  ;;  %v5199_v42 = vpack.c.bf16 %v5177_v31, %v5177_v31  ;;  %v5908_v37 = vsel %vm2669_vm2, %v17476_v45, 0  ;;  %v19555_v31 = vld [vmem:[#allocation53_spill] sm:$0xff] }
 0x6f8   : > { %v5198_v5 = vpack.c.bf16 %v5176_v9, %v5176_v9  ;;  %14075 = vmatprep.subr.bf16.mxu0 %v19508_v59 }
 0x6f9   : > { %v5112_v12 = vpop.xlane.xlu0 %5111  ;;  %v5115_v20 = vpop.xlane.xlu1 %5114 }
 0x6fa   : > { %14060 = vmatmul.mubr.msk.bf16.vlgmr.msra.gmra.mrb[152].mxu1 %vm2665_vm4, %v5198_v5  ;;  %15134 = vrcp.f32 %v5112_v12  ;;  %v19557_v12 = vld [vmem:[#allocation94_spill] sm:$0xff] }
 0x6fb   : > { %14070 = vmatpush3.bf16.msra.mxu1 %v5565_v18  ;;  %6727 = vrot.lane.b32.xlu1 %v16338_v55, %s15731_s24  ;;  %15136 = vrcp.f32 %v5115_v20  ;;  %v19556_v18 = vld [vmem:[#allocation31_spill] sm:$0xff] }
 0x6fc   : > { %14071 = vmatprep.mubr.msk.bf16.mxu1 %vm15728_vm0, %v19508_v59  ;;  %14081 = vmatprep.subr.bf16.mxu1 %v19508_v59  ;;  %v15131_v7 = vpop.eup %15130 }
 0x6fd   : > { %14066 = vmatmul.mubr.msk.bf16.vlgmr.msra.gmra.mrb[156].mxu0 %vm2665_vm4, %v5199_v42  ;;  %v5178_v35 = vmul.f32 %v15131_v7, %v17442_v48  ;;  %v5121_v57 = vpop.xlane.xlu1 %5120  ;;  %v19559_v42 = vld [vmem:[#allocation58_spill] sm:$0xff]  ;;  %v19560_v7 = vld [vmem:[#allocation36_spill] sm:$0xff] }
 0x6fe   : > { %14076 = vmatpush3.bf16.msra.mxu0 %v5614_v22  ;;  %14077 = vmatprep.mubr.msk.bf16.mxu0 %vm15728_vm0, %v19508_v59 }
 0x6ff   : > { %6829 = vrot.lane.b32.xlu1 %v16336_v53, %s15731_s24  ;;  %14087 = vmatprep.subr.bf16.mxu0 %v19508_v59  ;;  %v5200_v52 = vpack.c.bf16 %v5178_v35, %v5178_v35  ;;  %v19561_v35 = vld [vmem:[#allocation96_spill] sm:$0xff] }
 0x700   : > { %v15133_v46 = vpop.eup %15132 }
 0x701   : > { %v5118_v29 = vpop.xlane.xlu0 %5117  ;;  %v5179_v48 = vmul.f32 %v15133_v46, %v17447_v61  ;;  %v5127_v27 = vpop.xlane.xlu1 %5126  ;;  %v19563_v46 = vld [vmem:[#allocation35_spill] sm:$0xff] }
 0x702   : > { %15138 = vrcp.f32 %v5118_v29  ;;  %14072 = vmatmul.mubr.msk.bf16.vlgmr.msra.gmra.mrb[156].mxu1 %vm2665_vm4, %v5200_v52  ;;  %v19562_v52 = vld [vmem:[#allocation57_spill] sm:$0xff]  ;;  %v19564_v29 = vld [vmem:[#allocation62_spill] sm:$0xff] }
 0x703   : > { %15140 = vrcp.f32 %v5121_v57  ;;  %14082 = vmatpush3.bf16.msra.mxu1 %v5663_v3  ;;  %6827 = vrot.lane.b32.xlu1 %v16375_v26, %s15731_s24  ;;  %v5201_v15 = vpack.c.bf16 %v5179_v48, %v5179_v48  ;;  %v6006_v57 = vsel %vm2669_vm2, %v19561_v35, 0  ;;  %v19565_v3 = vld [vmem:[#allocation40_spill] sm:$0xff]  ;;  %v19566_v48 = vld [vmem:[#allocation61_spill] sm:$0xff] }
 0x704   : > { %14083 = vmatprep.mubr.msk.bf16.mxu1 %vm15728_vm0, %v19508_v59  ;;  %14093 = vmatprep.subr.bf16.mxu1 %v19508_v59  ;;  %v15135_v56 = vpop.eup %15134 }
 0x705   : > { %v15137_v41 = vpop.eup %15136  ;;  %14078 = vmatmul.mubr.msk.bf16.vlgmr.msra.gmra.mrb[160].mxu0 %vm2665_vm4, %v5201_v15  ;;  %v5180_v61 = vmul.f32 %v15135_v56, %v17453_v8  ;;  %v19567_v15 = vld [vmem:[#allocation39_spill] sm:$0xff]  ;;  %v19568_v56 = vld [vmem:[#allocation66_spill] sm:$0xff] }
 0x706   : > { %14088 = vmatpush3.bf16.msra.mxu0 %v5712_v10  ;;  %14089 = vmatprep.mubr.msk.bf16.mxu0 %vm15728_vm0, %v19508_v59  ;;  %v5181_v44 = vmul.f32 %v15137_v41, %v17451_v54  ;;  %v19569_v41 = vld [vmem:[#allocation47_spill] sm:$0xff] }
 0x707   : > { %6929 = vrot.lane.b32.xlu1 %v16370_v19, %s15731_s24  ;;  %v5202_v16 = vpack.c.bf16 %v5180_v61, %v5180_v61  ;;  %14099 = vmatprep.subr.bf16.mxu0 %v19508_v59  ;;  %v19570_v61 = vld [vmem:[#allocation64_spill] sm:$0xff] }
 0x708   : > { %v5203_v14 = vpack.c.bf16 %v5181_v44, %v5181_v44  ;;  %v19573_v44 = vld [vmem:[#allocation52_spill] sm:$0xff] }
 0x709   : > { %v5124_v40 = vpop.xlane.xlu0 %5123 }
 0x70a   : > { %15142 = vrcp.f32 %v5124_v40  ;;  %14084 = vmatmul.mubr.msk.bf16.vlgmr.msra.gmra.mrb[160].mxu1 %vm2665_vm4, %v5202_v16  ;;  %v19572_v16 = vld [vmem:[#allocation70_spill] sm:$0xff]  ;;  %v19574_v40 = vld [vmem:[#allocation69_spill] sm:$0xff] }
 0x70b   : > { %15144 = vrcp.f32 %v5127_v27  ;;  %14094 = vmatpush3.bf16.msra.mxu1 %v5761_v49  ;;  %6927 = vrot.lane.b32.xlu1 %v19513_v11, %s15731_s24  ;;  %v19571_v27 = vld [vmem:[#allocation43_spill] sm:$0xff]  ;;  %v19575_v49 = vld [vmem:[#allocation49_spill] sm:$0xff] }
 0x70c   : > { %v15139_v8 = vpop.eup %15138  ;;  %6196 = vrot.lane.b32.xlu0 %v17102_v6, %s15730_s17  ;;  %14095 = vmatprep.mubr.msk.bf16.mxu1 %vm15728_vm0, %v19508_v59 }
 0x70d   : > { %v15141_v54 = vpop.eup %15140  ;;  %14105 = vmatprep.subr.bf16.mxu1 %v19508_v59  ;;  %v5182_v28 = vmul.f32 %v15139_v8, %v17466_v32  ;;  %14090 = vmatmul.mubr.msk.bf16.vlgmr.msra.gmra.mrb[164].mxu0 %vm2665_vm4, %v5203_v14 }
 0x70e   : > { %14100 = vmatpush3.bf16.msra.mxu0 %v5810_v34  ;;  %14101 = vmatprep.mubr.msk.bf16.mxu0 %vm15728_vm0, %v19508_v59  ;;  %v5183_v58 = vmul.f32 %v15141_v54, %v17460_v60  ;;  %v19576_v54 = vld [vmem:[#allocation74_spill] sm:$0xff] }
 0x70f   : > { %7029 = vrot.lane.b32.xlu1 %v19517_v39, %s15731_s24  ;;  %v5204_v38 = vpack.c.bf16 %v5182_v28, %v5182_v28  ;;  %14111 = vmatprep.subr.bf16.mxu0 %v19508_v59  ;;  %v19577_v28 = vld [vmem:[#allocation56_spill] sm:$0xff] }
 0x710   : > { %6579 = vrot.lane.b32.xlu0 %v16274_v62, %s15731_s24  ;;  %v5205_v47 = vpack.c.bf16 %v5183_v58, %v5183_v58  ;;  %v19579_v58 = vld [vmem:[#allocation55_spill] sm:$0xff] }
 0x712   : > { %14096 = vmatmul.mubr.msk.bf16.vlgmr.msra.gmra.mrb[164].mxu1 %vm2665_vm4, %v5204_v38  ;;  %v19578_v38 = vld [vmem:[#allocation73_spill] sm:$0xff] }
 0x713   : > { %14106 = vmatpush3.bf16.msra.mxu1 %v5859_v43  ;;  %7027 = vrot.lane.b32.xlu1 %v19520_v21, %s15731_s24  ;;  %v19581_v43 = vld [vmem:[#allocation60_spill] sm:$0xff] }
 0x714   : > { %v15143_v32 = vpop.eup %15142  ;;  %6577 = vrot.lane.b32.xlu0 %v16302_v24, %s15731_s24  ;;  %14107 = vmatprep.mubr.msk.bf16.mxu1 %vm15728_vm0, %v19508_v59 }
 0x715   : > { %v15145_v60 = vpop.eup %15144  ;;  %14117 = vmatprep.subr.bf16.mxu1 %v19508_v59  ;;  %v5184_v9 = vmul.f32 %v15143_v32, %v17472_v51  ;;  %14102 = vmatmul.mubr.msk.bf16.vlgmr.msra.gmra.mrb[168].mxu0 %vm2665_vm4, %v5205_v47  ;;  %v19558_v51 = vld [vmem:[#allocation95_spill] sm:$0xff]  ;;  %v19582_v47 = vld [vmem:[#allocation76_spill] sm:$0xff] }
 0x716   : > { %14112 = vmatpush3.bf16.msra.mxu0 %v5908_v37  ;;  %14113 = vmatprep.mubr.msk.bf16.mxu0 %vm15728_vm0, %v19508_v59  ;;  %v5185_v20 = vmul.f32 %v15145_v60, %v19557_v12  ;;  %v5957_v45 = vsel %vm2669_vm2, %v19558_v51, 0  ;;  %v19583_v60 = vld [vmem:[#allocation59_spill] sm:$0xff]  ;;  %v19584_v37 = vld [vmem:[#allocation80_spill] sm:$0xff]  ;;  %v19586_v51 = vld [vmem:[#allocation82_spill] sm:$0xff] }
 0x717   : > { %7129 = vrot.lane.b32.xlu1 %v19555_v31, %s15731_s24  ;;  %v5206_v5 = vpack.c.bf16 %v5184_v9, %v5184_v9  ;;  %14123 = vmatprep.subr.bf16.mxu0 %v19508_v59 }
 0x718   : > { %6679 = vrot.lane.b32.xlu0 %v19556_v18, %s15731_s24  ;;  %v5207_v22 = vpack.c.bf16 %v5185_v20, %v5185_v20 }
 0x71a   : > { %14108 = vmatmul.mubr.msk.bf16.vlgmr.msra.gmra.mrb[168].mxu1 %vm2665_vm4, %v5206_v5  ;;  %v19585_v5 = vld [vmem:[#allocation65_spill] sm:$0xff] }
 0x71b   : > { %14118 = vmatpush3.bf16.msra.mxu1 %v5957_v45  ;;  %7127 = vrot.lane.b32.xlu1 %v19559_v42, %s15731_s24  ;;  %v19587_v45 = vld [vmem:[#allocation63_spill] sm:$0xff] }
 0x71c   : > { %6677 = vrot.lane.b32.xlu0 %v19560_v7, %s15731_s24  ;;  %14119 = vmatprep.mubr.msk.bf16.mxu1 %vm15728_vm0, %v19508_v59 }
 0x71d   : > { %14129 = vmatprep.subr.bf16.mxu1 %v19508_v59  ;;  %14114 = vmatmul.mubr.msk.bf16.vlgmr.msra.gmra.mrb[172].mxu0 %vm2665_vm4, %v5207_v22 }
 0x71e   : > { %14124 = vmatpush3.bf16.msra.mxu0 %v6006_v57  ;;  %14125 = vmatprep.mubr.msk.bf16.mxu0 %vm15728_vm0, %v19508_v59  ;;  %v19588_v57 = vld [vmem:[#allocation84_spill] sm:$0xff] }
 0x71f   : > { %7229 = vrot.lane.b32.xlu1 %v19562_v52, %s15731_s24  ;;  %14135 = vmatprep.subr.bf16.mxu0 %v19508_v59 }
 0x720   : > { %6779 = vrot.lane.b32.xlu0 %v19563_v46, %s15731_s24 }
 0x723   : > { %7227 = vrot.lane.b32.xlu1 %v19564_v29, %s15731_s24 }
 0x724   : > { %6777 = vrot.lane.b32.xlu0 %v19565_v3, %s15731_s24 }
 0x727   : > { %7329 = vrot.lane.b32.xlu1 %v19566_v48, %s15731_s24 }
 0x728   : > { %6879 = vrot.lane.b32.xlu0 %v19567_v15, %s15731_s24 }
 0x72b   : > { %7327 = vrot.lane.b32.xlu1 %v19568_v56, %s15731_s24 }
 0x72c   : > { %6877 = vrot.lane.b32.xlu0 %v19569_v41, %s15731_s24 }
 0x72e   : > { %v5133_v10 = vpop.xlane.xlu1 %5132 }
 0x72f   : > { %15146 = vrcp.f32 %v5133_v10  ;;  %7429 = vrot.lane.b32.xlu1 %v19570_v61, %s15731_s24  ;;  %v19589_v10 = vld [vmem:[#allocation68_spill] sm:$0xff] }
 0x730   : > { %6979 = vrot.lane.b32.xlu0 %v19571_v27, %s15731_s24 }
 0x733   : > { %7427 = vrot.lane.b32.xlu1 %v19572_v16, %s15731_s24 }
 0x734   : > { %6977 = vrot.lane.b32.xlu0 %v19573_v44, %s15731_s24 }
 0x737   : > { %7529 = vrot.lane.b32.xlu1 %v19574_v40, %s15731_s24  ;;  %v14939_v40 = vld [vmem:[%s16152_s19 + $0x18] sm:$0xff]  }
 0x738   : > { %7079 = vrot.lane.b32.xlu0 %v19575_v49, %s15731_s24 }
 0x739   : > { %v15147_v8 = vpop.eup %15146 }
 0x73a   : > { %v5187_v14 = vmul.f32 %v15147_v8, %v17483_v36  ;;  %v19580_v36 = vld [vmem:[#allocation78_spill] sm:$0xff] }
 0x73b   : > { %7527 = vrot.lane.b32.xlu1 %v19576_v54, %s15731_s24 }
 0x73c   : > { %7077 = vrot.lane.b32.xlu0 %v19577_v28, %s15731_s24  ;;  %v5209_v34 = vpack.c.bf16 %v5187_v14, %v5187_v14 }
 0x73e   : > { %14126 = vmatmul.mubr.msk.bf16.vlgmr.msra.gmra.mrb[176].mxu0 %vm2665_vm4, %v5209_v34  ;;  %v19590_v34 = vld [vmem:[#allocation97_spill] sm:$0xff] }
 0x73f   : > { %7629 = vrot.lane.b32.xlu1 %v19578_v38, %s15731_s24  ;;  %14137 = vmatprep.mubr.msk.bf16.mxu0 %vm15728_vm0, %v19508_v59 }
 0x740   : > { %7179 = vrot.lane.b32.xlu0 %v19579_v58, %s15731_s24 }
 0x743   : > { %7627 = vrot.lane.b32.xlu1 %v19580_v36, %s15731_s24 }
 0x744   : > { %7177 = vrot.lane.b32.xlu0 %v19581_v43, %s15731_s24 }
 0x746   : > { %v5130_v32 = vpop.xlane.xlu0 %5129 }
 0x747   : > { %15148 = vrcp.f32 %v5130_v32  ;;  %7989 = vrot.lane.b32.xlu1 %v19582_v47, %s15731_s24  ;;  %v6055_v32 = vsel %vm2669_vm2, %v19590_v34, 0  ;;  %v19594_v34 = vld [vmem:[#allocation71_spill] sm:$0xff]  ;;  %v14938_v47 = vld [vmem:[%s16152_s19 + $0x10] sm:$0xff]  }
 0x748   : > { %7279 = vrot.lane.b32.xlu0 %v19583_v60, %s15731_s24 }
 0x74a   : > { %v5136_v9 = vpop.xlane.xlu0 %5135 }
 0x74b   : > { %15150 = vrcp.f32 %v5136_v9  ;;  %8085 = vrot.lane.b32.xlu1 %v19584_v37, %s15731_s24  ;;  %v19591_v9 = vld [vmem:[#allocation85_spill] sm:$0xff] }
 0x74c   : > { %7277 = vrot.lane.b32.xlu0 %v19585_v5, %s15731_s24 }
 0x74e   : > { %v6099_v12 = vpop.permute.xlu0 %6098 }
 0x74f   : > { %v6104_v20 = vsel %vm2669_vm2, %v6099_v12, 0  ;;  %8181 = vrot.lane.b32.xlu1 %v19586_v51, %s15731_s24  ;;  %v19592_v12 = vld [vmem:[#allocation67_spill] sm:$0xff]  ;;  %v19600_v51 = vld [vmem:[#allocation45_spill] sm:$0xff] }
 0x750   : > { %7379 = vrot.lane.b32.xlu0 %v19587_v45, %s15731_s24  ;;  %14136 = vmatpush3.bf16.msra.mxu0 %v6104_v20  ;;  %v6148_v20 = vpop.permute.xlu1 %6147 }
 0x751   : > { %v15149_v22 = vpop.eup %15148  ;;  %14147 = vmatprep.subr.bf16.mxu0 %v19508_v59 }
 0x752   : > { %v5186_v35 = vmul.f32 %v15149_v22, %v17494_v50  ;;  %v19593_v22 = vld [vmem:[#allocation72_spill] sm:$0xff] }
 0x753   : > { %8277 = vrot.lane.b32.xlu1 %v19588_v57, %s15731_s24 }
 0x754   : > { %7377 = vrot.lane.b32.xlu0 %v19589_v10, %s15731_s24  ;;  %v5208_v8 = vpack.c.bf16 %v5186_v35, %v5186_v35 }
 0x755   : > { %v15151_v14 = vpop.eup %15150 }
 0x756   : > { %14120 = vmatmul.mubr.msk.bf16.vlgmr.msra.gmra.mrb[172].mxu1 %vm2665_vm4, %v5208_v8  ;;  %v5188_v50 = vmul.f32 %v15151_v14, %v17504_v0  ;;  %v6153_v8 = vsel %vm2669_vm2, %v6148_v20, 0  ;;  %v19595_v14 = vld [vmem:[#allocation77_spill] sm:$0xff] }
 0x757   : > { %14130 = vmatpush3.bf16.msra.mxu1 %v6055_v32  ;;  %8373 = vrot.lane.b32.xlu1 %v19591_v9, %s15731_s24  ;;  %v19596_v32 = vld [vmem:[#allocation75_spill] sm:$0xff] }
 0x758   : > { %7479 = vrot.lane.b32.xlu0 %v19592_v12, %s15731_s24  ;;  %14131 = vmatprep.mubr.msk.bf16.mxu1 %vm15728_vm0, %v19508_v59  ;;  %v5210_v35 = vpack.c.bf16 %v5188_v50, %v5188_v50  ;;  %v19597_v50 = vld [vmem:[#allocation79_spill] sm:$0xff] }
 0x759   : > { %14141 = vmatprep.subr.bf16.mxu1 %v19508_v59 }
 0x75c   : > { %7477 = vrot.lane.b32.xlu0 %v19593_v22, %s15731_s24 }
 0x75e   : > { %14132 = vmatmul.mubr.msk.bf16.vlgmr.msra.gmra.mrb[176].mxu1 %vm2665_vm4, %v5210_v35 }
 0x75f   : > { %14142 = vmatpush3.bf16.msra.mxu1 %v6153_v8  ;;  %14143 = vmatprep.mubr.msk.bf16.mxu1 %vm15728_vm0, %v19508_v59  ;;  %v19598_v8 = vld [vmem:[#allocation81_spill] sm:$0xff] }
 0x760   : > { %7579 = vrot.lane.b32.xlu0 %v19594_v34, %s15731_s24  ;;  %14153 = vmatprep.subr.bf16.mxu1 %v19508_v59 }
 0x763   : > { %v5139_v0 = vpop.xlane.xlu1 %5138 }
 0x764   : > { %15152 = vrcp.f32 %v5139_v0  ;;  %7577 = vrot.lane.b32.xlu0 %v19595_v14, %s15731_s24  ;;  %v19599_v0 = vld [vmem:[#allocation83_spill] sm:$0xff] }
 0x767   : > { %v5145_v57 = vpop.xlane.xlu1 %5144 }
 0x768   : > { %7941 = vrot.lane.b32.xlu0 %v19596_v32, %s15731_s24  ;;  %15154 = vrcp.f32 %v5145_v57 }
 0x76c   : > { %8037 = vrot.lane.b32.xlu0 %v19597_v50, %s15731_s24  ;;  %v6246_v50 = vpop.permute.xlu1 %6245 }
 0x76e   : > { %v15153_v20 = vpop.eup %15152 }
 0x76f   : > { %v5189_v35 = vmul.f32 %v15153_v20, %v17517_v63 }
 0x770   : > { %8133 = vrot.lane.b32.xlu0 %v19598_v8, %s15731_s24  ;;  %v6630_v20 = vpop.permute.xlu1 %6629 }
 0x771   : > { %v5211_v9 = vpack.c.bf16 %v5189_v35, %v5189_v35 }
 0x772   : > { %v15155_v8 = vpop.eup %15154 }
 0x773   : > { %14138 = vmatmul.mubr.msk.bf16.vlgmr.msra.gmra.mrb[180].mxu0 %vm2665_vm4, %v5211_v9  ;;  %v5191_v32 = vmul.f32 %v15155_v8, %v17523_v1 }
 0x774   : > { %8229 = vrot.lane.b32.xlu0 %v19599_v0, %s15731_s24  ;;  %14149 = vmatprep.mubr.msk.bf16.mxu0 %vm15728_vm0, %v19508_v59  ;;  %v6628_v9 = vpop.permute.xlu1 %6627 }
 0x775   : > { %v5213_v57 = vpack.c.bf16 %v5191_v32, %v5191_v32  ;;  %v6251_v32 = vsel %vm2669_vm2, %v6246_v50, 0 }
 0x778   : > { %8325 = vrot.lane.b32.xlu0 %v19600_v51, %s15731_s24  ;;  %v6730_v54 = vpop.permute.xlu1 %6729 }
 0x77f   : > { %v5142_v63 = vpop.xlane.xlu0 %5141 }
 0x780   : > { %15156 = vrcp.f32 %v5142_v63 }
 0x783   : > { %v5148_v35 = vpop.xlane.xlu0 %5147 }
 0x784   : > { %15158 = vrcp.f32 %v5148_v35 }
 0x787   : > { %v6197_v37 = vpop.permute.xlu0 %6196 }
 0x788   : > { %v6202_v0 = vsel %vm2669_vm2, %v6197_v37, 0 }
 0x789   : > { %14148 = vmatpush3.bf16.msra.mxu0 %v6202_v0 }
 0x78a   : > { %v15157_v36 = vpop.eup %15156  ;;  %v17766_v38 = vpop.f32.mrb[144].mxu0  ;;  %14159 = vmatprep.subr.bf16.mxu0 %v19508_v59 }
 0x78b   : > { %v14031_v51 = vpop.f32.mrb[145].mxu0  ;;  %v5190_v63 = vmul.f32 %v15157_v36, %v17539_v23  ;;  %v6728_v36 = vpop.permute.xlu1 %6727 }
 0x78c   : > { %v5261_v35 = vpop.f32.mrb[146].mxu0  ;;  %14150 = vmatmul.mubr.msk.bf16.vlgmr.msra.gmra.mrb[184].mxu0 %vm2665_vm4, %v5213_v57  ;;  %v14936_v57 = vld [vmem:[%s16152_s19] sm:$0xff]  }
 0x78d   : > { %v14032_v1 = vpop.f32.mrb[147].mxu0  ;;  %v5212_v8 = vpack.c.bf16 %v5190_v63, %v5190_v63  ;;  %14160 = vmatpush3.bf16.msra.mxu0 %v14938_v47  ;;  %14163 = vmatprep.mubr.msk.bf16.mxu0 %vm15728_vm0, %v19508_v59 }
 0x78e   : > { %v15159_v37 = vpop.eup %15158  ;;  %14161 = vmatprep.subr.bf16.mxu0 %v19508_v59  ;;  %v14937_v1 = vld [vmem:[%s16152_s19 + $0x8] sm:$0xff]  }
 0x78f   : > { %14144 = vmatmul.mubr.msk.bf16.vlgmr.msra.gmra.mrb[180].mxu1 %vm2665_vm4, %v5212_v8  ;;  %v5192_v23 = vmul.f32 %v15159_v37, %v17549_v17  ;;  %v6830_v35 = vpop.permute.xlu1 %6829  ;;  %v6635_v8 = vsel %vm1387_vm1, %v6630_v20, 0  ;;  %v6735_v20 = vsel %vm1387_vm1, %v6730_v54, 0 }
 0x790   : > { %14154 = vmatpush3.bf16.msra.mxu1 %v6251_v32  ;;  %14155 = vmatprep.mubr.msk.bf16.mxu1 %vm15728_vm0, %v19508_v59  ;;  %v19602_v32 = vld [vmem:[#allocation92_spill] sm:$0xff] }
 0x791   : > { %14175 = vmatprep.subr.bf16.mxu1 %v19508_v59  ;;  %14162 = vmatpush3.bf16.msra.mxu0 %v14939_v40  ;;  %v5214_v63 = vpack.c.bf16 %v5192_v23, %v5192_v23  ;;  %v19601_v40 = vld [vmem:[#allocation51_spill] sm:$0xff] }
 0x792   : > { %v5356_v47 = vpop.f32.mrb[148].mxu0  ;;  %14191 = vmatprep.subr.bf16.mxu0 %v19508_v59 }
 0x793   : > { %v14043_v51 = vpop.f32.mrb[149].mxu0  ;;  %v6828_v17 = vpop.permute.xlu1 %6827 }
 0x794   : > { %v5359_v0 = vpop.f32.mrb[150].mxu0  ;;  %v19603_v51 = vld [vmem:[#allocation93_spill] sm:$0xff] }
 0x795   : > { %v14044_v50 = vpop.f32.mrb[151].mxu0 }
 0x797   : > { %14156 = vmatmul.mubr.msk.bf16.vlgmr.msra.gmra.mrb[184].mxu1 %vm2665_vm4, %v5214_v63  ;;  %v6930_v37 = vpop.permute.xlu1 %6929 }
 0x798   : > { %14176 = vmatpush3.bf16.msra.mxu1 %v14936_v57  ;;  %14179 = vmatprep.mubr.msk.bf16.mxu1 %vm15728_vm0, %v19508_v59 }
 0x799   : > { %14177 = vmatprep.subr.bf16.mxu1 %v19508_v59 }
 0x79b   : > { %v6928_v23 = vpop.permute.xlu1 %6927 }
 0x79c   : > { %14178 = vmatpush3.bf16.msra.mxu1 %v14937_v1 }
 0x79d   : > { %14197 = vmatprep.subr.bf16.mxu1 %v19508_v59 }
 0x79f   : > { %14180 = vmatmul.mubr.msk.bf16.vlgmr.msra.gmra.mrb[188].mxu1 %vm1387_vm1, %v19601_v40  ;;  %v7030_v0 = vpop.permute.xlu1 %7029 }
 0x7a0   : > { %14183 = vmatprep.mubr.msk.bf16.mxu1 %vm15728_vm0, %v19508_v59 }
 0x7a3   : > { %v7028_v57 = vpop.permute.xlu1 %7027 }
 0x7a5   : > { %14198 = vmatpush3.bf16.xpose.msra.mxu1 %v6635_v8 }
 0x7a6   : > { %14209 = vmatprep.subr.bf16.mxu1 %v19508_v59 }
 0x7a7   : > { %14184 = vmatmul.mubr.msk.bf16.gmra.mrb[192].mxu1 %vm1387_vm1, %v19602_v32  ;;  %v7130_v50 = vpop.permute.xlu1 %7129  ;;  %v6835_v32 = vsel %vm1387_vm1, %v6830_v35, 0 }
 0x7a8   : > { %14187 = vmatprep.mubr.msk.bf16.mxu1 %vm15728_vm0, %v19508_v59 }
 0x7ab   : > { %v17814_v54 = vpop.permute.xlu1 %7127 }
 0x7af   : > { %14188 = vmatmul.mubr.msk.bf16.gmra.mrb[196].mxu1 %vm1387_vm1, %v19603_v51 }
 0x7b0   : > { %14199 = vmatprep.mubr.msk.bf16.mxu1 %vm15728_vm0, %v19508_v59 }
 0x7b7   : > { %14200 = vmatmul.mubr.msk.bf16.vlgmr.msra.gmra.mrb[200].mxu1 %vm1387_vm1, %v6628_v9 }
 0x7b8   : > { %14210 = vmatpush3.bf16.xpose.msra.mxu1 %v6735_v20  ;;  %14211 = vmatprep.mubr.msk.bf16.mxu1 %vm15728_vm0, %v19508_v59 }
 0x7b9   : > { %14221 = vmatprep.subr.bf16.mxu1 %v19508_v59 }
 0x7bc   : > { %v5307_v63 = vpop.f32.mrb[144].mxu1 }
 0x7bd   : > { %v6315_v1 = vcombine.low %v17766_v38, %v5307_v63  ;;  %v14037_v40 = vpop.f32.mrb[145].mxu1  ;;  %v6935_v38 = vsel %vm1387_vm1, %v6930_v37, 0  ;;  %v19604_v63 = vld [vmem:[#allocation30_spill] sm:$0xff] }
 0x7be   : > { %v5310_v8 = vpop.f32.mrb[146].mxu1 }
 0x7bf   : > { %14212 = vmatmul.mubr.msk.bf16.vlgmr.msra.gmra.mrb[204].mxu1 %vm1387_vm1, %v6728_v36  ;;  %v14038_v51 = vpop.f32.mrb[147].mxu1  ;;  %v6323_v40 = vrot.slane %v6315_v1, %v19604_v63  ;;  %v7230_v8 = vpop.permute.xlu1 %7229 }
 0x7c0   : > { %14222 = vmatpush3.bf16.xpose.msra.mxu1 %v6835_v32  ;;  %14223 = vmatprep.mubr.msk.bf16.mxu1 %vm15728_vm0, %v19508_v59 }
 0x7c1   : > { %14233 = vmatprep.subr.bf16.mxu1 %v19508_v59 }
 0x7c3   : > { %v7228_v37 = vpop.permute.xlu1 %7227 }
 0x7c4   : > { %v5405_v9 = vpop.f32.mrb[148].mxu1 }
 0x7c5   : > { %v6316_v20 = vcombine.low %v5356_v47, %v5405_v9  ;;  %v14049_v16 = vpop.f32.mrb[149].mxu1 }
 0x7c6   : > { %v5408_v61 = vpop.f32.mrb[150].mxu1 }
 0x7c7   : > { %v6330_v35 = vrot.slane %v6316_v20, %v19604_v63  ;;  %14224 = vmatmul.mubr.msk.bf16.vlgmr.msra.gmra.mrb[208].mxu1 %vm1387_vm1, %v6828_v17  ;;  %v14050_v36 = vpop.f32.mrb[151].mxu1  ;;  %v7035_v20 = vsel %vm1387_vm1, %v7030_v0, 0  ;;  %v7135_v0 = vsel %vm1387_vm1, %v7130_v50, 0 }
 0x7c8   : > { %14234 = vmatpush3.bf16.xpose.msra.mxu1 %v6935_v38  ;;  %v5454_v32 = vpop.f32.mrb[152].mxu0  ;;  %14235 = vmatprep.mubr.msk.bf16.mxu1 %vm15728_vm0, %v19508_v59  ;;  %v7330_v36 = vpop.permute.xlu1 %7329 }
 0x7c9   : > { %v6331_v51 = vcombine.low %v6323_v40, %v6330_v35  ;;  %v14055_v56 = vpop.f32.mrb[153].mxu0  ;;  %14245 = vmatprep.subr.bf16.mxu1 %v19508_v59 }
 0x7ca   : > { %v5457_v61 = vpop.f32.mrb[154].mxu0 }
 0x7cb   : > { %v14056_v16 = vpop.f32.mrb[155].mxu0 }
 0x7cd   : > { %v5503_v47 = vpop.f32.mrb[152].mxu1 }
 0x7ce   : > { %v6332_v1 = vcombine.low %v5454_v32, %v5503_v47  ;;  %v14061_v9 = vpop.f32.mrb[153].mxu1 }
 0x7cf   : > { %v5506_v17 = vpop.f32.mrb[154].mxu1  ;;  %14236 = vmatmul.mubr.msk.bf16.vlgmr.msra.gmra.mrb[212].mxu1 %vm1387_vm1, %v6928_v23 }
 0x7d0   : > { %14246 = vmatpush3.bf16.xpose.msra.mxu1 %v7035_v20  ;;  %v14062_v38 = vpop.f32.mrb[155].mxu1  ;;  %14247 = vmatprep.mubr.msk.bf16.mxu1 %vm15728_vm0, %v19508_v59  ;;  %v5552_v40 = vpop.f32.mrb[156].mxu0  ;;  %v6340_v23 = vrot.slane %v6332_v1, %v19604_v63 }
 0x7d1   : > { %14257 = vmatprep.subr.bf16.mxu1 %v19508_v59  ;;  %v14067_v56 = vpop.f32.mrb[157].mxu0 }
 0x7d2   : > { %v5555_v35 = vpop.f32.mrb[158].mxu0  ;;  %v7328_v56 = vpop.permute.xlu1 %7327 }
 0x7d3   : > { %v14068_v61 = vpop.f32.mrb[159].mxu0 }
 0x7d4   : > { %v6580_v61 = vpop.permute.xlu0 %6579 }
 0x7d5   : > { %v5601_v16 = vpop.f32.mrb[156].mxu1  ;;  %v6585_v1 = vsel %vm1387_vm1, %v6580_v61, 0 }
 0x7d6   : > { %v6333_v32 = vcombine.low %v5552_v40, %v5601_v16  ;;  %v14073_v47 = vpop.f32.mrb[157].mxu1 }
 0x7d7   : > { %v5604_v9 = vpop.f32.mrb[158].mxu1  ;;  %14248 = vmatmul.mubr.msk.bf16.vlgmr.msra.gmra.mrb[216].mxu1 %vm1387_vm1, %v7028_v57 }
 0x7d8   : > { %v6347_v20 = vrot.slane %v6333_v32, %v19604_v63  ;;  %14258 = vmatpush3.bf16.xpose.msra.mxu1 %v7135_v0  ;;  %v14074_v17 = vpop.f32.mrb[159].mxu1  ;;  %14259 = vmatprep.mubr.msk.bf16.mxu1 %vm15728_vm0, %v19508_v59  ;;  %v5650_v38 = vpop.f32.mrb[160].mxu0  ;;  %v7235_v0 = vsel %vm1387_vm1, %v7230_v8, 0 }
 0x7d9   : > { %14269 = vmatprep.subr.bf16.mxu1 %v19508_v59  ;;  %v14079_v35 = vpop.f32.mrb[161].mxu0 }
 0x7da   : > { %v6348_v40 = vcombine.low %v6340_v23, %v6347_v20  ;;  %v5653_v50 = vpop.f32.mrb[162].mxu0  ;;  %v7430_v23 = vpop.permute.xlu1 %7429 }
 0x7db   : > { %v14080_v47 = vpop.f32.mrb[163].mxu0 }
 0x7dc   : > { %v6414_v16 = vpack.c.bf16 %v6348_v40, %v6331_v51 }
 0x7dd   : > { %v5699_v57 = vpop.f32.mrb[160].mxu1 }
 0x7de   : > { %v6349_v9 = vcombine.low %v5650_v38, %v5699_v57  ;;  %v14085_v32 = vpop.f32.mrb[161].mxu1  ;;  %14164 = vmatmul.mubr.msk.bf16.vlgmr.msra.gmra.mrb[188].mxu0 %vm1387_vm1, %v6414_v16  ;;  %v7428_v61 = vpop.permute.xlu1 %7427  ;;  %v7335_v16 = vsel %vm1387_vm1, %v7330_v36, 0 }
 0x7df   : > { %14192 = vmatpush3.bf16.xpose.msra.mxu0 %v6585_v1  ;;  %v5702_v17 = vpop.f32.mrb[162].mxu1  ;;  %14260 = vmatmul.mubr.msk.bf16.vlgmr.msra.gmra.mrb[220].mxu1 %vm1387_vm1, %v17814_v54 }
 0x7e0   : > { %v14086_v20 = vpop.f32.mrb[163].mxu1  ;;  %14270 = vmatpush3.bf16.xpose.msra.mxu1 %v7235_v0  ;;  %14271 = vmatprep.mubr.msk.bf16.mxu1 %vm15728_vm0, %v19508_v59  ;;  %v5748_v51 = vpop.f32.mrb[164].mxu0  ;;  %v6357_v57 = vrot.slane %v6349_v9, %v19604_v63  ;;  %v7435_v9 = vsel %vm1387_vm1, %v7430_v23, 0 }
 0x7e1   : > { %14281 = vmatprep.subr.bf16.mxu1 %v19508_v59  ;;  %14167 = vmatprep.mubr.msk.bf16.mxu0 %vm15728_vm0, %v19508_v59  ;;  %v14091_v38 = vpop.f32.mrb[165].mxu0 }
 0x7e2   : > { %14203 = vmatprep.subr.bf16.mxu0 %v19508_v59  ;;  %v5751_v8 = vpop.f32.mrb[166].mxu0  ;;  %v7530_v38 = vpop.permute.xlu1 %7529 }
 0x7e3   : > { %v14092_v40 = vpop.f32.mrb[167].mxu0 }
 0x7e5   : > { %v5797_v35 = vpop.f32.mrb[164].mxu1 }
 0x7e6   : > { %v6350_v54 = vcombine.low %v5748_v51, %v5797_v35  ;;  %v14097_v50 = vpop.f32.mrb[165].mxu1 }
 0x7e7   : > { %v5800_v47 = vpop.f32.mrb[166].mxu1  ;;  %14272 = vmatmul.mubr.msk.bf16.vlgmr.msra.gmra.mrb[224].mxu1 %vm1387_vm1, %v7228_v37 }
 0x7e8   : > { %v6364_v1 = vrot.slane %v6350_v54, %v19604_v63  ;;  %v14098_v32 = vpop.f32.mrb[167].mxu1  ;;  %14282 = vmatpush3.bf16.xpose.msra.mxu1 %v7335_v16  ;;  %14283 = vmatprep.mubr.msk.bf16.mxu1 %vm15728_vm0, %v19508_v59  ;;  %v5846_v0 = vpop.f32.mrb[168].mxu0 }
 0x7e9   : > { %14293 = vmatprep.subr.bf16.mxu1 %v19508_v59  ;;  %v14103_v20 = vpop.f32.mrb[169].mxu0  ;;  %v7528_v16 = vpop.permute.xlu1 %7527  ;;  %v7535_v32 = vsel %vm1387_vm1, %v7530_v38, 0 }
 0x7ea   : > { %v6365_v17 = vcombine.low %v6357_v57, %v6364_v1  ;;  %v5849_v51 = vpop.f32.mrb[170].mxu0 }
 0x7eb   : > { %v14104_v36 = vpop.f32.mrb[171].mxu0 }
 0x7ed   : > { %v5895_v8 = vpop.f32.mrb[168].mxu1  ;;  %v7630_v23 = vpop.permute.xlu1 %7629 }
 0x7ee   : > { %v6366_v40 = vcombine.low %v5846_v0, %v5895_v8  ;;  %v14109_v37 = vpop.f32.mrb[169].mxu1  ;;  %v7635_v0 = vsel %vm1387_vm1, %v7630_v23, 0 }
 0x7ef   : > { %v5898_v35 = vpop.f32.mrb[170].mxu1  ;;  %14284 = vmatmul.mubr.msk.bf16.vlgmr.msra.gmra.mrb[228].mxu1 %vm1387_vm1, %v7328_v56 }
 0x7f0   : > { %v14110_v54 = vpop.f32.mrb[171].mxu1  ;;  %14294 = vmatpush3.bf16.xpose.msra.mxu1 %v7435_v9  ;;  %14295 = vmatprep.mubr.msk.bf16.mxu1 %vm15728_vm0, %v19508_v59  ;;  %v5944_v50 = vpop.f32.mrb[172].mxu0 }
 0x7f1   : > { %14305 = vmatprep.subr.bf16.mxu1 %v19508_v59  ;;  %v14115_v47 = vpop.f32.mrb[173].mxu0  ;;  %v7628_v56 = vpop.permute.xlu1 %7627 }
 0x7f2   : > { %v5947_v57 = vpop.f32.mrb[174].mxu0 }
 0x7f3   : > { %v14116_v1 = vpop.f32.mrb[175].mxu0 }
 0x7f5   : > { %v7990_v20 = vpop.permute.xlu1 %7989 }
 0x7f7   : > { %14296 = vmatmul.mubr.msk.bf16.vlgmr.msra.gmra.mrb[232].mxu1 %vm1387_vm1, %v7428_v61  ;;  %v7995_v61 = vsel %vm2669_vm2, %v7990_v20, 0 }
 0x7f8   : > { %14306 = vmatpush3.bf16.xpose.msra.mxu1 %v7535_v32  ;;  %14307 = vmatprep.mubr.msk.bf16.mxu1 %vm15728_vm0, %v19508_v59 }
 0x7f9   : > { %14317 = vmatprep.subr.bf16.mxu1 %v19508_v59 }
 0x7ff   : > { %14308 = vmatmul.mubr.msk.bf16.vlgmr.msra.gmra.mrb[236].mxu1 %vm1387_vm1, %v7528_v16  ;;  %v6374_v16 = vrot.slane %v6366_v40, %v19604_v63 }
 0x800   : > { %14318 = vmatpush3.bf16.xpose.msra.mxu1 %v7635_v0  ;;  %14319 = vmatprep.mubr.msk.bf16.mxu1 %vm15728_vm0, %v19508_v59 }
 0x801   : > { %14329 = vmatprep.subr.bf16.mxu1 %v19508_v59 }
 0x807   : > { %14320 = vmatmul.mubr.msk.bf16.vlgmr.msra.gmra.mrb[240].mxu1 %vm1387_vm1, %v7628_v56 }
 0x808   : > { %14330 = vmatpush3.bf16.msra.mxu1 %v7995_v61  ;;  %14331 = vmatprep.mubr.msk.bf16.mxu1 %vm15728_vm0, %v19508_v59 }
 0x809   : > { %14341 = vmatprep.subr.bf16.mxu1 %v19508_v59 }
 0x811   : > { %v6042_v51 = vpop.f32.mrb[176].mxu0 }
 0x812   : > { %v14127_v38 = vpop.f32.mrb[177].mxu0 }
 0x813   : > { %v6045_v36 = vpop.f32.mrb[178].mxu0 }
 0x814   : > { %v14128_v8 = vpop.f32.mrb[179].mxu0 }
 0x829   : > { %v5993_v37 = vpop.f32.mrb[172].mxu1 }
 0x82a   : > { %v6367_v9 = vcombine.low %v5944_v50, %v5993_v37  ;;  %v14121_v35 = vpop.f32.mrb[173].mxu1  ;;  %v6578_v50 = vpop.permute.xlu0 %6577 }
 0x82b   : > { %v5996_v54 = vpop.f32.mrb[174].mxu1 }
 0x82c   : > { %v6381_v47 = vrot.slane %v6367_v9, %v19604_v63  ;;  %v14122_v57 = vpop.f32.mrb[175].mxu1 }
 0x82e   : > { %v6382_v1 = vcombine.low %v6374_v16, %v6381_v47  ;;  %v6680_v37 = vpop.permute.xlu0 %6679 }
 0x830   : > { %v6415_v32 = vpack.c.bf16 %v6382_v1, %v6365_v17 }
 0x831   : > { %v6091_v23 = vpop.f32.mrb[176].mxu1 }
 0x832   : > { %v6383_v56 = vcombine.low %v6042_v51, %v6091_v23  ;;  %v14133_v0 = vpop.f32.mrb[177].mxu1  ;;  %14168 = vmatmul.mubr.msk.bf16.gmra.mrb[192].mxu0 %vm1387_vm1, %v6415_v32  ;;  %v6678_v9 = vpop.permute.xlu0 %6677 }
 0x833   : > { %v6094_v20 = vpop.f32.mrb[178].mxu1  ;;  %14171 = vmatprep.mubr.msk.bf16.mxu0 %vm15728_vm0, %v19508_v59 }
 0x834   : > { %v14134_v61 = vpop.f32.mrb[179].mxu1  ;;  %v6391_v20 = vrot.slane %v6383_v56, %v19604_v63 }
 0x836   : > { %v6780_v35 = vpop.permute.xlu0 %6779 }
 0x83a   : > { %v6778_v54 = vpop.permute.xlu0 %6777 }
 0x83e   : > { %v6880_v1 = vpop.permute.xlu0 %6879 }
 0x846   : > { %v6140_v38 = vpop.f32.mrb[180].mxu0 }
 0x847   : > { %v14139_v36 = vpop.f32.mrb[181].mxu0 }
 0x848   : > { %v6143_v8 = vpop.f32.mrb[182].mxu0 }
 0x849   : > { %v14140_v40 = vpop.f32.mrb[183].mxu0 }
 0x84a   : > { %v6878_v40 = vpop.permute.xlu0 %6877 }
 0x84e   : > { %v6980_v31 = vpop.permute.xlu0 %6979 }
 0x85f   : > { %v6238_v17 = vpop.f32.mrb[184].mxu0 }
 0x860   : > { %v14151_v16 = vpop.f32.mrb[185].mxu0 }
 0x861   : > { %v6241_v51 = vpop.f32.mrb[186].mxu0 }
 0x862   : > { %v6189_v47 = vpop.f32.mrb[180].mxu1  ;;  %v14152_v57 = vpop.f32.mrb[187].mxu0 }
 0x863   : > { %v6384_v32 = vcombine.low %v6140_v38, %v6189_v47  ;;  %v14145_v23 = vpop.f32.mrb[181].mxu1 }
 0x864   : > { %v6192_v0 = vpop.f32.mrb[182].mxu1 }
 0x865   : > { %v6398_v61 = vrot.slane %v6384_v32, %v19604_v63  ;;  %v14146_v36 = vpop.f32.mrb[183].mxu1  ;;  %v6978_v32 = vpop.permute.xlu0 %6977 }
 0x867   : > { %v6399_v8 = vcombine.low %v6391_v20, %v6398_v61  ;;  %v6785_v20 = vsel %vm1387_vm1, %v6780_v35, 0 }
 0x86a   : > { %v6287_v48 = vpop.f32.mrb[184].mxu1 }
 0x86b   : > { %v6400_v29 = vcombine.low %v6238_v17, %v6287_v48  ;;  %v14157_v52 = vpop.f32.mrb[185].mxu1 }
 0x86c   : > { %v6290_v42 = vpop.f32.mrb[186].mxu1  ;;  %v6685_v52 = vsel %vm1387_vm1, %v6680_v37, 0 }
 0x86d   : > { %v6407_v16 = vrot.slane %v6400_v29, %v19604_v63  ;;  %v14158_v51 = vpop.f32.mrb[187].mxu1  ;;  %v7080_v29 = vpop.permute.xlu0 %7079 }
 0x86e   : > { %v6885_v51 = vsel %vm1387_vm1, %v6880_v1, 0  ;;  %v6985_v1 = vsel %vm1387_vm1, %v6980_v31, 0  ;;  %v7085_v31 = vsel %vm1387_vm1, %v7080_v29, 0 }
 0x86f   : > { %v6416_v57 = vpack.c.bf16 %v6407_v16, %v6399_v8 }
 0x871   : > { %14172 = vmatmul.mubr.msk.bf16.gmra.mrb[196].mxu0 %vm1387_vm1, %v6416_v57  ;;  %v7078_v61 = vpop.permute.xlu0 %7077 }
 0x872   : > { %v17882_v38 = vpop.f32.mrb[188].mxu1  ;;  %14193 = vmatprep.mubr.msk.bf16.mxu0 %vm15728_vm0, %v19508_v59 }
 0x873   : > { %v14181_v56 = vpop.f32.mrb[189].mxu1 }
 0x874   : > { %v17886_v47 = vpop.f32.mrb[190].mxu1 }
 0x875   : > { %v14182_v23 = vpop.f32.mrb[191].mxu1  ;;  %v7180_v16 = vpop.permute.xlu0 %7179 }
 0x876   : > { %v7185_v29 = vsel %vm1387_vm1, %v7180_v16, 0 }
 0x879   : > { %14194 = vmatmul.mubr.msk.bf16.vlgmr.msra.gmra.mrb[200].mxu0 %vm1387_vm1, %v6578_v50  ;;  %v7178_v23 = vpop.permute.xlu0 %7177 }
 0x87a   : > { %14204 = vmatpush3.bf16.xpose.msra.mxu0 %v6685_v52  ;;  %v17890_v42 = vpop.f32.mrb[192].mxu1  ;;  %14205 = vmatprep.mubr.msk.bf16.mxu0 %vm15728_vm0, %v19508_v59 }
 0x87b   : > { %v14185_v48 = vpop.f32.mrb[193].mxu1  ;;  %14215 = vmatprep.subr.bf16.mxu0 %v19508_v59 }
 0x87c   : > { %v17895_v17 = vpop.f32.mrb[194].mxu1 }
 0x87d   : > { %v14186_v0 = vpop.f32.mrb[195].mxu1  ;;  %v7280_v48 = vpop.permute.xlu0 %7279 }
 0x87e   : > { %v7285_v16 = vsel %vm1387_vm1, %v7280_v48, 0 }
 0x881   : > { %14206 = vmatmul.mubr.msk.bf16.vlgmr.msra.gmra.mrb[204].mxu0 %vm1387_vm1, %v6678_v9 }
 0x882   : > { %14216 = vmatpush3.bf16.xpose.msra.mxu0 %v6785_v20  ;;  %v17899_v50 = vpop.f32.mrb[196].mxu1  ;;  %14217 = vmatprep.mubr.msk.bf16.mxu0 %vm15728_vm0, %v19508_v59 }
 0x883   : > { %v14189_v37 = vpop.f32.mrb[197].mxu1  ;;  %14227 = vmatprep.subr.bf16.mxu0 %v19508_v59 }
 0x884   : > { %v17904_v36 = vpop.f32.mrb[198].mxu1 }
 0x885   : > { %v14190_v8 = vpop.f32.mrb[199].mxu1 }
 0x889   : > { %14218 = vmatmul.mubr.msk.bf16.vlgmr.msra.gmra.mrb[208].mxu0 %vm1387_vm1, %v6778_v54 }
 0x88a   : > { %14228 = vmatpush3.bf16.xpose.msra.mxu0 %v6885_v51  ;;  %v17908_v35 = vpop.f32.mrb[200].mxu1  ;;  %14229 = vmatprep.mubr.msk.bf16.mxu0 %vm15728_vm0, %v19508_v59  ;;  %v7278_v51 = vpop.permute.xlu0 %7277 }
 0x88b   : > { %v14201_v9 = vpop.f32.mrb[201].mxu1  ;;  %v7680_v57 = vsel %vm2400_vm3, %v17908_v35, -inf  ;;  %14239 = vmatprep.subr.bf16.mxu0 %v19508_v59 }
 0x88c   : > { %7681 = vmax.xlane.f32.xlu1 %v7680_v57  ;;  %v6674_v56 = vpop.f32.mrb[202].mxu1 }
 0x88d   : > { %v14202_v52 = vpop.f32.mrb[203].mxu1 }
 0x891   : > { %14230 = vmatmul.mubr.msk.bf16.vlgmr.msra.gmra.mrb[212].mxu0 %vm1387_vm1, %v6878_v40 }
 0x892   : > { %14240 = vmatpush3.bf16.xpose.msra.mxu0 %v6985_v1  ;;  %v17917_v54 = vpop.f32.mrb[204].mxu1  ;;  %14241 = vmatprep.mubr.msk.bf16.mxu0 %vm15728_vm0, %v19508_v59  ;;  %v7380_v1 = vpop.permute.xlu0 %7379 }
 0x893   : > { %v14213_v0 = vpop.f32.mrb[205].mxu1  ;;  %v7686_v20 = vsel %vm2400_vm3, %v17917_v54, -inf  ;;  %14251 = vmatprep.subr.bf16.mxu0 %v19508_v59  ;;  %v7385_v48 = vsel %vm1387_vm1, %v7380_v1, 0 }
 0x894   : > { %7687 = vmax.xlane.f32.xlu0 %v7686_v20  ;;  %v6774_v37 = vpop.f32.mrb[206].mxu1 }
 0x895   : > { %v14214_v8 = vpop.f32.mrb[207].mxu1 }
 0x896   : > { %v7378_v8 = vpop.permute.xlu0 %7377 }
 0x899   : > { %14242 = vmatmul.mubr.msk.bf16.vlgmr.msra.gmra.mrb[216].mxu0 %vm1387_vm1, %v6978_v32 }
 0x89a   : > { %14252 = vmatpush3.bf16.xpose.msra.mxu0 %v7085_v31  ;;  %v17926_v40 = vpop.f32.mrb[208].mxu1  ;;  %14253 = vmatprep.mubr.msk.bf16.mxu0 %vm15728_vm0, %v19508_v59 }
 0x89b   : > { %v14225_v9 = vpop.f32.mrb[209].mxu1  ;;  %v7692_v57 = vsel %vm2400_vm3, %v17926_v40, -inf  ;;  %14263 = vmatprep.subr.bf16.mxu0 %v19508_v59 }
 0x89c   : > { %7693 = vmax.xlane.f32.xlu1 %v7692_v57  ;;  %v6874_v56 = vpop.f32.mrb[210].mxu1  ;;  %v7480_v9 = vpop.permute.xlu0 %7479 }
 0x89d   : > { %v14226_v52 = vpop.f32.mrb[211].mxu1 }
 0x8a1   : > { %14254 = vmatmul.mubr.msk.bf16.vlgmr.msra.gmra.mrb[220].mxu0 %vm1387_vm1, %v7078_v61 }
 0x8a2   : > { %14264 = vmatpush3.bf16.xpose.msra.mxu0 %v7185_v29  ;;  %v17935_v32 = vpop.f32.mrb[212].mxu1  ;;  %14265 = vmatprep.mubr.msk.bf16.mxu0 %vm15728_vm0, %v19508_v59 }
 0x8a3   : > { %v14237_v0 = vpop.f32.mrb[213].mxu1  ;;  %v7698_v20 = vsel %vm2400_vm3, %v17935_v32, -inf  ;;  %14275 = vmatprep.subr.bf16.mxu0 %v19508_v59 }
 0x8a4   : > { %7699 = vmax.xlane.f32.xlu1 %v7698_v20  ;;  %v6974_v37 = vpop.f32.mrb[214].mxu1  ;;  %v7478_v0 = vpop.permute.xlu0 %7477 }
 0x8a5   : > { %v14238_v31 = vpop.f32.mrb[215].mxu1 }
 0x8a9   : > { %14266 = vmatmul.mubr.msk.bf16.vlgmr.msra.gmra.mrb[224].mxu0 %vm1387_vm1, %v7178_v23 }
 0x8aa   : > { %14276 = vmatpush3.bf16.xpose.msra.mxu0 %v7285_v16  ;;  %v17944_v61 = vpop.f32.mrb[216].mxu1  ;;  %14277 = vmatprep.mubr.msk.bf16.mxu0 %vm15728_vm0, %v19508_v59 }
 0x8ab   : > { %v14249_v57 = vpop.f32.mrb[217].mxu1  ;;  %v7704_v56 = vsel %vm2400_vm3, %v17944_v61, -inf  ;;  %14287 = vmatprep.subr.bf16.mxu0 %v19508_v59 }
 0x8ac   : > { %7705 = vmax.xlane.f32.xlu1 %v7704_v56  ;;  %v7074_v52 = vpop.f32.mrb[218].mxu1 }
 0x8ad   : > { %v14250_v29 = vpop.f32.mrb[219].mxu1 }
 0x8ae   : > { %v7485_v29 = vsel %vm1387_vm1, %v7480_v9, 0 }
 0x8b1   : > { %v6476_v23 = vpop.f32.mrb[188].mxu0  ;;  %14278 = vmatmul.mubr.msk.bf16.vlgmr.msra.gmra.mrb[228].mxu0 %vm1387_vm1, %v7278_v51 }
 0x8b2   : > { %v17954_v20 = vadd.f32 %v17882_v38, %v6476_v23  ;;  %v14165_v37 = vpop.f32.mrb[189].mxu0  ;;  %14288 = vmatpush3.bf16.xpose.msra.mxu0 %v7385_v48  ;;  %v17956_v31 = vpop.f32.mrb[220].mxu1  ;;  %14289 = vmatprep.mubr.msk.bf16.mxu0 %vm15728_vm0, %v19508_v59 }
 0x8b3   : > { %v6479_v16 = vpop.f32.mrb[190].mxu0  ;;  %v14261_v57 = vpop.f32.mrb[221].mxu1  ;;  %v7710_v56 = vsel %vm2400_vm3, %v17956_v31, -inf  ;;  %14299 = vmatprep.subr.bf16.mxu0 %v19508_v59 }
 0x8b4   : > { %19605 = vst [vmem:[#allocation31_spill] sm:$0xff] %v17954_v20  ;;  %v17964_v1 = vadd.f32 %v17886_v47, %v6479_v16  ;;  %v14166_v51 = vpop.f32.mrb[191].mxu0  ;;  %7711 = vmax.xlane.f32.xlu1 %v7710_v56  ;;  %v7174_v38 = vpop.f32.mrb[222].mxu1 }
 0x8b5   : > { %v14262_v52 = vpop.f32.mrb[223].mxu1  ;;  %v7580_v48 = vpop.permute.xlu0 %7579 }
 0x8b6   : > { %19606 = vst [vmem:[#allocation94_spill] sm:$0xff] %v17964_v1  ;;  %v7585_v9 = vsel %vm1387_vm1, %v7580_v48, 0 }
 0x8b9   : > { %14290 = vmatmul.mubr.msk.bf16.vlgmr.msra.gmra.mrb[232].mxu0 %vm1387_vm1, %v7378_v8  ;;  %v7578_v56 = vpop.permute.xlu0 %7577 }
 0x8ba   : > { %14300 = vmatpush3.bf16.xpose.msra.mxu0 %v7485_v29  ;;  %v17968_v23 = vpop.f32.mrb[224].mxu1  ;;  %14301 = vmatprep.mubr.msk.bf16.mxu0 %vm15728_vm0, %v19508_v59 }
 0x8bb   : > { %v14273_v37 = vpop.f32.mrb[225].mxu1  ;;  %v7716_v47 = vsel %vm2400_vm3, %v17968_v23, -inf  ;;  %14311 = vmatprep.subr.bf16.mxu0 %v19508_v59 }
 0x8bc   : > { %7717 = vmax.xlane.f32.xlu1 %v7716_v47  ;;  %v7274_v16 = vpop.f32.mrb[226].mxu1 }
 0x8bd   : > { %v14274_v57 = vpop.f32.mrb[227].mxu1  ;;  %v7942_v37 = vpop.permute.xlu0 %7941 }
 0x8be   : > { %v7947_v48 = vsel %vm2669_vm2, %v7942_v37, 0 }
 0x8c1   : > { %14302 = vmatmul.mubr.msk.bf16.vlgmr.msra.gmra.mrb[236].mxu0 %vm1387_vm1, %v7478_v0 }
 0x8c2   : > { %14312 = vmatpush3.bf16.xpose.msra.mxu0 %v7585_v9  ;;  %v17977_v8 = vpop.f32.mrb[228].mxu1  ;;  %14313 = vmatprep.mubr.msk.bf16.mxu0 %vm15728_vm0, %v19508_v59 }
 0x8c3   : > { %v14285_v51 = vpop.f32.mrb[229].mxu1  ;;  %v7722_v38 = vsel %vm2400_vm3, %v17977_v8, -inf  ;;  %14323 = vmatprep.subr.bf16.mxu0 %v19508_v59 }
 0x8c4   : > { %7723 = vmax.xlane.f32.xlu1 %v7722_v38  ;;  %v7374_v52 = vpop.f32.mrb[230].mxu1 }
 0x8c5   : > { %v14286_v29 = vpop.f32.mrb[231].mxu1 }
 0x8c9   : > { %14314 = vmatmul.mubr.msk.bf16.vlgmr.msra.gmra.mrb[240].mxu0 %vm1387_vm1, %v7578_v56 }
 0x8ca   : > { %14324 = vmatpush3.bf16.msra.mxu0 %v7947_v48  ;;  %v17986_v0 = vpop.f32.mrb[232].mxu1  ;;  %14325 = vmatprep.mubr.msk.bf16.mxu0 %vm15728_vm0, %v19508_v59 }
 0x8cb   : > { %v14297_v47 = vpop.f32.mrb[233].mxu1  ;;  %v7728_v16 = vsel %vm2400_vm3, %v17986_v0, -inf  ;;  %14335 = vmatprep.subr.bf16.mxu0 %v19508_v59 }
 0x8cc   : > { %7729 = vmax.xlane.f32.xlu1 %v7728_v16  ;;  %v7474_v57 = vpop.f32.mrb[234].mxu1 }
 0x8cd   : > { %v14298_v9 = vpop.f32.mrb[235].mxu1  ;;  %v18001_v57 = vpop.permute.xlu1 %8085 }
 0x8d2   : > { %v17993_v51 = vpop.f32.mrb[236].mxu1 }
 0x8d3   : > { %v14309_v38 = vpop.f32.mrb[237].mxu1  ;;  %v7734_v56 = vsel %vm2400_vm3, %v17993_v51, -inf }
 0x8d4   : > { %7735 = vmax.xlane.f32.xlu1 %v7734_v56  ;;  %v7574_v52 = vpop.f32.mrb[238].mxu1 }
 0x8d5   : > { %v14310_v29 = vpop.f32.mrb[239].mxu1 }
 0x8d6   : > { %v18009_v29 = vpop.permute.xlu1 %8181 }
 0x8da   : > { %v17997_v37 = vpop.f32.mrb[240].mxu1  ;;  %v18013_v21 = vpop.permute.xlu1 %8277 }
 0x8db   : > { %v14321_v48 = vpop.f32.mrb[241].mxu1  ;;  %v7740_v47 = vsel %vm2400_vm3, %v17997_v37, -inf }
 0x8dc   : > { %7741 = vmax.xlane.f32.xlu1 %v7740_v47  ;;  %v7674_v1 = vpop.f32.mrb[242].mxu1  ;;  %v18011_v48 = vpop.permute.xlu0 %8037 }
 0x8dd   : > { %v14322_v16 = vpop.f32.mrb[243].mxu1 }
 0x8de   : > { %v18017_v47 = vpop.permute.xlu1 %8373 }
 0x8e0   : > { %v18015_v1 = vpop.permute.xlu0 %8133 }
 0x8e4   : > { %v18019_v16 = vpop.permute.xlu0 %8229 }
 0x905   : > { %v6484_v9 = vpop.f32.mrb[192].mxu0 }
 0x906   : > { %v18004_v38 = vadd.f32 %v17890_v42, %v6484_v9  ;;  %v14169_v20 = vpop.f32.mrb[193].mxu0 }
 0x907   : > { %v6487_v63 = vpop.f32.mrb[194].mxu0 }
 0x908   : > { %19607 = vst [vmem:[#allocation95_spill] sm:$0xff] %v18004_v38  ;;  %v18007_v56 = vadd.f32 %v17895_v17, %v6487_v63  ;;  %v14170_v52 = vpop.f32.mrb[195].mxu0  ;;  %v18022_v38 = vpop.permute.xlu0 %8325 }
 0x909   : > { %19609 = vst [vmem:[#allocation96_spill] sm:$0xff] %v18022_v38 }
 0x90a   : > { %19608 = vst [vmem:[#allocation36_spill] sm:$0xff] %v18007_v56 }
 0x919   : > { %v7682_v42 = vpop.xlane.xlu1 %7681 }
 0x91a   : > { %v7744_v20 = vsub.f32 %v17908_v35, %v7682_v42 }
 0x91c   : > { %v7767_v9 = vmul.f32 1.442695, %v7744_v20 }
 0x91e   : > { %15160 = vpow2.f32 %v7767_v9 }
 0x921   : > { %v7688_v63 = vpop.xlane.xlu0 %7687 }
 0x922   : > { %v7746_v17 = vsub.f32 %v17917_v54, %v7688_v63 }
 0x924   : > { %v7771_v52 = vmul.f32 1.442695, %v7746_v17 }
 0x926   : > { %15162 = vpow2.f32 %v7771_v52 }
 0x928   : > { %v18025_v56 = vpop.eup %15160 }
 0x929   : > { %v7694_v39 = vpop.xlane.xlu1 %7693  ;;  %v7812_v11 = vsel %vm2400_vm3, %v18025_v56, 0.0 }
 0x92a   : > { %v7748_v19 = vsub.f32 %v17926_v40, %v7694_v39  ;;  %7813 = vadd.xlane.f32.xlu1 %v7812_v11 }
 0x92c   : > { %v7775_v26 = vmul.f32 1.442695, %v7748_v19 }
 0x92e   : > { %15164 = vpow2.f32 %v7775_v26 }
 0x930   : > { %v18030_v35 = vpop.eup %15162 }
 0x931   : > { %v7700_v42 = vpop.xlane.xlu1 %7699  ;;  %v7818_v20 = vsel %vm2400_vm3, %v18030_v35, 0.0 }
 0x932   : > { %v7750_v54 = vsub.f32 %v17935_v32, %v7700_v42  ;;  %7819 = vadd.xlane.f32.xlu1 %v7818_v20 }
 0x934   : > { %v7779_v9 = vmul.f32 1.442695, %v7750_v54 }
 0x936   : > { %15166 = vpow2.f32 %v7779_v9 }
 0x938   : > { %v18035_v63 = vpop.eup %15164 }
 0x939   : > { %v7706_v17 = vpop.xlane.xlu1 %7705  ;;  %v7824_v39 = vsel %vm2400_vm3, %v18035_v63, 0.0 }
 0x93a   : > { %v7752_v19 = vsub.f32 %v17944_v61, %v7706_v17  ;;  %7825 = vadd.xlane.f32.xlu1 %v7824_v39 }
 0x93c   : > { %v7783_v26 = vmul.f32 1.442695, %v7752_v19 }
 0x93e   : > { %15168 = vpow2.f32 %v7783_v26 }
 0x940   : > { %v18040_v11 = vpop.eup %15166 }
 0x941   : > { %v7712_v40 = vpop.xlane.xlu1 %7711  ;;  %v7830_v32 = vsel %vm2400_vm3, %v18040_v11, 0.0 }
 0x942   : > { %v7754_v52 = vsub.f32 %v17956_v31, %v7712_v40  ;;  %7831 = vadd.xlane.f32.xlu1 %v7830_v32 }
 0x944   : > { %v7787_v42 = vmul.f32 1.442695, %v7754_v52  ;;  %v6492_v20 = vpop.f32.mrb[196].mxu0 }
 0x945   : > { %v18046_v54 = vadd.f32 %v17899_v50, %v6492_v20  ;;  %v14173_v9 = vpop.f32.mrb[197].mxu0 }
 0x946   : > { %15170 = vpow2.f32 %v7787_v42  ;;  %v6495_v61 = vpop.f32.mrb[198].mxu0 }
 0x947   : > { %19610 = vst [vmem:[#allocation35_spill] sm:$0xff] %v18046_v54  ;;  %v18049_v17 = vadd.f32 %v17904_v36, %v6495_v61  ;;  %v14174_v39 = vpop.f32.mrb[199].mxu0 }
 0x948   : > { %v18051_v19 = vpop.eup %15168 }
 0x949   : > { %19611 = vst [vmem:[#allocation40_spill] sm:$0xff] %v18049_v17  ;;  %v7718_v26 = vpop.xlane.xlu1 %7717  ;;  %v7836_v53 = vsel %vm2400_vm3, %v18051_v19, 0.0 }
 0x94a   : > { %v7756_v31 = vsub.f32 %v17968_v23, %v7718_v26  ;;  %7837 = vadd.xlane.f32.xlu0 %v7836_v53  ;;  %v19612_v53 = vld [vmem:[#allocation87_spill] sm:$0xff] }
 0x94c   : > { %v7791_v40 = vmul.f32 1.442695, %v7756_v31  ;;  %v18056_v32 = vpop.f32.mrb[200].mxu0 }
 0x94d   : > { %v14195_v50 = vpop.f32.mrb[201].mxu0  ;;  %v7677_v52 = vsel %vm2400_vm3, %v18056_v32, -inf }
 0x94e   : > { %15172 = vpow2.f32 %v7791_v40  ;;  %v6624_v36 = vpop.f32.mrb[202].mxu0  ;;  %7678 = vmax.xlane.f32.xlu0 %v7677_v52 }
 0x94f   : > { %v14196_v42 = vpop.f32.mrb[203].mxu0  ;;  %v19613_v36 = vld [vmem:[#allocation88_spill] sm:$0xff] }
 0x950   : > { %v18060_v20 = vpop.eup %15170 }
 0x951   : > { %v7724_v9 = vpop.xlane.xlu1 %7723  ;;  %v7842_v61 = vsel %vm2400_vm3, %v18060_v20, 0.0 }
 0x952   : > { %v7758_v23 = vsub.f32 %v17977_v8, %v7724_v9  ;;  %7843 = vadd.xlane.f32.xlu0 %v7842_v61 }
 0x953   : > { %8469 = vrot.lane.b32.xlu1 %v19612_v53, %s15731_s24  ;;  %v19615_v53 = vld [vmem:[#allocation50_spill] sm:$0xff] }
 0x954   : > { %v7795_v39 = vmul.f32 1.442695, %v7758_v23  ;;  %v18067_v26 = vpop.f32.mrb[204].mxu0  ;;  %v19614_v23 = vld [vmem:[#allocation90_spill] sm:$0xff] }
 0x955   : > { %v14207_v31 = vpop.f32.mrb[205].mxu0  ;;  %v7683_v40 = vsel %vm2400_vm3, %v18067_v26, -inf }
 0x956   : > { %15174 = vpow2.f32 %v7795_v39  ;;  %v6724_v50 = vpop.f32.mrb[206].mxu0  ;;  %7684 = vmax.xlane.f32.xlu0 %v7683_v40 }
 0x957   : > { %v14208_v52 = vpop.f32.mrb[207].mxu0  ;;  %8565 = vrot.lane.b32.xlu1 %v19613_v36, %s15731_s24 }
 0x958   : > { %v18073_v42 = vpop.eup %15172 }
 0x959   : > { %v7730_v8 = vpop.xlane.xlu1 %7729  ;;  %v7848_v9 = vsel %vm2400_vm3, %v18073_v42, 0.0 }
 0x95a   : > { %v7760_v61 = vsub.f32 %v17986_v0, %v7730_v8  ;;  %7849 = vadd.xlane.f32.xlu0 %v7848_v9  ;;  %v19616_v8 = vld [vmem:[#allocation91_spill] sm:$0xff] }
 0x95b   : > { %8661 = vrot.lane.b32.xlu1 %v19614_v23, %s15731_s24 }
 0x95c   : > { %v7799_v31 = vmul.f32 1.442695, %v7760_v61  ;;  %v18080_v39 = vpop.f32.mrb[208].mxu0 }
 0x95d   : > { %v14219_v40 = vpop.f32.mrb[209].mxu0  ;;  %v7689_v50 = vsel %vm2400_vm3, %v18080_v39, -inf }
 0x95e   : > { %15176 = vpow2.f32 %v7799_v31  ;;  %v6824_v52 = vpop.f32.mrb[210].mxu0  ;;  %7690 = vmax.xlane.f32.xlu0 %v7689_v50 }
 0x95f   : > { %v14220_v36 = vpop.f32.mrb[211].mxu0  ;;  %8709 = vrot.lane.b32.xlu1 %v19615_v53, %s15731_s24 }
 0x960   : > { %v18086_v17 = vpop.eup %15174 }
 0x961   : > { %v7854_v0 = vsel %vm2400_vm3, %v18086_v17, 0.0  ;;  %v7736_v38 = vpop.xlane.xlu1 %7735 }
 0x962   : > { %7855 = vadd.xlane.f32.xlu0 %v7854_v0 }
 0x963   : > { %8757 = vrot.lane.b32.xlu1 %v19616_v8, %s15731_s24 }
 0x964   : > { %v18092_v9 = vpop.f32.mrb[212].mxu0 }
 0x965   : > { %v14231_v61 = vpop.f32.mrb[213].mxu0  ;;  %v7695_v31 = vsel %vm2400_vm3, %v18092_v9, -inf }
 0x966   : > { %v6924_v40 = vpop.f32.mrb[214].mxu0  ;;  %7696 = vmax.xlane.f32.xlu0 %v7695_v31 }
 0x967   : > { %v14232_v36 = vpop.f32.mrb[215].mxu0 }
 0x968   : > { %v18096_v50 = vpop.eup %15176 }
 0x969   : > { %v7860_v52 = vsel %vm2400_vm3, %v18096_v50, 0.0 }
 0x96a   : > { %7861 = vadd.xlane.f32.xlu0 %v7860_v52 }
 0x96c   : > { %v18100_v53 = vpop.f32.mrb[216].mxu0 }
 0x96d   : > { %v14243_v0 = vpop.f32.mrb[217].mxu0  ;;  %v7701_v8 = vsel %vm2400_vm3, %v18100_v53, -inf }
 0x96e   : > { %v7024_v23 = vpop.f32.mrb[218].mxu0  ;;  %7702 = vmax.xlane.f32.xlu0 %v7701_v8 }
 0x96f   : > { %v14244_v61 = vpop.f32.mrb[219].mxu0 }
 0x974   : > { %v18104_v54 = vpop.f32.mrb[220].mxu0 }
 0x975   : > { %v14255_v40 = vpop.f32.mrb[221].mxu0  ;;  %v7707_v31 = vsel %vm2400_vm3, %v18104_v54, -inf }
 0x976   : > { %v7124_v36 = vpop.f32.mrb[222].mxu0  ;;  %7708 = vmax.xlane.f32.xlu0 %v7707_v31 }
 0x977   : > { %v14256_v14 = vpop.f32.mrb[223].mxu0 }
 0x97c   : > { %v18108_v55 = vpop.f32.mrb[224].mxu0 }
 0x97d   : > { %v14267_v52 = vpop.f32.mrb[225].mxu0  ;;  %v7713_v0 = vsel %vm2400_vm3, %v18108_v55, -inf }
 0x97e   : > { %v7224_v34 = vpop.f32.mrb[226].mxu0  ;;  %7714 = vmax.xlane.f32.xlu0 %v7713_v0  ;;  %v19617_v52 = vld [vmem:[#allocation86_spill] sm:$0xff] }
 0x97f   : > { %v14268_v23 = vpop.f32.mrb[227].mxu0 }
 0x984   : > { %v18112_v8 = vpop.f32.mrb[228].mxu0 }
 0x985   : > { %v14279_v61 = vpop.f32.mrb[229].mxu0 }
 0x986   : > { %v7324_v25 = vpop.f32.mrb[230].mxu0 }
 0x987   : > { %v14280_v40 = vpop.f32.mrb[231].mxu0 }
 0x988   : > { %v7762_v40 = vsub.f32 %v17993_v51, %v7736_v38 }
 0x98a   : > { %v7803_v10 = vmul.f32 1.442695, %v7762_v40  ;;  %v8091_v40 = vsel %vm2669_vm2, %v18001_v57, 0 }
 0x98c   : > { %v18114_v22 = vpop.f32.mrb[232].mxu0  ;;  %15178 = vpow2.f32 %v7803_v10 }
 0x98d   : > { %v14291_v30 = vpop.f32.mrb[233].mxu0 }
 0x98e   : > { %v7424_v36 = vpop.f32.mrb[234].mxu0  ;;  %v7719_v30 = vsel %vm2400_vm3, %v18112_v8, -inf }
 0x98f   : > { %v14292_v31 = vpop.f32.mrb[235].mxu0 }
 0x990   : > { %v18127_v31 = vpop.xlane.xlu1 %7741 }
 0x994   : > { %v18116_v14 = vpop.f32.mrb[236].mxu0  ;;  %8421 = vrot.lane.b32.xlu0 %v19617_v52, %s15731_s24 }
 0x995   : > { %v14303_v12 = vpop.f32.mrb[237].mxu0  ;;  %v7731_v10 = vsel %vm2400_vm3, %v18116_v14, -inf }
 0x996   : > { %v7524_v24 = vpop.f32.mrb[238].mxu0  ;;  %v18125_v36 = vpop.eup %15178 }
 0x997   : > { %v14304_v34 = vpop.f32.mrb[239].mxu0  ;;  %v7866_v24 = vsel %vm2400_vm3, %v18125_v36, 0.0 }
 0x998   : > { %v7725_v34 = vsel %vm2400_vm3, %v18114_v22, -inf }
 0x99c   : > { %v18120_v0 = vpop.f32.mrb[240].mxu0 }
 0x99d   : > { %v14315_v23 = vpop.f32.mrb[241].mxu0 }
 0x99e   : > { %v7624_v61 = vpop.f32.mrb[242].mxu0  ;;  %v7737_v23 = vsel %vm2400_vm3, %v18120_v0, -inf }
 0x99f   : > { %v14316_v25 = vpop.f32.mrb[243].mxu0 }
 0x9b3   : > { %7720 = vmax.xlane.f32.xlu0 %v7719_v30 }
 0x9b7   : > { %7867 = vadd.xlane.f32.xlu0 %v7866_v24  ;;  %v7814_v12 = vpop.xlane.xlu1 %7813 }
 0x9b8   : > { %15180 = vrcp.f32 %v7814_v12 }
 0x9bb   : > { %7726 = vmax.xlane.f32.xlu0 %v7725_v34 }
 0x9bf   : > { %7732 = vmax.xlane.f32.xlu0 %v7731_v10  ;;  %v7820_v51 = vpop.xlane.xlu1 %7819 }
 0x9c0   : > { %15182 = vrcp.f32 %v7820_v51 }
 0x9c2   : > { %v15181_v38 = vpop.eup %15180 }
 0x9c3   : > { %7738 = vmax.xlane.f32.xlu0 %v7737_v23  ;;  %v7898_v61 = vmul.f32 %v15181_v38, %v18025_v56  ;;  %v8187_v56 = vsel %vm2669_vm2, %v18009_v29, 0 }
 0x9c5   : > { %v7920_v25 = vpack.c.bf16 %v7898_v61, %v7898_v61 }
 0x9c7   : > { %14332 = vmatmul.mubr.msk.bf16.vlgmr.msra.gmra.mrb[244].mxu1 %vm2665_vm4, %v7920_v25  ;;  %v7826_v30 = vpop.xlane.xlu1 %7825 }
 0x9c8   : > { %14342 = vmatpush3.bf16.msra.mxu1 %v8091_v40  ;;  %15184 = vrcp.f32 %v7826_v30  ;;  %14343 = vmatprep.mubr.msk.bf16.mxu1 %vm15728_vm0, %v19508_v59 }
 0x9c9   : > { %14353 = vmatprep.subr.bf16.mxu1 %v19508_v59 }
 0x9ca   : > { %v15183_v24 = vpop.eup %15182 }
 0x9cb   : > { %v7900_v12 = vmul.f32 %v15183_v24, %v18030_v35  ;;  %v8283_v35 = vsel %vm2669_vm2, %v18013_v21, 0  ;;  %v8379_v21 = vsel %vm2669_vm2, %v18017_v47, 0 }
 0x9cd   : > { %v7922_v34 = vpack.c.bf16 %v7900_v12, %v7900_v12 }
 0x9cf   : > { %14344 = vmatmul.mubr.msk.bf16.vlgmr.msra.gmra.mrb[248].mxu1 %vm2665_vm4, %v7922_v34  ;;  %v7832_v57 = vpop.xlane.xlu1 %7831 }
 0x9d0   : > { %14354 = vmatpush3.bf16.msra.mxu1 %v8187_v56  ;;  %15186 = vrcp.f32 %v7832_v57  ;;  %14355 = vmatprep.mubr.msk.bf16.mxu1 %vm15728_vm0, %v19508_v59 }
 0x9d1   : > { %14365 = vmatprep.subr.bf16.mxu1 %v19508_v59 }
 0x9d2   : > { %v15185_v10 = vpop.eup %15184 }
 0x9d3   : > { %v7902_v51 = vmul.f32 %v15185_v10, %v18035_v63  ;;  %v8470_v34 = vpop.permute.xlu1 %8469 }
 0x9d4   : > { %v8475_v10 = vsel %vm2669_vm2, %v8470_v34, 0 }
 0x9d5   : > { %v7924_v38 = vpack.c.bf16 %v7902_v51, %v7902_v51 }
 0x9d7   : > { %v7838_v23 = vpop.xlane.xlu0 %7837  ;;  %14356 = vmatmul.mubr.msk.bf16.vlgmr.msra.gmra.mrb[252].mxu1 %vm2665_vm4, %v7924_v38 }
 0x9d8   : > { %15188 = vrcp.f32 %v7838_v23  ;;  %14366 = vmatpush3.bf16.msra.mxu1 %v8283_v35  ;;  %14367 = vmatprep.mubr.msk.bf16.mxu1 %vm15728_vm0, %v19508_v59  ;;  %v8566_v35 = vpop.permute.xlu1 %8565 }
 0x9d9   : > { %14377 = vmatprep.subr.bf16.mxu1 %v19508_v59 }
 0x9da   : > { %v15187_v29 = vpop.eup %15186 }
 0x9db   : > { %v7904_v61 = vmul.f32 %v15187_v29, %v18040_v11  ;;  %v7679_v25 = vpop.xlane.xlu0 %7678 }
 0x9dc   : > { %v7743_v63 = vsub.f32 %v18056_v32, %v7679_v25 }
 0x9dd   : > { %v7926_v40 = vpack.c.bf16 %v7904_v61, %v7904_v61 }
 0x9de   : > { %v7765_v30 = vmul.f32 1.442695, %v7743_v63 }
 0x9df   : > { %v7844_v24 = vpop.xlane.xlu0 %7843  ;;  %14368 = vmatmul.mubr.msk.bf16.vlgmr.msra.gmra.mrb[0].mxu1 %vm2665_vm4, %v7926_v40 }
 0x9e0   : > { %15190 = vpow2.f32 %v7765_v30  ;;  %14378 = vmatpush3.bf16.msra.mxu1 %v8379_v21  ;;  %14379 = vmatprep.mubr.msk.bf16.mxu1 %vm15728_vm0, %v19508_v59  ;;  %v8571_v30 = vsel %vm2669_vm2, %v8566_v35, 0  ;;  %v8662_v21 = vpop.permute.xlu1 %8661 }
 0x9e1   : > { %15192 = vrcp.f32 %v7844_v24  ;;  %14389 = vmatprep.subr.bf16.mxu1 %v19508_v59 }
 0x9e2   : > { %v15189_v11 = vpop.eup %15188 }
 0x9e3   : > { %v7906_v12 = vmul.f32 %v15189_v11, %v18051_v19  ;;  %v7685_v32 = vpop.xlane.xlu0 %7684 }
 0x9e4   : > { %v7745_v56 = vsub.f32 %v18067_v26, %v7685_v32 }
 0x9e5   : > { %v7928_v57 = vpack.c.bf16 %v7906_v12, %v7906_v12 }
 0x9e6   : > { %v7769_v47 = vmul.f32 1.442695, %v7745_v56 }
 0x9e7   : > { %v7850_v51 = vpop.xlane.xlu0 %7849  ;;  %14380 = vmatmul.mubr.msk.bf16.vlgmr.msra.gmra.mrb[4].mxu1 %vm2665_vm4, %v7928_v57  ;;  %v18190_v57 = vpop.permute.xlu1 %8709 }
 0x9e8   : > { %15194 = vpow2.f32 %v7769_v47  ;;  %14390 = vmatpush3.bf16.msra.mxu1 %v8475_v10  ;;  %14391 = vmatprep.mubr.msk.bf16.mxu1 %vm15728_vm0, %v19508_v59  ;;  %v8667_v10 = vsel %vm2669_vm2, %v8662_v21, 0 }
 0x9e9   : > { %15196 = vrcp.f32 %v7850_v51  ;;  %14401 = vmatprep.subr.bf16.mxu1 %v19508_v59 }
 0x9ea   : > { %v18173_v19 = vpop.eup %15190 }
 0x9eb   : > { %v15193_v38 = vpop.eup %15192  ;;  %v7691_v26 = vpop.xlane.xlu0 %7690  ;;  %v7809_v23 = vsel %vm2400_vm3, %v18173_v19, 0.0 }
 0x9ec   : > { %v7908_v29 = vmul.f32 %v15193_v38, %v18060_v20  ;;  %v7747_v61 = vsub.f32 %v18080_v39, %v7691_v26  ;;  %7810 = vadd.xlane.f32.xlu0 %v7809_v23  ;;  %v8758_v23 = vpop.permute.xlu1 %8757 }
 0x9ee   : > { %v7930_v25 = vpack.c.bf16 %v7908_v29, %v7908_v29  ;;  %v7773_v63 = vmul.f32 1.442695, %v7747_v61 }
 0x9ef   : > { %v7856_v40 = vpop.xlane.xlu0 %7855 }
 0x9f0   : > { %15198 = vpow2.f32 %v7773_v63  ;;  %14392 = vmatmul.mubr.msk.bf16.vlgmr.msra.gmra.mrb[8].mxu1 %vm2665_vm4, %v7930_v25  ;;  %v8763_v25 = vsel %vm2669_vm2, %v8758_v23, 0 }
 0x9f1   : > { %15200 = vrcp.f32 %v7856_v40  ;;  %14402 = vmatpush3.bf16.msra.mxu1 %v8571_v30  ;;  %14403 = vmatprep.mubr.msk.bf16.mxu1 %vm15728_vm0, %v19508_v59 }
 0x9f2   : > { %v18183_v24 = vpop.eup %15194  ;;  %14413 = vmatprep.subr.bf16.mxu1 %v19508_v59 }
 0x9f3   : > { %v15197_v20 = vpop.eup %15196  ;;  %v7697_v39 = vpop.xlane.xlu0 %7696  ;;  %v7815_v11 = vsel %vm2400_vm3, %v18183_v24, 0.0 }
 0x9f4   : > { %v7910_v12 = vmul.f32 %v15197_v20, %v18073_v42  ;;  %v7749_v32 = vsub.f32 %v18092_v9, %v7697_v39  ;;  %7816 = vadd.xlane.f32.xlu0 %v7815_v11 }
 0x9f6   : > { %v7932_v34 = vpack.c.bf16 %v7910_v12, %v7910_v12  ;;  %v7777_v56 = vmul.f32 1.442695, %v7749_v32 }
 0x9f7   : > { %v7862_v47 = vpop.xlane.xlu0 %7861 }
 0x9f8   : > { %15202 = vpow2.f32 %v7777_v56  ;;  %14404 = vmatmul.mubr.msk.bf16.vlgmr.msra.gmra.mrb[12].mxu1 %vm2665_vm4, %v7932_v34 }
 0x9f9   : > { %15204 = vrcp.f32 %v7862_v47  ;;  %14414 = vmatpush3.bf16.msra.mxu1 %v8667_v10  ;;  %14415 = vmatprep.mubr.msk.bf16.mxu1 %vm15728_vm0, %v19508_v59  ;;  %v19618_v10 = vld [vmem:[#allocation46_spill] sm:$0xff] }
 0x9fa   : > { %v18196_v51 = vpop.eup %15198  ;;  %14425 = vmatprep.subr.bf16.mxu1 %v19508_v59 }
 0x9fb   : > { %v15201_v42 = vpop.eup %15200  ;;  %v7703_v9 = vpop.xlane.xlu0 %7702  ;;  %v7821_v38 = vsel %vm2400_vm3, %v18196_v51, 0.0 }
 0x9fc   : > { %v7912_v35 = vmul.f32 %v15201_v42, %v18086_v17  ;;  %v7751_v26 = vsub.f32 %v18100_v53, %v7703_v9  ;;  %7822 = vadd.xlane.f32.xlu0 %v7821_v38 }
 0x9fe   : > { %v7934_v29 = vpack.c.bf16 %v7912_v35, %v7912_v35  ;;  %v7781_v61 = vmul.f32 1.442695, %v7751_v26 }
 0xa00   : > { %15206 = vpow2.f32 %v7781_v61  ;;  %14416 = vmatmul.mubr.msk.bf16.vlgmr.msra.gmra.mrb[16].mxu1 %vm2665_vm4, %v7934_v29 }
 0xa01   : > { %14426 = vmatpush3.bf16.msra.mxu1 %v8763_v25  ;;  %14427 = vmatprep.mubr.msk.bf16.mxu1 %vm15728_vm0, %v19508_v59 }
 0xa02   : > { %v18207_v63 = vpop.eup %15202  ;;  %14437 = vmatprep.subr.bf16.mxu1 %v19508_v59 }
 0xa03   : > { %v15205_v17 = vpop.eup %15204  ;;  %v7709_v40 = vpop.xlane.xlu0 %7708  ;;  %v7827_v53 = vsel %vm2400_vm3, %v18207_v63, 0.0 }
 0xa04   : > { %v7914_v30 = vmul.f32 %v15205_v17, %v18096_v50  ;;  %v7753_v21 = vsub.f32 %v18104_v54, %v7709_v40  ;;  %7828 = vadd.xlane.f32.xlu0 %v7827_v53  ;;  %v19619_v17 = vld [vmem:[#allocation89_spill] sm:$0xff] }
 0xa06   : > { %v7936_v20 = vpack.c.bf16 %v7914_v30, %v7914_v30  ;;  %v7785_v39 = vmul.f32 1.442695, %v7753_v21  ;;  %v8043_v21 = vsel %vm2669_vm2, %v18011_v48, 0 }
 0xa08   : > { %15208 = vpow2.f32 %v7785_v39  ;;  %14428 = vmatmul.mubr.msk.bf16.vlgmr.msra.gmra.mrb[20].mxu1 %vm2665_vm4, %v7936_v20 }
 0xa09   : > { %14439 = vmatprep.mubr.msk.bf16.mxu1 %vm15728_vm0, %v19508_v59 }
 0xa0a   : > { %v18217_v11 = vpop.eup %15206 }
 0xa0b   : > { %v7715_v12 = vpop.xlane.xlu0 %7714  ;;  %v7833_v32 = vsel %vm2400_vm3, %v18217_v11, 0.0 }
 0xa0c   : > { %v7755_v34 = vsub.f32 %v18108_v55, %v7715_v12  ;;  %7834 = vadd.xlane.f32.xlu1 %v7833_v32  ;;  %v7764_v55 = vsub.f32 %v17997_v37, %v18127_v31  ;;  %v8139_v32 = vsel %vm2669_vm2, %v18015_v1, 0 }
 0xa0e   : > { %v7789_v50 = vmul.f32 1.442695, %v7755_v34  ;;  %v7807_v9 = vmul.f32 1.442695, %v7764_v55  ;;  %v8235_v34 = vsel %vm2669_vm2, %v18019_v16, 0 }
 0xa0f   : > { %v18238_v26 = vpop.permute.xlu0 %8421 }
 0xa10   : > { %15210 = vpow2.f32 %v7789_v50 }
 0xa11   : > { %15212 = vpow2.f32 %v7807_v9  ;;  %v19620_v9 = vld [vmem:[#allocation68_spill] sm:$0xff] }
 0xa12   : > { %v18222_v54 = vpop.eup %15208 }
 0xa13   : > { %v7839_v56 = vsel %vm2400_vm3, %v18222_v54, 0.0 }
 0xa14   : > { %7840 = vadd.xlane.f32.xlu1 %v7839_v56 }
 0xa1a   : > { %v18226_v47 = vpop.eup %15210  ;;  %8517 = vrot.lane.b32.xlu0 %v19618_v10, %s15731_s24 }
 0xa1b   : > { %v7845_v42 = vsel %vm2400_vm3, %v18226_v47, 0.0  ;;  %v18234_v38 = vpop.eup %15212 }
 0xa1c   : > { %7846 = vadd.xlane.f32.xlu1 %v7845_v42  ;;  %v7872_v35 = vsel %vm2400_vm3, %v18234_v38, 0.0 }
 0xa39   : > { %7873 = vadd.xlane.f32.xlu0 %v7872_v35  ;;  %v19621_v35 = vld [vmem:[#allocation96_spill] sm:$0xff] }
 0xa40   : > { %v7721_v23 = vpop.xlane.xlu0 %7720 }
 0xa41   : > { %v7757_v29 = vsub.f32 %v18112_v8, %v7721_v23  ;;  %v8331_v23 = vsel %vm2669_vm2, %v19621_v35, 0 }
 0xa43   : > { %v7793_v61 = vmul.f32 1.442695, %v7757_v29 }
 0xa44   : > { %v18257_v8 = vpop.xlane.xlu0 %7867 }
 0xa45   : > { %15214 = vpow2.f32 %v7793_v61  ;;  %v19623_v61 = vld [vmem:[#allocation67_spill] sm:$0xff] }
 0xa48   : > { %v7727_v31 = vpop.xlane.xlu0 %7726 }
 0xa4c   : > { %v7733_v40 = vpop.xlane.xlu0 %7732 }
 0xa4d   : > { %v7761_v53 = vsub.f32 %v18116_v14, %v7733_v40 }
 0xa4f   : > { %v18241_v25 = vpop.eup %15214  ;;  %8613 = vrot.lane.b32.xlu0 %v19619_v17, %s15731_s24 }
 0xa50   : > { %v7851_v37 = vsel %vm2400_vm3, %v18241_v25, 0.0 }
 0xa51   : > { %7852 = vadd.xlane.f32.xlu1 %v7851_v37 }
 0xa53   : > { %8805 = vrot.lane.b32.xlu0 %v17078_v33, %s15731_s24 }
 0xa57   : > { %8901 = vrot.lane.b32.xlu0 %v17102_v6, %s15731_s24 }
 0xa5b   : > { %9211 = vrot.lane.b32.xlu0 %v16274_v62, %s15732_s26  ;;  %v7759_v62 = vsub.f32 %v18114_v22, %v7727_v31 }
 0xa5f   : > { %9261 = vrot.lane.b32.xlu0 %v16279_v2, %s15732_s26  ;;  %v7797_v2 = vmul.f32 1.442695, %v7759_v62 }
 0xa61   : > { %15216 = vpow2.f32 %v7797_v2 }
 0xa62   : > { %8853 = vrot.lane.b32.xlu1 %v17090_v4, %s15731_s24 }
 0xa63   : > { %9311 = vrot.lane.b32.xlu0 %v19556_v18, %s15732_s26  ;;  %v7739_v18 = vpop.xlane.xlu0 %7738 }
 0xa67   : > { %9309 = vrot.lane.b32.xlu0 %v19560_v7, %s15732_s26  ;;  %v7801_v7 = vmul.f32 1.442695, %v7761_v53 }
 0xa6b   : > { %9411 = vrot.lane.b32.xlu0 %v19563_v46, %s15732_s26  ;;  %v7763_v46 = vsub.f32 %v18120_v0, %v7739_v18  ;;  %v18278_v22 = vpop.eup %15216  ;;  %v19624_v18 = vld [vmem:[#allocation34_spill] sm:$0xff] }
 0xa6c   : > { %v7857_v14 = vsel %vm2400_vm3, %v18278_v22, 0.0 }
 0xa6f   : > { %9409 = vrot.lane.b32.xlu0 %v19565_v3, %s15732_s26  ;;  %v7805_v3 = vmul.f32 1.442695, %v7763_v46  ;;  %v8427_v46 = vsel %vm2669_vm2, %v18238_v26, 0 }
 0xa73   : > { %9511 = vrot.lane.b32.xlu0 %v19567_v15, %s15732_s26 }
 0xa77   : > { %9509 = vrot.lane.b32.xlu0 %v19569_v41, %s15732_s26 }
 0xa79   : > { %v7811_v30 = vpop.xlane.xlu0 %7810 }
 0xa7a   : > { %15218 = vrcp.f32 %v7811_v30 }
 0xa7b   : > { %9611 = vrot.lane.b32.xlu0 %v19571_v27, %s15732_s26  ;;  %15220 = vpow2.f32 %v7801_v7  ;;  %v19625_v7 = vld [vmem:[#allocation72_spill] sm:$0xff] }
 0xa7c   : > { %15222 = vpow2.f32 %v7805_v3 }
 0xa7f   : > { %9609 = vrot.lane.b32.xlu0 %v19573_v44, %s15732_s26 }
 0xa81   : > { %v7817_v15 = vpop.xlane.xlu0 %7816 }
 0xa82   : > { %15224 = vrcp.f32 %v7817_v15  ;;  %v19627_v15 = vld [vmem:[#allocation71_spill] sm:$0xff] }
 0xa83   : > { %9711 = vrot.lane.b32.xlu0 %v19575_v49, %s15732_s26 }
 0xa84   : > { %v15219_v41 = vpop.eup %15218 }
 0xa85   : > { %v7897_v0 = vmul.f32 %v15219_v41, %v18173_v19  ;;  %v18285_v27 = vpop.eup %15220 }
 0xa86   : > { %7858 = vadd.xlane.f32.xlu1 %v7857_v14  ;;  %v7863_v49 = vsel %vm2400_vm3, %v18285_v27, 0.0  ;;  %v18294_v39 = vpop.eup %15222 }
 0xa87   : > { %9709 = vrot.lane.b32.xlu0 %v19577_v28, %s15732_s26  ;;  %v7919_v44 = vpack.c.bf16 %v7897_v0, %v7897_v0  ;;  %v7869_v48 = vsel %vm2400_vm3, %v18294_v39, 0.0 }
 0xa89   : > { %14326 = vmatmul.mubr.msk.bf16.vlgmr.msra.gmra.mrb[244].mxu0 %vm2665_vm4, %v7919_v44  ;;  %v7823_v20 = vpop.xlane.xlu0 %7822 }
 0xa8a   : > { %14336 = vmatpush3.bf16.msra.mxu0 %v8043_v21  ;;  %15226 = vrcp.f32 %v7823_v20  ;;  %7864 = vadd.xlane.f32.xlu1 %v7863_v49  ;;  %v19628_v49 = vld [vmem:[#allocation38_spill] sm:$0xff] }
 0xa8b   : > { %9811 = vrot.lane.b32.xlu0 %v19579_v58, %s15732_s26  ;;  %14337 = vmatprep.mubr.msk.bf16.mxu0 %vm15728_vm0, %v19508_v59 }
 0xa8c   : > { %v15225_v28 = vpop.eup %15224  ;;  %14347 = vmatprep.subr.bf16.mxu0 %v19508_v59 }
 0xa8d   : > { %v7899_v19 = vmul.f32 %v15225_v28, %v18183_v24  ;;  %v19629_v28 = vld [vmem:[#allocation77_spill] sm:$0xff] }
 0xa8e   : > { %7870 = vadd.xlane.f32.xlu1 %v7869_v48 }
 0xa8f   : > { %9809 = vrot.lane.b32.xlu0 %v19581_v43, %s15732_s26  ;;  %v7921_v12 = vpack.c.bf16 %v7899_v19, %v7899_v19 }
 0xa91   : > { %14338 = vmatmul.mubr.msk.bf16.vlgmr.msra.gmra.mrb[248].mxu0 %vm2665_vm4, %v7921_v12  ;;  %v7829_v58 = vpop.xlane.xlu0 %7828 }
 0xa92   : > { %14348 = vmatpush3.bf16.msra.mxu0 %v8139_v32  ;;  %15228 = vrcp.f32 %v7829_v58  ;;  %14349 = vmatprep.mubr.msk.bf16.mxu0 %vm15728_vm0, %v19508_v59 }
 0xa93   : > { %9911 = vrot.lane.b32.xlu0 %v19583_v60, %s15732_s26  ;;  %14359 = vmatprep.subr.bf16.mxu0 %v19508_v59 }
 0xa94   : > { %v15227_v24 = vpop.eup %15226 }
 0xa95   : > { %v7901_v43 = vmul.f32 %v15227_v24, %v18196_v51  ;;  %v8518_v21 = vpop.permute.xlu0 %8517 }
 0xa96   : > { %v8523_v48 = vsel %vm2669_vm2, %v8518_v21, 0 }
 0xa97   : > { %9909 = vrot.lane.b32.xlu0 %v19585_v5, %s15732_s26  ;;  %v7923_v1 = vpack.c.bf16 %v7901_v43, %v7901_v43 }
 0xa99   : > { %14350 = vmatmul.mubr.msk.bf16.vlgmr.msra.gmra.mrb[252].mxu0 %vm2665_vm4, %v7923_v1  ;;  %v7835_v50 = vpop.xlane.xlu1 %7834 }
 0xa9a   : > { %14360 = vmatpush3.bf16.msra.mxu0 %v8235_v34  ;;  %15230 = vrcp.f32 %v7835_v50  ;;  %v18320_v56 = vpop.f32.mrb[244].mxu1  ;;  %14361 = vmatprep.mubr.msk.bf16.mxu0 %vm15728_vm0, %v19508_v59  ;;  %v19631_v34 = vld [vmem:[#allocation42_spill] sm:$0xff] }
 0xa9b   : > { %10011 = vrot.lane.b32.xlu0 %v19587_v45, %s15732_s26  ;;  %v14333_v60 = vpop.f32.mrb[245].mxu1  ;;  %14371 = vmatprep.subr.bf16.mxu0 %v19508_v59 }
 0xa9c   : > { %v15229_v5 = vpop.eup %15228  ;;  %v8034_v51 = vpop.f32.mrb[246].mxu1  ;;  %v19632_v60 = vld [vmem:[#allocation41_spill] sm:$0xff] }
 0xa9d   : > { %v7903_v16 = vmul.f32 %v15229_v5, %v18207_v63  ;;  %v14334_v42 = vpop.f32.mrb[247].mxu1  ;;  %v19622_v63 = vld [vmem:[#allocation32_spill] sm:$0xff] }
 0xa9f   : > { %v7925_v55 = vpack.c.bf16 %v7903_v16, %v7903_v16  ;;  %8949 = vrot.lane.b32.xlu1 %v17114_v13, %s15731_s24  ;;  %10009 = vrot.lane.b32.xlu0 %v19620_v9, %s15732_s26 }
 0xaa1   : > { %14362 = vmatmul.mubr.msk.bf16.vlgmr.msra.gmra.mrb[0].mxu0 %vm2665_vm4, %v7925_v55  ;;  %v7841_v45 = vpop.xlane.xlu1 %7840  ;;  %v19634_v55 = vld [vmem:[#allocation44_spill] sm:$0xff] }
 0xaa2   : > { %14372 = vmatpush3.bf16.msra.mxu0 %v8331_v23  ;;  %15232 = vrcp.f32 %v7841_v45  ;;  %v18335_v29 = vpop.f32.mrb[248].mxu1  ;;  %14373 = vmatprep.mubr.msk.bf16.mxu0 %vm15728_vm0, %v19508_v59 }
 0xaa3   : > { %9209 = vrot.lane.b32.xlu1 %v19622_v63, %s15732_s26  ;;  %10111 = vrot.lane.b32.xlu0 %v19623_v61, %s15732_s26  ;;  %v14345_v37 = vpop.f32.mrb[249].mxu1  ;;  %v19635_v63 = vld [vmem:[#allocation54_spill] sm:$0xff] }
 0xaa4   : > { %v15231_v31 = vpop.eup %15230  ;;  %v8130_v40 = vpop.f32.mrb[250].mxu1  ;;  %14383 = vmatprep.subr.bf16.mxu0 %v19508_v59 }
 0xaa5   : > { %v7905_v62 = vmul.f32 %v15231_v31, %v18217_v11  ;;  %v14346_v2 = vpop.f32.mrb[251].mxu1  ;;  %v19626_v11 = vld [vmem:[#allocation33_spill] sm:$0xff] }
 0xaa6   : > { %v19636_v40 = vld [vmem:[#allocation53_spill] sm:$0xff] }
 0xaa7   : > { %v7927_v53 = vpack.c.bf16 %v7905_v62, %v7905_v62  ;;  %9259 = vrot.lane.b32.xlu1 %v19624_v18, %s15732_s26  ;;  %10109 = vrot.lane.b32.xlu0 %v19625_v7, %s15732_s26  ;;  %v19637_v18 = vld [vmem:[#allocation58_spill] sm:$0xff] }
 0xaa9   : > { %14374 = vmatmul.mubr.msk.bf16.vlgmr.msra.gmra.mrb[4].mxu0 %vm2665_vm4, %v7927_v53  ;;  %v7847_v30 = vpop.xlane.xlu1 %7846 }
 0xaaa   : > { %14384 = vmatpush3.bf16.msra.mxu0 %v8427_v46  ;;  %15234 = vrcp.f32 %v7847_v30  ;;  %v18352_v3 = vpop.f32.mrb[252].mxu1  ;;  %14385 = vmatprep.mubr.msk.bf16.mxu0 %vm15728_vm0, %v19508_v59  ;;  %v19638_v46 = vld [vmem:[#allocation57_spill] sm:$0xff] }
 0xaab   : > { %9361 = vrot.lane.b32.xlu1 %v19626_v11, %s15732_s26  ;;  %10211 = vrot.lane.b32.xlu0 %v19627_v15, %s15732_s26  ;;  %v14357_v41 = vpop.f32.mrb[253].mxu1  ;;  %15236 = vrcp.f32 %v18257_v8 }
 0xaac   : > { %v15233_v14 = vpop.eup %15232  ;;  %v8226_v0 = vpop.f32.mrb[254].mxu1  ;;  %14395 = vmatprep.subr.bf16.mxu0 %v19508_v59  ;;  %v19639_v41 = vld [vmem:[#allocation62_spill] sm:$0xff] }
 0xaad   : > { %v7907_v26 = vmul.f32 %v15233_v14, %v18222_v54  ;;  %v14358_v44 = vpop.f32.mrb[255].mxu1  ;;  %v19630_v54 = vld [vmem:[#allocation37_spill] sm:$0xff] }
 0xaae   : > { %v19640_v0 = vld [vmem:[#allocation61_spill] sm:$0xff] }
 0xaaf   : > { %v7929_v20 = vpack.c.bf16 %v7907_v26, %v7907_v26  ;;  %9359 = vrot.lane.b32.xlu1 %v19628_v49, %s15732_s26  ;;  %10209 = vrot.lane.b32.xlu0 %v19629_v28, %s15732_s26  ;;  %v19641_v28 = vld [vmem:[#allocation66_spill] sm:$0xff] }
 0xab1   : > { %14386 = vmatmul.mubr.msk.bf16.vlgmr.msra.gmra.mrb[8].mxu0 %vm2665_vm4, %v7929_v20 }
 0xab2   : > { %14396 = vmatpush3.bf16.msra.mxu0 %v8523_v48  ;;  %v18368_v19 = vpop.f32.mrb[0].mxu1  ;;  %14397 = vmatprep.mubr.msk.bf16.mxu0 %vm15728_vm0, %v19508_v59 }
 0xab3   : > { %9461 = vrot.lane.b32.xlu1 %v19630_v54, %s15732_s26  ;;  %v14369_v12 = vpop.f32.mrb[1].mxu1  ;;  %14407 = vmatprep.subr.bf16.mxu0 %v19508_v59  ;;  %v19642_v54 = vld [vmem:[#allocation64_spill] sm:$0xff] }
 0xab4   : > { %v15235_v32 = vpop.eup %15234  ;;  %v8322_v58 = vpop.f32.mrb[2].mxu1 }
 0xab5   : > { %v7909_v24 = vmul.f32 %v15235_v32, %v18226_v47  ;;  %v14370_v43 = vpop.f32.mrb[3].mxu1  ;;  %v19633_v47 = vld [vmem:[#allocation48_spill] sm:$0xff]  ;;  %v15237_v20 = vpop.eup %15236  ;;  %v19643_v58 = vld [vmem:[#allocation70_spill] sm:$0xff] }
 0xab6   : > { %v7916_v8 = vmul.f32 %v15237_v20, %v18125_v36  ;;  %v19644_v43 = vld [vmem:[#allocation69_spill] sm:$0xff] }
 0xab7   : > { %v7931_v1 = vpack.c.bf16 %v7909_v24, %v7909_v24  ;;  %9459 = vrot.lane.b32.xlu1 %v19631_v34, %s15732_s26  ;;  %v8715_v34 = vsel %vm2669_vm2, %v18190_v57, 0 }
 0xab8   : > { %v7938_v32 = vpack.c.bf16 %v7916_v8, %v7916_v8 }
 0xab9   : > { %14398 = vmatmul.mubr.msk.bf16.vlgmr.msra.gmra.mrb[12].mxu0 %vm2665_vm4, %v7931_v1 }
 0xaba   : > { %v18379_v50 = vpop.f32.mrb[4].mxu1  ;;  %14409 = vmatprep.mubr.msk.bf16.mxu0 %vm15728_vm0, %v19508_v59 }
 0xabb   : > { %9561 = vrot.lane.b32.xlu1 %v19632_v60, %s15732_s26  ;;  %v14381_v5 = vpop.f32.mrb[5].mxu1  ;;  %v19645_v60 = vld [vmem:[#allocation74_spill] sm:$0xff] }
 0xabc   : > { %v8418_v51 = vpop.f32.mrb[6].mxu1  ;;  %v19647_v5 = vld [vmem:[#allocation78_spill] sm:$0xff] }
 0xabd   : > { %v14382_v16 = vpop.f32.mrb[7].mxu1 }
 0xabf   : > { %9559 = vrot.lane.b32.xlu1 %v19633_v47, %s15732_s26 }
 0xac3   : > { %v18387_v42 = vpop.f32.mrb[8].mxu1  ;;  %9661 = vrot.lane.b32.xlu1 %v19634_v55, %s15732_s26 }
 0xac4   : > { %v14393_v9 = vpop.f32.mrb[9].mxu1 }
 0xac5   : > { %v8514_v35 = vpop.f32.mrb[10].mxu1 }
 0xac6   : > { %v14394_v23 = vpop.f32.mrb[11].mxu1  ;;  %v7874_v45 = vpop.xlane.xlu0 %7873 }
 0xac7   : > { %9659 = vrot.lane.b32.xlu1 %v19635_v63, %s15732_s26 }
 0xaca   : > { %v8614_v61 = vpop.permute.xlu0 %8613 }
 0xacb   : > { %v8619_v37 = vsel %vm2669_vm2, %v8614_v61, 0  ;;  %v18394_v31 = vpop.f32.mrb[12].mxu1  ;;  %9761 = vrot.lane.b32.xlu1 %v19636_v40, %s15732_s26 }
 0xacc   : > { %v14405_v62 = vpop.f32.mrb[13].mxu1  ;;  %14408 = vmatpush3.bf16.msra.mxu0 %v8619_v37 }
 0xacd   : > { %v8610_v2 = vpop.f32.mrb[14].mxu1  ;;  %14419 = vmatprep.subr.bf16.mxu0 %v19508_v59 }
 0xace   : > { %v14406_v53 = vpop.f32.mrb[15].mxu1  ;;  %v8806_v51 = vpop.permute.xlu0 %8805 }
 0xacf   : > { %9759 = vrot.lane.b32.xlu1 %v19637_v18, %s15732_s26 }
 0xad2   : > { %v8902_v16 = vpop.permute.xlu0 %8901 }
 0xad3   : > { %v18401_v7 = vpop.f32.mrb[16].mxu1  ;;  %9861 = vrot.lane.b32.xlu1 %v19638_v46, %s15732_s26 }
 0xad4   : > { %v14417_v30 = vpop.f32.mrb[17].mxu1 }
 0xad5   : > { %v8706_v11 = vpop.f32.mrb[18].mxu1 }
 0xad6   : > { %v14418_v15 = vpop.f32.mrb[19].mxu1  ;;  %v9212_v57 = vpop.permute.xlu0 %9211  ;;  %v8811_v11 = vsel %vm2669_vm2, %v8806_v51, 0 }
 0xad7   : > { %9859 = vrot.lane.b32.xlu1 %v19639_v41, %s15732_s26 }
 0xada   : > { %v9262_v47 = vpop.permute.xlu0 %9261 }
 0xadb   : > { %v18408_v14 = vpop.f32.mrb[20].mxu1  ;;  %9961 = vrot.lane.b32.xlu1 %v19640_v0, %s15732_s26 }
 0xadc   : > { %v14429_v26 = vpop.f32.mrb[21].mxu1 }
 0xadd   : > { %v8802_v44 = vpop.f32.mrb[22].mxu1 }
 0xade   : > { %v14430_v21 = vpop.f32.mrb[23].mxu1  ;;  %v7853_v49 = vpop.xlane.xlu1 %7852  ;;  %v8907_v44 = vsel %vm2669_vm2, %v8902_v16, 0 }
 0xadf   : > { %9959 = vrot.lane.b32.xlu1 %v19641_v28, %s15732_s26  ;;  %15238 = vrcp.f32 %v7853_v49  ;;  %v9312_v55 = vpop.permute.xlu0 %9311  ;;  %v14940_v49 = vld [vmem:[%s16152_s19 + $0x20] sm:$0xff]   ;;  %v9267_v28 = vsel %vm1387_vm1, %v9262_v47, 0 }
 0xae0   : > { %15240 = vrcp.f32 %v7874_v45 }
 0xae2   : > { %v8854_v48 = vpop.permute.xlu1 %8853 }
 0xae3   : > { %10061 = vrot.lane.b32.xlu1 %v19642_v54, %s15732_s26  ;;  %v8859_v12 = vsel %vm2669_vm2, %v8854_v48, 0  ;;  %v9310_v23 = vpop.permute.xlu0 %9309 }
 0xae4   : > { %14438 = vmatpush3.bf16.msra.mxu1 %v8859_v12  ;;  %v9317_v12 = vsel %vm1387_vm1, %v9312_v55, 0 }
 0xae5   : > { %14449 = vmatprep.subr.bf16.mxu1 %v19508_v59 }
 0xae7   : > { %10059 = vrot.lane.b32.xlu1 %v19643_v58, %s15732_s26  ;;  %14440 = vmatmul.mubr.msk.bf16.vlgmr.msra.gmra.mrb[24].mxu1 %vm2665_vm4, %v7938_v32  ;;  %v9412_v62 = vpop.permute.xlu0 %9411 }
 0xae8   : > { %14451 = vmatprep.mubr.msk.bf16.mxu1 %vm15728_vm0, %v19508_v59  ;;  %v9417_v58 = vsel %vm1387_vm1, %v9412_v62, 0 }
 0xae9   : > { %v15239_v24 = vpop.eup %15238 }
 0xaea   : > { %v7911_v36 = vmul.f32 %v15239_v24, %v18241_v25  ;;  %v19646_v25 = vld [vmem:[#allocation73_spill] sm:$0xff]  ;;  %v15241_v63 = vpop.eup %15240 }
 0xaeb   : > { %10161 = vrot.lane.b32.xlu1 %v19644_v43, %s15732_s26  ;;  %v7918_v40 = vmul.f32 %v15241_v63, %v18234_v38  ;;  %v9410_v15 = vpop.permute.xlu0 %9409 }
 0xaec   : > { %v7933_v1 = vpack.c.bf16 %v7911_v36, %v7911_v36 }
 0xaed   : > { %v7940_v30 = vpack.c.bf16 %v7918_v40, %v7918_v40  ;;  %v19648_v40 = vld [vmem:[#allocation30_spill] sm:$0xff] }
 0xaee   : > { %14410 = vmatmul.mubr.msk.bf16.vlgmr.msra.gmra.mrb[16].mxu0 %vm2665_vm4, %v7933_v1 }
 0xaef   : > { %10159 = vrot.lane.b32.xlu1 %v19645_v60, %s15732_s26  ;;  %14420 = vmatpush3.bf16.msra.mxu0 %v8715_v34  ;;  %v9512_v26 = vpop.permute.xlu0 %9511 }
 0xaf0   : > { %14421 = vmatprep.mubr.msk.bf16.mxu0 %vm15728_vm0, %v19508_v59  ;;  %14431 = vmatprep.subr.bf16.mxu0 %v19508_v59  ;;  %v9517_v43 = vsel %vm1387_vm1, %v9512_v26, 0 }
 0xaf3   : > { %10261 = vrot.lane.b32.xlu1 %v19646_v25, %s15732_s26  ;;  %v9510_v21 = vpop.permute.xlu0 %9509 }
 0xaf7   : > { %10259 = vrot.lane.b32.xlu1 %v19647_v5, %s15732_s26  ;;  %v9612_v48 = vpop.permute.xlu0 %9611 }
 0xaf8   : > { %v9617_v34 = vsel %vm1387_vm1, %v9612_v48, 0 }
 0xafb   : > { %v9610_v32 = vpop.permute.xlu0 %9609 }
 0xaff   : > { %v9712_v24 = vpop.permute.xlu0 %9711 }
 0xb00   : > { %v9717_v25 = vsel %vm1387_vm1, %v9712_v24, 0 }
 0xb03   : > { %v9710_v36 = vpop.permute.xlu0 %9709 }
 0xb07   : > { %v9812_v1 = vpop.permute.xlu0 %9811 }
 0xb0b   : > { %v9810_v60 = vpop.permute.xlu0 %9809 }
 0xb0f   : > { %v9912_v5 = vpop.permute.xlu0 %9911 }
 0xb13   : > { %v7859_v9 = vpop.xlane.xlu1 %7858 }
 0xb14   : > { %15242 = vrcp.f32 %v7859_v9  ;;  %v9910_v9 = vpop.permute.xlu0 %9909 }
 0xb17   : > { %v7865_v35 = vpop.xlane.xlu1 %7864 }
 0xb18   : > { %15244 = vrcp.f32 %v7865_v35  ;;  %v9817_v35 = vsel %vm1387_vm1, %v9812_v1, 0 }
 0xb1b   : > { %v7871_v61 = vpop.xlane.xlu1 %7870 }
 0xb1c   : > { %15246 = vrcp.f32 %v7871_v61 }
 0xb1e   : > { %v15243_v37 = vpop.eup %15242 }
 0xb1f   : > { %v7913_v2 = vmul.f32 %v15243_v37, %v18278_v22  ;;  %v8950_v53 = vpop.permute.xlu1 %8949  ;;  %v9217_v22 = vsel %vm1387_vm1, %v9212_v57, 0  ;;  %v10012_v37 = vpop.permute.xlu0 %10011 }
 0xb20   : > { %v8955_v18 = vsel %vm2669_vm2, %v8950_v53, 0 }
 0xb21   : > { %v7935_v46 = vpack.c.bf16 %v7913_v2, %v7913_v2  ;;  %14450 = vmatpush3.bf16.msra.mxu1 %v8955_v18  ;;  %v9917_v18 = vsel %vm1387_vm1, %v9912_v5, 0 }
 0xb22   : > { %v15245_v45 = vpop.eup %15244  ;;  %14471 = vmatprep.subr.bf16.mxu1 %v19508_v59 }
 0xb23   : > { %14422 = vmatmul.mubr.msk.bf16.vlgmr.msra.gmra.mrb[20].mxu0 %vm2665_vm4, %v7935_v46  ;;  %v7915_v38 = vmul.f32 %v15245_v45, %v18285_v27  ;;  %v9210_v20 = vpop.permute.xlu1 %9209 }
 0xb24   : > { %14432 = vmatpush3.bf16.msra.mxu0 %v8811_v11  ;;  %14452 = vmatmul.mubr.msk.bf16.vlgmr.msra.gmra.mrb[28].mxu1 %vm2665_vm4, %v7940_v30 }
 0xb25   : > { %14433 = vmatprep.mubr.msk.bf16.mxu0 %vm15728_vm0, %v19508_v59  ;;  %14443 = vmatprep.subr.bf16.mxu0 %v19508_v59  ;;  %v7937_v41 = vpack.c.bf16 %v7915_v38, %v7915_v38 }
 0xb26   : > { %14473 = vmatprep.mubr.msk.bf16.mxu1 %vm15728_vm0, %v19508_v59  ;;  %v15247_v0 = vpop.eup %15246 }
 0xb27   : > { %v7917_v27 = vmul.f32 %v15247_v0, %v18294_v39  ;;  %v14941_v39 = vld [vmem:[%s16152_s19 + $0x28] sm:$0xff]   ;;  %v9260_v54 = vpop.permute.xlu1 %9259 }
 0xb29   : > { %v7939_v8 = vpack.c.bf16 %v7917_v27, %v7917_v27 }
 0xb2a   : > { %14472 = vmatpush3.bf16.xpose.msra.mxu1 %v9217_v22  ;;  %v10017_v22 = vsel %vm1387_vm1, %v10012_v37, 0 }
 0xb2b   : > { %14434 = vmatmul.mubr.msk.bf16.vlgmr.msra.gmra.mrb[24].mxu0 %vm2665_vm4, %v7937_v41  ;;  %14477 = vmatprep.subr.bf16.mxu1 %v19508_v59 }
 0xb2c   : > { %14444 = vmatpush3.bf16.msra.mxu0 %v8907_v44  ;;  %14445 = vmatprep.mubr.msk.bf16.mxu0 %vm15728_vm0, %v19508_v59 }
 0xb2d   : > { %14455 = vmatprep.subr.bf16.mxu0 %v19508_v59 }
 0xb31   : > { %14474 = vmatmul.mubr.msk.bf16.vlgmr.msra.gmra.mrb[32].mxu1 %vm1387_vm1, %v9210_v20 }
 0xb32   : > { %14478 = vmatpush3.bf16.xpose.msra.mxu1 %v9267_v28  ;;  %14479 = vmatprep.mubr.msk.bf16.mxu1 %vm15728_vm0, %v19508_v59 }
 0xb33   : > { %14446 = vmatmul.mubr.msk.bf16.vlgmr.msra.gmra.mrb[28].mxu0 %vm2665_vm4, %v7939_v8  ;;  %14483 = vmatprep.subr.bf16.mxu1 %v19508_v59 }
 0xb34   : > { %14456 = vmatpush3.bf16.msra.mxu0 %v14940_v49  ;;  %14459 = vmatprep.mubr.msk.bf16.mxu0 %vm15728_vm0, %v19508_v59 }
 0xb35   : > { %14457 = vmatprep.subr.bf16.mxu0 %v19508_v59 }
 0xb38   : > { %14458 = vmatpush3.bf16.msra.mxu0 %v14941_v39  ;;  %v9362_v39 = vpop.permute.xlu1 %9361 }
 0xb39   : > { %14480 = vmatmul.mubr.msk.bf16.vlgmr.msra.gmra.mrb[36].mxu1 %vm1387_vm1, %v9260_v54  ;;  %14489 = vmatprep.subr.bf16.mxu0 %v19508_v59  ;;  %v9367_v54 = vsel %vm1387_vm1, %v9362_v39, 0 }
 0xb3a   : > { %14484 = vmatpush3.bf16.xpose.msra.mxu1 %v9317_v12  ;;  %14485 = vmatprep.mubr.msk.bf16.mxu1 %vm15728_vm0, %v19508_v59 }
 0xb3b   : > { %14495 = vmatprep.subr.bf16.mxu1 %v19508_v59 }
 0xb41   : > { %14486 = vmatmul.mubr.msk.bf16.vlgmr.msra.gmra.mrb[40].mxu1 %vm1387_vm1, %v9310_v23 }
 0xb42   : > { %14496 = vmatpush3.bf16.xpose.msra.mxu1 %v9417_v58  ;;  %14497 = vmatprep.mubr.msk.bf16.mxu1 %vm15728_vm0, %v19508_v59 }
 0xb43   : > { %14507 = vmatprep.subr.bf16.mxu1 %v19508_v59 }
 0xb49   : > { %14498 = vmatmul.mubr.msk.bf16.vlgmr.msra.gmra.mrb[44].mxu1 %vm1387_vm1, %v9410_v15 }
 0xb4a   : > { %14508 = vmatpush3.bf16.xpose.msra.mxu1 %v9517_v43  ;;  %14509 = vmatprep.mubr.msk.bf16.mxu1 %vm15728_vm0, %v19508_v59 }
 0xb4b   : > { %14519 = vmatprep.subr.bf16.mxu1 %v19508_v59 }
 0xb51   : > { %14510 = vmatmul.mubr.msk.bf16.vlgmr.msra.gmra.mrb[48].mxu1 %vm1387_vm1, %v9510_v21 }
 0xb52   : > { %14520 = vmatpush3.bf16.xpose.msra.mxu1 %v9617_v34  ;;  %14521 = vmatprep.mubr.msk.bf16.mxu1 %vm15728_vm0, %v19508_v59 }
 0xb53   : > { %14531 = vmatprep.subr.bf16.mxu1 %v19508_v59 }
 0xb59   : > { %14522 = vmatmul.mubr.msk.bf16.vlgmr.msra.gmra.mrb[52].mxu1 %vm1387_vm1, %v9610_v32 }
 0xb5a   : > { %14532 = vmatpush3.bf16.xpose.msra.mxu1 %v9717_v25  ;;  %14533 = vmatprep.mubr.msk.bf16.mxu1 %vm15728_vm0, %v19508_v59 }
 0xb5b   : > { %14543 = vmatprep.subr.bf16.mxu1 %v19508_v59 }
 0xb5c   : > { %v7983_v51 = vpop.f32.mrb[244].mxu0 }
 0xb5d   : > { %v9019_v16 = vcombine.low %v7983_v51, %v18320_v56  ;;  %v14327_v57 = vpop.f32.mrb[245].mxu0 }
 0xb5e   : > { %v7986_v47 = vpop.f32.mrb[246].mxu0 }
 0xb5f   : > { %v14328_v55 = vpop.f32.mrb[247].mxu0  ;;  %v9027_v62 = vrot.slane %v9019_v16, %v19648_v40 }
 0xb61   : > { %14534 = vmatmul.mubr.msk.bf16.vlgmr.msra.gmra.mrb[56].mxu1 %vm1387_vm1, %v9710_v36 }
 0xb62   : > { %14544 = vmatpush3.bf16.xpose.msra.mxu1 %v9817_v35  ;;  %14545 = vmatprep.mubr.msk.bf16.mxu1 %vm15728_vm0, %v19508_v59 }
 0xb63   : > { %14555 = vmatprep.subr.bf16.mxu1 %v19508_v59 }
 0xb64   : > { %v8079_v23 = vpop.f32.mrb[248].mxu0 }
 0xb65   : > { %v9020_v63 = vcombine.low %v8079_v23, %v18335_v29  ;;  %v14339_v61 = vpop.f32.mrb[249].mxu0  ;;  %v10010_v29 = vpop.permute.xlu0 %10009 }
 0xb66   : > { %v8082_v56 = vpop.f32.mrb[250].mxu0 }
 0xb67   : > { %v9034_v2 = vrot.slane %v9020_v63, %v19648_v40  ;;  %v14340_v53 = vpop.f32.mrb[251].mxu0 }
 0xb69   : > { %v9035_v46 = vcombine.low %v9027_v62, %v9034_v2  ;;  %14546 = vmatmul.mubr.msk.bf16.vlgmr.msra.gmra.mrb[60].mxu1 %vm1387_vm1, %v9810_v60  ;;  %v10112_v41 = vpop.permute.xlu0 %10111 }
 0xb6a   : > { %14556 = vmatpush3.bf16.xpose.msra.mxu1 %v9917_v18  ;;  %14557 = vmatprep.mubr.msk.bf16.mxu1 %vm15728_vm0, %v19508_v59  ;;  %v10117_v28 = vsel %vm1387_vm1, %v10112_v41, 0 }
 0xb6b   : > { %14567 = vmatprep.subr.bf16.mxu1 %v19508_v59 }
 0xb6c   : > { %v8175_v45 = vpop.f32.mrb[252].mxu0 }
 0xb6d   : > { %v9036_v30 = vcombine.low %v8175_v45, %v18352_v3  ;;  %v14351_v11 = vpop.f32.mrb[253].mxu0  ;;  %v10110_v49 = vpop.permute.xlu0 %10109 }
 0xb6e   : > { %v8178_v15 = vpop.f32.mrb[254].mxu0 }
 0xb6f   : > { %v14352_v38 = vpop.f32.mrb[255].mxu0  ;;  %v9044_v3 = vrot.slane %v9036_v30, %v19648_v40 }
 0xb71   : > { %14558 = vmatmul.mubr.msk.bf16.vlgmr.msra.gmra.mrb[64].mxu1 %vm1387_vm1, %v9910_v9  ;;  %v10212_v58 = vpop.permute.xlu0 %10211 }
 0xb72   : > { %14568 = vmatpush3.bf16.xpose.msra.mxu1 %v10017_v22  ;;  %14569 = vmatprep.mubr.msk.bf16.mxu1 %vm15728_vm0, %v19508_v59  ;;  %v10217_v43 = vsel %vm1387_vm1, %v10212_v58, 0 }
 0xb73   : > { %14579 = vmatprep.subr.bf16.mxu1 %v19508_v59 }
 0xb74   : > { %v8271_v0 = vpop.f32.mrb[0].mxu0 }
 0xb75   : > { %v9037_v26 = vcombine.low %v8271_v0, %v18368_v19  ;;  %v14363_v44 = vpop.f32.mrb[1].mxu0  ;;  %v10210_v16 = vpop.permute.xlu0 %10209 }
 0xb76   : > { %v8274_v27 = vpop.f32.mrb[2].mxu0 }
 0xb77   : > { %v9051_v21 = vrot.slane %v9037_v26, %v19648_v40  ;;  %v14364_v20 = vpop.f32.mrb[3].mxu0 }
 0xb79   : > { %v9052_v8 = vcombine.low %v9044_v3, %v9051_v21  ;;  %14570 = vmatmul.mubr.msk.bf16.vlgmr.msra.gmra.mrb[68].mxu1 %vm1387_vm1, %v10010_v29 }
 0xb7a   : > { %14580 = vmatpush3.bf16.xpose.msra.mxu1 %v10117_v28  ;;  %14581 = vmatprep.mubr.msk.bf16.mxu1 %vm15728_vm0, %v19508_v59 }
 0xb7b   : > { %v9118_v48 = vpack.c.bf16 %v9052_v8, %v9035_v46  ;;  %14591 = vmatprep.subr.bf16.mxu1 %v19508_v59 }
 0xb7c   : > { %v8367_v19 = vpop.f32.mrb[4].mxu0 }
 0xb7d   : > { %v9053_v12 = vcombine.low %v8367_v19, %v18379_v50  ;;  %v14375_v32 = vpop.f32.mrb[5].mxu0  ;;  %14460 = vmatmul.mubr.msk.bf16.vlgmr.msra.gmra.mrb[32].mxu0 %vm1387_vm1, %v9118_v48 }
 0xb7e   : > { %14490 = vmatpush3.bf16.xpose.msra.mxu0 %v9367_v54  ;;  %v8370_v24 = vpop.f32.mrb[6].mxu0  ;;  %14463 = vmatprep.mubr.msk.bf16.mxu0 %vm15728_vm0, %v19508_v59 }
 0xb7f   : > { %v14376_v36 = vpop.f32.mrb[7].mxu0  ;;  %14501 = vmatprep.subr.bf16.mxu0 %v19508_v59  ;;  %v9061_v25 = vrot.slane %v9053_v12, %v19648_v40 }
 0xb81   : > { %14582 = vmatmul.mubr.msk.bf16.vlgmr.msra.gmra.mrb[72].mxu1 %vm1387_vm1, %v10110_v49 }
 0xb82   : > { %14592 = vmatpush3.bf16.xpose.msra.mxu1 %v10217_v43  ;;  %14593 = vmatprep.mubr.msk.bf16.mxu1 %vm15728_vm0, %v19508_v59 }
 0xb83   : > { %14603 = vmatprep.subr.bf16.mxu1 %v19508_v59 }
 0xb84   : > { %v8463_v50 = vpop.f32.mrb[8].mxu0 }
 0xb85   : > { %v9054_v1 = vcombine.low %v8463_v50, %v18387_v42  ;;  %v14387_v34 = vpop.f32.mrb[9].mxu0 }
 0xb86   : > { %v8466_v60 = vpop.f32.mrb[10].mxu0 }
 0xb87   : > { %v9068_v5 = vrot.slane %v9054_v1, %v19648_v40  ;;  %v14388_v51 = vpop.f32.mrb[11].mxu0 }
 0xb89   : > { %v9069_v57 = vcombine.low %v9061_v25, %v9068_v5  ;;  %14594 = vmatmul.mubr.msk.bf16.vlgmr.msra.gmra.mrb[76].mxu1 %vm1387_vm1, %v10210_v16 }
 0xb8a   : > { %14605 = vmatprep.mubr.msk.bf16.mxu1 %vm15728_vm0, %v19508_v59 }
 0xb8c   : > { %v8559_v47 = vpop.f32.mrb[12].mxu0 }
 0xb8d   : > { %v9070_v55 = vcombine.low %v8559_v47, %v18394_v31  ;;  %v14399_v9 = vpop.f32.mrb[13].mxu0  ;;  %v9360_v31 = vpop.permute.xlu1 %9359 }
 0xb8e   : > { %v8562_v35 = vpop.f32.mrb[14].mxu0 }
 0xb8f   : > { %v14400_v42 = vpop.f32.mrb[15].mxu0  ;;  %v9078_v18 = vrot.slane %v9070_v55, %v19648_v40 }
 0xb91   : > { %v9462_v11 = vpop.permute.xlu1 %9461 }
 0xb95   : > { %v9460_v15 = vpop.permute.xlu1 %9459 }
 0xb99   : > { %v9562_v21 = vpop.permute.xlu1 %9561 }
 0xb9d   : > { %v9560_v12 = vpop.permute.xlu1 %9559 }
 0xba1   : > { %v9662_v5 = vpop.permute.xlu1 %9661 }
 0xba5   : > { %v9660_v35 = vpop.permute.xlu1 %9659 }
 0xbba   : > { %v8895_v23 = vpop.f32.mrb[24].mxu1 }
 0xbbb   : > { %v14441_v63 = vpop.f32.mrb[25].mxu1 }
 0xbbc   : > { %v8898_v61 = vpop.f32.mrb[26].mxu1 }
 0xbbd   : > { %v14442_v37 = vpop.f32.mrb[27].mxu1 }
 0xbbe   : > { %v9762_v37 = vpop.permute.xlu1 %9761 }
 0xbc1   : > { %v8655_v56 = vpop.f32.mrb[16].mxu0 }
 0xbc2   : > { %v9071_v62 = vcombine.low %v8655_v56, %v18401_v7  ;;  %v14411_v2 = vpop.f32.mrb[17].mxu0 }
 0xbc3   : > { %v8658_v53 = vpop.f32.mrb[18].mxu0  ;;  %v9760_v2 = vpop.permute.xlu1 %9759 }
 0xbc4   : > { %v9085_v46 = vrot.slane %v9071_v62, %v19648_v40  ;;  %v14412_v29 = vpop.f32.mrb[19].mxu0 }
 0xbc6   : > { %v9086_v45 = vcombine.low %v9078_v18, %v9085_v46  ;;  %v9567_v18 = vsel %vm1387_vm1, %v9562_v21, 0 }
 0xbc8   : > { %v9119_v30 = vpack.c.bf16 %v9086_v45, %v9069_v57 }
 0xbca   : > { %14464 = vmatmul.mubr.msk.bf16.gmra.mrb[36].mxu0 %vm1387_vm1, %v9119_v30 }
 0xbcb   : > { %14467 = vmatprep.mubr.msk.bf16.mxu0 %vm15728_vm0, %v19508_v59 }
 0xbf6   : > { %v8751_v38 = vpop.f32.mrb[20].mxu0 }
 0xbf7   : > { %v9087_v7 = vcombine.low %v8751_v38, %v18408_v14  ;;  %v14423_v22 = vpop.f32.mrb[21].mxu0  ;;  %v8991_v41 = vpop.f32.mrb[28].mxu1  ;;  %v9667_v38 = vsel %vm1387_vm1, %v9662_v5, 0 }
 0xbf8   : > { %v8754_v0 = vpop.f32.mrb[22].mxu0  ;;  %v14453_v26 = vpop.f32.mrb[29].mxu1 }
 0xbf9   : > { %v14424_v44 = vpop.f32.mrb[23].mxu0  ;;  %v8994_v27 = vpop.f32.mrb[30].mxu1  ;;  %v9095_v39 = vrot.slane %v9087_v7, %v19648_v40 }
 0xbfa   : > { %v14454_v3 = vpop.f32.mrb[31].mxu1  ;;  %v9767_v44 = vsel %vm1387_vm1, %v9762_v37, 0 }
 0xbfe   : > { %v8847_v20 = vpop.f32.mrb[24].mxu0 }
 0xbff   : > { %v9088_v49 = vcombine.low %v8847_v20, %v8895_v23  ;;  %v14435_v28 = vpop.f32.mrb[25].mxu0  ;;  %v9467_v23 = vsel %vm1387_vm1, %v9462_v11, 0 }
 0xc00   : > { %v8850_v8 = vpop.f32.mrb[26].mxu0 }
 0xc01   : > { %v9102_v48 = vrot.slane %v9088_v49, %v19648_v40  ;;  %v14436_v19 = vpop.f32.mrb[27].mxu0 }
 0xc03   : > { %v9103_v54 = vcombine.low %v9095_v39, %v9102_v48 }
 0xc04   : > { %v18552_v14 = vpop.f32.mrb[32].mxu1 }
 0xc05   : > { %v14475_v32 = vpop.f32.mrb[33].mxu1  ;;  %v10309_v58 = vsel %vm2400_vm3, %v18552_v14, -inf }
 0xc06   : > { %v8943_v24 = vpop.f32.mrb[28].mxu0  ;;  %10310 = vmax.xlane.f32.xlu0 %v10309_v58  ;;  %v9256_v36 = vpop.f32.mrb[34].mxu1 }
 0xc07   : > { %v9104_v43 = vcombine.low %v8943_v24, %v8991_v41  ;;  %v14447_v50 = vpop.f32.mrb[29].mxu0  ;;  %v14476_v1 = vpop.f32.mrb[35].mxu1 }
 0xc08   : > { %v8946_v34 = vpop.f32.mrb[30].mxu0 }
 0xc09   : > { %v9111_v60 = vrot.slane %v9104_v43, %v19648_v40  ;;  %v14448_v25 = vpop.f32.mrb[31].mxu0 }
 0xc0b   : > { %v9120_v51 = vpack.c.bf16 %v9111_v60, %v9103_v54 }
 0xc0c   : > { %v18557_v16 = vpop.f32.mrb[36].mxu1 }
 0xc0d   : > { %14468 = vmatmul.mubr.msk.bf16.gmra.mrb[40].mxu0 %vm1387_vm1, %v9120_v51  ;;  %v14481_v57 = vpop.f32.mrb[37].mxu1  ;;  %v10312_v47 = vsel %vm2400_vm3, %v18557_v16, -inf }
 0xc0e   : > { %10313 = vmax.xlane.f32.xlu1 %v10312_v47  ;;  %v9306_v55 = vpop.f32.mrb[38].mxu1  ;;  %14491 = vmatprep.mubr.msk.bf16.mxu0 %vm15728_vm0, %v19508_v59 }
 0xc0f   : > { %v14482_v9 = vpop.f32.mrb[39].mxu1 }
 0xc14   : > { %v18564_v42 = vpop.f32.mrb[40].mxu1 }
 0xc15   : > { %v14487_v63 = vpop.f32.mrb[41].mxu1  ;;  %14492 = vmatmul.mubr.msk.bf16.vlgmr.msra.gmra.mrb[44].mxu0 %vm1387_vm1, %v9360_v31  ;;  %v10315_v61 = vsel %vm2400_vm3, %v18564_v42, -inf  ;;  %v9862_v31 = vpop.permute.xlu1 %9861 }
 0xc16   : > { %14502 = vmatpush3.bf16.xpose.msra.mxu0 %v9467_v23  ;;  %10316 = vmax.xlane.f32.xlu0 %v10315_v61  ;;  %v9356_v56 = vpop.f32.mrb[42].mxu1  ;;  %v9867_v39 = vsel %vm1387_vm1, %v9862_v31, 0 }
 0xc17   : > { %v14488_v62 = vpop.f32.mrb[43].mxu1  ;;  %14503 = vmatprep.mubr.msk.bf16.mxu0 %vm15728_vm0, %v19508_v59  ;;  %14513 = vmatprep.subr.bf16.mxu0 %v19508_v59 }
 0xc19   : > { %v9860_v0 = vpop.permute.xlu1 %9859 }
 0xc1c   : > { %v18573_v53 = vpop.f32.mrb[44].mxu1 }
 0xc1d   : > { %v14499_v46 = vpop.f32.mrb[45].mxu1  ;;  %14504 = vmatmul.mubr.msk.bf16.vlgmr.msra.gmra.mrb[48].mxu0 %vm1387_vm1, %v9460_v15  ;;  %v10321_v29 = vsel %vm2400_vm3, %v18573_v53, -inf  ;;  %v9962_v21 = vpop.permute.xlu1 %9961 }
 0xc1e   : > { %14514 = vmatpush3.bf16.xpose.msra.mxu0 %v9567_v18  ;;  %10322 = vmax.xlane.f32.xlu0 %v10321_v29  ;;  %v9456_v45 = vpop.f32.mrb[46].mxu1  ;;  %v9967_v24 = vsel %vm1387_vm1, %v9962_v21, 0 }
 0xc1f   : > { %v14500_v30 = vpop.f32.mrb[47].mxu1  ;;  %14515 = vmatprep.mubr.msk.bf16.mxu0 %vm15728_vm0, %v19508_v59  ;;  %14525 = vmatprep.subr.bf16.mxu0 %v19508_v59 }
 0xc20   : > { %v19650_v30 = vld [vmem:[#allocation94_spill] sm:$0xff] }
 0xc21   : > { %v9960_v28 = vpop.permute.xlu1 %9959 }
 0xc24   : > { %v18582_v11 = vpop.f32.mrb[48].mxu1 }
 0xc25   : > { %v14511_v7 = vpop.f32.mrb[49].mxu1  ;;  %14516 = vmatmul.mubr.msk.bf16.vlgmr.msra.gmra.mrb[52].mxu0 %vm1387_vm1, %v9560_v12  ;;  %v10327_v15 = vsel %vm2400_vm3, %v18582_v11, -inf  ;;  %v10062_v32 = vpop.permute.xlu1 %10061 }
 0xc26   : > { %14526 = vmatpush3.bf16.xpose.msra.mxu0 %v9667_v38  ;;  %10328 = vmax.xlane.f32.xlu0 %v10327_v15  ;;  %v9556_v22 = vpop.f32.mrb[50].mxu1  ;;  %v10067_v25 = vsel %vm1387_vm1, %v10062_v32, 0 }
 0xc27   : > { %v14512_v41 = vpop.f32.mrb[51].mxu1  ;;  %14527 = vmatprep.mubr.msk.bf16.mxu0 %vm15728_vm0, %v19508_v59  ;;  %14537 = vmatprep.subr.bf16.mxu0 %v19508_v59 }
 0xc29   : > { %v10060_v34 = vpop.permute.xlu1 %10059 }
 0xc2c   : > { %v18591_v26 = vpop.f32.mrb[52].mxu1 }
 0xc2d   : > { %v14523_v27 = vpop.f32.mrb[53].mxu1  ;;  %14528 = vmatmul.mubr.msk.bf16.vlgmr.msra.gmra.mrb[56].mxu0 %vm1387_vm1, %v9660_v35  ;;  %v10333_v3 = vsel %vm2400_vm3, %v18591_v26, -inf  ;;  %v10162_v57 = vpop.permute.xlu1 %10161 }
 0xc2e   : > { %14538 = vmatpush3.bf16.xpose.msra.mxu0 %v9767_v44  ;;  %10334 = vmax.xlane.f32.xlu0 %v10333_v3  ;;  %v9656_v20 = vpop.f32.mrb[54].mxu1  ;;  %v10167_v23 = vsel %vm1387_vm1, %v10162_v57, 0 }
 0xc2f   : > { %v14524_v49 = vpop.f32.mrb[55].mxu1  ;;  %14539 = vmatprep.mubr.msk.bf16.mxu0 %vm15728_vm0, %v19508_v59  ;;  %14549 = vmatprep.subr.bf16.mxu0 %v19508_v59 }
 0xc31   : > { %v10160_v9 = vpop.permute.xlu1 %10159 }
 0xc34   : > { %v18600_v8 = vpop.f32.mrb[56].mxu1 }
 0xc35   : > { %v14535_v48 = vpop.f32.mrb[57].mxu1  ;;  %14540 = vmatmul.mubr.msk.bf16.vlgmr.msra.gmra.mrb[60].mxu0 %vm1387_vm1, %v9760_v2  ;;  %v10339_v19 = vsel %vm2400_vm3, %v18600_v8, -inf  ;;  %v19649_v2 = vld [vmem:[#allocation31_spill] sm:$0xff]  ;;  %v10262_v29 = vpop.permute.xlu1 %10261 }
 0xc36   : > { %14550 = vmatpush3.bf16.xpose.msra.mxu0 %v9867_v39  ;;  %10340 = vmax.xlane.f32.xlu0 %v10339_v19  ;;  %v9756_v54 = vpop.f32.mrb[58].mxu1  ;;  %v10267_v15 = vsel %vm1387_vm1, %v10262_v29, 0 }
 0xc37   : > { %v14536_v12 = vpop.f32.mrb[59].mxu1  ;;  %14551 = vmatprep.mubr.msk.bf16.mxu0 %vm15728_vm0, %v19508_v59  ;;  %14561 = vmatprep.subr.bf16.mxu0 %v19508_v59 }
 0xc39   : > { %v10260_v27 = vpop.permute.xlu1 %10259 }
 0xc3c   : > { %v18609_v58 = vpop.f32.mrb[60].mxu1 }
 0xc3d   : > { %v14547_v36 = vpop.f32.mrb[61].mxu1  ;;  %14552 = vmatmul.mubr.msk.bf16.vlgmr.msra.gmra.mrb[64].mxu0 %vm1387_vm1, %v9860_v0  ;;  %v10345_v43 = vsel %vm2400_vm3, %v18609_v58, -inf }
 0xc3e   : > { %14562 = vmatpush3.bf16.xpose.msra.mxu0 %v9967_v24  ;;  %10346 = vmax.xlane.f32.xlu0 %v10345_v43  ;;  %v9856_v50 = vpop.f32.mrb[62].mxu1  ;;  %v19651_v36 = vld [vmem:[#allocation95_spill] sm:$0xff] }
 0xc3f   : > { %v14548_v1 = vpop.f32.mrb[63].mxu1  ;;  %14563 = vmatprep.mubr.msk.bf16.mxu0 %vm15728_vm0, %v19508_v59  ;;  %14573 = vmatprep.subr.bf16.mxu0 %v19508_v59 }
 0xc44   : > { %v18618_v60 = vpop.f32.mrb[64].mxu1 }
 0xc45   : > { %v14559_v5 = vpop.f32.mrb[65].mxu1  ;;  %14564 = vmatmul.mubr.msk.bf16.vlgmr.msra.gmra.mrb[68].mxu0 %vm1387_vm1, %v9960_v28  ;;  %v10351_v51 = vsel %vm2400_vm3, %v18618_v60, -inf }
 0xc46   : > { %14574 = vmatpush3.bf16.xpose.msra.mxu0 %v10067_v25  ;;  %10352 = vmax.xlane.f32.xlu0 %v10351_v51  ;;  %v9956_v47 = vpop.f32.mrb[66].mxu1 }
 0xc47   : > { %v14560_v55 = vpop.f32.mrb[67].mxu1  ;;  %14575 = vmatprep.mubr.msk.bf16.mxu0 %vm15728_vm0, %v19508_v59  ;;  %14585 = vmatprep.subr.bf16.mxu0 %v19508_v59 }
 0xc4c   : > { %v18627_v35 = vpop.f32.mrb[68].mxu1 }
 0xc4d   : > { %v14571_v63 = vpop.f32.mrb[69].mxu1  ;;  %14576 = vmatmul.mubr.msk.bf16.vlgmr.msra.gmra.mrb[72].mxu0 %vm1387_vm1, %v10060_v34  ;;  %v10357_v61 = vsel %vm2400_vm3, %v18627_v35, -inf  ;;  %v19652_v34 = vld [vmem:[#allocation36_spill] sm:$0xff] }
 0xc4e   : > { %14586 = vmatpush3.bf16.xpose.msra.mxu0 %v10167_v23  ;;  %10358 = vmax.xlane.f32.xlu0 %v10357_v61  ;;  %v10056_v37 = vpop.f32.mrb[70].mxu1 }
 0xc4f   : > { %v14572_v56 = vpop.f32.mrb[71].mxu1  ;;  %14587 = vmatprep.mubr.msk.bf16.mxu0 %vm15728_vm0, %v19508_v59  ;;  %14597 = vmatprep.subr.bf16.mxu0 %v19508_v59 }
 0xc50   : > { %v9180_v62 = vpop.f32.mrb[32].mxu0 }
 0xc51   : > { %v18637_v18 = vadd.f32 %v9180_v62, %v19649_v2  ;;  %v14461_v46 = vpop.f32.mrb[33].mxu0 }
 0xc52   : > { %v9183_v45 = vpop.f32.mrb[34].mxu0 }
 0xc53   : > { %v18640_v31 = vadd.f32 %v9183_v45, %v19650_v30  ;;  %v14462_v38 = vpop.f32.mrb[35].mxu0 }
 0xc54   : > { %v18642_v7 = vpop.f32.mrb[72].mxu1 }
 0xc55   : > { %v14583_v22 = vpop.f32.mrb[73].mxu1  ;;  %14588 = vmatmul.mubr.msk.bf16.vlgmr.msra.gmra.mrb[76].mxu0 %vm1387_vm1, %v10160_v9  ;;  %v10363_v41 = vsel %vm2400_vm3, %v18642_v7, -inf }
 0xc56   : > { %14598 = vmatpush3.bf16.xpose.msra.mxu0 %v10267_v15  ;;  %10364 = vmax.xlane.f32.xlu0 %v10363_v41  ;;  %v10156_v0 = vpop.f32.mrb[74].mxu1 }
 0xc57   : > { %v14584_v44 = vpop.f32.mrb[75].mxu1  ;;  %14599 = vmatprep.mubr.msk.bf16.mxu0 %vm15728_vm0, %v19508_v59  ;;  %14609 = vmatprep.subr.bf16.mxu0 %v19508_v59 }
 0xc5c   : > { %v18651_v3 = vpop.f32.mrb[76].mxu1 }
 0xc5d   : > { %v14595_v21 = vpop.f32.mrb[77].mxu1  ;;  %14600 = vmatmul.mubr.msk.bf16.vlgmr.msra.gmra.mrb[80].mxu0 %vm1387_vm1, %v10260_v27  ;;  %v10369_v20 = vsel %vm2400_vm3, %v18651_v3, -inf }
 0xc5e   : > { %10370 = vmax.xlane.f32.xlu0 %v10369_v20  ;;  %v10256_v49 = vpop.f32.mrb[78].mxu1  ;;  %14611 = vmatprep.mubr.msk.bf16.mxu0 %vm15728_vm0, %v19508_v59 }
 0xc5f   : > { %v14596_v28 = vpop.f32.mrb[79].mxu1 }
 0xc60   : > { %v19654_v28 = vld [vmem:[#allocation35_spill] sm:$0xff] }
 0xc93   : > { %v10311_v39 = vpop.xlane.xlu0 %10310 }
 0xc94   : > { %v10375_v48 = vsub.f32 %v18552_v14, %v10311_v39 }
 0xc96   : > { %v10397_v19 = vmul.f32 1.442695, %v10375_v48 }
 0xc98   : > { %15248 = vpow2.f32 %v10397_v19  ;;  %v19655_v19 = vld [vmem:[#allocation40_spill] sm:$0xff] }
 0xc9b   : > { %v10314_v54 = vpop.xlane.xlu1 %10313 }
 0xc9c   : > { %v10376_v12 = vsub.f32 %v18557_v16, %v10314_v54 }
 0xc9d   : > { %v9188_v24 = vpop.f32.mrb[36].mxu0 }
 0xc9e   : > { %v10399_v32 = vmul.f32 1.442695, %v10376_v12  ;;  %v18661_v43 = vadd.f32 %v9188_v24, %v19651_v36  ;;  %v14465_v50 = vpop.f32.mrb[37].mxu0 }
 0xc9f   : > { %v9191_v1 = vpop.f32.mrb[38].mxu0 }
 0xca0   : > { %15250 = vpow2.f32 %v10399_v32  ;;  %v18664_v25 = vadd.f32 %v9191_v1, %v19652_v34  ;;  %v14466_v5 = vpop.f32.mrb[39].mxu0 }
 0xca2   : > { %v18666_v51 = vpop.eup %15248 }
 0xca3   : > { %v10317_v14 = vpop.xlane.xlu0 %10316  ;;  %v10441_v57 = vsel %vm2400_vm3, %v18666_v51, 0.0 }
 0xca4   : > { %v10377_v16 = vsub.f32 %v18564_v42, %v10317_v14  ;;  %10442 = vadd.xlane.f32.xlu0 %v10441_v57 }
 0xca6   : > { %v10401_v47 = vmul.f32 1.442695, %v10377_v16 }
 0xca8   : > { %15252 = vpow2.f32 %v10401_v47  ;;  %v19656_v47 = vld [vmem:[#allocation80_spill] sm:$0xff] }
 0xcaa   : > { %v18671_v55 = vpop.eup %15250 }
 0xcab   : > { %v10323_v9 = vpop.xlane.xlu0 %10322  ;;  %v10444_v23 = vsel %vm2400_vm3, %v18671_v55, 0.0 }
 0xcac   : > { %v10379_v63 = vsub.f32 %v18573_v53, %v10323_v9  ;;  %10445 = vadd.xlane.f32.xlu1 %v10444_v23  ;;  %v19653_v53 = vld [vmem:[#allocation76_spill] sm:$0xff] }
 0xcae   : > { %v10405_v61 = vmul.f32 1.442695, %v10379_v63 }
 0xcb0   : > { %15254 = vpow2.f32 %v10405_v61 }
 0xcb2   : > { %v18676_v37 = vpop.eup %15252 }
 0xcb3   : > { %v10329_v56 = vpop.xlane.xlu0 %10328  ;;  %v10447_v42 = vsel %vm2400_vm3, %v18676_v37, 0.0 }
 0xcb4   : > { %v10381_v62 = vsub.f32 %v18582_v11, %v10329_v56  ;;  %10448 = vadd.xlane.f32.xlu0 %v10447_v42 }
 0xcb6   : > { %v10409_v2 = vmul.f32 1.442695, %v10381_v62 }
 0xcb8   : > { %15256 = vpow2.f32 %v10409_v2  ;;  %v19657_v2 = vld [vmem:[#allocation75_spill] sm:$0xff] }
 0xcba   : > { %v18681_v46 = vpop.eup %15254 }
 0xcbb   : > { %v10453_v29 = vsel %vm2400_vm3, %v18681_v46, 0.0  ;;  %v10335_v38 = vpop.xlane.xlu0 %10334 }
 0xcbc   : > { %10454 = vadd.xlane.f32.xlu0 %v10453_v29  ;;  %v10383_v11 = vsub.f32 %v18591_v26, %v10335_v38 }
 0xcbd   : > { %10621 = vrot.lane.b32.xlu1 %v19653_v53, %s15732_s26 }
 0xcbe   : > { %v10413_v15 = vmul.f32 1.442695, %v10383_v11  ;;  %v19658_v11 = vld [vmem:[#allocation79_spill] sm:$0xff] }
 0xcc0   : > { %15258 = vpow2.f32 %v10413_v15 }
 0xcc2   : > { %v18687_v45 = vpop.eup %15256 }
 0xcc3   : > { %v10459_v30 = vsel %vm2400_vm3, %v18687_v45, 0.0  ;;  %v10341_v22 = vpop.xlane.xlu0 %10340 }
 0xcc4   : > { %10460 = vadd.xlane.f32.xlu0 %v10459_v30  ;;  %v10385_v42 = vsub.f32 %v18600_v8, %v10341_v22 }
 0xcc6   : > { %v10417_v38 = vmul.f32 1.442695, %v10385_v42 }
 0xcc8   : > { %15260 = vpow2.f32 %v10417_v38 }
 0xcca   : > { %v18700_v21 = vpop.eup %15258 }
 0xccb   : > { %v18692_v41 = vpop.xlane.xlu0 %10346  ;;  %v10465_v49 = vsel %vm2400_vm3, %v18700_v21, 0.0 }
 0xcd3   : > { %v18694_v0 = vpop.xlane.xlu0 %10352 }
 0xcdb   : > { %v18696_v44 = vpop.xlane.xlu0 %10358 }
 0xcdc   : > { %v10391_v27 = vsub.f32 %v18627_v35, %v18696_v44 }
 0xce0   : > { %v9196_v20 = vpop.f32.mrb[40].mxu0 }
 0xce1   : > { %v18705_v26 = vadd.f32 %v9196_v20, %v19654_v28  ;;  %v14469_v39 = vpop.f32.mrb[41].mxu0  ;;  %10466 = vadd.xlane.f32.xlu1 %v10465_v49  ;;  %v19659_v20 = vld [vmem:[#allocation81_spill] sm:$0xff]  ;;  %v19660_v28 = vld [vmem:[#allocation83_spill] sm:$0xff] }
 0xce2   : > { %v9199_v48 = vpop.f32.mrb[42].mxu0 }
 0xce3   : > { %v18708_v54 = vadd.f32 %v9199_v48, %v19655_v19  ;;  %v14470_v12 = vpop.f32.mrb[43].mxu0  ;;  %v18710_v32 = vpop.xlane.xlu0 %10364  ;;  %v19661_v48 = vld [vmem:[#allocation45_spill] sm:$0xff] }
 0xce4   : > { %v10393_v24 = vsub.f32 %v18642_v7, %v18710_v32  ;;  %v18741_v12 = vpop.eup %15260 }
 0xce8   : > { %v18714_v36 = vpop.f32.mrb[44].mxu0 }
 0xce9   : > { %v14493_v50 = vpop.f32.mrb[45].mxu0  ;;  %v10318_v1 = vsel %vm2400_vm3, %v18714_v36, -inf }
 0xcea   : > { %v9406_v34 = vpop.f32.mrb[46].mxu0  ;;  %10319 = vmax.xlane.f32.xlu0 %v10318_v1 }
 0xceb   : > { %v14494_v5 = vpop.f32.mrb[47].mxu0  ;;  %v10471_v34 = vsel %vm2400_vm3, %v18741_v12, 0.0 }
 0xcf0   : > { %v18718_v14 = vpop.f32.mrb[48].mxu0 }
 0xcf1   : > { %v14505_v57 = vpop.f32.mrb[49].mxu0  ;;  %v10324_v35 = vsel %vm2400_vm3, %v18718_v14, -inf }
 0xcf2   : > { %v9506_v16 = vpop.f32.mrb[50].mxu0  ;;  %10717 = vrot.lane.b32.xlu1 %v19656_v47, %s15732_s26 }
 0xcf3   : > { %v14506_v9 = vpop.f32.mrb[51].mxu0 }
 0xcf8   : > { %v18722_v23 = vpop.f32.mrb[52].mxu0 }
 0xcf9   : > { %v14517_v63 = vpop.f32.mrb[53].mxu0  ;;  %v10330_v44 = vsel %vm2400_vm3, %v18722_v23, -inf }
 0xcfa   : > { %v9606_v61 = vpop.f32.mrb[54].mxu0 }
 0xcfb   : > { %v14518_v56 = vpop.f32.mrb[55].mxu0 }
 0xcfc   : > { %v19662_v56 = vld [vmem:[#allocation82_spill] sm:$0xff] }
 0xd00   : > { %v18725_v62 = vpop.f32.mrb[56].mxu0  ;;  %10573 = vrot.lane.b32.xlu0 %v19657_v2, %s15732_s26 }
 0xd01   : > { %v14529_v29 = vpop.f32.mrb[57].mxu0 }
 0xd02   : > { %v9706_v53 = vpop.f32.mrb[58].mxu0 }
 0xd03   : > { %v14530_v30 = vpop.f32.mrb[59].mxu0 }
 0xd04   : > { %10669 = vrot.lane.b32.xlu0 %v19658_v11, %s15732_s26 }
 0xd08   : > { %v18731_v15 = vpop.f32.mrb[60].mxu0  ;;  %10765 = vrot.lane.b32.xlu0 %v19659_v20, %s15732_s26 }
 0xd09   : > { %v14541_v49 = vpop.f32.mrb[61].mxu0 }
 0xd0a   : > { %v9806_v8 = vpop.f32.mrb[62].mxu0 }
 0xd0b   : > { %v14542_v22 = vpop.f32.mrb[63].mxu0 }
 0xd0c   : > { %10861 = vrot.lane.b32.xlu0 %v19660_v28, %s15732_s26 }
 0xd10   : > { %v18737_v39 = vpop.f32.mrb[64].mxu0  ;;  %10957 = vrot.lane.b32.xlu0 %v19661_v48, %s15732_s26 }
 0xd11   : > { %v14553_v19 = vpop.f32.mrb[65].mxu0 }
 0xd12   : > { %v9906_v50 = vpop.f32.mrb[66].mxu0 }
 0xd13   : > { %v14554_v1 = vpop.f32.mrb[67].mxu0 }
 0xd14   : > { %11053 = vrot.lane.b32.xlu0 %v19617_v52, %s15732_s26  ;;  %v18775_v1 = vpop.xlane.xlu0 %10370 }
 0xd16   : > { %10472 = vadd.xlane.f32.xlu1 %v10471_v34 }
 0xd18   : > { %v18747_v5 = vpop.f32.mrb[68].mxu0  ;;  %11149 = vrot.lane.b32.xlu0 %v19618_v10, %s15732_s26 }
 0xd19   : > { %v14565_v57 = vpop.f32.mrb[69].mxu0 }
 0xd1a   : > { %v10006_v16 = vpop.f32.mrb[70].mxu0 }
 0xd1b   : > { %v14566_v47 = vpop.f32.mrb[71].mxu0 }
 0xd1c   : > { %11245 = vrot.lane.b32.xlu0 %v19619_v17, %s15732_s26  ;;  %v10387_v17 = vsub.f32 %v18609_v58, %v18692_v41  ;;  %v19663_v41 = vld [vmem:[#allocation84_spill] sm:$0xff] }
 0xd1e   : > { %v10421_v20 = vmul.f32 1.442695, %v10387_v17 }
 0xd20   : > { %v18753_v9 = vpop.f32.mrb[72].mxu0 }
 0xd21   : > { %v14577_v63 = vpop.f32.mrb[73].mxu0  ;;  %v10360_v7 = vsel %vm2400_vm3, %v18753_v9, -inf }
 0xd22   : > { %v10106_v61 = vpop.f32.mrb[74].mxu0 }
 0xd23   : > { %v14578_v52 = vpop.f32.mrb[75].mxu0 }
 0xd27   : > { %10813 = vrot.lane.b32.xlu1 %v19662_v56, %s15732_s26 }
 0xd28   : > { %v18757_v42 = vpop.f32.mrb[76].mxu0 }
 0xd29   : > { %v14589_v2 = vpop.f32.mrb[77].mxu0 }
 0xd2a   : > { %v10206_v29 = vpop.f32.mrb[78].mxu0 }
 0xd2b   : > { %v14590_v53 = vpop.f32.mrb[79].mxu0 }
 0xd30   : > { %v18759_v10 = vpop.f32.mrb[80].mxu0 }
 0xd31   : > { %v14601_v30 = vpop.f32.mrb[81].mxu0  ;;  %v10443_v34 = vpop.xlane.xlu0 %10442 }
 0xd32   : > { %v10306_v38 = vpop.f32.mrb[82].mxu0 }
 0xd33   : > { %v14602_v11 = vpop.f32.mrb[83].mxu0 }
 0xd39   : > { %v10446_v49 = vpop.xlane.xlu1 %10445 }
 0xd3a   : > { %15262 = vrcp.f32 %v10446_v49 }
 0xd3b   : > { %15264 = vpow2.f32 %v10421_v20 }
 0xd3c   : > { %15266 = vrcp.f32 %v10443_v34 }
 0xd3d   : > { %v10622_v8 = vpop.permute.xlu1 %10621 }
 0xd3e   : > { %v10627_v22 = vsel %vm2669_vm2, %v10622_v8, 0 }
 0xd3f   : > { %14610 = vmatpush3.bf16.msra.mxu0 %v10627_v22 }
 0xd40   : > { %14621 = vmatprep.subr.bf16.mxu0 %v19508_v59 }
 0xd41   : > { %v10449_v57 = vpop.xlane.xlu0 %10448 }
 0xd44   : > { %v15263_v28 = vpop.eup %15262 }
 0xd45   : > { %v10530_v48 = vmul.f32 %v15263_v28, %v18671_v55  ;;  %v18766_v19 = vpop.eup %15264  ;;  %v10389_v55 = vsub.f32 %v18618_v60, %v18694_v0 }
 0xd46   : > { %v10477_v58 = vsel %vm2400_vm3, %v18766_v19, 0.0  ;;  %v15267_v2 = vpop.eup %15266 }
 0xd47   : > { %v10552_v50 = vpack.c.bf16 %v10530_v48, %v10530_v48  ;;  %v10425_v16 = vmul.f32 1.442695, %v10389_v55  ;;  %v10529_v0 = vmul.f32 %v15267_v2, %v18666_v51 }
 0xd49   : > { %14612 = vmatmul.mubr.msk.bf16.vlgmr.msra.gmra.mrb[84].mxu0 %vm2665_vm4, %v10552_v50  ;;  %v10455_v63 = vpop.xlane.xlu0 %10454  ;;  %15268 = vpow2.f32 %v10425_v16  ;;  %v10551_v11 = vpack.c.bf16 %v10529_v0, %v10529_v0  ;;  %v10429_v0 = vmul.f32 1.442695, %v10391_v27  ;;  %v10336_v27 = vsel %vm2400_vm3, %v18725_v62, -inf }
 0xd4a   : > { %14623 = vmatprep.mubr.msk.bf16.mxu0 %vm15728_vm0, %v19508_v59  ;;  %15270 = vrcp.f32 %v10449_v57  ;;  %v19664_v57 = vld [vmem:[#allocation85_spill] sm:$0xff] }
 0xd4b   : > { %10478 = vadd.xlane.f32.xlu1 %v10477_v58  ;;  %15272 = vrcp.f32 %v10455_v63 }
 0xd51   : > { %v10461_v52 = vpop.xlane.xlu0 %10460 }
 0xd52   : > { %15274 = vrcp.f32 %v10461_v52 }
 0xd53   : > { %v18786_v30 = vpop.eup %15268 }
 0xd54   : > { %v15271_v17 = vpop.eup %15270  ;;  %v10483_v49 = vsel %vm2400_vm3, %v18786_v30, 0.0 }
 0xd55   : > { %v10531_v51 = vmul.f32 %v15271_v17, %v18676_v37  ;;  %v15273_v48 = vpop.eup %15272 }
 0xd56   : > { %v10533_v58 = vmul.f32 %v15273_v48, %v18681_v46 }
 0xd57   : > { %v10553_v28 = vpack.c.bf16 %v10531_v51, %v10531_v51 }
 0xd5c   : > { %10909 = vrot.lane.b32.xlu1 %v19663_v41, %s15732_s26  ;;  %v10555_v41 = vpack.c.bf16 %v10533_v58, %v10533_v58  ;;  %v15275_v34 = vpop.eup %15274 }
 0xd5d   : > { %v10535_v16 = vmul.f32 %v15275_v34, %v18687_v45  ;;  %v10433_v34 = vmul.f32 1.442695, %v10393_v24  ;;  %v10366_v24 = vsel %vm2400_vm3, %v18757_v42, -inf }
 0xd6e   : > { %v10467_v47 = vpop.xlane.xlu1 %10466 }
 0xd6f   : > { %15276 = vrcp.f32 %v10467_v47  ;;  %v10557_v47 = vpack.c.bf16 %v10535_v16, %v10535_v16 }
 0xd72   : > { %v10718_v61 = vpop.permute.xlu1 %10717 }
 0xd73   : > { %v10723_v56 = vsel %vm2669_vm2, %v10718_v61, 0 }
 0xd74   : > { %14622 = vmatpush3.bf16.msra.mxu0 %v10723_v56 }
 0xd75   : > { %14633 = vmatprep.subr.bf16.mxu0 %v19508_v59 }
 0xd77   : > { %v18781_v29 = vpop.xlane.xlu0 %10319 }
 0xd78   : > { %v10378_v60 = vsub.f32 %v18714_v36, %v18781_v29  ;;  %v10372_v36 = vsel %vm2400_vm3, %v18759_v10, -inf }
 0xd79   : > { %v15277_v63 = vpop.eup %15276 }
 0xd7a   : > { %v10537_v52 = vmul.f32 %v15277_v63, %v18700_v21  ;;  %v10403_v16 = vmul.f32 1.442695, %v10378_v60 }
 0xd7b   : > { %v10574_v53 = vpop.permute.xlu0 %10573 }
 0xd7c   : > { %v10579_v38 = vsel %vm2669_vm2, %v10574_v53, 0  ;;  %v10559_v56 = vpack.c.bf16 %v10537_v52, %v10537_v52 }
 0xd7d   : > { %14604 = vmatpush3.bf16.msra.mxu1 %v10579_v38 }
 0xd7e   : > { %14615 = vmatprep.subr.bf16.mxu1 %v19508_v59 }
 0xd7f   : > { %v10670_v20 = vpop.permute.xlu0 %10669 }
 0xd80   : > { %v10675_v8 = vsel %vm2669_vm2, %v10670_v20, 0  ;;  %10484 = vadd.xlane.f32.xlu1 %v10483_v49  ;;  %14606 = vmatmul.mubr.msk.bf16.vlgmr.msra.gmra.mrb[80].mxu1 %vm2665_vm4, %v10551_v11 }
 0xd81   : > { %14616 = vmatpush3.bf16.msra.mxu1 %v10675_v8  ;;  %14617 = vmatprep.mubr.msk.bf16.mxu1 %vm15728_vm0, %v19508_v59 }
 0xd82   : > { %14627 = vmatprep.subr.bf16.mxu1 %v19508_v59 }
 0xd83   : > { %v10766_v22 = vpop.permute.xlu0 %10765 }
 0xd84   : > { %v10771_v50 = vsel %vm2669_vm2, %v10766_v22, 0  ;;  %v19665_v22 = vld [vmem:[#allocation87_spill] sm:$0xff] }
 0xd87   : > { %v10862_v37 = vpop.permute.xlu0 %10861 }
 0xd88   : > { %14618 = vmatmul.mubr.msk.bf16.vlgmr.msra.gmra.mrb[84].mxu1 %vm2665_vm4, %v10553_v28  ;;  %v10867_v55 = vsel %vm2669_vm2, %v10862_v37, 0 }
 0xd89   : > { %14628 = vmatpush3.bf16.msra.mxu1 %v10771_v50  ;;  %14629 = vmatprep.mubr.msk.bf16.mxu1 %vm15728_vm0, %v19508_v59 }
 0xd8a   : > { %14639 = vmatprep.subr.bf16.mxu1 %v19508_v59 }
 0xd8b   : > { %v10958_v46 = vpop.permute.xlu0 %10957 }
 0xd8c   : > { %v10963_v61 = vsel %vm2669_vm2, %v10958_v46, 0  ;;  %v10354_v46 = vsel %vm2400_vm3, %v18747_v5, -inf }
 0xd8f   : > { %v11054_v45 = vpop.permute.xlu0 %11053 }
 0xd90   : > { %14630 = vmatmul.mubr.msk.bf16.vlgmr.msra.gmra.mrb[88].mxu1 %vm2665_vm4, %v10555_v41  ;;  %v11059_v2 = vsel %vm2669_vm2, %v11054_v45, 0 }
 0xd91   : > { %14640 = vmatpush3.bf16.msra.mxu1 %v10867_v55  ;;  %11005 = vrot.lane.b32.xlu1 %v19664_v57, %s15732_s26 }
 0xd92   : > { %14641 = vmatprep.mubr.msk.bf16.mxu1 %vm15728_vm0, %v19508_v59  ;;  %14651 = vmatprep.subr.bf16.mxu1 %v19508_v59 }
 0xd93   : > { %v11150_v11 = vpop.permute.xlu0 %11149 }
 0xd94   : > { %v11155_v49 = vsel %vm2669_vm2, %v11150_v11, 0 }
 0xd97   : > { %v11246_v58 = vpop.permute.xlu0 %11245 }
 0xd98   : > { %14642 = vmatmul.mubr.msk.bf16.vlgmr.msra.gmra.mrb[92].mxu1 %vm2665_vm4, %v10557_v47  ;;  %v11251_v41 = vsel %vm2669_vm2, %v11246_v58, 0 }
 0xd99   : > { %14652 = vmatpush3.bf16.msra.mxu1 %v10963_v61  ;;  %14653 = vmatprep.mubr.msk.bf16.mxu1 %vm15728_vm0, %v19508_v59 }
 0xd9a   : > { %14663 = vmatprep.subr.bf16.mxu1 %v19508_v59 }
 0xda0   : > { %14654 = vmatmul.mubr.msk.bf16.vlgmr.msra.gmra.mrb[96].mxu1 %vm2665_vm4, %v10559_v56 }
 0xda1   : > { %14664 = vmatpush3.bf16.msra.mxu1 %v11059_v2  ;;  %14665 = vmatprep.mubr.msk.bf16.mxu1 %vm15728_vm0, %v19508_v59 }
 0xda2   : > { %14675 = vmatprep.subr.bf16.mxu1 %v19508_v59 }
 0xda3   : > { %v10473_v53 = vpop.xlane.xlu1 %10472 }
 0xda4   : > { %15278 = vrcp.f32 %v10473_v53 }
 0xda5   : > { %15280 = vpow2.f32 %v10429_v0 }
 0xda7   : > { %v18844_v51 = vpop.permute.xlu1 %10813 }
 0xdae   : > { %v15279_v21 = vpop.eup %15278 }
 0xdaf   : > { %v10539_v38 = vmul.f32 %v15279_v21, %v18741_v12  ;;  %v18827_v17 = vpop.eup %15280  ;;  %v10342_v12 = vsel %vm2400_vm3, %v18731_v15, -inf }
 0xdb0   : > { %v10489_v8 = vsel %vm2400_vm3, %v18827_v17, 0.0 }
 0xdb1   : > { %v10561_v20 = vpack.c.bf16 %v10539_v38, %v10539_v38 }
 0xdb3   : > { %14666 = vmatmul.mubr.msk.bf16.vlgmr.msra.gmra.mrb[100].mxu1 %vm2665_vm4, %v10561_v20 }
 0xdb4   : > { %14676 = vmatpush3.bf16.msra.mxu1 %v11155_v49  ;;  %14677 = vmatprep.mubr.msk.bf16.mxu1 %vm15728_vm0, %v19508_v59 }
 0xdb5   : > { %10490 = vadd.xlane.f32.xlu1 %v10489_v8  ;;  %14687 = vmatprep.subr.bf16.mxu1 %v19508_v59 }
 0xdb9   : > { %10325 = vmax.xlane.f32.xlu1 %v10324_v35 }
 0xdbd   : > { %10331 = vmax.xlane.f32.xlu1 %v10330_v44 }
 0xdc1   : > { %10337 = vmax.xlane.f32.xlu1 %v10336_v27 }
 0xdc5   : > { %10343 = vmax.xlane.f32.xlu1 %v10342_v12 }
 0xdd6   : > { %11101 = vrot.lane.b32.xlu1 %v19665_v22, %s15732_s26 }
 0xdd8   : > { %v10479_v28 = vpop.xlane.xlu1 %10478 }
 0xdd9   : > { %15282 = vrcp.f32 %v10479_v28 }
 0xdda   : > { %15284 = vpow2.f32 %v10433_v34 }
 0xddb   : > { %15286 = vpow2.f32 %v10403_v16 }
 0xddc   : > { %v18870_v32 = vpop.permute.xlu1 %10909 }
 0xde3   : > { %v15283_v48 = vpop.eup %15282 }
 0xde4   : > { %v10541_v50 = vmul.f32 %v15283_v48, %v18766_v19  ;;  %v10348_v19 = vsel %vm2400_vm3, %v18737_v39, -inf  ;;  %v18859_v55 = vpop.eup %15284 }
 0xde5   : > { %v10495_v57 = vsel %vm2400_vm3, %v18859_v55, 0.0  ;;  %v18876_v29 = vpop.eup %15286 }
 0xde6   : > { %v10563_v37 = vpack.c.bf16 %v10541_v50, %v10541_v50  ;;  %v10450_v60 = vsel %vm2400_vm3, %v18876_v29, 0.0 }
 0xde8   : > { %14678 = vmatmul.mubr.msk.bf16.vlgmr.msra.gmra.mrb[104].mxu1 %vm2665_vm4, %v10563_v37 }
 0xde9   : > { %14688 = vmatpush3.bf16.msra.mxu1 %v11251_v41  ;;  %14689 = vmatprep.mubr.msk.bf16.mxu1 %vm15728_vm0, %v19508_v59 }
 0xdea   : > { %14699 = vmatprep.subr.bf16.mxu1 %v19508_v59 }
 0xdfa   : > { %10349 = vmax.xlane.f32.xlu1 %v10348_v19 }
 0xdfe   : > { %10496 = vadd.xlane.f32.xlu1 %v10495_v57 }
 0xe02   : > { %10355 = vmax.xlane.f32.xlu1 %v10354_v46 }
 0xe06   : > { %10361 = vmax.xlane.f32.xlu1 %v10360_v7 }
 0xe0a   : > { %10367 = vmax.xlane.f32.xlu1 %v10366_v24 }
 0xe0d   : > { %v10485_v47 = vpop.xlane.xlu1 %10484 }
 0xe0e   : > { %15288 = vrcp.f32 %v10485_v47  ;;  %10373 = vmax.xlane.f32.xlu1 %v10372_v36 }
 0xe11   : > { %v18886_v53 = vpop.permute.xlu1 %11005 }
 0xe12   : > { %10451 = vadd.xlane.f32.xlu1 %v10450_v60 }
 0xe18   : > { %v15289_v63 = vpop.eup %15288 }
 0xe19   : > { %v10543_v61 = vmul.f32 %v15289_v63, %v18786_v30 }
 0xe1b   : > { %v10565_v52 = vpack.c.bf16 %v10543_v61, %v10543_v61 }
 0xe1c   : > { %v18881_v45 = vpop.f32.mrb[84].mxu0 }
 0xe1d   : > { %v14613_v56 = vpop.f32.mrb[85].mxu0  ;;  %14690 = vmatmul.mubr.msk.bf16.vlgmr.msra.gmra.mrb[108].mxu1 %vm2665_vm4, %v10565_v52 }
 0xe1e   : > { %v10666_v2 = vpop.f32.mrb[86].mxu0  ;;  %14701 = vmatprep.mubr.msk.bf16.mxu1 %vm15728_vm0, %v19508_v59  ;;  %v19666_v56 = vld [vmem:[#allocation88_spill] sm:$0xff] }
 0xe1f   : > { %v14614_v0 = vpop.f32.mrb[87].mxu0 }
 0xe42   : > { %v18888_v21 = vpop.xlane.xlu1 %10490 }
 0xe46   : > { %v10326_v38 = vpop.xlane.xlu1 %10325 }
 0xe47   : > { %v10380_v11 = vsub.f32 %v18718_v14, %v10326_v38 }
 0xe49   : > { %v10407_v20 = vmul.f32 1.442695, %v10380_v11 }
 0xe4a   : > { %v10332_v30 = vpop.xlane.xlu1 %10331 }
 0xe4b   : > { %15290 = vpow2.f32 %v10407_v20  ;;  %v10382_v49 = vsub.f32 %v18722_v23, %v10332_v30 }
 0xe4d   : > { %v10411_v8 = vmul.f32 1.442695, %v10382_v49 }
 0xe4e   : > { %v10338_v35 = vpop.xlane.xlu1 %10337 }
 0xe4f   : > { %15292 = vpow2.f32 %v10411_v8  ;;  %v10384_v44 = vsub.f32 %v18725_v62, %v10338_v35  ;;  %v10395_v8 = vsub.f32 %v18651_v3, %v18775_v1 }
 0xe51   : > { %v10415_v27 = vmul.f32 1.442695, %v10384_v44  ;;  %v10437_v35 = vmul.f32 1.442695, %v10395_v8 }
 0xe52   : > { %v10344_v12 = vpop.xlane.xlu1 %10343 }
 0xe53   : > { %15294 = vpow2.f32 %v10415_v27  ;;  %v10386_v22 = vsub.f32 %v18731_v15, %v10344_v12  ;;  %v18894_v28 = vpop.f32.mrb[80].mxu1 }
 0xe54   : > { %v11651_v14 = vcombine.low %v18894_v28, %v18881_v45  ;;  %v14607_v48 = vpop.f32.mrb[81].mxu1 }
 0xe55   : > { %v18898_v50 = vpop.eup %15290  ;;  %v10419_v58 = vmul.f32 1.442695, %v10386_v22  ;;  %v10618_v23 = vpop.f32.mrb[82].mxu1 }
 0xe56   : > { %v14608_v37 = vpop.f32.mrb[83].mxu1  ;;  %v10456_v41 = vsel %vm2400_vm3, %v18898_v50, 0.0  ;;  %v18926_v44 = vpop.permute.xlu1 %11101 }
 0xe57   : > { %15296 = vpow2.f32 %v10419_v58  ;;  %10457 = vadd.xlane.f32.xlu1 %v10456_v41 }
 0xe58   : > { %15298 = vpow2.f32 %v10437_v35 }
 0xe59   : > { %v18902_v62 = vpop.eup %15292 }
 0xe5a   : > { %v10462_v15 = vsel %vm2400_vm3, %v18902_v62, 0.0 }
 0xe5b   : > { %10463 = vadd.xlane.f32.xlu1 %v10462_v15  ;;  %v18906_v34 = vpop.f32.mrb[84].mxu1 }
 0xe5c   : > { %v14619_v19 = vpop.f32.mrb[85].mxu1 }
 0xe5d   : > { %v18908_v57 = vpop.eup %15294  ;;  %v10714_v16 = vpop.f32.mrb[86].mxu1 }
 0xe5e   : > { %v14620_v46 = vpop.f32.mrb[87].mxu1  ;;  %v10468_v7 = vsel %vm2400_vm3, %v18908_v57, 0.0 }
 0xe5f   : > { %10469 = vadd.xlane.f32.xlu0 %v10468_v7 }
 0xe61   : > { %v18912_v24 = vpop.eup %15296 }
 0xe62   : > { %v10474_v47 = vsel %vm2400_vm3, %v18912_v24, 0.0  ;;  %v18933_v15 = vpop.eup %15298 }
 0xe63   : > { %10475 = vadd.xlane.f32.xlu0 %v10474_v47  ;;  %v18916_v36 = vpop.f32.mrb[88].mxu1  ;;  %v10501_v3 = vsel %vm2400_vm3, %v18933_v15, 0.0 }
 0xe64   : > { %v14631_v60 = vpop.f32.mrb[89].mxu1 }
 0xe65   : > { %v10810_v63 = vpop.f32.mrb[90].mxu1 }
 0xe66   : > { %v14632_v61 = vpop.f32.mrb[91].mxu1 }
 0xe6b   : > { %v18918_v52 = vpop.f32.mrb[92].mxu1 }
 0xe6c   : > { %11197 = vrot.lane.b32.xlu1 %v19666_v56, %s15732_s26  ;;  %v14643_v2 = vpop.f32.mrb[93].mxu1 }
 0xe6d   : > { %v10906_v0 = vpop.f32.mrb[94].mxu1 }
 0xe6e   : > { %v14644_v38 = vpop.f32.mrb[95].mxu1 }
 0xe73   : > { %v18922_v11 = vpop.f32.mrb[96].mxu1 }
 0xe74   : > { %v14655_v20 = vpop.f32.mrb[97].mxu1 }
 0xe75   : > { %v11002_v30 = vpop.f32.mrb[98].mxu1  ;;  %v19668_v20 = vld [vmem:[#allocation50_spill] sm:$0xff] }
 0xe76   : > { %v14656_v49 = vpop.f32.mrb[99].mxu1  ;;  %v19669_v30 = vld [vmem:[#allocation91_spill] sm:$0xff] }
 0xe86   : > { %v18928_v27 = vpop.f32.mrb[100].mxu1 }
 0xe87   : > { %v10350_v12 = vpop.xlane.xlu1 %10349  ;;  %v14667_v22 = vpop.f32.mrb[101].mxu1 }
 0xe88   : > { %v10388_v48 = vsub.f32 %v18737_v39, %v10350_v12  ;;  %v11098_v58 = vpop.f32.mrb[102].mxu1  ;;  %v10819_v12 = vsel %vm2669_vm2, %v18844_v51, 0 }
 0xe89   : > { %v14668_v23 = vpop.f32.mrb[103].mxu1 }
 0xe8a   : > { %v10423_v37 = vmul.f32 1.442695, %v10388_v48 }
 0xe8b   : > { %v18931_v41 = vpop.xlane.xlu1 %10496 }
 0xe8c   : > { %15300 = vpow2.f32 %v10423_v37 }
 0xe8f   : > { %v10356_v19 = vpop.xlane.xlu1 %10355 }
 0xe90   : > { %v10390_v1 = vsub.f32 %v18747_v5, %v10356_v19  ;;  %10502 = vadd.xlane.f32.xlu1 %v10501_v3 }
 0xe92   : > { %v10427_v16 = vmul.f32 1.442695, %v10390_v1 }
 0xe93   : > { %v10362_v46 = vpop.xlane.xlu1 %10361 }
 0xe94   : > { %15302 = vpow2.f32 %v10427_v16  ;;  %v10392_v39 = vsub.f32 %v18753_v9, %v10362_v46  ;;  %v19667_v9 = vld [vmem:[#allocation90_spill] sm:$0xff] }
 0xe96   : > { %v18939_v7 = vpop.eup %15300  ;;  %v10431_v47 = vmul.f32 1.442695, %v10392_v39 }
 0xe97   : > { %v10368_v60 = vpop.xlane.xlu1 %10367  ;;  %v10480_v63 = vsel %vm2400_vm3, %v18939_v7, 0.0 }
 0xe98   : > { %15304 = vpow2.f32 %v10431_v47  ;;  %10481 = vadd.xlane.f32.xlu0 %v10480_v63  ;;  %v10394_v51 = vsub.f32 %v18757_v42, %v10368_v60 }
 0xe9a   : > { %v10435_v58 = vmul.f32 1.442695, %v10394_v51 }
 0xe9b   : > { %v10374_v61 = vpop.xlane.xlu1 %10373 }
 0xe9c   : > { %v10396_v23 = vsub.f32 %v18759_v10, %v10374_v61 }
 0xe9e   : > { %v18943_v56 = vpop.eup %15302 }
 0xe9f   : > { %v10452_v2 = vpop.xlane.xlu1 %10451  ;;  %v10486_v5 = vsel %vm2400_vm3, %v18943_v56, 0.0 }
 0xea0   : > { %10487 = vadd.xlane.f32.xlu0 %v10486_v5  ;;  %15306 = vrcp.f32 %v10452_v2  ;;  %v10915_v5 = vsel %vm2669_vm2, %v18870_v32, 0 }
 0xea1   : > { %11293 = vrot.lane.b32.xlu1 %v19667_v9, %s15732_s26  ;;  %15308 = vpow2.f32 %v10435_v58 }
 0xea2   : > { %v18949_v0 = vpop.eup %15304 }
 0xea3   : > { %v10492_v38 = vsel %vm2400_vm3, %v18949_v0, 0.0 }
 0xea4   : > { %10493 = vadd.xlane.f32.xlu0 %v10492_v38 }
 0xea5   : > { %11341 = vrot.lane.b32.xlu1 %v19668_v20, %s15732_s26 }
 0xea9   : > { %11389 = vrot.lane.b32.xlu1 %v19669_v30, %s15732_s26 }
 0xeaa   : > { %v15307_v49 = vpop.eup %15306 }
 0xeab   : > { %v10532_v8 = vmul.f32 %v15307_v49, %v18876_v29  ;;  %v18974_v37 = vpop.eup %15308  ;;  %v11107_v49 = vsel %vm2669_vm2, %v18926_v44, 0 }
 0xeac   : > { %v10498_v19 = vsel %vm2400_vm3, %v18974_v37, 0.0 }
 0xead   : > { %11485 = vrot.lane.b32.xlu1 %v17090_v4, %s15732_s26  ;;  %v10554_v35 = vpack.c.bf16 %v10532_v8, %v10532_v8 }
 0xeaf   : > { %14624 = vmatmul.mubr.msk.bf16.vlgmr.msra.gmra.mrb[88].mxu0 %vm2665_vm4, %v10554_v35 }
 0xeb0   : > { %14634 = vmatpush3.bf16.msra.mxu0 %v10819_v12  ;;  %14635 = vmatprep.mubr.msk.bf16.mxu0 %vm15728_vm0, %v19508_v59 }
 0xeb1   : > { %11581 = vrot.lane.b32.xlu1 %v17114_v13, %s15732_s26  ;;  %14645 = vmatprep.subr.bf16.mxu0 %v19508_v59  ;;  %v10439_v13 = vmul.f32 1.442695, %v10396_v23 }
 0xeb3   : > { %15310 = vpow2.f32 %v10439_v13 }
 0xeba   : > { %11437 = vrot.lane.b32.xlu0 %v17078_v33, %s15732_s26 }
 0xebb   : > { %v18970_v29 = vpop.f32.mrb[104].mxu1 }
 0xebc   : > { %v14679_v4 = vpop.f32.mrb[105].mxu1 }
 0xebd   : > { %v11194_v22 = vpop.f32.mrb[106].mxu1  ;;  %v18978_v3 = vpop.eup %15310 }
 0xebe   : > { %v14680_v48 = vpop.f32.mrb[107].mxu1  ;;  %v10504_v33 = vsel %vm2400_vm3, %v18978_v3, 0.0 }
 0xed9   : > { %10499 = vadd.xlane.f32.xlu0 %v10498_v19 }
 0xedd   : > { %10505 = vadd.xlane.f32.xlu0 %v10504_v33 }
 0xee4   : > { %v10458_v1 = vpop.xlane.xlu1 %10457 }
 0xee5   : > { %15312 = vrcp.f32 %v10458_v1 }
 0xee8   : > { %v10464_v42 = vpop.xlane.xlu1 %10463 }
 0xee9   : > { %15314 = vrcp.f32 %v10464_v42 }
 0xeec   : > { %v10470_v10 = vpop.xlane.xlu0 %10469  ;;  %v11198_v8 = vpop.permute.xlu1 %11197 }
 0xeed   : > { %15316 = vrcp.f32 %v10470_v10 }
 0xeef   : > { %v15313_v16 = vpop.eup %15312 }
 0xef0   : > { %v10534_v46 = vmul.f32 %v15313_v16, %v18898_v50  ;;  %v18983_v39 = vpop.f32.mrb[108].mxu1  ;;  %v10476_v9 = vpop.xlane.xlu0 %10475 }
 0xef1   : > { %v14691_v47 = vpop.f32.mrb[109].mxu1  ;;  %15318 = vrcp.f32 %v10476_v9 }
 0xef2   : > { %v10556_v60 = vpack.c.bf16 %v10534_v46, %v10534_v46  ;;  %v11290_v63 = vpop.f32.mrb[110].mxu1  ;;  %15320 = vrcp.f32 %v18888_v21 }
 0xef3   : > { %v15315_v61 = vpop.eup %15314  ;;  %11533 = vrot.lane.b32.xlu0 %v17102_v6, %s15732_s26  ;;  %v14692_v2 = vpop.f32.mrb[111].mxu1  ;;  %v11011_v6 = vsel %vm2669_vm2, %v18886_v53, 0 }
 0xef4   : > { %14636 = vmatmul.mubr.msk.bf16.vlgmr.msra.gmra.mrb[92].mxu0 %vm2665_vm4, %v10556_v60  ;;  %v10536_v50 = vmul.f32 %v15315_v61, %v18902_v62 }
 0xef5   : > { %14646 = vmatpush3.bf16.msra.mxu0 %v10915_v5  ;;  %14647 = vmatprep.mubr.msk.bf16.mxu0 %vm15728_vm0, %v19508_v59 }
 0xef6   : > { %14657 = vmatprep.subr.bf16.mxu0 %v19508_v59  ;;  %v10558_v38 = vpack.c.bf16 %v10536_v50, %v10536_v50 }
 0xef7   : > { %v15317_v20 = vpop.eup %15316 }
 0xef8   : > { %v10538_v32 = vmul.f32 %v15317_v20, %v18908_v57  ;;  %v11203_v57 = vsel %vm2669_vm2, %v11198_v8, 0 }
 0xefa   : > { %v10560_v62 = vpack.c.bf16 %v10538_v32, %v10538_v32  ;;  %v14942_v32 = vld [vmem:[%s16152_s19 + $0x30] sm:$0xff]  }
 0xefb   : > { %v15319_v30 = vpop.eup %15318 }
 0xefc   : > { %14648 = vmatmul.mubr.msk.bf16.vlgmr.msra.gmra.mrb[96].mxu0 %vm2665_vm4, %v10558_v38  ;;  %v10540_v53 = vmul.f32 %v15319_v30, %v18912_v24  ;;  %v15321_v12 = vpop.eup %15320 }
 0xefd   : > { %14658 = vmatpush3.bf16.msra.mxu0 %v11011_v6  ;;  %14659 = vmatprep.mubr.msk.bf16.mxu0 %vm15728_vm0, %v19508_v59  ;;  %v10545_v24 = vmul.f32 %v15321_v12, %v18827_v17  ;;  %v19670_v12 = vmov 0  }
 0xefe   : > { %14669 = vmatprep.subr.bf16.mxu0 %v19508_v59  ;;  %v10562_v35 = vpack.c.bf16 %v10540_v53, %v10540_v53 }
 0xeff   : > { %v10567_v58 = vpack.c.bf16 %v10545_v24, %v10545_v24 }
 0xf04   : > { %14660 = vmatmul.mubr.msk.bf16.vlgmr.msra.gmra.mrb[100].mxu0 %vm2665_vm4, %v10560_v62 }
 0xf05   : > { %14670 = vmatpush3.bf16.msra.mxu0 %v11107_v49  ;;  %14671 = vmatprep.mubr.msk.bf16.mxu0 %vm15728_vm0, %v19508_v59 }
 0xf06   : > { %14681 = vmatprep.subr.bf16.mxu0 %v19508_v59 }
 0xf0c   : > { %14672 = vmatmul.mubr.msk.bf16.vlgmr.msra.gmra.mrb[104].mxu0 %vm2665_vm4, %v10562_v35  ;;  %v14943_v35 = vld [vmem:[%s16152_s19 + $0x38] sm:$0xff]   ;;  %s19674_s19 = sld [smem:[#allocation24_spill]] }
 0xf0d   : > { %14682 = vmatpush3.bf16.msra.mxu0 %v11203_v57  ;;  %14683 = vmatprep.mubr.msk.bf16.mxu0 %vm15728_vm0, %v19508_v59 }
 0xf0e   : > { %14693 = vmatprep.subr.bf16.mxu0 %v19508_v59 }
 0xf12   : > { %p13141_p2 = scmp.ne.s32.totalorder %s19674_s19, 1 }
 0xf13   : > { %vm15734_vm6 = vmmov (!%p13141_p2), 0   ;;  %vm12459_vm7 = vcmask (!%p13141_p2), 1045504   ;;  %s19675_s22 = sld [smem:[#allocation102_spill]] (!%p13141_p2) }
 0xf1d   : > { %v10503_v44 = vpop.xlane.xlu1 %10502 }
 0xf21   : > { %v11294_v4 = vpop.permute.xlu1 %11293 }
 0xf22   : > { %v11299_v1 = vsel %vm2669_vm2, %v11294_v4, 0 }
 0xf25   : > { %v11342_v22 = vpop.permute.xlu1 %11341  ;;  %v10482_v48 = vpop.xlane.xlu0 %10481 }
 0xf26   : > { %v11347_v51 = vsel %vm2669_vm2, %v11342_v22, 0  ;;  %15322 = vrcp.f32 %v10482_v48 }
 0xf27   : > { %15324 = vrcp.f32 %v18931_v41  ;;  %14700 = vmatpush3.bf16.msra.mxu1 %v11347_v51  ;;  %v11659_v51 = vrot.slane %v11651_v14, %v19648_v40 }
 0xf28   : > { %14711 = vmatprep.subr.bf16.mxu1 %v19508_v59 }
 0xf29   : > { %v11390_v46 = vpop.permute.xlu1 %11389 }
 0xf2a   : > { %14702 = vmatmul.mubr.msk.bf16.vlgmr.msra.gmra.mrb[112].mxu1 %vm2665_vm4, %v10567_v58  ;;  %v11395_v63 = vsel %vm2669_vm2, %v11390_v46, 0 }
 0xf2b   : > { %14713 = vmatprep.mubr.msk.bf16.mxu1 %vm15728_vm0, %v19508_v59 }
 0xf2d   : > { %v10488_v21 = vpop.xlane.xlu0 %10487 }
 0xf2e   : > { %15326 = vrcp.f32 %v10488_v21 }
 0xf30   : > { %v15323_v23 = vpop.eup %15322 }
 0xf31   : > { %v15325_v17 = vpop.eup %15324  ;;  %v10542_v13 = vmul.f32 %v15323_v23, %v18939_v7  ;;  %v10494_v19 = vpop.xlane.xlu0 %10493 }
 0xf32   : > { %15328 = vrcp.f32 %v10494_v19  ;;  %v10547_v41 = vmul.f32 %v15325_v17, %v18859_v55 }
 0xf33   : > { %v10564_v33 = vpack.c.bf16 %v10542_v13, %v10542_v13  ;;  %15330 = vrcp.f32 %v10503_v44 }
 0xf34   : > { %v10569_v16 = vpack.c.bf16 %v10547_v41, %v10547_v41 }
 0xf35   : > { %14684 = vmatmul.mubr.msk.bf16.vlgmr.msra.gmra.mrb[108].mxu0 %vm2665_vm4, %v10564_v33  ;;  %v11438_v42 = vpop.permute.xlu0 %11437 }
 0xf36   : > { %14694 = vmatpush3.bf16.msra.mxu0 %v11299_v1  ;;  %v11443_v10 = vsel %vm2669_vm2, %v11438_v42, 0  ;;  %14695 = vmatprep.mubr.msk.bf16.mxu0 %vm15728_vm0, %v19508_v59 }
 0xf37   : > { %14712 = vmatpush3.bf16.msra.mxu1 %v11443_v10  ;;  %14705 = vmatprep.subr.bf16.mxu0 %v19508_v59 }
 0xf38   : > { %v15327_v7 = vpop.eup %15326  ;;  %14723 = vmatprep.subr.bf16.mxu1 %v19508_v59 }
 0xf39   : > { %v10544_v55 = vmul.f32 %v15327_v7, %v18943_v56  ;;  %v11486_v56 = vpop.permute.xlu1 %11485 }
 0xf3a   : > { %14714 = vmatmul.mubr.msk.bf16.vlgmr.msra.gmra.mrb[116].mxu1 %vm2665_vm4, %v10569_v16  ;;  %v11491_v5 = vsel %vm2669_vm2, %v11486_v56, 0 }
 0xf3b   : > { %v10566_v47 = vpack.c.bf16 %v10544_v55, %v10544_v55  ;;  %14725 = vmatprep.mubr.msk.bf16.mxu1 %vm15728_vm0, %v19508_v59 }
 0xf3c   : > { %v15329_v60 = vpop.eup %15328 }
 0xf3d   : > { %14696 = vmatmul.mubr.msk.bf16.vlgmr.msra.gmra.mrb[112].mxu0 %vm2665_vm4, %v10566_v47  ;;  %v10546_v61 = vmul.f32 %v15329_v60, %v18949_v0  ;;  %v15331_v9 = vpop.eup %15330  ;;  %v11582_v53 = vpop.permute.xlu1 %11581 }
 0xf3e   : > { %14706 = vmatpush3.bf16.msra.mxu0 %v11395_v63  ;;  %14707 = vmatprep.mubr.msk.bf16.mxu0 %vm15728_vm0, %v19508_v59  ;;  %v10549_v38 = vmul.f32 %v15331_v9, %v18933_v15  ;;  %v11587_v57 = vsel %vm2669_vm2, %v11582_v53, 0 }
 0xf3f   : > { %14717 = vmatprep.subr.bf16.mxu0 %v19508_v59  ;;  %v10568_v2 = vpack.c.bf16 %v10546_v61, %v10546_v61 }
 0xf40   : > { %v10571_v30 = vpack.c.bf16 %v10549_v38, %v10549_v38 }
 0xf45   : > { %14708 = vmatmul.mubr.msk.bf16.vlgmr.msra.gmra.mrb[116].mxu0 %vm2665_vm4, %v10568_v2 }
 0xf46   : > { %14718 = vmatpush3.bf16.msra.mxu0 %v11491_v5  ;;  %14719 = vmatprep.mubr.msk.bf16.mxu0 %vm15728_vm0, %v19508_v59 }
 0xf47   : > { %14729 = vmatprep.subr.bf16.mxu0 %v19508_v59 }
 0xf66   : > { %v10500_v50 = vpop.xlane.xlu0 %10499 }
 0xf67   : > { %15332 = vrcp.f32 %v10500_v50 }
 0xf6a   : > { %v10506_v0 = vpop.xlane.xlu0 %10505 }
 0xf6b   : > { %15334 = vrcp.f32 %v10506_v0 }
 0xf6e   : > { %v11534_v20 = vpop.permute.xlu0 %11533 }
 0xf6f   : > { %v11539_v6 = vsel %vm2669_vm2, %v11534_v20, 0 }
 0xf70   : > { %14724 = vmatpush3.bf16.msra.mxu1 %v11539_v6 }
 0xf71   : > { %v15333_v62 = vpop.eup %15332  ;;  %14735 = vmatprep.subr.bf16.mxu1 %v19508_v59 }
 0xf72   : > { %v10548_v49 = vmul.f32 %v15333_v62, %v18974_v37 }
 0xf73   : > { %14726 = vmatmul.mubr.msk.bf16.vlgmr.msra.gmra.mrb[120].mxu1 %vm2665_vm4, %v10571_v30 }
 0xf74   : > { %v10570_v8 = vpack.c.bf16 %v10548_v49, %v10548_v49  ;;  %14736 = vmatpush3.bf16.msra.mxu1 %v14942_v32  ;;  %14739 = vmatprep.mubr.msk.bf16.mxu1 %vm15728_vm0, %v19508_v59 }
 0xf75   : > { %v15335_v15 = vpop.eup %15334  ;;  %14737 = vmatprep.subr.bf16.mxu1 %v19508_v59 }
 0xf76   : > { %14720 = vmatmul.mubr.msk.bf16.vlgmr.msra.gmra.mrb[120].mxu0 %vm2665_vm4, %v10570_v8  ;;  %v10550_v37 = vmul.f32 %v15335_v15, %v18978_v3 }
 0xf77   : > { %14730 = vmatpush3.bf16.msra.mxu0 %v11587_v57  ;;  %14731 = vmatprep.mubr.msk.bf16.mxu0 %vm15728_vm0, %v19508_v59 }
 0xf78   : > { %14738 = vmatpush3.bf16.msra.mxu1 %v14943_v35  ;;  %v10572_v44 = vpack.c.bf16 %v10550_v37, %v10550_v37 }
 0xf7e   : > { %14732 = vmatmul.mubr.msk.bf16.vlgmr.msra.gmra.mrb[124].mxu0 %vm2665_vm4, %v10572_v44 }
 0xf7f   : > { %12090 = vmatprep.mubr.bf16.mxu0 %v19670_v12 }
 0xf82   : > { %v10759_v4 = vpop.f32.mrb[88].mxu0 }
 0xf83   : > { %v11652_v24 = vcombine.low %v18906_v34, %v10759_v4  ;;  %v14625_v22 = vpop.f32.mrb[89].mxu0 }
 0xf84   : > { %v10762_v48 = vpop.f32.mrb[90].mxu0 }
 0xf85   : > { %v11666_v58 = vrot.slane %v11652_v24, %v19648_v40  ;;  %v14626_v21 = vpop.f32.mrb[91].mxu0 }
 0xf87   : > { %v11667_v3 = vcombine.low %v11659_v51, %v11666_v58 }
 0xfc7   : > { %v10855_v23 = vpop.f32.mrb[92].mxu0 }
 0xfc8   : > { %v11668_v17 = vcombine.low %v18916_v36, %v10855_v23  ;;  %v14637_v13 = vpop.f32.mrb[93].mxu0 }
 0xfc9   : > { %v10858_v19 = vpop.f32.mrb[94].mxu0 }
 0xfca   : > { %v14638_v33 = vpop.f32.mrb[95].mxu0  ;;  %v11676_v10 = vrot.slane %v11668_v17, %v19648_v40 }
 0xfcf   : > { %v10951_v41 = vpop.f32.mrb[96].mxu0 }
 0xfd0   : > { %v11669_v34 = vcombine.low %v18918_v52, %v10951_v41  ;;  %v14649_v1 = vpop.f32.mrb[97].mxu0 }
 0xfd1   : > { %v10954_v42 = vpop.f32.mrb[98].mxu0 }
 0xfd2   : > { %v11683_v45 = vrot.slane %v11669_v34, %v19648_v40  ;;  %v14650_v28 = vpop.f32.mrb[99].mxu0 }
 0xfd4   : > { %v11684_v14 = vcombine.low %v11676_v10, %v11683_v45 }
 0xfd6   : > { %v11750_v7 = vpack.c.bf16 %v11684_v14, %v11667_v3 }
 0xfd7   : > { %v11047_v16 = vpop.f32.mrb[100].mxu0 }
 0xfd8   : > { %v11685_v55 = vcombine.low %v18922_v11, %v11047_v16  ;;  %v14661_v46 = vpop.f32.mrb[101].mxu0  ;;  %14740 = vmatmul.mubr.msk.bf16.vlgmr.msra.gmra.mrb[124].mxu1 %vm1387_vm1, %v11750_v7 }
 0xfd9   : > { %v11050_v36 = vpop.f32.mrb[102].mxu0  ;;  %14743 = vmatprep.mubr.msk.bf16.mxu1 %vm15728_vm0, %v19508_v59 }
 0xfda   : > { %v14662_v52 = vpop.f32.mrb[103].mxu0  ;;  %v11693_v56 = vrot.slane %v11685_v55, %v19648_v40  ;;  %v19671_v36 = vld [vmem:[#allocation28_spill] sm:$0xff] }
 0xfdb   : > { %v11843_v52 = vsub.s32 3, %v19671_v36 }
 0xfdf   : > { %v11143_v47 = vpop.f32.mrb[104].mxu0 }
 0xfe0   : > { %v11686_v60 = vcombine.low %v18928_v27, %v11143_v47  ;;  %v14673_v63 = vpop.f32.mrb[105].mxu0  ;;  %v19092_v47 = vld [vmem:[%s16166_s10] sm:$0xff] }
 0xfe1   : > { %v11146_v61 = vpop.f32.mrb[106].mxu0 }
 0xfe2   : > { %v11700_v2 = vrot.slane %v11686_v60, %v19648_v40  ;;  %v14674_v5 = vpop.f32.mrb[107].mxu0  ;;  %v11844_v60 = vrot.slane %v19092_v47, %v11843_v52  ;;  %v14967_v52 = vld [vmem:[%s16158_s18 + $0x74] ss:$8 sps:$4 sm:$0xff]  }
 0xfe4   : > { %v11701_v50 = vcombine.low %v11693_v56, %v11700_v2 }
 0xffd   : > { %v11383_v11 = vpop.f32.mrb[112].mxu1 }
 0xffe   : > { %v14703_v9 = vpop.f32.mrb[113].mxu1 }
 0xfff   : > { %v11386_v0 = vpop.f32.mrb[114].mxu1  ;;  %v15361_v9 = vld [vmem:[#allocation2] sm:$0xff] }
0x1000   : > { %v14704_v38 = vpop.f32.mrb[115].mxu1 }
0x1001   : > { %v15362_v38 = vld [vmem:[#allocation2 + $0x8] sm:$0xff] }
0x1008   : > { %v11239_v20 = vpop.f32.mrb[108].mxu0 }
0x1009   : > { %v11702_v6 = vcombine.low %v18970_v29, %v11239_v20  ;;  %v14685_v32 = vpop.f32.mrb[109].mxu0 }
0x100a   : > { %v11242_v62 = vpop.f32.mrb[110].mxu0 }
0x100b   : > { %v14686_v30 = vpop.f32.mrb[111].mxu0  ;;  %v11710_v44 = vrot.slane %v11702_v6, %v19648_v40 }
0x100d   : > { %v11479_v49 = vpop.f32.mrb[116].mxu1 }
0x100e   : > { %v14715_v27 = vpop.f32.mrb[117].mxu1 }
0x100f   : > { %v11482_v53 = vpop.f32.mrb[118].mxu1 }
0x1010   : > { %v11335_v8 = vpop.f32.mrb[112].mxu0  ;;  %v14716_v35 = vpop.f32.mrb[119].mxu1 }
0x1011   : > { %v11703_v15 = vcombine.low %v18983_v39, %v11335_v8  ;;  %v14697_v57 = vpop.f32.mrb[113].mxu0  ;;  %v15363_v8 = vld [vmem:[#allocation2 + $0x10] sm:$0xff]  ;;  %v15364_v35 = vld [vmem:[#allocation2 + $0x18] sm:$0xff] }
0x1012   : > { %v11338_v37 = vpop.f32.mrb[114].mxu0 }
0x1013   : > { %v11717_v4 = vrot.slane %v11703_v15, %v19648_v40  ;;  %v14698_v24 = vpop.f32.mrb[115].mxu0 }
0x1015   : > { %v11718_v22 = vcombine.low %v11710_v44, %v11717_v4 }
0x1017   : > { %v11751_v48 = vpack.c.bf16 %v11718_v22, %v11701_v50 }
0x1018   : > { %v11431_v29 = vpop.f32.mrb[116].mxu0 }
0x1019   : > { %v11719_v51 = vcombine.low %v11383_v11, %v11431_v29  ;;  %v14709_v58 = vpop.f32.mrb[117].mxu0  ;;  %14744 = vmatmul.mubr.msk.bf16.gmra.mrb[128].mxu1 %vm1387_vm1, %v11751_v48  ;;  %v15365_v48 = vld [vmem:[#allocation2 + $0x20] sm:$0xff] }
0x101a   : > { %v11434_v21 = vpop.f32.mrb[118].mxu0  ;;  %14747 = vmatprep.mubr.msk.bf16.mxu1 %vm15728_vm0, %v19508_v59 }
0x101b   : > { %v14710_v3 = vpop.f32.mrb[119].mxu0  ;;  %v11727_v1 = vrot.slane %v11719_v51, %v19648_v40  ;;  %v15366_v51 = vld [vmem:[#allocation2 + $0x28] sm:$0xf] }
0x1046   : > { %v11575_v39 = vpop.f32.mrb[120].mxu1 }
0x1047   : > { %v14727_v23 = vpop.f32.mrb[121].mxu1 }
0x1048   : > { %v11578_v17 = vpop.f32.mrb[122].mxu1 }
0x1049   : > { %v11527_v13 = vpop.f32.mrb[120].mxu0  ;;  %v14728_v19 = vpop.f32.mrb[123].mxu1 }
0x104a   : > { %v11720_v33 = vcombine.low %v11479_v49, %v11527_v13  ;;  %v14721_v41 = vpop.f32.mrb[121].mxu0 }
0x104b   : > { %v11530_v34 = vpop.f32.mrb[122].mxu0  ;;  %v14946_v41 = vld [vmem:[%s16158_s18 + $0x4] ss:$8 sps:$4 sm:$0xff]  }
0x104c   : > { %v11734_v42 = vrot.slane %v11720_v33, %v19648_v40  ;;  %v14722_v10 = vpop.f32.mrb[123].mxu0  ;;  %v14944_v33 = vld [vmem:[%s16158_s18] ss:$8 sps:$4 sm:$0xff]   ;;  %v14949_v34 = vld [vmem:[%s16158_s18 + $0x14] ss:$8 sps:$4 sm:$0xff]   ;;  %12058 = vmatprep.subr.bf16.mxu0 %v14946_v41 }
0x104d   : > { %12059 = vmatpush1.bf16.msra.mxu0 %v14944_v33  ;;  %v14950_v10 = vld [vmem:[%s16158_s18 + $0x20] ss:$8 sps:$4 sm:$0xff]  }
0x104e   : > { %v11735_v45 = vcombine.low %v11727_v1, %v11734_v42  ;;  %v14947_v1 = vld [vmem:[%s16158_s18 + $0x10] ss:$8 sps:$4 sm:$0xff]   ;;  %12060 = vmatprep.subr.bf16.mxu0 %v14949_v34  ;;  %v14952_v42 = vld [vmem:[%s16158_s18 + $0x24] ss:$8 sps:$4 sm:$0xff]  }
0x104f   : > { %v14977_v33 = vld [vmem:[%s16160_s12 + $0x20] sm:$0xff]   ;;  %v14978_v41 = vld [vmem:[%s16160_s12 + $0x68] sm:$0xff]  }
0x1051   : > { %v11623_v28 = vpop.f32.mrb[124].mxu0  ;;  %12061 = vmatpush1.bf16.msra.mxu0 %v14947_v1 }
0x1052   : > { %v11736_v14 = vcombine.low %v11575_v39, %v11623_v28  ;;  %v14733_v7 = vpop.f32.mrb[125].mxu0  ;;  %12062 = vmatprep.subr.bf16.mxu0 %v14952_v42  ;;  %v14953_v28 = vld [vmem:[%s16158_s18 + $0x30] ss:$8 sps:$4 sm:$0xff]  }
0x1053   : > { %v11626_v59 = vpop.f32.mrb[126].mxu0  ;;  %v14956_v7 = vld [vmem:[%s16158_s18 + $0x40] ss:$8 sps:$4 sm:$0xff]  }
0x1054   : > { %v11743_v16 = vrot.slane %v11736_v14, %v19648_v40  ;;  %v14734_v55 = vpop.f32.mrb[127].mxu0  ;;  %v14958_v14 = vld [vmem:[%s16158_s18 + $0x44] ss:$8 sps:$4 sm:$0xff]   ;;  %v14961_v59 = vld [vmem:[%s16158_s18 + $0x54] ss:$8 sps:$4 sm:$0xff]  }
0x1055   : > { %12063 = vmatpush1.bf16.msra.mxu0 %v14950_v10  ;;  %v14964_v55 = vld [vmem:[%s16158_s18 + $0x64] ss:$8 sps:$4 sm:$0xff]  }
0x1056   : > { %v11752_v46 = vpack.c.bf16 %v11743_v16, %v11735_v45  ;;  %v14955_v45 = vld [vmem:[%s16158_s18 + $0x34] ss:$8 sps:$4 sm:$0xff]   ;;  %v14959_v16 = vld [vmem:[%s16158_s18 + $0x50] ss:$8 sps:$4 sm:$0xff]  }
0x1057   : > { %12064 = vmatprep.subr.bf16.mxu0 %v14955_v45 }
0x1058   : > { %14748 = vmatmul.mubr.msk.bf16.gmra.mrb[132].mxu1 %vm1387_vm1, %v11752_v46  ;;  %v14962_v46 = vld [vmem:[%s16158_s18 + $0x60] ss:$8 sps:$4 sm:$0xff]  }
0x1059   : > { %12065 = vmatpush1.bf16.msra.mxu0 %v14953_v28 }
0x105a   : > { %12066 = vmatprep.subr.bf16.mxu0 %v14958_v14 }
0x105d   : > { %12067 = vmatpush1.bf16.msra.mxu0 %v14956_v7 }
0x105e   : > { %12068 = vmatprep.subr.bf16.mxu0 %v14961_v59 }
0x1061   : > { %12069 = vmatpush1.bf16.msra.mxu0 %v14959_v16 }
0x1062   : > { %12070 = vmatprep.subr.bf16.mxu0 %v14964_v55 }
0x1065   : > { %12071 = vmatpush1.bf16.msra.mxu0 %v14962_v46 }
0x1066   : > { %12072 = vmatprep.subr.bf16.mxu0 %v14967_v52 }
0x10ab   : > { %v11812_v63 = vpop.f32.mrb[124].mxu1 }
0x10ac   : > { %v11835_v61 = vadd.f32 %v11812_v63, %v18637_v18  ;;  %v14741_v56 = vpop.f32.mrb[125].mxu1 }
0x10ad   : > { %v11815_v2 = vpop.f32.mrb[126].mxu1 }
0x10ae   : > { %v11845_v5 = vadd.f32 %v11844_v60, %v11835_v61  ;;  %v11836_v50 = vadd.f32 %v11815_v2, %v18640_v31  ;;  %v14742_v11 = vpop.f32.mrb[127].mxu1 }
0x10b0   : > { %v11846_v40 = vadd.f32 %v11844_v60, %v11836_v50  ;;  %v11851_v0 = vadd.f32 %v15361_v9, %v11845_v5 }
0x10b2   : > { %11857 = vadd.xlane.f32.xlu0 %v11851_v0  ;;  %v11852_v20 = vadd.f32 %v15362_v38, %v11846_v40 }
0x10b4   : > { %11859 = vadd.xlane.f32.xlu1 %v11852_v20 }
0x10ec   : > { %v11820_v6 = vpop.f32.mrb[128].mxu1 }
0x10ed   : > { %v11837_v32 = vadd.f32 %v11820_v6, %v18661_v43  ;;  %v14745_v62 = vpop.f32.mrb[129].mxu1 }
0x10ee   : > { %v11823_v30 = vpop.f32.mrb[130].mxu1 }
0x10ef   : > { %v11847_v49 = vadd.f32 %v11844_v60, %v11837_v32  ;;  %v11838_v18 = vadd.f32 %v11823_v30, %v18664_v25  ;;  %v14746_v27 = vpop.f32.mrb[131].mxu1 }
0x10f1   : > { %v11848_v53 = vadd.f32 %v11844_v60, %v11838_v18  ;;  %v19099_v31 = vadd.f32 %v15363_v8, %v11847_v49 }
0x10f3   : > { %11861 = vadd.xlane.f32.xlu0 %v19099_v31  ;;  %v19102_v15 = vadd.f32 %v15364_v35, %v11848_v53 }
0x10f7   : > { %11863 = vadd.xlane.f32.xlu0 %v19102_v15 }
0x112b   : > { %v11828_v57 = vpop.f32.mrb[132].mxu1 }
0x112c   : > { %v11839_v43 = vadd.f32 %v11828_v57, %v18705_v26  ;;  %v14749_v37 = vpop.f32.mrb[133].mxu1 }
0x112d   : > { %v11831_v44 = vpop.f32.mrb[134].mxu1 }
0x112e   : > { %v11849_v4 = vadd.f32 %v11844_v60, %v11839_v43  ;;  %v11840_v25 = vadd.f32 %v11831_v44, %v18708_v54  ;;  %v14750_v24 = vpop.f32.mrb[135].mxu1  ;;  %v11939_v43 = vsub.s32 6, %v19671_v36 }
0x1130   : > { %v11850_v22 = vadd.f32 %v11844_v60, %v11840_v25  ;;  %v11855_v29 = vadd.f32 %v15365_v48, %v11849_v4  ;;  %v14965_v60 = vld [vmem:[%s16158_s18 + $0x70] ss:$8 sps:$4 sm:$0xff]   ;;  %v19158_v25 = vrot.slane %v19092_v47, %v11939_v43  ;;  %v19673_v43 = vsub.s32 1, %v19671_v36 }
0x1131   : > { %12073 = vmatpush1.bf16.msra.mxu0 %v14965_v60 }
0x1132   : > { %11865 = vadd.xlane.f32.xlu1 %v11855_v29  ;;  %v11856_v58 = vadd.f32 %v15366_v51, %v11850_v22 }
0x1134   : > { %v11868_v21 = vsel %vm11867_vm5, %v11856_v58, 0.0 }
0x1135   : > { %11869 = vadd.xlane.f32.xlu0 %v11868_v21  ;;  %v14968_v21 = vld [vmem:[%s16160_s12 + $0x40] sm:$0xff]  }
0x1136   : > { %13551 = vmatprep.subr.bf16.mxu1 %v14968_v21 }
0x113f   : > { %v11858_v26 = vpop.xlane.xlu0 %11857 }
0x1140   : > { %v11872_v3 = vmul.f32 0.0078125, %v11858_v26  ;;  %v14969_v26 = vld [vmem:[%s16160_s12] sm:$0xff]  }
0x1141   : > { %v11860_v39 = vpop.xlane.xlu1 %11859  ;;  %13552 = vmatpush3.bf16.msra.mxu1 %v14969_v26 }
0x1142   : > { %v19108_v54 = vsub.f32 %v11851_v0, %v11872_v3  ;;  %v11873_v23 = vmul.f32 0.0078125, %v11860_v39  ;;  %v14970_v3 = vld [vmem:[%s16160_s12 + $0x48] sm:$0xff]  }
0x1143   : > { %v14971_v39 = vld [vmem:[%s16160_s12 + $0x8] sm:$0xff]   ;;  %13553 = vmatprep.subr.bf16.mxu1 %v14970_v3 }
0x1144   : > { %v19110_v17 = vsub.f32 %v11852_v20, %v11873_v23  ;;  %v11884_v13 = vmul.f32 %v19108_v54, %v19108_v54  ;;  %v14973_v23 = vld [vmem:[%s16160_s12 + $0x10] sm:$0xff]  }
0x1145   : > { %13554 = vmatpush3.bf16.msra.mxu1 %v14971_v39 }
0x1146   : > { %11890 = vadd.xlane.f32.xlu0 %v11884_v13  ;;  %v11885_v19 = vmul.f32 %v19110_v17, %v19110_v17  ;;  %v14975_v13 = vld [vmem:[%s16160_s12 + $0x18] sm:$0xff]  }
0x1148   : > { %11892 = vadd.xlane.f32.xlu1 %v11885_v19  ;;  %v14976_v19 = vld [vmem:[%s16160_s12 + $0x60] sm:$0xff]  }
0x1180   : > { %v11862_v63 = vpop.xlane.xlu0 %11861 }
0x1181   : > { %v11874_v61 = vmul.f32 0.0078125, %v11862_v63 }
0x1183   : > { %v19133_v56 = vsub.f32 %v19099_v31, %v11874_v61  ;;  %v14979_v61 = vld [vmem:[%s16160_s12 + $0x28] sm:$0xff]  }
0x1184   : > { %v11864_v2 = vpop.xlane.xlu0 %11863 }
0x1185   : > { %v11875_v5 = vmul.f32 0.0078125, %v11864_v2  ;;  %v11886_v50 = vmul.f32 %v19133_v56, %v19133_v56  ;;  %v14981_v2 = vld [vmem:[%s16160_s12 + $0x30] sm:$0xff]  }
0x1187   : > { %v19138_v11 = vsub.f32 %v19102_v15, %v11875_v5  ;;  %11894 = vadd.xlane.f32.xlu0 %v11886_v50  ;;  %v11929_v15 = vsub.s32 5, %v19671_v36  ;;  %v14982_v5 = vld [vmem:[%s16160_s12 + $0x78] sm:$0xff]  }
0x1188   : > { %v14983_v50 = vld [vmem:[%s16160_s12 + $0x38] sm:$0xff]  }
0x1189   : > { %v11887_v40 = vmul.f32 %v19138_v11, %v19138_v11  ;;  %v19153_v57 = vrot.slane %v19092_v47, %v11929_v15  ;;  %v19672_v15 = vld [vmem:[#allocation29_spill] sm:$0xff] }
0x118b   : > { %11896 = vadd.xlane.f32.xlu1 %v11887_v40 }
0x11bf   : > { %v11866_v9 = vpop.xlane.xlu1 %11865 }
0x11c0   : > { %v11876_v0 = vmul.f32 0.0078125, %v11866_v9 }
0x11c2   : > { %v19142_v38 = vsub.f32 %v11855_v29, %v11876_v0  ;;  %v11870_v20 = vpop.xlane.xlu0 %11869 }
0x11c3   : > { %v11877_v6 = vmul.f32 0.0078125, %v11870_v20 }
0x11c4   : > { %v11888_v32 = vmul.f32 %v19142_v38, %v19142_v38 }
0x11c5   : > { %v19146_v62 = vsub.f32 %v11856_v58, %v11877_v6 }
0x11c6   : > { %11898 = vadd.xlane.f32.xlu0 %v11888_v32 }
0x11c7   : > { %v11889_v30 = vmul.f32 %v19146_v62, %v19146_v62 }
0x11c9   : > { %v11900_v49 = vsel %vm11867_vm5, %v11889_v30, 0.0 }
0x11ca   : > { %11901 = vadd.xlane.f32.xlu1 %v11900_v49 }
0x11d3   : > { %v11891_v18 = vpop.xlane.xlu0 %11890 }
0x11d4   : > { %v11903_v27 = vmul.f32 0.0078125, %v11891_v18 }
0x11d5   : > { %v11893_v53 = vpop.xlane.xlu1 %11892 }
0x11d6   : > { %v11909_v8 = vadd.f32 1e-05, %v11903_v27  ;;  %v11904_v31 = vmul.f32 0.0078125, %v11893_v53 }
0x11d8   : > { %15336 = vrsqrt.f32 %v11909_v8  ;;  %v11910_v35 = vadd.f32 1e-05, %v11904_v31 }
0x11da   : > { %15338 = vrsqrt.f32 %v11910_v35  ;;  %v11966_v35 = vld [vmem:[%s16168_s2] sm:$0x3] }
0x11e2   : > { %v15337_v37 = vpop.eup %15336 }
0x11e3   : > { %v11921_v44 = vmul.f32 %v15337_v37, %v19108_v54  ;;  %v14972_v54 = vld [vmem:[%s16160_s12 + $0x50] sm:$0xff]   ;;  %v11975_v37 = vrot.slane %v11966_v35, %v19673_v43 }
0x11e4   : > { %v15339_v4 = vpop.eup %15338  ;;  %13555 = vmatprep.subr.bf16.mxu1 %v14972_v54 }
0x11e5   : > { %v11931_v24 = vmul.f32 %v19153_v57, %v11921_v44  ;;  %v11922_v22 = vmul.f32 %v15339_v4, %v19110_v17  ;;  %v14974_v17 = vld [vmem:[%s16160_s12 + $0x58] sm:$0xff]   ;;  %13556 = vmatpush3.bf16.msra.mxu1 %v14973_v23 }
0x11e6   : > { %13557 = vmatprep.subr.bf16.mxu1 %v14974_v17 }
0x11e7   : > { %v11932_v48 = vmul.f32 %v19153_v57, %v11922_v22  ;;  %v19164_v29 = vadd.f32 %v19158_v25, %v11931_v24 }
0x11e9   : > { %v19167_v51 = vadd.f32 %v19158_v25, %v11932_v48  ;;  %13558 = vmatpush3.bf16.msra.mxu1 %v14975_v13 }
0x11ea   : > { %13559 = vmatprep.subr.bf16.mxu1 %v14976_v19 }
0x11eb   : > { %v11947_v58 = vpack.c.bf16 %v19167_v51, %v19164_v29 }
0x11ed   : > { %12091 = vmatmul.mubr.bf16.vlgmr.msra.gmra.mrb[128].mxu0 %v11947_v58  ;;  %13560 = vmatpush3.bf16.msra.mxu1 %v14977_v33 }
0x11ee   : > { %12100 = vmatprep.mubr.bf16.mxu0 %v19670_v12  ;;  %13561 = vmatprep.subr.bf16.mxu1 %v14978_v41 }
0x11f1   : > { %13562 = vmatpush3.bf16.msra.mxu1 %v14979_v61 }
0x1214   : > { %v11895_v34 = vpop.xlane.xlu0 %11894 }
0x1215   : > { %v11905_v1 = vmul.f32 0.0078125, %v11895_v34 }
0x1217   : > { %v11911_v42 = vadd.f32 1e-05, %v11905_v1 }
0x1218   : > { %v11897_v10 = vpop.xlane.xlu1 %11896 }
0x1219   : > { %15340 = vrsqrt.f32 %v11911_v42  ;;  %v11906_v45 = vmul.f32 0.0078125, %v11897_v10 }
0x121b   : > { %v11912_v28 = vadd.f32 1e-05, %v11906_v45 }
0x121d   : > { %15342 = vrsqrt.f32 %v11912_v28 }
0x1223   : > { %v15341_v14 = vpop.eup %15340 }
0x1224   : > { %v11923_v7 = vmul.f32 %v15341_v14, %v19133_v56  ;;  %v14980_v56 = vld [vmem:[%s16160_s12 + $0x70] sm:$0xff]  }
0x1225   : > { %13563 = vmatprep.subr.bf16.mxu1 %v14980_v56 }
0x1226   : > { %v11933_v16 = vmul.f32 %v19153_v57, %v11923_v7  ;;  %13564 = vmatpush3.bf16.msra.mxu1 %v14981_v2 }
0x1227   : > { %v15343_v59 = vpop.eup %15342  ;;  %13565 = vmatprep.subr.bf16.mxu1 %v14982_v5 }
0x1228   : > { %v11924_v55 = vmul.f32 %v15343_v59, %v19138_v11  ;;  %v19188_v52 = vadd.f32 %v19158_v25, %v11933_v16 }
0x122a   : > { %v11934_v46 = vmul.f32 %v19153_v57, %v11924_v55  ;;  %13566 = vmatpush3.bf16.msra.mxu1 %v14983_v50 }
0x122c   : > { %v19191_v60 = vadd.f32 %v19158_v25, %v11934_v46 }
0x122e   : > { %v11948_v63 = vpack.c.bf16 %v19191_v60, %v19188_v52 }
0x1230   : > { %12101 = vmatmul.mubr.bf16.gmra.mrb[132].mxu0 %v11948_v63 }
0x1231   : > { %12110 = vmatprep.mubr.bf16.mxu0 %v19670_v12 }
0x1253   : > { %v11899_v11 = vpop.xlane.xlu0 %11898 }
0x1254   : > { %v11907_v40 = vmul.f32 0.0078125, %v11899_v11 }
0x1256   : > { %v11913_v9 = vadd.f32 1e-05, %v11907_v40 }
0x1257   : > { %v11902_v0 = vpop.xlane.xlu1 %11901 }
0x1258   : > { %15344 = vrsqrt.f32 %v11913_v9  ;;  %v11908_v20 = vmul.f32 0.0078125, %v11902_v0 }
0x125a   : > { %v11914_v6 = vadd.f32 1e-05, %v11908_v20  ;;  %v12173_v20 = vsub.s32 4, %v19671_v36 }
0x125c   : > { %15346 = vrsqrt.f32 %v11914_v6 }
0x1262   : > { %v15345_v12 = vpop.eup %15344 }
0x1263   : > { %v11925_v32 = vmul.f32 %v15345_v12, %v19142_v38  ;;  %v11971_v38 = vrot.slane %v11966_v35, %v19672_v15  ;;  %v12174_v12 = vrot.slane %v19092_v47, %v12173_v20 }
0x1265   : > { %v11935_v49 = vmul.f32 %v19153_v57, %v11925_v32 }
0x1266   : > { %v15347_v30 = vpop.eup %15346 }
0x1267   : > { %v11926_v18 = vmul.f32 %v15347_v30, %v19146_v62  ;;  %v19206_v53 = vadd.f32 %v19158_v25, %v11935_v49 }
0x1269   : > { %v11936_v27 = vmul.f32 %v19153_v57, %v11926_v18 }
0x126b   : > { %v19209_v8 = vadd.f32 %v19158_v25, %v11936_v27 }
0x126d   : > { %v11949_v31 = vpack.c.bf16 %v19209_v8, %v19206_v53 }
0x126f   : > { %12111 = vmatmul.mubr.bf16.gmra.mrb[136].mxu0 %v11949_v31 }
0x12c0   : > { %v12092_v44 = vpop.f32.mrb[128].mxu0 }
0x12c1   : > { %v12093_v62 = vadd.f32 %v12092_v44, %v11971_v38  ;;  %v12094_v4 = vpop.f32.mrb[129].mxu0 }
0x12c2   : > { %v12095_v57 = vadd.f32 %v12094_v4, %v11975_v37  ;;  %v12096_v24 = vpop.f32.mrb[130].mxu0 }
0x12c3   : > { %v12097_v22 = vadd.f32 %v12096_v24, %v11971_v38  ;;  %v12098_v48 = vpop.f32.mrb[131].mxu0  ;;  %v12121_v25 = vmax.f32 %v12093_v62, 0.0 }
0x12c4   : > { %v12099_v58 = vadd.f32 %v12098_v48, %v11975_v37  ;;  %v12122_v26 = vmax.f32 %v12095_v57, 0.0 }
0x12c5   : > { %v12123_v21 = vmax.f32 %v12097_v22, 0.0 }
0x12c6   : > { %v12124_v3 = vmax.f32 %v12099_v58, 0.0 }
0x12c7   : > { %v12133_v39 = vpack.c.bf16 %v12123_v21, %v12121_v25 }
0x12c8   : > { %v12134_v54 = vpack.c.bf16 %v12124_v3, %v12122_v26 }
0x12ca   : > { %12303 = vmatprep.mubr.bf16.mxu1 %v12134_v54 }
0x12cb   : > { %12304 = vmatmul.mubr.bf16.vlgmr.msra.gmra.mrb[136].mxu1 %v12133_v39 }
0x1303   : > { %v12102_v23 = vpop.f32.mrb[132].mxu0 }
0x1304   : > { %v12103_v17 = vadd.f32 %v12102_v23, %v11971_v38  ;;  %v12104_v13 = vpop.f32.mrb[133].mxu0 }
0x1305   : > { %v12105_v19 = vadd.f32 %v12104_v13, %v11975_v37  ;;  %v12106_v33 = vpop.f32.mrb[134].mxu0 }
0x1306   : > { %v12107_v41 = vadd.f32 %v12106_v33, %v11971_v38  ;;  %v12108_v34 = vpop.f32.mrb[135].mxu0  ;;  %v12125_v42 = vmax.f32 %v12103_v17, 0.0 }
0x1307   : > { %v12109_v1 = vadd.f32 %v12108_v34, %v11975_v37  ;;  %v12126_v45 = vmax.f32 %v12105_v19, 0.0 }
0x1308   : > { %v12127_v10 = vmax.f32 %v12107_v41, 0.0 }
0x1309   : > { %v12128_v28 = vmax.f32 %v12109_v1, 0.0 }
0x130a   : > { %v12135_v14 = vpack.c.bf16 %v12127_v10, %v12125_v42 }
0x130b   : > { %v12136_v7 = vpack.c.bf16 %v12128_v28, %v12126_v45 }
0x130d   : > { %12311 = vmatprep.mubr.bf16.mxu1 %v12136_v7 }
0x130e   : > { %12312 = vmatmul.mubr.bf16.gmra.mrb[140].mxu1 %v12135_v14 }
0x1342   : > { %v12112_v59 = vpop.f32.mrb[136].mxu0 }
0x1343   : > { %v12113_v16 = vadd.f32 %v12112_v59, %v11971_v38  ;;  %v12114_v55 = vpop.f32.mrb[137].mxu0 }
0x1344   : > { %v12115_v46 = vadd.f32 %v12114_v55, %v11975_v37  ;;  %v12116_v63 = vpop.f32.mrb[138].mxu0 }
0x1345   : > { %v12117_v61 = vadd.f32 %v12116_v63, %v11971_v38  ;;  %v12118_v56 = vpop.f32.mrb[139].mxu0  ;;  %v12129_v5 = vmax.f32 %v12113_v16, 0.0 }
0x1346   : > { %v12119_v2 = vadd.f32 %v12118_v56, %v11975_v37  ;;  %v12130_v11 = vmax.f32 %v12115_v46, 0.0 }
0x1347   : > { %v12131_v50 = vmax.f32 %v12117_v61, 0.0 }
0x1348   : > { %v12132_v40 = vmax.f32 %v12119_v2, 0.0 }
0x1349   : > { %v12137_v9 = vpack.c.bf16 %v12131_v50, %v12129_v5 }
0x134a   : > { %v12138_v0 = vpack.c.bf16 %v12132_v40, %v12130_v11 }
0x134c   : > { %12319 = vmatprep.mubr.bf16.mxu1 %v12138_v0 }
0x134d   : > { %12320 = vmatmul.mubr.bf16.gmra.mrb[144].mxu1 %v12137_v9 }
0x139e   : > { %v13567_v6 = vpop.f32.mrb[136].mxu1 }
0x139f   : > { %v13568_v32 = vpop.f32.mrb[137].mxu1 }
0x13a0   : > { %v13569_v30 = vadd.f32 %v13568_v32, %v13567_v6  ;;  %v13570_v49 = vpop.f32.mrb[138].mxu1  ;;  %v12404_v32 = vsub.s32 7, %v19671_v36 }
0x13a1   : > { %v13571_v18 = vpop.f32.mrb[139].mxu1 }
0x13a2   : > { %v12306_v27 = vadd.f32 %v13569_v30, %v12174_v12  ;;  %v13572_v31 = vadd.f32 %v13571_v18, %v13570_v49  ;;  %v622_v30 = vld [vmem:[%s16166_s10 + $0x8] sm:$0xff]  ;;  %v12405_v49 = vrot.slane %v19092_v47, %v12404_v32 }
0x13a4   : > { %v12309_v35 = vadd.f32 %v13572_v31, %v12174_v12  ;;  %v12328_v38 = vadd.f32 %v12306_v27, %v19164_v29  ;;  %v12415_v27 = vrot.slane %v622_v30, %v19672_v15 }
0x13a6   : > { %12334 = vadd.xlane.f32.xlu1 %v12328_v38  ;;  %v12329_v43 = vadd.f32 %v12309_v35, %v19167_v51 }
0x13a8   : > { %12336 = vadd.xlane.f32.xlu0 %v12329_v43 }
0x13e1   : > { %v13573_v37 = vpop.f32.mrb[140].mxu1 }
0x13e2   : > { %v13574_v44 = vpop.f32.mrb[141].mxu1 }
0x13e3   : > { %v13575_v62 = vadd.f32 %v13574_v44, %v13573_v37  ;;  %v13576_v4 = vpop.f32.mrb[142].mxu1 }
0x13e4   : > { %v13577_v57 = vpop.f32.mrb[143].mxu1 }
0x13e5   : > { %v12314_v24 = vadd.f32 %v13575_v62, %v12174_v12  ;;  %v13578_v22 = vadd.f32 %v13577_v57, %v13576_v4 }
0x13e7   : > { %v12330_v48 = vadd.f32 %v12314_v24, %v19188_v52  ;;  %v12317_v17 = vadd.f32 %v13578_v22, %v12174_v12 }
0x13e9   : > { %12338 = vadd.xlane.f32.xlu1 %v12330_v48  ;;  %v12331_v52 = vadd.f32 %v12317_v17, %v19191_v60 }
0x1420   : > { %v13579_v58 = vpop.f32.mrb[144].mxu1 }
0x1421   : > { %v13580_v25 = vpop.f32.mrb[145].mxu1 }
0x1422   : > { %v13581_v21 = vadd.f32 %v13580_v25, %v13579_v58  ;;  %v13582_v26 = vpop.f32.mrb[146].mxu1 }
0x1423   : > { %v13583_v3 = vpop.f32.mrb[147].mxu1 }
0x1424   : > { %v12322_v29 = vadd.f32 %v13581_v21, %v12174_v12  ;;  %v13584_v39 = vadd.f32 %v13583_v3, %v13582_v26 }
0x1426   : > { %v12325_v54 = vadd.f32 %v13584_v39, %v12174_v12  ;;  %v12332_v51 = vadd.f32 %v12322_v29, %v19206_v53 }
0x1428   : > { %12342 = vadd.xlane.f32.xlu1 %v12332_v51  ;;  %v12333_v23 = vadd.f32 %v12325_v54, %v19209_v8 }
0x142a   : > { %v12344_v13 = vsel %vm11867_vm5, %v12333_v23, 0.0 }
0x142b   : > { %12345 = vadd.xlane.f32.xlu0 %v12344_v13 }
0x142f   : > { %12340 = vadd.xlane.f32.xlu0 %v12331_v52 }
0x1433   : > { %v12335_v19 = vpop.xlane.xlu1 %12334 }
0x1434   : > { %v12347_v33 = vmul.f32 0.0078125, %v12335_v19 }
0x1435   : > { %v12337_v41 = vpop.xlane.xlu0 %12336 }
0x1436   : > { %v12353_v34 = vsub.f32 %v12328_v38, %v12347_v33  ;;  %v12348_v1 = vmul.f32 0.0078125, %v12337_v41 }
0x1438   : > { %v12354_v42 = vsub.f32 %v12329_v43, %v12348_v1  ;;  %v12359_v10 = vmul.f32 %v12353_v34, %v12353_v34 }
0x143a   : > { %12365 = vadd.xlane.f32.xlu0 %v12359_v10  ;;  %v12360_v45 = vmul.f32 %v12354_v42, %v12354_v42 }
0x143c   : > { %12367 = vadd.xlane.f32.xlu1 %v12360_v45  ;;  %v15367_v45 = vld [vmem:[#allocation13] sm:$0xff] (!%p13141_p2)  }
0x1476   : > { %v12339_v53 = vpop.xlane.xlu1 %12338 }
0x1477   : > { %v12349_v28 = vmul.f32 0.0078125, %v12339_v53  ;;  %v15733_v53 = vmov (!%p13141_p2), 0.0  }
0x1478   : > { %14751 = vmatprep.subr.bf16.mxu0 (!%p13141_p2), %v15733_v53  ;;  %14771 = vmatprep.subr.bf16.mxu1 (!%p13141_p2), %v15733_v53 }
0x1479   : > { %v12355_v8 = vsub.f32 %v12330_v48, %v12349_v28  ;;  %14752 = vmatpush3.bf16.msra.mxu0 (!%p13141_p2), %v15367_v45  ;;  %v15368_v28 = vld [vmem:[#allocation13 + $0x8] sm:$0xff] (!%p13141_p2)   ;;  %14767 = vmatprep.mubr.msk.bf16.mxu0 (!%p13141_p2), %vm15734_vm6, %v15733_v53 }
0x147a   : > { %14753 = vmatprep.subr.bf16.mxu0 (!%p13141_p2), %v15733_v53  ;;  %14787 = vmatprep.mubr.msk.bf16.mxu1 (!%p13141_p2), %vm15734_vm6, %v15733_v53 }
0x147b   : > { %v12361_v14 = vmul.f32 %v12355_v8, %v12355_v8 }
0x147d   : > { %12369 = vadd.xlane.f32.xlu0 %v12361_v14  ;;  %14754 = vmatpush3.bf16.msra.mxu0 (!%p13141_p2), %v15368_v28  ;;  %v15370_v14 = vld [vmem:[#allocation13 + $0x18] sm:$0xff] (!%p13141_p2)  }
0x147e   : > { %14755 = vmatprep.subr.bf16.mxu0 (!%p13141_p2), %v15733_v53 }
0x14b5   : > { %v12343_v7 = vpop.xlane.xlu1 %12342 }
0x14b6   : > { %v12351_v59 = vmul.f32 0.0078125, %v12343_v7  ;;  %v15371_v7 = vld [vmem:[#allocation13 + $0x20] sm:$0xff] (!%p13141_p2)  }
0x14b8   : > { %v12357_v16 = vsub.f32 %v12332_v51, %v12351_v59  ;;  %v12346_v60 = vpop.xlane.xlu0 %12345  ;;  %v15372_v59 = vld [vmem:[#allocation13 + $0x28] sm:$0xff] (!%p13141_p2)  }
0x14b9   : > { %v12352_v55 = vmul.f32 0.0078125, %v12346_v60 }
0x14ba   : > { %v12363_v46 = vmul.f32 %v12357_v16, %v12357_v16 }
0x14bb   : > { %v12358_v56 = vsub.f32 %v12333_v23, %v12352_v55 }
0x14bc   : > { %v12341_v63 = vpop.xlane.xlu0 %12340  ;;  %12373 = vadd.xlane.f32.xlu0 %v12363_v46  ;;  %v15374_v46 = vld [vmem:[#allocation13 + $0x38] sm:$0xff] (!%p13141_p2)  }
0x14bd   : > { %v12350_v61 = vmul.f32 0.0078125, %v12341_v63  ;;  %v12364_v50 = vmul.f32 %v12358_v56, %v12358_v56 }
0x14bf   : > { %v12356_v2 = vsub.f32 %v12331_v52, %v12350_v61  ;;  %v12375_v11 = vsel %vm11867_vm5, %v12364_v50, 0.0  ;;  %v15377_v50 = vld [vmem:[#allocation16 + $0x10] sm:$0xff] (!%p13141_p2)  }
0x14c1   : > { %v12362_v5 = vmul.f32 %v12356_v2, %v12356_v2 }
0x14c3   : > { %12371 = vadd.xlane.f32.xlu1 %v12362_v5  ;;  %v15376_v5 = vld [vmem:[#allocation16 + $0x8] sm:$0xff] (!%p13141_p2)  }
0x14c7   : > { %12376 = vadd.xlane.f32.xlu1 %v12375_v11  ;;  %v12366_v40 = vpop.xlane.xlu0 %12365  ;;  %v15378_v11 = vld [vmem:[#allocation16 + $0x18] sm:$0xff] (!%p13141_p2)  }
0x14c8   : > { %v12378_v9 = vmul.f32 0.0078125, %v12366_v40  ;;  %v15379_v40 = vld [vmem:[#allocation16 + $0x20] sm:$0xff] (!%p13141_p2)  }
0x14c9   : > { %v12368_v0 = vpop.xlane.xlu1 %12367 }
0x14ca   : > { %v12384_v20 = vadd.f32 1e-05, %v12378_v9  ;;  %v12379_v6 = vmul.f32 0.0078125, %v12368_v0  ;;  %v15380_v9 = vld [vmem:[#allocation16 + $0x28] sm:$0xff] (!%p13141_p2)   ;;  %v15381_v0 = vld [vmem:[#allocation16 + $0x30] sm:$0xff] (!%p13141_p2)  }
0x14cc   : > { %15348 = vrsqrt.f32 %v12384_v20  ;;  %v12385_v12 = vadd.f32 1e-05, %v12379_v6  ;;  %v15382_v20 = vld [vmem:[#allocation16 + $0x38] sm:$0xff] (!%p13141_p2)  }
0x14cd   : > { %v13142_v6 = vld [vmem:[#allocation14] ss:$0 sm:$0xff] (!%p13141_p2) }
0x14ce   : > { %15350 = vrsqrt.f32 %v12385_v12 }
0x14d6   : > { %v15349_v18 = vpop.eup %15348 }
0x14d7   : > { %v12396_v31 = vmul.f32 %v15349_v18, %v12353_v34 }
0x14d8   : > { %v15351_v35 = vpop.eup %15350 }
0x14d9   : > { %v12406_v38 = vmul.f32 %v12405_v49, %v12396_v31  ;;  %v12397_v43 = vmul.f32 %v15351_v35, %v12354_v42 }
0x14db   : > { %v12416_v37 = vadd.f32 %v12415_v27, %v12406_v38  ;;  %v12407_v44 = vmul.f32 %v12405_v49, %v12397_v43 }
0x14dd   : > { %12422 = vst [vmem:[#allocation2] sm:$0xff] %v12416_v37  ;;  %v12417_v62 = vadd.f32 %v12415_v27, %v12407_v44 }
0x14df   : > { %12423 = vst [vmem:[#allocation2 + $0x8] sm:$0xff] %v12417_v62 }
0x150a   : > { %v12370_v4 = vpop.xlane.xlu0 %12369 }
0x150b   : > { %v12380_v57 = vmul.f32 0.0078125, %v12370_v4 }
0x150d   : > { %v12386_v24 = vadd.f32 1e-05, %v12380_v57 }
0x150f   : > { %15352 = vrsqrt.f32 %v12386_v24 }
0x1519   : > { %v15353_v36 = vpop.eup %15352 }
0x151a   : > { %v12398_v22 = vmul.f32 %v15353_v36, %v12355_v8  ;;  %v15369_v8 = vld [vmem:[#allocation13 + $0x10] sm:$0xff] (!%p13141_p2)  }
0x151b   : > { %14756 = vmatpush3.bf16.msra.mxu0 (!%p13141_p2), %v15369_v8 }
0x151c   : > { %v12408_v48 = vmul.f32 %v12405_v49, %v12398_v22  ;;  %14757 = vmatprep.subr.bf16.mxu0 (!%p13141_p2), %v15733_v53 }
0x151e   : > { %v12418_v47 = vadd.f32 %v12415_v27, %v12408_v48 }
0x151f   : > { %14758 = vmatpush3.bf16.msra.mxu0 (!%p13141_p2), %v15370_v14 }
0x1520   : > { %12424 = vst [vmem:[#allocation2 + $0x10] sm:$0xff] %v12418_v47  ;;  %14759 = vmatprep.subr.bf16.mxu0 (!%p13141_p2), %v15733_v53 }
0x1523   : > { %14760 = vmatpush3.bf16.msra.mxu0 (!%p13141_p2), %v15371_v7 }
0x1524   : > { %14761 = vmatprep.subr.bf16.mxu0 (!%p13141_p2), %v15733_v53 }
0x1527   : > { %14762 = vmatpush3.bf16.msra.mxu0 (!%p13141_p2), %v15372_v59 }
0x1528   : > { %14763 = vmatprep.subr.bf16.mxu0 (!%p13141_p2), %v15733_v53 }
0x1549   : > { %v12374_v58 = vpop.xlane.xlu0 %12373 }
0x154a   : > { %v12382_v15 = vmul.f32 0.0078125, %v12374_v58 }
0x154c   : > { %v12388_v25 = vadd.f32 1e-05, %v12382_v15 }
0x154e   : > { %15354 = vrsqrt.f32 %v12388_v25 }
0x1550   : > { %v12372_v21 = vpop.xlane.xlu1 %12371 }
0x1551   : > { %v12381_v26 = vmul.f32 0.0078125, %v12372_v21 }
0x1553   : > { %v12387_v3 = vadd.f32 1e-05, %v12381_v26 }
0x1554   : > { %v12377_v29 = vpop.xlane.xlu1 %12376 }
0x1555   : > { %15356 = vrsqrt.f32 %v12387_v3  ;;  %v12383_v39 = vmul.f32 0.0078125, %v12377_v29 }
0x1557   : > { %v12389_v54 = vadd.f32 1e-05, %v12383_v39 }
0x1558   : > { %v15355_v51 = vpop.eup %15354 }
0x1559   : > { %v12400_v23 = vmul.f32 %v15355_v51, %v12357_v16  ;;  %15358 = vrsqrt.f32 %v12389_v54  ;;  %v15373_v16 = vld [vmem:[#allocation13 + $0x30] sm:$0xff] (!%p13141_p2)  }
0x155a   : > { %14764 = vmatpush3.bf16.msra.mxu0 (!%p13141_p2), %v15373_v16 }
0x155b   : > { %v12410_v17 = vmul.f32 %v12405_v49, %v12400_v23  ;;  %14765 = vmatprep.subr.bf16.mxu0 (!%p13141_p2), %v15733_v53 }
0x155d   : > { %v12420_v13 = vadd.f32 %v12415_v27, %v12410_v17 }
0x155e   : > { %14766 = vmatpush3.bf16.msra.mxu0 (!%p13141_p2), %v15374_v46 }
0x155f   : > { %v15357_v52 = vpop.eup %15356  ;;  %12426 = vst [vmem:[#allocation2 + $0x20] sm:$0xff] %v12420_v13 }
0x1560   : > { %v12399_v19 = vmul.f32 %v15357_v52, %v12356_v2  ;;  %v15375_v2 = vld [vmem:[#allocation16] sm:$0xff] (!%p13141_p2)  }
0x1561   : > { %14772 = vmatpush3.bf16.msra.mxu1 (!%p13141_p2), %v15375_v2 }
0x1562   : > { %v12409_v33 = vmul.f32 %v12405_v49, %v12399_v19  ;;  %14773 = vmatprep.subr.bf16.mxu1 (!%p13141_p2), %v15733_v53 }
0x1563   : > { %v15359_v41 = vpop.eup %15358 }
0x1564   : > { %v12419_v34 = vadd.f32 %v12415_v27, %v12409_v33  ;;  %v12401_v1 = vmul.f32 %v15359_v41, %v12358_v56  ;;  %12431 = sbr.rel (%p13141_p2) target bundleno = 5954 (0x1742), region = 104 }
0x1565   : > { %14774 = vmatpush3.bf16.msra.mxu1 (!%p13141_p2), %v15376_v5 }
0x1566   : > { %12425 = vst [vmem:[#allocation2 + $0x18] sm:$0xff] %v12419_v34  ;;  %v12411_v42 = vmul.f32 %v12405_v49, %v12401_v1  ;;  %v12432_v60 = vpack.c.bf16 (!%p13141_p2), %v12420_v13, %v12419_v34  ;;  %14775 = vmatprep.subr.bf16.mxu1 (!%p13141_p2), %v15733_v53 }
0x1568   : > { %v12421_v10 = vadd.f32 %v12415_v27, %v12411_v42  ;;  %v12460_v63 = vrot.slane (!%p13141_p2), %v12432_v60, 2 }
0x1569   : > { %14776 = vmatpush3.bf16.msra.mxu1 (!%p13141_p2), %v15377_v50 }
0x156a   : > { %12427 = vst [vmem:[#allocation2 + $0x28] sm:$0xf] %v12421_v10  ;;  %v12433_v55 = vpack.c.bf16 (!%p13141_p2), %v12421_v10, %v12421_v10  ;;  %14777 = vmatprep.subr.bf16.mxu1 (!%p13141_p2), %v15733_v53 }
0x156c   : > { %v12461_v61 = vrot.slane %v12433_v55, 2 }
0x156d   : > { %14778 = vmatpush3.bf16.msra.mxu1 %v15378_v11 }
0x156e   : > { %v12462_v56 = vsel %vm12459_vm7, %v12460_v63, %v12461_v61  ;;  %14779 = vmatprep.subr.bf16.mxu1 %v15733_v53 }
0x156f   : > { %14768 = vmatmul.mubr.bf16.vlgmr.msra.gmra.mrb[0].mxu0 %v12462_v56 }
0x1571   : > { %14780 = vmatpush3.bf16.msra.mxu1 %v15379_v40 }
0x1572   : > { %14781 = vmatprep.subr.bf16.mxu1 %v15733_v53 }
0x1575   : > { %14782 = vmatpush3.bf16.msra.mxu1 %v15380_v9 }
0x1576   : > { %14783 = vmatprep.subr.bf16.mxu1 %v15733_v53 }
0x1579   : > { %14784 = vmatpush3.bf16.msra.mxu1 %v15381_v0 }
0x157a   : > { %14785 = vmatprep.subr.bf16.mxu1 %v15733_v53 }
0x157d   : > { %14786 = vmatpush3.bf16.msra.mxu1 %v15382_v20 }
0x1642   : > { %v12546_v12 = vpop.f32.mrb[0].mxu0 }
0x1643   : > { %v12547_v32 = vadd.f32 %v13142_v6, %v12546_v12  ;;  %v14769_v30 = vpop.f32.mrb[1].mxu0 }
0x1644   : > { %v12549_v49 = vpop.f32.mrb[2].mxu0 }
0x1645   : > { %v12553_v18 = vmin.f32 %v12547_v32, 20.0  ;;  %v12550_v27 = vadd.f32 %v13142_v6, %v12549_v49  ;;  %v14770_v31 = vpop.f32.mrb[3].mxu0 }
0x1647   : > { %v12555_v35 = vmul.f32 1.442695, %v12553_v18  ;;  %v12554_v38 = vmin.f32 %v12550_v27, 20.0 }
0x1649   : > { %15383 = vpow2.f32 %v12555_v35  ;;  %v12557_v43 = vmul.f32 1.442695, %v12554_v38 }
0x164b   : > { %15385 = vpow2.f32 %v12557_v43 }
0x1653   : > { %v15384_v37 = vpop.eup %15383 }
0x1654   : > { %v12559_v44 = vadd.f32 1.0, %v15384_v37 }
0x1655   : > { %v15386_v62 = vpop.eup %15385 }
0x1656   : > { %v12561_v4 = vmul.f32 %v12559_v44, %v12559_v44  ;;  %v12560_v57 = vadd.f32 1.0, %v15386_v62 }
0x1658   : > { %v12567_v24 = vadd.f32 1.0, %v12561_v4  ;;  %v12562_v36 = vmul.f32 %v12560_v57, %v12560_v57  ;;  %v13151_v48 = vadd.f32 -1.0, %v12561_v4 }
0x165a   : > { %15387 = vrcp.f32 %v12567_v24  ;;  %v12568_v22 = vadd.f32 1.0, %v12562_v36  ;;  %v13152_v47 = vadd.f32 -1.0, %v12562_v36  ;;  %v12565_v15 = vmul.f32 %v13151_v48, %v12547_v32 }
0x165c   : > { %15389 = vrcp.f32 %v12568_v22  ;;  %v12566_v25 = vmul.f32 %v13152_v47, %v12550_v27 }
0x1664   : > { %v15388_v58 = vpop.eup %15387 }
0x1665   : > { %v12571_v26 = vmul.f32 %v15388_v58, %v12565_v15 }
0x1666   : > { %v15390_v21 = vpop.eup %15389 }
0x1667   : > { %v12572_v3 = vmul.f32 %v15390_v21, %v12566_v25 }
0x1669   : > { %v12573_v29 = vpack.c.bf16 %v12572_v3, %v12571_v26 }
0x166b   : > { %14788 = vmatmul.mubr.bf16.vlgmr.msra.gmra.mrb[0].mxu1 %v12573_v29 }
0x173e   : > { %v12672_v39 = vpop.f32.mrb[0].mxu1 }
0x173f   : > { %12679 = vst [vmem:[%s19675_s22] sm:$0xff] %v12672_v39  ;;  %v14789_v54 = vpop.f32.mrb[1].mxu1 }
0x1740   : > { %v12675_v51 = vpop.f32.mrb[2].mxu1 }
0x1741   : > { %12680 = vst [vmem:[%s19675_s22 + $0x8] sm:$0xff] %v12675_v51  ;;  %v14790_v23 = vpop.f32.mrb[3].mxu1 }
0x1742 PF: > { %s19676_s16 = sld [smem:[#allocation25_spill]]  ;;  %s19677_s20 = sld [smem:[#allocation23_spill]] }
0x1743   : > { %s19678_s15 = sld [smem:[#allocation26_spill]]  ;;  %s19679_s13 = smov %s15701_s14 }
0x1748   : > { %p30_p6 = scmp.ge.s32.totalorder %s19676_s16, 4   ;;  %s19680_s14 = smov %s19677_s20 }
0x174a   :  { %32 = sbr.rel (!%p30_p6) target bundleno = 16 (0x10), region = 177 }
0x1751   :  { %12692 = vsyncpa [#allocation4], 1 }
0x1752   :  { %12694 = vsyncpa [#allocation4 + $0x1], 1 }
0x1753   :  { %12695 = vsyncpa [#allocation6], 1 }
0x1754   :  { %12697 = vsyncpa [#allocation6 + $0x1], 1 }
0x1755   :  { %12698 = vsyncpa [#allocation9], 1 }
0x1756   :  { %12700 = vsyncpa [#allocation9 + $0x1], 1 }
0x1757   :  { %12701 = vsyncpa [#allocation12], 1 }
0x1758   :  { %12703 = vsyncpa [#allocation12 + $0x1], 1 }
0x1759   :  { %12704 = vsyncpa [#allocation15], 1 }

</bundles_post_ra>
